<compile_context>
chip_gen: v7x
topology: tpu7x:2x2x1
jax: 0.10.0
libtpu: 0.0.40
codegen_flags: <defaults>
</compile_context>

<pallas_src>
import math
from functools import partial

import jax
import jax.numpy as jnp
from jax.experimental import pallas as pl
from jax.experimental.pallas import tpu as pltpu

COMPUTE_DTYPE = jnp.bfloat16   # matmul operand dtype (accumulation stays f32)
ACT_DTYPE = jnp.bfloat16       # inter-layer activation storage dtype


def _round_up(x, m):
    return ((x + m - 1) // m) * m


def _balanced_tile(dim, max_tile, align):
    """Pick a tile size (and padded extent) minimizing padding.

    dim <= max_tile -> full-extent block (always legal, no padding).
    dim  > max_tile -> tile = round_up(ceil(dim/steps), align), padded = round_up(dim, tile).
    """
    if dim <= max_tile:
        return dim, dim
    steps = pl.cdiv(dim, max_tile)
    t = _round_up(pl.cdiv(dim, steps), align)
    return t, _round_up(dim, t)


# ----------------------------------------------------------------------------
# Pallas kernels
# ----------------------------------------------------------------------------
def _mm_kernel(x_ref, w_ref, b_ref, *rest, activate, has_residual):
    """Tiled matmul with f32 accumulator; epilogue fuses bias (+residual) (+ReLU)."""
    if has_residual:
        r_ref, o_ref, acc_ref = rest
    else:
        o_ref, acc_ref = rest
        r_ref = None

    @pl.when(pl.program_id(2) == 0)
    def _():
        acc_ref[...] = jnp.zeros_like(acc_ref)

    acc_ref[...] += jnp.dot(x_ref[...], w_ref[...],
                            preferred_element_type=jnp.float32)

    @pl.when(pl.program_id(2) == pl.num_programs(2) - 1)
    def _():
        out = acc_ref[...] + b_ref[...]
        if has_residual:
            out = out + r_ref[...].astype(jnp.float32)
        if activate:
            out = jnp.maximum(out, 0.0)
        o_ref[...] = out.astype(o_ref.dtype)


def _maxpool_kernel(*refs):
    """Elementwise max over k*k shifted NHWC views (each a (rows, OW*C) block)."""
    o_ref = refs[-1]
    r = refs[0][...]
    for ref in refs[1:-1]:
        r = jnp.maximum(r, ref[...])
    o_ref[...] = r


# ----------------------------------------------------------------------------
# Pallas wrappers
# ----------------------------------------------------------------------------
def fused_matmul(x, w, b, *, activate, residual=None, out_dtype=ACT_DTYPE,
                 tm=256, tn=512, tk=2048):
    """(M,K) @ (K,N) + b[N] (+residual) (+ReLU) -> out_dtype.

    Operands cast to bf16, f32 accumulation.  Tiles are "balanced" so padding of
    each axis is minimal; K is tiled over an "arbitrary" grid axis with a VMEM
    f32 accumulator so large K never forces a full-K weight block into VMEM.
    """
    M, K = x.shape
    Kw, N = w.shape
    assert K == Kw

    # --- tile sizes (sublane align 16 for bf16, lane align 128) --------------
    tm_eff, Mp = _balanced_tile(M, tm, 16)
    tn_eff, Np = _balanced_tile(N, tn, 128)
    tk_eff, Kp = _balanced_tile(K, tk, 128)

    # --- operand prep ---------------------------------------------------------
    xi = x.astype(COMPUTE_DTYPE)
    if Mp != M or Kp != K:
        xi = jnp.pad(xi, ((0, Mp - M), (0, Kp - K)))
    wi = w.astype(COMPUTE_DTYPE)
    if Kp != K or Np != N:
        wi = jnp.pad(wi, ((0, Kp - K), (0, Np - N)))
    bi = b.astype(jnp.float32).reshape(1, N)
    if Np != N:
        bi = jnp.pad(bi, ((0, 0), (0, Np - N)))

    has_residual = residual is not None
    inputs = [xi, wi, bi]
    in_specs = [
        pl.BlockSpec((tm_eff, tk_eff), lambda i, j, k: (i, k)),
        pl.BlockSpec((tk_eff, tn_eff), lambda i, j, k: (k, j)),
        pl.BlockSpec((1, tn_eff), lambda i, j, k: (0, j)),
    ]
    if has_residual:
        ri = residual.astype(COMPUTE_DTYPE)
        if Mp != M or Np != N:
            ri = jnp.pad(ri, ((0, Mp - M), (0, Np - N)))
        inputs.append(ri)
        in_specs.append(pl.BlockSpec((tm_eff, tn_eff), lambda i, j, k: (i, j)))

    grid = (Mp // tm_eff, Np // tn_eff, Kp // tk_eff)
    out = pl.pallas_call(
        partial(_mm_kernel, activate=activate, has_residual=has_residual),
        out_shape=jax.ShapeDtypeStruct((Mp, Np), out_dtype),
        grid=grid,
        in_specs=in_specs,
        out_specs=pl.BlockSpec((tm_eff, tn_eff), lambda i, j, k: (i, j)),
        scratch_shapes=[pltpu.VMEM((tm_eff, tn_eff), jnp.float32)],
        compiler_params=pltpu.CompilerParams(
            dimension_semantics=("parallel", "parallel", "arbitrary"),
            vmem_limit_bytes=64 * 1024 * 1024),
    )(*inputs)

    if Mp != M or Np != N:
        out = out[:M, :N]
    return out


def max_pool_nhwc(x, k, stride, padding, tm=512):
    """MaxPool2d on NHWC via k*k shifted views + Pallas elementwise max (dtype-preserving)."""
    N, H, W, C = x.shape
    xp = jnp.pad(x, ((0, 0), (padding, padding), (padding, padding), (0, 0)),
                 constant_values=-jnp.inf)
    Hp, Wp = H + 2 * padding, W + 2 * padding
    OH = (Hp - k) // stride + 1
    OW = (Wp - k) // stride + 1

    views = []
    for i in range(k):
        for j in range(k):
            v = xp[:, i:i + stride * OH:stride, j:j + stride * OW:stride, :]
            views.append(v.reshape(N * OH, OW * C))   # lane-dense: OW*C on lanes

    M, L = N * OH, OW * C
    tm_eff, Mp = _balanced_tile(M, tm, 16)
    if Mp != M:
        views = [jnp.pad(v, ((0, Mp - M), (0, 0))) for v in views]

    spec = pl.BlockSpec((tm_eff, L), lambda i: (i, 0))
    out = pl.pallas_call(
        _maxpool_kernel,
        out_shape=jax.ShapeDtypeStruct((Mp, L), x.dtype),
        grid=(Mp // tm_eff,),
        in_specs=[spec] * len(views),
        out_specs=spec,
        compiler_params=pltpu.CompilerParams(dimension_semantics=("parallel",)),
    )(*views)
    return out[:M].reshape(N, OH, OW, C)


# ----------------------------------------------------------------------------
# Convolution lowering (NHWC im2col glue in plain JAX; 1x1 = plain matmul)
# ----------------------------------------------------------------------------
def _im2col_nhwc(x, kh, kw, stride, padding):
    N, H, W, C = x.shape
    xp = jnp.pad(x, ((0, 0), (padding, padding), (padding, padding), (0, 0)))
    Hp, Wp = H + 2 * padding, W + 2 * padding
    OH = (Hp - kh) // stride + 1
    OW = (Wp - kw) // stride + 1
    cols = []
    for i in range(kh):
        for j in range(kw):
            cols.append(xp[:, i:i + stride * OH:stride, j:j + stride * OW:stride, :])
    p = jnp.concatenate(cols, axis=-1)            # (N, OH, OW, kh*kw*C)
    return p.reshape(N * OH * OW, kh * kw * C), OH, OW


def wrn_conv(x, p, stride, padding, activate, residual=None, out_dtype=ACT_DTYPE):
    """WRNConv (Conv2d bias=True [+ReLU]) on NHWC, optional fused residual+ReLU."""
    w_hwio = p["w"]                               # (KH, KW, IC, OC) bf16
    kh, kw, ic, oc = w_hwio.shape
    x = x.astype(COMPUTE_DTYPE)                   # halve patch HBM traffic
    N = x.shape[0]

    if kh == 1 and kw == 1 and padding == 0:      # 1x1 fast path: no im2col
        xs = x[:, ::stride, ::stride, :] if stride != 1 else x
        OH, OW = xs.shape[1], xs.shape[2]
        xm = xs.reshape(N * OH * OW, ic)
    else:
        xm, OH, OW = _im2col_nhwc(x, kh, kw, stride, padding)

    w2 = w_hwio.reshape(kh * kw * ic, oc)
    res_m = residual.reshape(N * OH * OW, oc) if residual is not None else None
    out = fused_matmul(xm, w2, p["b"], activate=activate, residual=res_m,
                       out_dtype=out_dtype)
    return out.reshape(N, OH, OW, oc)


# ----------------------------------------------------------------------------
# Parameter init (mirrors module __init__; weights pre-converted to HWIO bf16)
# ----------------------------------------------------------------------------
def _key_iter(key):
    while True:
        key, sub = jax.random.split(key)
        yield sub


def _conv_params(key, oc, ic, kh, kw):
    fan_in = ic * kh * kw
    bound = math.sqrt(6.0 / fan_in)               # kaiming_uniform_
    w = jax.random.uniform(key, (oc, ic, kh, kw), jnp.float32, -bound, bound)
    w_hwio = jnp.transpose(w, (2, 3, 1, 0)).astype(COMPUTE_DTYPE)   # (KH,KW,IC,OC)
    b = jnp.zeros((oc,), jnp.float32)             # nn.init.constant_(bias, 0)
    return {"w": w_hwio, "b": b}


def _fc_pool_params(key, out_f, in_f, pool_hw):
    """Linear params with the weight replicated over pool_hw spatial positions
    and pre-scaled by 1/pool_hw -> fuses AvgPool2d(7)+flatten+Linear into one matmul."""
    k1, k2 = jax.random.split(key)
    bound = 1.0 / math.sqrt(in_f)
    w = jax.random.uniform(k1, (out_f, in_f), jnp.float32, -bound, bound)
    b = jax.random.uniform(k2, (out_f,), jnp.float32, -bound, bound)
    w_pool = (jnp.tile(w.T, (pool_hw, 1)) / pool_hw).astype(COMPUTE_DTYPE)  # (pool_hw*in_f, out_f)
    return {"w_pool": w_pool, "b": b}


def build_wrn_params(key, channels, init_block_channels, width_factor,
                     in_channels, num_classes):
    keys = _key_iter(key)
    params = {"init_conv": _conv_params(next(keys), init_block_channels, in_channels, 7, 7)}
    in_c = init_block_channels
    for i, stage in enumerate(channels):
        for j, out_c in enumerate(stage):
            stride = 2 if (j == 0 and i != 0) else 1
            mid = int(round(out_c // 4 * width_factor))
            u = {
                "conv1": _conv_params(next(keys), mid, in_c, 1, 1),
                "conv2": _conv_params(next(keys), mid, mid, 3, 3),
                "conv3": _conv_params(next(keys), out_c, mid, 1, 1),
            }
            if in_c != out_c or stride != 1:
                u["id_conv"] = _conv_params(next(keys), out_c, in_c, 1, 1)
            params[f"stage{i}_unit{j}"] = u
            in_c = out_c
    params["fc"] = _fc_pool_params(next(keys), num_classes, in_c, pool_hw=49)
    return params


# ----------------------------------------------------------------------------
# Forward pass (WRN.forward semantics, NHWC internally)
# ----------------------------------------------------------------------------
def wrn_unit(x, p, stride, in_c, out_c):
    resize_identity = (in_c != out_c) or (stride != 1)
    if resize_identity:
        identity = wrn_conv(x, p["id_conv"], stride=stride, padding=0, activate=False)
    else:
        identity = x
    y = wrn_conv(x, p["conv1"], stride=1, padding=0, activate=True)
    y = wrn_conv(y, p["conv2"], stride=stride, padding=1, activate=True)
    # conv3 (activate=False in the module) + residual add + unit ReLU, all fused
    # into the conv3 matmul epilogue.
    y = wrn_conv(y, p["conv3"], stride=1, padding=0, activate=True, residual=identity)
    return y


def wrn_forward(x, params, channels, init_block_channels, width_factor):
    x = jnp.transpose(x, (0, 2, 3, 1))            # NCHW input -> NHWC internal
    # init block: 7x7 s2 p3 conv + ReLU, then 3x3 s2 p1 max-pool
    x = wrn_conv(x, params["init_conv"], stride=2, padding=3, activate=True)
    x = max_pool_nhwc(x, k=3, stride=2, padding=1)
    in_c = init_block_channels
    for i, stage in enumerate(channels):
        for j, out_c in enumerate(stage):
            stride = 2 if (j == 0 and i != 0) else 1
            x = wrn_unit(x, params[f"stage{i}_unit{j}"], stride, in_c, out_c)
            in_c = out_c
    # final_pool AvgPool2d(7, stride=1) + flatten + Linear, fused into one matmul
    N, H, W, C = x.shape
    assert (H, W) == (7, 7), "WRN expects a 7x7 final feature map (224-style input)"
    feat = x.reshape(N, H * W * C)
    logits = fused_matmul(feat, params["fc"]["w_pool"], params["fc"]["b"],
                          activate=False, out_dtype=jnp.float32)
    return logits


# ----------------------------------------------------------------------------
if __name__ == "__main__":
    # Small WRN config (scaled down so the final feature map is exactly 7x7,
    # matching the model's AvgPool2d(7) contract).
    batch = 2
    in_channels = 3
    in_size = (56, 56)
    init_block_channels = 8
    channels = [[16], [32]]
    width_factor = 1.0
    num_classes = 10

    key = jax.random.PRNGKey(0)
    kx, kp = jax.random.split(key)
    x = jax.random.normal(kx, (batch, in_channels) + in_size, jnp.float32)

    params = build_wrn_params(kp, channels, init_block_channels, width_factor,
                              in_channels, num_classes)

    fwd = jax.jit(partial(wrn_forward, channels=channels,
                          init_block_channels=init_block_channels,
                          width_factor=width_factor))
    out = jax.block_until_ready(fwd(x, params))
    assert out.shape == (batch, num_classes), out.shape
    assert bool(jnp.all(jnp.isfinite(out)))
    print("KERNEL_OK")
</pallas_src>

<mosaic_0001>
module attributes {stable_mosaic.version = 11 : i64} {
  func.func @_mm_kernel(%arg0: i32, %arg1: i32, %arg2: i32, %arg3: memref<224x147xbf16, #tpu.memory_space<vmem>>, %arg4: memref<147x8xbf16, #tpu.memory_space<vmem>>, %arg5: memref<1x8xf32, #tpu.memory_space<vmem>>, %arg6: memref<224x8xbf16, #tpu.memory_space<vmem>>, %arg7: memref<224x8xf32, #tpu.memory_space<vmem>>) attributes {dimension_semantics = [#tpu.dimension_semantics<parallel>, #tpu.dimension_semantics<parallel>, #tpu.dimension_semantics<arbitrary>], iteration_bounds = array<i64: 7, 1, 1>, scalar_prefetch = 0 : i64, scratch_operands = 1 : i64, tpu.core_type = #tpu.core_type<tc>, window_params = [{transform_indices = @transform_0, window_bounds = array<i64: 224, 147>}, {transform_indices = @transform_1, window_bounds = array<i64: 147, 8>}, {transform_indices = @transform_2, window_bounds = array<i64: 1, 8>}, {transform_indices = @transform_3, window_bounds = array<i64: 224, 8>}]} {
    %c0_i32 = arith.constant 0 : i32
    %0 = arith.cmpi eq, %arg2, %c0_i32 : i32
    %1 = arith.extui %0 : i1 to i32
    %c0_i32_0 = arith.constant 0 : i32
    %2 = arith.cmpi ne, %1, %c0_i32_0 : i32
    scf.if %2 {
      %cst_10 = arith.constant 0.000000e+00 : f32
      %12 = vector.broadcast %cst_10 : f32 to vector<224x8xf32>
      %c0_11 = arith.constant 0 : index
      %c0_12 = arith.constant 0 : index
      %13 = vector.load %arg7[%c0_11, %c0_12] : memref<224x8xf32, #tpu.memory_space<vmem>>, vector<224x8xf32>
      tpu.vector_store %arg7[%c0_11, %c0_12], %12 {strides = array<i32>} : memref<224x8xf32, #tpu.memory_space<vmem>>, vector<224x8xf32>,
    } else {
    }
    %c0 = arith.constant 0 : index
    %c0_1 = arith.constant 0 : index
    %3 = vector.load %arg7[%c0, %c0_1] : memref<224x8xf32, #tpu.memory_space<vmem>>, vector<224x8xf32>
    %c0_2 = arith.constant 0 : index
    %c0_3 = arith.constant 0 : index
    %4 = vector.load %arg3[%c0_2, %c0_3] : memref<224x147xbf16, #tpu.memory_space<vmem>>, vector<224x147xbf16>
    %c0_4 = arith.constant 0 : index
    %c0_5 = arith.constant 0 : index
    %5 = vector.load %arg4[%c0_4, %c0_5] : memref<147x8xbf16, #tpu.memory_space<vmem>>, vector<147x8xbf16>
    %cst = arith.constant dense<0.000000e+00> : vector<224x8xf32>
    %6 = tpu.matmul %4, %5, %cst {dimension_numbers = #tpu.dot_dimension_numbers<[1], [0], [0], [1], [0, 0, 1, 1], [], []>} : vector<224x147xbf16>, vector<147x8xbf16>, vector<224x8xf32> -> vector<224x8xf32>
    %7 = arith.addf %3, %6 : vector<224x8xf32>
    %c0_6 = arith.constant 0 : index
    %c0_7 = arith.constant 0 : index
    %8 = vector.load %arg7[%c0_6, %c0_7] : memref<224x8xf32, #tpu.memory_space<vmem>>, vector<224x8xf32>
    tpu.vector_store %arg7[%c0_6, %c0_7], %7 {strides = array<i32>} : memref<224x8xf32, #tpu.memory_space<vmem>>, vector<224x8xf32>,
    %c0_i32_8 = arith.constant 0 : i32
    %9 = arith.cmpi eq, %arg2, %c0_i32_8 : i32
    %10 = arith.extui %9 : i1 to i32
    %c0_i32_9 = arith.constant 0 : i32
    %11 = arith.cmpi ne, %10, %c0_i32_9 : i32
    scf.if %11 {
      %c0_10 = arith.constant 0 : index
      %c0_11 = arith.constant 0 : index
      %12 = vector.load %arg7[%c0_10, %c0_11] : memref<224x8xf32, #tpu.memory_space<vmem>>, vector<224x8xf32>
      %c0_12 = arith.constant 0 : index
      %c0_13 = arith.constant 0 : index
      %13 = vector.load %arg5[%c0_12, %c0_13] : memref<1x8xf32, #tpu.memory_space<vmem>>, vector<1x8xf32>
      %14 = vector.broadcast %13 : vector<1x8xf32> to vector<224x8xf32>
      %15 = arith.addf %12, %14 : vector<224x8xf32>
      %cst_14 = arith.constant 0.000000e+00 : f32
      %16 = vector.broadcast %cst_14 : f32 to vector<224x8xf32>
      %17 = arith.maximumf %15, %16 : vector<224x8xf32>
      %18 = arith.truncf %17 : vector<224x8xf32> to vector<224x8xbf16>
      %c0_15 = arith.constant 0 : index
      %c0_16 = arith.constant 0 : index
      %19 = vector.load %arg6[%c0_15, %c0_16] : memref<224x8xbf16, #tpu.memory_space<vmem>>, vector<224x8xbf16>
      tpu.vector_store %arg6[%c0_15, %c0_16], %18 {strides = array<i32>} : memref<224x8xbf16, #tpu.memory_space<vmem>>, vector<224x8xbf16>,
    } else {
    }
    return
  }
  func.func @transform_0(%arg0: i32, %arg1: i32, %arg2: i32) -> (i32, i32) {
    %c0_i32 = arith.constant 0 : i32
    return %arg0, %arg2 : i32, i32
  }
  func.func @transform_1(%arg0: i32, %arg1: i32, %arg2: i32) -> (i32, i32) {
    %c0_i32 = arith.constant 0 : i32
    return %arg2, %arg1 : i32, i32
  }
  func.func @transform_2(%arg0: i32, %arg1: i32, %arg2: i32) -> (i32, i32) {
    %c0_i32 = arith.constant 0 : i32
    %c0_i32_0 = arith.constant 0 : i32
    return %c0_i32, %arg1 : i32, i32
  }
  func.func @transform_3(%arg0: i32, %arg1: i32, %arg2: i32) -> (i32, i32) {
    %c0_i32 = arith.constant 0 : i32
    return %arg0, %arg1 : i32, i32
  }
}

module attributes {stable_mosaic.version = 11 : i64} {
  func.func @_maxpool_kernel(%arg0: i32, %arg1: memref<28x112xbf16, #tpu.memory_space<vmem>>, %arg2: memref<28x112xbf16, #tpu.memory_space<vmem>>, %arg3: memref<28x112xbf16, #tpu.memory_space<vmem>>, %arg4: memref<28x112xbf16, #tpu.memory_space<vmem>>, %arg5: memref<28x112xbf16, #tpu.memory_space<vmem>>, %arg6: memref<28x112xbf16, #tpu.memory_space<vmem>>, %arg7: memref<28x112xbf16, #tpu.memory_space<vmem>>, %arg8: memref<28x112xbf16, #tpu.memory_space<vmem>>, %arg9: memref<28x112xbf16, #tpu.memory_space<vmem>>, %arg10: memref<28x112xbf16, #tpu.memory_space<vmem>>) attributes {dimension_semantics = [#tpu.dimension_semantics<parallel>], iteration_bounds = array<i64: 1>, scalar_prefetch = 0 : i64, scratch_operands = 0 : i64, tpu.core_type = #tpu.core_type<tc>, window_params = [{transform_indices = @transform_0, window_bounds = array<i64: 28, 112>}, {transform_indices = @transform_1, window_bounds = array<i64: 28, 112>}, {transform_indices = @transform_2, window_bounds = array<i64: 28, 112>}, {transform_indices = @transform_3, window_bounds = array<i64: 28, 112>}, {transform_indices = @transform_4, window_bounds = array<i64: 28, 112>}, {transform_indices = @transform_5, window_bounds = array<i64: 28, 112>}, {transform_indices = @transform_6, window_bounds = array<i64: 28, 112>}, {transform_indices = @transform_7, window_bounds = array<i64: 28, 112>}, {transform_indices = @transform_8, window_bounds = array<i64: 28, 112>}, {transform_indices = @transform_9, window_bounds = array<i64: 28, 112>}]} {
    %c0 = arith.constant 0 : index
    %c0_0 = arith.constant 0 : index
    %0 = vector.load %arg1[%c0, %c0_0] : memref<28x112xbf16, #tpu.memory_space<vmem>>, vector<28x112xbf16>
    %c0_1 = arith.constant 0 : index
    %c0_2 = arith.constant 0 : index
    %1 = vector.load %arg2[%c0_1, %c0_2] : memref<28x112xbf16, #tpu.memory_space<vmem>>, vector<28x112xbf16>
    %2 = arith.maximumf %0, %1 : vector<28x112xbf16>
    %c0_3 = arith.constant 0 : index
    %c0_4 = arith.constant 0 : index
    %3 = vector.load %arg3[%c0_3, %c0_4] : memref<28x112xbf16, #tpu.memory_space<vmem>>, vector<28x112xbf16>
    %4 = arith.maximumf %2, %3 : vector<28x112xbf16>
    %c0_5 = arith.constant 0 : index
    %c0_6 = arith.constant 0 : index
    %5 = vector.load %arg4[%c0_5, %c0_6] : memref<28x112xbf16, #tpu.memory_space<vmem>>, vector<28x112xbf16>
    %6 = arith.maximumf %4, %5 : vector<28x112xbf16>
    %c0_7 = arith.constant 0 : index
    %c0_8 = arith.constant 0 : index
    %7 = vector.load %arg5[%c0_7, %c0_8] : memref<28x112xbf16, #tpu.memory_space<vmem>>, vector<28x112xbf16>
    %8 = arith.maximumf %6, %7 : vector<28x112xbf16>
    %c0_9 = arith.constant 0 : index
    %c0_10 = arith.constant 0 : index
    %9 = vector.load %arg6[%c0_9, %c0_10] : memref<28x112xbf16, #tpu.memory_space<vmem>>, vector<28x112xbf16>
    %10 = arith.maximumf %8, %9 : vector<28x112xbf16>
    %c0_11 = arith.constant 0 : index
    %c0_12 = arith.constant 0 : index
    %11 = vector.load %arg7[%c0_11, %c0_12] : memref<28x112xbf16, #tpu.memory_space<vmem>>, vector<28x112xbf16>
    %12 = arith.maximumf %10, %11 : vector<28x112xbf16>
    %c0_13 = arith.constant 0 : index
    %c0_14 = arith.constant 0 : index
    %13 = vector.load %arg8[%c0_13, %c0_14] : memref<28x112xbf16, #tpu.memory_space<vmem>>, vector<28x112xbf16>
    %14 = arith.maximumf %12, %13 : vector<28x112xbf16>
    %c0_15 = arith.constant 0 : index
    %c0_16 = arith.constant 0 : index
    %15 = vector.load %arg9[%c0_15, %c0_16] : memref<28x112xbf16, #tpu.memory_space<vmem>>, vector<28x112xbf16>
    %16 = arith.maximumf %14, %15 : vector<28x112xbf16>
    %c0_17 = arith.constant 0 : index
    %c0_18 = arith.constant 0 : index
    %17 = vector.load %arg10[%c0_17, %c0_18] : memref<28x112xbf16, #tpu.memory_space<vmem>>, vector<28x112xbf16>
    tpu.vector_store %arg10[%c0_17, %c0_18], %16 {strides = array<i32>} : memref<28x112xbf16, #tpu.memory_space<vmem>>, vector<28x112xbf16>,
    return
  }
  func.func @transform_0(%arg0: i32) -> (i32, i32) {
    %c0_i32 = arith.constant 0 : i32
    %c0_i32_0 = arith.constant 0 : i32
    return %arg0, %c0_i32 : i32, i32
  }
  func.func @transform_1(%arg0: i32) -> (i32, i32) {
    %c0_i32 = arith.constant 0 : i32
    %c0_i32_0 = arith.constant 0 : i32
    return %arg0, %c0_i32 : i32, i32
  }
  func.func @transform_2(%arg0: i32) -> (i32, i32) {
    %c0_i32 = arith.constant 0 : i32
    %c0_i32_0 = arith.constant 0 : i32
    return %arg0, %c0_i32 : i32, i32
  }
  func.func @transform_3(%arg0: i32) -> (i32, i32) {
    %c0_i32 = arith.constant 0 : i32
    %c0_i32_0 = arith.constant 0 : i32
    return %arg0, %c0_i32 : i32, i32
  }
  func.func @transform_4(%arg0: i32) -> (i32, i32) {
    %c0_i32 = arith.constant 0 : i32
    %c0_i32_0 = arith.constant 0 : i32
    return %arg0, %c0_i32 : i32, i32
  }
  func.func @transform_5(%arg0: i32) -> (i32, i32) {
    %c0_i32 = arith.constant 0 : i32
    %c0_i32_0 = arith.constant 0 : i32
    return %arg0, %c0_i32 : i32, i32
  }
  func.func @transform_6(%arg0: i32) -> (i32, i32) {
    %c0_i32 = arith.constant 0 : i32
    %c0_i32_0 = arith.constant 0 : i32
    return %arg0, %c0_i32 : i32, i32
  }
  func.func @transform_7(%arg0: i32) -> (i32, i32) {
    %c0_i32 = arith.constant 0 : i32
    %c0_i32_0 = arith.constant 0 : i32
    return %arg0, %c0_i32 : i32, i32
  }
  func.func @transform_8(%arg0: i32) -> (i32, i32) {
    %c0_i32 = arith.constant 0 : i32
    %c0_i32_0 = arith.constant 0 : i32
    return %arg0, %c0_i32 : i32, i32
  }
  func.func @transform_9(%arg0: i32) -> (i32, i32) {
    %c0_i32 = arith.constant 0 : i32
    %c0_i32_0 = arith.constant 0 : i32
    return %arg0, %c0_i32 : i32, i32
  }
}

module attributes {stable_mosaic.version = 11 : i64} {
  func.func @_mm_kernel(%arg0: i32, %arg1: i32, %arg2: i32, %arg3: memref<208x8xbf16, #tpu.memory_space<vmem>>, %arg4: memref<8x4xbf16, #tpu.memory_space<vmem>>, %arg5: memref<1x4xf32, #tpu.memory_space<vmem>>, %arg6: memref<208x4xbf16, #tpu.memory_space<vmem>>, %arg7: memref<208x4xf32, #tpu.memory_space<vmem>>) attributes {dimension_semantics = [#tpu.dimension_semantics<parallel>, #tpu.dimension_semantics<parallel>, #tpu.dimension_semantics<arbitrary>], iteration_bounds = array<i64: 2, 1, 1>, scalar_prefetch = 0 : i64, scratch_operands = 1 : i64, tpu.core_type = #tpu.core_type<tc>, window_params = [{transform_indices = @transform_0, window_bounds = array<i64: 208, 8>}, {transform_indices = @transform_1, window_bounds = array<i64: 8, 4>}, {transform_indices = @transform_2, window_bounds = array<i64: 1, 4>}, {transform_indices = @transform_3, window_bounds = array<i64: 208, 4>}]} {
    %c0_i32 = arith.constant 0 : i32
    %0 = arith.cmpi eq, %arg2, %c0_i32 : i32
    %1 = arith.extui %0 : i1 to i32
    %c0_i32_0 = arith.constant 0 : i32
    %2 = arith.cmpi ne, %1, %c0_i32_0 : i32
    scf.if %2 {
      %cst_10 = arith.constant 0.000000e+00 : f32
      %12 = vector.broadcast %cst_10 : f32 to vector<208x4xf32>
      %c0_11 = arith.constant 0 : index
      %c0_12 = arith.constant 0 : index
      %13 = vector.load %arg7[%c0_11, %c0_12] : memref<208x4xf32, #tpu.memory_space<vmem>>, vector<208x4xf32>
      tpu.vector_store %arg7[%c0_11, %c0_12], %12 {strides = array<i32>} : memref<208x4xf32, #tpu.memory_space<vmem>>, vector<208x4xf32>,
    } else {
    }
    %c0 = arith.constant 0 : index
    %c0_1 = arith.constant 0 : index
    %3 = vector.load %arg7[%c0, %c0_1] : memref<208x4xf32, #tpu.memory_space<vmem>>, vector<208x4xf32>
    %c0_2 = arith.constant 0 : index
    %c0_3 = arith.constant 0 : index
    %4 = vector.load %arg3[%c0_2, %c0_3] : memref<208x8xbf16, #tpu.memory_space<vmem>>, vector<208x8xbf16>
    %c0_4 = arith.constant 0 : index
    %c0_5 = arith.constant 0 : index
    %5 = vector.load %arg4[%c0_4, %c0_5] : memref<8x4xbf16, #tpu.memory_space<vmem>>, vector<8x4xbf16>
    %cst = arith.constant dense<0.000000e+00> : vector<208x4xf32>
    %6 = tpu.matmul %4, %5, %cst {dimension_numbers = #tpu.dot_dimension_numbers<[1], [0], [0], [1], [0, 0, 1, 1], [], []>} : vector<208x8xbf16>, vector<8x4xbf16>, vector<208x4xf32> -> vector<208x4xf32>
    %7 = arith.addf %3, %6 : vector<208x4xf32>
    %c0_6 = arith.constant 0 : index
    %c0_7 = arith.constant 0 : index
    %8 = vector.load %arg7[%c0_6, %c0_7] : memref<208x4xf32, #tpu.memory_space<vmem>>, vector<208x4xf32>
    tpu.vector_store %arg7[%c0_6, %c0_7], %7 {strides = array<i32>} : memref<208x4xf32, #tpu.memory_space<vmem>>, vector<208x4xf32>,
    %c0_i32_8 = arith.constant 0 : i32
    %9 = arith.cmpi eq, %arg2, %c0_i32_8 : i32
    %10 = arith.extui %9 : i1 to i32
    %c0_i32_9 = arith.constant 0 : i32
    %11 = arith.cmpi ne, %10, %c0_i32_9 : i32
    scf.if %11 {
      %c0_10 = arith.constant 0 : index
      %c0_11 = arith.constant 0 : index
      %12 = vector.load %arg7[%c0_10, %c0_11] : memref<208x4xf32, #tpu.memory_space<vmem>>, vector<208x4xf32>
      %c0_12 = arith.constant 0 : index
      %c0_13 = arith.constant 0 : index
      %13 = vector.load %arg5[%c0_12, %c0_13] : memref<1x4xf32, #tpu.memory_space<vmem>>, vector<1x4xf32>
      %14 = vector.broadcast %13 : vector<1x4xf32> to vector<208x4xf32>
      %15 = arith.addf %12, %14 : vector<208x4xf32>
      %cst_14 = arith.constant 0.000000e+00 : f32
      %16 = vector.broadcast %cst_14 : f32 to vector<208x4xf32>
      %17 = arith.maximumf %15, %16 : vector<208x4xf32>
      %18 = arith.truncf %17 : vector<208x4xf32> to vector<208x4xbf16>
      %c0_15 = arith.constant 0 : index
      %c0_16 = arith.constant 0 : index
      %19 = vector.load %arg6[%c0_15, %c0_16] : memref<208x4xbf16, #tpu.memory_space<vmem>>, vector<208x4xbf16>
      tpu.vector_store %arg6[%c0_15, %c0_16], %18 {strides = array<i32>} : memref<208x4xbf16, #tpu.memory_space<vmem>>, vector<208x4xbf16>,
    } else {
    }
    return
  }
  func.func @transform_0(%arg0: i32, %arg1: i32, %arg2: i32) -> (i32, i32) {
    %c0_i32 = arith.constant 0 : i32
    return %arg0, %arg2 : i32, i32
  }
  func.func @transform_1(%arg0: i32, %arg1: i32, %arg2: i32) -> (i32, i32) {
    %c0_i32 = arith.constant 0 : i32
    return %arg2, %arg1 : i32, i32
  }
  func.func @transform_2(%arg0: i32, %arg1: i32, %arg2: i32) -> (i32, i32) {
    %c0_i32 = arith.constant 0 : i32
    %c0_i32_0 = arith.constant 0 : i32
    return %c0_i32, %arg1 : i32, i32
  }
  func.func @transform_3(%arg0: i32, %arg1: i32, %arg2: i32) -> (i32, i32) {
    %c0_i32 = arith.constant 0 : i32
    return %arg0, %arg1 : i32, i32
  }
}

module attributes {stable_mosaic.version = 11 : i64} {
  func.func @_mm_kernel(%arg0: i32, %arg1: i32, %arg2: i32, %arg3: memref<208x36xbf16, #tpu.memory_space<vmem>>, %arg4: memref<36x4xbf16, #tpu.memory_space<vmem>>, %arg5: memref<1x4xf32, #tpu.memory_space<vmem>>, %arg6: memref<208x4xbf16, #tpu.memory_space<vmem>>, %arg7: memref<208x4xf32, #tpu.memory_space<vmem>>) attributes {dimension_semantics = [#tpu.dimension_semantics<parallel>, #tpu.dimension_semantics<parallel>, #tpu.dimension_semantics<arbitrary>], iteration_bounds = array<i64: 2, 1, 1>, scalar_prefetch = 0 : i64, scratch_operands = 1 : i64, tpu.core_type = #tpu.core_type<tc>, window_params = [{transform_indices = @transform_0, window_bounds = array<i64: 208, 36>}, {transform_indices = @transform_1, window_bounds = array<i64: 36, 4>}, {transform_indices = @transform_2, window_bounds = array<i64: 1, 4>}, {transform_indices = @transform_3, window_bounds = array<i64: 208, 4>}]} {
    %c0_i32 = arith.constant 0 : i32
    %0 = arith.cmpi eq, %arg2, %c0_i32 : i32
    %1 = arith.extui %0 : i1 to i32
    %c0_i32_0 = arith.constant 0 : i32
    %2 = arith.cmpi ne, %1, %c0_i32_0 : i32
    scf.if %2 {
      %cst_10 = arith.constant 0.000000e+00 : f32
      %12 = vector.broadcast %cst_10 : f32 to vector<208x4xf32>
      %c0_11 = arith.constant 0 : index
      %c0_12 = arith.constant 0 : index
      %13 = vector.load %arg7[%c0_11, %c0_12] : memref<208x4xf32, #tpu.memory_space<vmem>>, vector<208x4xf32>
      tpu.vector_store %arg7[%c0_11, %c0_12], %12 {strides = array<i32>} : memref<208x4xf32, #tpu.memory_space<vmem>>, vector<208x4xf32>,
    } else {
    }
    %c0 = arith.constant 0 : index
    %c0_1 = arith.constant 0 : index
    %3 = vector.load %arg7[%c0, %c0_1] : memref<208x4xf32, #tpu.memory_space<vmem>>, vector<208x4xf32>
    %c0_2 = arith.constant 0 : index
    %c0_3 = arith.constant 0 : index
    %4 = vector.load %arg3[%c0_2, %c0_3] : memref<208x36xbf16, #tpu.memory_space<vmem>>, vector<208x36xbf16>
    %c0_4 = arith.constant 0 : index
    %c0_5 = arith.constant 0 : index
    %5 = vector.load %arg4[%c0_4, %c0_5] : memref<36x4xbf16, #tpu.memory_space<vmem>>, vector<36x4xbf16>
    %cst = arith.constant dense<0.000000e+00> : vector<208x4xf32>
    %6 = tpu.matmul %4, %5, %cst {dimension_numbers = #tpu.dot_dimension_numbers<[1], [0], [0], [1], [0, 0, 1, 1], [], []>} : vector<208x36xbf16>, vector<36x4xbf16>, vector<208x4xf32> -> vector<208x4xf32>
    %7 = arith.addf %3, %6 : vector<208x4xf32>
    %c0_6 = arith.constant 0 : index
    %c0_7 = arith.constant 0 : index
    %8 = vector.load %arg7[%c0_6, %c0_7] : memref<208x4xf32, #tpu.memory_space<vmem>>, vector<208x4xf32>
    tpu.vector_store %arg7[%c0_6, %c0_7], %7 {strides = array<i32>} : memref<208x4xf32, #tpu.memory_space<vmem>>, vector<208x4xf32>,
    %c0_i32_8 = arith.constant 0 : i32
    %9 = arith.cmpi eq, %arg2, %c0_i32_8 : i32
    %10 = arith.extui %9 : i1 to i32
    %c0_i32_9 = arith.constant 0 : i32
    %11 = arith.cmpi ne, %10, %c0_i32_9 : i32
    scf.if %11 {
      %c0_10 = arith.constant 0 : index
      %c0_11 = arith.constant 0 : index
      %12 = vector.load %arg7[%c0_10, %c0_11] : memref<208x4xf32, #tpu.memory_space<vmem>>, vector<208x4xf32>
      %c0_12 = arith.constant 0 : index
      %c0_13 = arith.constant 0 : index
      %13 = vector.load %arg5[%c0_12, %c0_13] : memref<1x4xf32, #tpu.memory_space<vmem>>, vector<1x4xf32>
      %14 = vector.broadcast %13 : vector<1x4xf32> to vector<208x4xf32>
      %15 = arith.addf %12, %14 : vector<208x4xf32>
      %cst_14 = arith.constant 0.000000e+00 : f32
      %16 = vector.broadcast %cst_14 : f32 to vector<208x4xf32>
      %17 = arith.maximumf %15, %16 : vector<208x4xf32>
      %18 = arith.truncf %17 : vector<208x4xf32> to vector<208x4xbf16>
      %c0_15 = arith.constant 0 : index
      %c0_16 = arith.constant 0 : index
      %19 = vector.load %arg6[%c0_15, %c0_16] : memref<208x4xbf16, #tpu.memory_space<vmem>>, vector<208x4xbf16>
      tpu.vector_store %arg6[%c0_15, %c0_16], %18 {strides = array<i32>} : memref<208x4xbf16, #tpu.memory_space<vmem>>, vector<208x4xbf16>,
    } else {
    }
    return
  }
  func.func @transform_0(%arg0: i32, %arg1: i32, %arg2: i32) -> (i32, i32) {
    %c0_i32 = arith.constant 0 : i32
    return %arg0, %arg2 : i32, i32
  }
  func.func @transform_1(%arg0: i32, %arg1: i32, %arg2: i32) -> (i32, i32) {
    %c0_i32 = arith.constant 0 : i32
    return %arg2, %arg1 : i32, i32
  }
  func.func @transform_2(%arg0: i32, %arg1: i32, %arg2: i32) -> (i32, i32) {
    %c0_i32 = arith.constant 0 : i32
    %c0_i32_0 = arith.constant 0 : i32
    return %c0_i32, %arg1 : i32, i32
  }
  func.func @transform_3(%arg0: i32, %arg1: i32, %arg2: i32) -> (i32, i32) {
    %c0_i32 = arith.constant 0 : i32
    return %arg0, %arg1 : i32, i32
  }
}

module attributes {stable_mosaic.version = 11 : i64} {
  func.func @_mm_kernel(%arg0: i32, %arg1: i32, %arg2: i32, %arg3: memref<208x8xbf16, #tpu.memory_space<vmem>>, %arg4: memref<8x16xbf16, #tpu.memory_space<vmem>>, %arg5: memref<1x16xf32, #tpu.memory_space<vmem>>, %arg6: memref<208x16xbf16, #tpu.memory_space<vmem>>, %arg7: memref<208x16xf32, #tpu.memory_space<vmem>>) attributes {dimension_semantics = [#tpu.dimension_semantics<parallel>, #tpu.dimension_semantics<parallel>, #tpu.dimension_semantics<arbitrary>], iteration_bounds = array<i64: 2, 1, 1>, scalar_prefetch = 0 : i64, scratch_operands = 1 : i64, tpu.core_type = #tpu.core_type<tc>, window_params = [{transform_indices = @transform_0, window_bounds = array<i64: 208, 8>}, {transform_indices = @transform_1, window_bounds = array<i64: 8, 16>}, {transform_indices = @transform_2, window_bounds = array<i64: 1, 16>}, {transform_indices = @transform_3, window_bounds = array<i64: 208, 16>}]} {
    %c0_i32 = arith.constant 0 : i32
    %0 = arith.cmpi eq, %arg2, %c0_i32 : i32
    %1 = arith.extui %0 : i1 to i32
    %c0_i32_0 = arith.constant 0 : i32
    %2 = arith.cmpi ne, %1, %c0_i32_0 : i32
    scf.if %2 {
      %cst_10 = arith.constant 0.000000e+00 : f32
      %12 = vector.broadcast %cst_10 : f32 to vector<208x16xf32>
      %c0_11 = arith.constant 0 : index
      %c0_12 = arith.constant 0 : index
      %13 = vector.load %arg7[%c0_11, %c0_12] : memref<208x16xf32, #tpu.memory_space<vmem>>, vector<208x16xf32>
      tpu.vector_store %arg7[%c0_11, %c0_12], %12 {strides = array<i32>} : memref<208x16xf32, #tpu.memory_space<vmem>>, vector<208x16xf32>,
    } else {
    }
    %c0 = arith.constant 0 : index
    %c0_1 = arith.constant 0 : index
    %3 = vector.load %arg7[%c0, %c0_1] : memref<208x16xf32, #tpu.memory_space<vmem>>, vector<208x16xf32>
    %c0_2 = arith.constant 0 : index
    %c0_3 = arith.constant 0 : index
    %4 = vector.load %arg3[%c0_2, %c0_3] : memref<208x8xbf16, #tpu.memory_space<vmem>>, vector<208x8xbf16>
    %c0_4 = arith.constant 0 : index
    %c0_5 = arith.constant 0 : index
    %5 = vector.load %arg4[%c0_4, %c0_5] : memref<8x16xbf16, #tpu.memory_space<vmem>>, vector<8x16xbf16>
    %cst = arith.constant dense<0.000000e+00> : vector<208x16xf32>
    %6 = tpu.matmul %4, %5, %cst {dimension_numbers = #tpu.dot_dimension_numbers<[1], [0], [0], [1], [0, 0, 1, 1], [], []>} : vector<208x8xbf16>, vector<8x16xbf16>, vector<208x16xf32> -> vector<208x16xf32>
    %7 = arith.addf %3, %6 : vector<208x16xf32>
    %c0_6 = arith.constant 0 : index
    %c0_7 = arith.constant 0 : index
    %8 = vector.load %arg7[%c0_6, %c0_7] : memref<208x16xf32, #tpu.memory_space<vmem>>, vector<208x16xf32>
    tpu.vector_store %arg7[%c0_6, %c0_7], %7 {strides = array<i32>} : memref<208x16xf32, #tpu.memory_space<vmem>>, vector<208x16xf32>,
    %c0_i32_8 = arith.constant 0 : i32
    %9 = arith.cmpi eq, %arg2, %c0_i32_8 : i32
    %10 = arith.extui %9 : i1 to i32
    %c0_i32_9 = arith.constant 0 : i32
    %11 = arith.cmpi ne, %10, %c0_i32_9 : i32
    scf.if %11 {
      %c0_10 = arith.constant 0 : index
      %c0_11 = arith.constant 0 : index
      %12 = vector.load %arg7[%c0_10, %c0_11] : memref<208x16xf32, #tpu.memory_space<vmem>>, vector<208x16xf32>
      %c0_12 = arith.constant 0 : index
      %c0_13 = arith.constant 0 : index
      %13 = vector.load %arg5[%c0_12, %c0_13] : memref<1x16xf32, #tpu.memory_space<vmem>>, vector<1x16xf32>
      %14 = vector.broadcast %13 : vector<1x16xf32> to vector<208x16xf32>
      %15 = arith.addf %12, %14 : vector<208x16xf32>
      %16 = arith.truncf %15 : vector<208x16xf32> to vector<208x16xbf16>
      %c0_14 = arith.constant 0 : index
      %c0_15 = arith.constant 0 : index
      %17 = vector.load %arg6[%c0_14, %c0_15] : memref<208x16xbf16, #tpu.memory_space<vmem>>, vector<208x16xbf16>
      tpu.vector_store %arg6[%c0_14, %c0_15], %16 {strides = array<i32>} : memref<208x16xbf16, #tpu.memory_space<vmem>>, vector<208x16xbf16>,
    } else {
    }
    return
  }
  func.func @transform_0(%arg0: i32, %arg1: i32, %arg2: i32) -> (i32, i32) {
    %c0_i32 = arith.constant 0 : i32
    return %arg0, %arg2 : i32, i32
  }
  func.func @transform_1(%arg0: i32, %arg1: i32, %arg2: i32) -> (i32, i32) {
    %c0_i32 = arith.constant 0 : i32
    return %arg2, %arg1 : i32, i32
  }
  func.func @transform_2(%arg0: i32, %arg1: i32, %arg2: i32) -> (i32, i32) {
    %c0_i32 = arith.constant 0 : i32
    %c0_i32_0 = arith.constant 0 : i32
    return %c0_i32, %arg1 : i32, i32
  }
  func.func @transform_3(%arg0: i32, %arg1: i32, %arg2: i32) -> (i32, i32) {
    %c0_i32 = arith.constant 0 : i32
    return %arg0, %arg1 : i32, i32
  }
}

module attributes {stable_mosaic.version = 11 : i64} {
  func.func @_mm_kernel(%arg0: i32, %arg1: i32, %arg2: i32, %arg3: memref<208x4xbf16, #tpu.memory_space<vmem>>, %arg4: memref<4x16xbf16, #tpu.memory_space<vmem>>, %arg5: memref<1x16xf32, #tpu.memory_space<vmem>>, %arg6: memref<208x16xbf16, #tpu.memory_space<vmem>>, %arg7: memref<208x16xbf16, #tpu.memory_space<vmem>>, %arg8: memref<208x16xf32, #tpu.memory_space<vmem>>) attributes {dimension_semantics = [#tpu.dimension_semantics<parallel>, #tpu.dimension_semantics<parallel>, #tpu.dimension_semantics<arbitrary>], iteration_bounds = array<i64: 2, 1, 1>, scalar_prefetch = 0 : i64, scratch_operands = 1 : i64, tpu.core_type = #tpu.core_type<tc>, window_params = [{transform_indices = @transform_0, window_bounds = array<i64: 208, 4>}, {transform_indices = @transform_1, window_bounds = array<i64: 4, 16>}, {transform_indices = @transform_2, window_bounds = array<i64: 1, 16>}, {transform_indices = @transform_3, window_bounds = array<i64: 208, 16>}, {transform_indices = @transform_4, window_bounds = array<i64: 208, 16>}]} {
    %c0_i32 = arith.constant 0 : i32
    %0 = arith.cmpi eq, %arg2, %c0_i32 : i32
    %1 = arith.extui %0 : i1 to i32
    %c0_i32_0 = arith.constant 0 : i32
    %2 = arith.cmpi ne, %1, %c0_i32_0 : i32
    scf.if %2 {
      %cst_10 = arith.constant 0.000000e+00 : f32
      %12 = vector.broadcast %cst_10 : f32 to vector<208x16xf32>
      %c0_11 = arith.constant 0 : index
      %c0_12 = arith.constant 0 : index
      %13 = vector.load %arg8[%c0_11, %c0_12] : memref<208x16xf32, #tpu.memory_space<vmem>>, vector<208x16xf32>
      tpu.vector_store %arg8[%c0_11, %c0_12], %12 {strides = array<i32>} : memref<208x16xf32, #tpu.memory_space<vmem>>, vector<208x16xf32>,
    } else {
    }
    %c0 = arith.constant 0 : index
    %c0_1 = arith.constant 0 : index
    %3 = vector.load %arg8[%c0, %c0_1] : memref<208x16xf32, #tpu.memory_space<vmem>>, vector<208x16xf32>
    %c0_2 = arith.constant 0 : index
    %c0_3 = arith.constant 0 : index
    %4 = vector.load %arg3[%c0_2, %c0_3] : memref<208x4xbf16, #tpu.memory_space<vmem>>, vector<208x4xbf16>
    %c0_4 = arith.constant 0 : index
    %c0_5 = arith.constant 0 : index
    %5 = vector.load %arg4[%c0_4, %c0_5] : memref<4x16xbf16, #tpu.memory_space<vmem>>, vector<4x16xbf16>
    %cst = arith.constant dense<0.000000e+00> : vector<208x16xf32>
    %6 = tpu.matmul %4, %5, %cst {dimension_numbers = #tpu.dot_dimension_numbers<[1], [0], [0], [1], [0, 0, 1, 1], [], []>} : vector<208x4xbf16>, vector<4x16xbf16>, vector<208x16xf32> -> vector<208x16xf32>
    %7 = arith.addf %3, %6 : vector<208x16xf32>
    %c0_6 = arith.constant 0 : index
    %c0_7 = arith.constant 0 : index
    %8 = vector.load %arg8[%c0_6, %c0_7] : memref<208x16xf32, #tpu.memory_space<vmem>>, vector<208x16xf32>
    tpu.vector_store %arg8[%c0_6, %c0_7], %7 {strides = array<i32>} : memref<208x16xf32, #tpu.memory_space<vmem>>, vector<208x16xf32>,
    %c0_i32_8 = arith.constant 0 : i32
    %9 = arith.cmpi eq, %arg2, %c0_i32_8 : i32
    %10 = arith.extui %9 : i1 to i32
    %c0_i32_9 = arith.constant 0 : i32
    %11 = arith.cmpi ne, %10, %c0_i32_9 : i32
    scf.if %11 {
      %c0_10 = arith.constant 0 : index
      %c0_11 = arith.constant 0 : index
      %12 = vector.load %arg8[%c0_10, %c0_11] : memref<208x16xf32, #tpu.memory_space<vmem>>, vector<208x16xf32>
      %c0_12 = arith.constant 0 : index
      %c0_13 = arith.constant 0 : index
      %13 = vector.load %arg5[%c0_12, %c0_13] : memref<1x16xf32, #tpu.memory_space<vmem>>, vector<1x16xf32>
      %14 = vector.broadcast %13 : vector<1x16xf32> to vector<208x16xf32>
      %15 = arith.addf %12, %14 : vector<208x16xf32>
      %c0_14 = arith.constant 0 : index
      %c0_15 = arith.constant 0 : index
      %16 = vector.load %arg6[%c0_14, %c0_15] : memref<208x16xbf16, #tpu.memory_space<vmem>>, vector<208x16xbf16>
      %17 = arith.extf %16 : vector<208x16xbf16> to vector<208x16xf32>
      %18 = arith.addf %15, %17 : vector<208x16xf32>
      %cst_16 = arith.constant 0.000000e+00 : f32
      %19 = vector.broadcast %cst_16 : f32 to vector<208x16xf32>
      %20 = arith.maximumf %18, %19 : vector<208x16xf32>
      %21 = arith.truncf %20 : vector<208x16xf32> to vector<208x16xbf16>
      %c0_17 = arith.constant 0 : index
      %c0_18 = arith.constant 0 : index
      %22 = vector.load %arg7[%c0_17, %c0_18] : memref<208x16xbf16, #tpu.memory_space<vmem>>, vector<208x16xbf16>
      tpu.vector_store %arg7[%c0_17, %c0_18], %21 {strides = array<i32>} : memref<208x16xbf16, #tpu.memory_space<vmem>>, vector<208x16xbf16>,
    } else {
    }
    return
  }
  func.func @transform_0(%arg0: i32, %arg1: i32, %arg2: i32) -> (i32, i32) {
    %c0_i32 = arith.constant 0 : i32
    return %arg0, %arg2 : i32, i32
  }
  func.func @transform_1(%arg0: i32, %arg1: i32, %arg2: i32) -> (i32, i32) {
    %c0_i32 = arith.constant 0 : i32
    return %arg2, %arg1 : i32, i32
  }
  func.func @transform_2(%arg0: i32, %arg1: i32, %arg2: i32) -> (i32, i32) {
    %c0_i32 = arith.constant 0 : i32
    %c0_i32_0 = arith.constant 0 : i32
    return %c0_i32, %arg1 : i32, i32
  }
  func.func @transform_3(%arg0: i32, %arg1: i32, %arg2: i32) -> (i32, i32) {
    %c0_i32 = arith.constant 0 : i32
    return %arg0, %arg1 : i32, i32
  }
  func.func @transform_4(%arg0: i32, %arg1: i32, %arg2: i32) -> (i32, i32) {
    %c0_i32 = arith.constant 0 : i32
    return %arg0, %arg1 : i32, i32
  }
}

module attributes {stable_mosaic.version = 11 : i64} {
  func.func @_mm_kernel(%arg0: i32, %arg1: i32, %arg2: i32, %arg3: memref<208x16xbf16, #tpu.memory_space<vmem>>, %arg4: memref<16x8xbf16, #tpu.memory_space<vmem>>, %arg5: memref<1x8xf32, #tpu.memory_space<vmem>>, %arg6: memref<208x8xbf16, #tpu.memory_space<vmem>>, %arg7: memref<208x8xf32, #tpu.memory_space<vmem>>) attributes {dimension_semantics = [#tpu.dimension_semantics<parallel>, #tpu.dimension_semantics<parallel>, #tpu.dimension_semantics<arbitrary>], iteration_bounds = array<i64: 2, 1, 1>, scalar_prefetch = 0 : i64, scratch_operands = 1 : i64, tpu.core_type = #tpu.core_type<tc>, window_params = [{transform_indices = @transform_0, window_bounds = array<i64: 208, 16>}, {transform_indices = @transform_1, window_bounds = array<i64: 16, 8>}, {transform_indices = @transform_2, window_bounds = array<i64: 1, 8>}, {transform_indices = @transform_3, window_bounds = array<i64: 208, 8>}]} {
    %c0_i32 = arith.constant 0 : i32
    %0 = arith.cmpi eq, %arg2, %c0_i32 : i32
    %1 = arith.extui %0 : i1 to i32
    %c0_i32_0 = arith.constant 0 : i32
    %2 = arith.cmpi ne, %1, %c0_i32_0 : i32
    scf.if %2 {
      %cst_10 = arith.constant 0.000000e+00 : f32
      %12 = vector.broadcast %cst_10 : f32 to vector<208x8xf32>
      %c0_11 = arith.constant 0 : index
      %c0_12 = arith.constant 0 : index
      %13 = vector.load %arg7[%c0_11, %c0_12] : memref<208x8xf32, #tpu.memory_space<vmem>>, vector<208x8xf32>
      tpu.vector_store %arg7[%c0_11, %c0_12], %12 {strides = array<i32>} : memref<208x8xf32, #tpu.memory_space<vmem>>, vector<208x8xf32>,
    } else {
    }
    %c0 = arith.constant 0 : index
    %c0_1 = arith.constant 0 : index
    %3 = vector.load %arg7[%c0, %c0_1] : memref<208x8xf32, #tpu.memory_space<vmem>>, vector<208x8xf32>
    %c0_2 = arith.constant 0 : index
    %c0_3 = arith.constant 0 : index
    %4 = vector.load %arg3[%c0_2, %c0_3] : memref<208x16xbf16, #tpu.memory_space<vmem>>, vector<208x16xbf16>
    %c0_4 = arith.constant 0 : index
    %c0_5 = arith.constant 0 : index
    %5 = vector.load %arg4[%c0_4, %c0_5] : memref<16x8xbf16, #tpu.memory_space<vmem>>, vector<16x8xbf16>
    %cst = arith.constant dense<0.000000e+00> : vector<208x8xf32>
    %6 = tpu.matmul %4, %5, %cst {dimension_numbers = #tpu.dot_dimension_numbers<[1], [0], [0], [1], [0, 0, 1, 1], [], []>} : vector<208x16xbf16>, vector<16x8xbf16>, vector<208x8xf32> -> vector<208x8xf32>
    %7 = arith.addf %3, %6 : vector<208x8xf32>
    %c0_6 = arith.constant 0 : index
    %c0_7 = arith.constant 0 : index
    %8 = vector.load %arg7[%c0_6, %c0_7] : memref<208x8xf32, #tpu.memory_space<vmem>>, vector<208x8xf32>
    tpu.vector_store %arg7[%c0_6, %c0_7], %7 {strides = array<i32>} : memref<208x8xf32, #tpu.memory_space<vmem>>, vector<208x8xf32>,
    %c0_i32_8 = arith.constant 0 : i32
    %9 = arith.cmpi eq, %arg2, %c0_i32_8 : i32
    %10 = arith.extui %9 : i1 to i32
    %c0_i32_9 = arith.constant 0 : i32
    %11 = arith.cmpi ne, %10, %c0_i32_9 : i32
    scf.if %11 {
      %c0_10 = arith.constant 0 : index
      %c0_11 = arith.constant 0 : index
      %12 = vector.load %arg7[%c0_10, %c0_11] : memref<208x8xf32, #tpu.memory_space<vmem>>, vector<208x8xf32>
      %c0_12 = arith.constant 0 : index
      %c0_13 = arith.constant 0 : index
      %13 = vector.load %arg5[%c0_12, %c0_13] : memref<1x8xf32, #tpu.memory_space<vmem>>, vector<1x8xf32>
      %14 = vector.broadcast %13 : vector<1x8xf32> to vector<208x8xf32>
      %15 = arith.addf %12, %14 : vector<208x8xf32>
      %cst_14 = arith.constant 0.000000e+00 : f32
      %16 = vector.broadcast %cst_14 : f32 to vector<208x8xf32>
      %17 = arith.maximumf %15, %16 : vector<208x8xf32>
      %18 = arith.truncf %17 : vector<208x8xf32> to vector<208x8xbf16>
      %c0_15 = arith.constant 0 : index
      %c0_16 = arith.constant 0 : index
      %19 = vector.load %arg6[%c0_15, %c0_16] : memref<208x8xbf16, #tpu.memory_space<vmem>>, vector<208x8xbf16>
      tpu.vector_store %arg6[%c0_15, %c0_16], %18 {strides = array<i32>} : memref<208x8xbf16, #tpu.memory_space<vmem>>, vector<208x8xbf16>,
    } else {
    }
    return
  }
  func.func @transform_0(%arg0: i32, %arg1: i32, %arg2: i32) -> (i32, i32) {
    %c0_i32 = arith.constant 0 : i32
    return %arg0, %arg2 : i32, i32
  }
  func.func @transform_1(%arg0: i32, %arg1: i32, %arg2: i32) -> (i32, i32) {
    %c0_i32 = arith.constant 0 : i32
    return %arg2, %arg1 : i32, i32
  }
  func.func @transform_2(%arg0: i32, %arg1: i32, %arg2: i32) -> (i32, i32) {
    %c0_i32 = arith.constant 0 : i32
    %c0_i32_0 = arith.constant 0 : i32
    return %c0_i32, %arg1 : i32, i32
  }
  func.func @transform_3(%arg0: i32, %arg1: i32, %arg2: i32) -> (i32, i32) {
    %c0_i32 = arith.constant 0 : i32
    return %arg0, %arg1 : i32, i32
  }
}

module attributes {stable_mosaic.version = 11 : i64} {
  func.func @_mm_kernel(%arg0: i32, %arg1: i32, %arg2: i32, %arg3: memref<98x72xbf16, #tpu.memory_space<vmem>>, %arg4: memref<72x8xbf16, #tpu.memory_space<vmem>>, %arg5: memref<1x8xf32, #tpu.memory_space<vmem>>, %arg6: memref<98x8xbf16, #tpu.memory_space<vmem>>, %arg7: memref<98x8xf32, #tpu.memory_space<vmem>>) attributes {dimension_semantics = [#tpu.dimension_semantics<parallel>, #tpu.dimension_semantics<parallel>, #tpu.dimension_semantics<arbitrary>], iteration_bounds = array<i64: 1, 1, 1>, scalar_prefetch = 0 : i64, scratch_operands = 1 : i64, tpu.core_type = #tpu.core_type<tc>, window_params = [{transform_indices = @transform_0, window_bounds = array<i64: 98, 72>}, {transform_indices = @transform_1, window_bounds = array<i64: 72, 8>}, {transform_indices = @transform_2, window_bounds = array<i64: 1, 8>}, {transform_indices = @transform_3, window_bounds = array<i64: 98, 8>}]} {
    %c0_i32 = arith.constant 0 : i32
    %0 = arith.cmpi eq, %arg2, %c0_i32 : i32
    %1 = arith.extui %0 : i1 to i32
    %c0_i32_0 = arith.constant 0 : i32
    %2 = arith.cmpi ne, %1, %c0_i32_0 : i32
    scf.if %2 {
      %cst_10 = arith.constant 0.000000e+00 : f32
      %12 = vector.broadcast %cst_10 : f32 to vector<98x8xf32>
      %c0_11 = arith.constant 0 : index
      %c0_12 = arith.constant 0 : index
      %13 = vector.load %arg7[%c0_11, %c0_12] : memref<98x8xf32, #tpu.memory_space<vmem>>, vector<98x8xf32>
      tpu.vector_store %arg7[%c0_11, %c0_12], %12 {strides = array<i32>} : memref<98x8xf32, #tpu.memory_space<vmem>>, vector<98x8xf32>,
    } else {
    }
    %c0 = arith.constant 0 : index
    %c0_1 = arith.constant 0 : index
    %3 = vector.load %arg7[%c0, %c0_1] : memref<98x8xf32, #tpu.memory_space<vmem>>, vector<98x8xf32>
    %c0_2 = arith.constant 0 : index
    %c0_3 = arith.constant 0 : index
    %4 = vector.load %arg3[%c0_2, %c0_3] : memref<98x72xbf16, #tpu.memory_space<vmem>>, vector<98x72xbf16>
    %c0_4 = arith.constant 0 : index
    %c0_5 = arith.constant 0 : index
    %5 = vector.load %arg4[%c0_4, %c0_5] : memref<72x8xbf16, #tpu.memory_space<vmem>>, vector<72x8xbf16>
    %cst = arith.constant dense<0.000000e+00> : vector<98x8xf32>
    %6 = tpu.matmul %4, %5, %cst {dimension_numbers = #tpu.dot_dimension_numbers<[1], [0], [0], [1], [0, 0, 1, 1], [], []>} : vector<98x72xbf16>, vector<72x8xbf16>, vector<98x8xf32> -> vector<98x8xf32>
    %7 = arith.addf %3, %6 : vector<98x8xf32>
    %c0_6 = arith.constant 0 : index
    %c0_7 = arith.constant 0 : index
    %8 = vector.load %arg7[%c0_6, %c0_7] : memref<98x8xf32, #tpu.memory_space<vmem>>, vector<98x8xf32>
    tpu.vector_store %arg7[%c0_6, %c0_7], %7 {strides = array<i32>} : memref<98x8xf32, #tpu.memory_space<vmem>>, vector<98x8xf32>,
    %c0_i32_8 = arith.constant 0 : i32
    %9 = arith.cmpi eq, %arg2, %c0_i32_8 : i32
    %10 = arith.extui %9 : i1 to i32
    %c0_i32_9 = arith.constant 0 : i32
    %11 = arith.cmpi ne, %10, %c0_i32_9 : i32
    scf.if %11 {
      %c0_10 = arith.constant 0 : index
      %c0_11 = arith.constant 0 : index
      %12 = vector.load %arg7[%c0_10, %c0_11] : memref<98x8xf32, #tpu.memory_space<vmem>>, vector<98x8xf32>
      %c0_12 = arith.constant 0 : index
      %c0_13 = arith.constant 0 : index
      %13 = vector.load %arg5[%c0_12, %c0_13] : memref<1x8xf32, #tpu.memory_space<vmem>>, vector<1x8xf32>
      %14 = vector.broadcast %13 : vector<1x8xf32> to vector<98x8xf32>
      %15 = arith.addf %12, %14 : vector<98x8xf32>
      %cst_14 = arith.constant 0.000000e+00 : f32
      %16 = vector.broadcast %cst_14 : f32 to vector<98x8xf32>
      %17 = arith.maximumf %15, %16 : vector<98x8xf32>
      %18 = arith.truncf %17 : vector<98x8xf32> to vector<98x8xbf16>
      %c0_15 = arith.constant 0 : index
      %c0_16 = arith.constant 0 : index
      %19 = vector.load %arg6[%c0_15, %c0_16] : memref<98x8xbf16, #tpu.memory_space<vmem>>, vector<98x8xbf16>
      tpu.vector_store %arg6[%c0_15, %c0_16], %18 {strides = array<i32>} : memref<98x8xbf16, #tpu.memory_space<vmem>>, vector<98x8xbf16>,
    } else {
    }
    return
  }
  func.func @transform_0(%arg0: i32, %arg1: i32, %arg2: i32) -> (i32, i32) {
    %c0_i32 = arith.constant 0 : i32
    return %arg0, %arg2 : i32, i32
  }
  func.func @transform_1(%arg0: i32, %arg1: i32, %arg2: i32) -> (i32, i32) {
    %c0_i32 = arith.constant 0 : i32
    return %arg2, %arg1 : i32, i32
  }
  func.func @transform_2(%arg0: i32, %arg1: i32, %arg2: i32) -> (i32, i32) {
    %c0_i32 = arith.constant 0 : i32
    %c0_i32_0 = arith.constant 0 : i32
    return %c0_i32, %arg1 : i32, i32
  }
  func.func @transform_3(%arg0: i32, %arg1: i32, %arg2: i32) -> (i32, i32) {
    %c0_i32 = arith.constant 0 : i32
    return %arg0, %arg1 : i32, i32
  }
}

module attributes {stable_mosaic.version = 11 : i64} {
  func.func @_mm_kernel(%arg0: i32, %arg1: i32, %arg2: i32, %arg3: memref<98x8xbf16, #tpu.memory_space<vmem>>, %arg4: memref<8x32xbf16, #tpu.memory_space<vmem>>, %arg5: memref<1x32xf32, #tpu.memory_space<vmem>>, %arg6: memref<98x32xbf16, #tpu.memory_space<vmem>>, %arg7: memref<98x32xbf16, #tpu.memory_space<vmem>>, %arg8: memref<98x32xf32, #tpu.memory_space<vmem>>) attributes {dimension_semantics = [#tpu.dimension_semantics<parallel>, #tpu.dimension_semantics<parallel>, #tpu.dimension_semantics<arbitrary>], iteration_bounds = array<i64: 1, 1, 1>, scalar_prefetch = 0 : i64, scratch_operands = 1 : i64, tpu.core_type = #tpu.core_type<tc>, window_params = [{transform_indices = @transform_0, window_bounds = array<i64: 98, 8>}, {transform_indices = @transform_1, window_bounds = array<i64: 8, 32>}, {transform_indices = @transform_2, window_bounds = array<i64: 1, 32>}, {transform_indices = @transform_3, window_bounds = array<i64: 98, 32>}, {transform_indices = @transform_4, window_bounds = array<i64: 98, 32>}]} {
    %c0_i32 = arith.constant 0 : i32
    %0 = arith.cmpi eq, %arg2, %c0_i32 : i32
    %1 = arith.extui %0 : i1 to i32
    %c0_i32_0 = arith.constant 0 : i32
    %2 = arith.cmpi ne, %1, %c0_i32_0 : i32
    scf.if %2 {
      %cst_10 = arith.constant 0.000000e+00 : f32
      %12 = vector.broadcast %cst_10 : f32 to vector<98x32xf32>
      %c0_11 = arith.constant 0 : index
      %c0_12 = arith.constant 0 : index
      %13 = vector.load %arg8[%c0_11, %c0_12] : memref<98x32xf32, #tpu.memory_space<vmem>>, vector<98x32xf32>
      tpu.vector_store %arg8[%c0_11, %c0_12], %12 {strides = array<i32>} : memref<98x32xf32, #tpu.memory_space<vmem>>, vector<98x32xf32>,
    } else {
    }
    %c0 = arith.constant 0 : index
    %c0_1 = arith.constant 0 : index
    %3 = vector.load %arg8[%c0, %c0_1] : memref<98x32xf32, #tpu.memory_space<vmem>>, vector<98x32xf32>
    %c0_2 = arith.constant 0 : index
    %c0_3 = arith.constant 0 : index
    %4 = vector.load %arg3[%c0_2, %c0_3] : memref<98x8xbf16, #tpu.memory_space<vmem>>, vector<98x8xbf16>
    %c0_4 = arith.constant 0 : index
    %c0_5 = arith.constant 0 : index
    %5 = vector.load %arg4[%c0_4, %c0_5] : memref<8x32xbf16, #tpu.memory_space<vmem>>, vector<8x32xbf16>
    %cst = arith.constant dense<0.000000e+00> : vector<98x32xf32>
    %6 = tpu.matmul %4, %5, %cst {dimension_numbers = #tpu.dot_dimension_numbers<[1], [0], [0], [1], [0, 0, 1, 1], [], []>} : vector<98x8xbf16>, vector<8x32xbf16>, vector<98x32xf32> -> vector<98x32xf32>
    %7 = arith.addf %3, %6 : vector<98x32xf32>
    %c0_6 = arith.constant 0 : index
    %c0_7 = arith.constant 0 : index
    %8 = vector.load %arg8[%c0_6, %c0_7] : memref<98x32xf32, #tpu.memory_space<vmem>>, vector<98x32xf32>
    tpu.vector_store %arg8[%c0_6, %c0_7], %7 {strides = array<i32>} : memref<98x32xf32, #tpu.memory_space<vmem>>, vector<98x32xf32>,
    %c0_i32_8 = arith.constant 0 : i32
    %9 = arith.cmpi eq, %arg2, %c0_i32_8 : i32
    %10 = arith.extui %9 : i1 to i32
    %c0_i32_9 = arith.constant 0 : i32
    %11 = arith.cmpi ne, %10, %c0_i32_9 : i32
    scf.if %11 {
      %c0_10 = arith.constant 0 : index
      %c0_11 = arith.constant 0 : index
      %12 = vector.load %arg8[%c0_10, %c0_11] : memref<98x32xf32, #tpu.memory_space<vmem>>, vector<98x32xf32>
      %c0_12 = arith.constant 0 : index
      %c0_13 = arith.constant 0 : index
      %13 = vector.load %arg5[%c0_12, %c0_13] : memref<1x32xf32, #tpu.memory_space<vmem>>, vector<1x32xf32>
      %14 = vector.broadcast %13 : vector<1x32xf32> to vector<98x32xf32>
      %15 = arith.addf %12, %14 : vector<98x32xf32>
      %c0_14 = arith.constant 0 : index
      %c0_15 = arith.constant 0 : index
      %16 = vector.load %arg6[%c0_14, %c0_15] : memref<98x32xbf16, #tpu.memory_space<vmem>>, vector<98x32xbf16>
      %17 = arith.extf %16 : vector<98x32xbf16> to vector<98x32xf32>
      %18 = arith.addf %15, %17 : vector<98x32xf32>
      %cst_16 = arith.constant 0.000000e+00 : f32
      %19 = vector.broadcast %cst_16 : f32 to vector<98x32xf32>
      %20 = arith.maximumf %18, %19 : vector<98x32xf32>
      %21 = arith.truncf %20 : vector<98x32xf32> to vector<98x32xbf16>
      %c0_17 = arith.constant 0 : index
      %c0_18 = arith.constant 0 : index
      %22 = vector.load %arg7[%c0_17, %c0_18] : memref<98x32xbf16, #tpu.memory_space<vmem>>, vector<98x32xbf16>
      tpu.vector_store %arg7[%c0_17, %c0_18], %21 {strides = array<i32>} : memref<98x32xbf16, #tpu.memory_space<vmem>>, vector<98x32xbf16>,
    } else {
    }
    return
  }
  func.func @transform_0(%arg0: i32, %arg1: i32, %arg2: i32) -> (i32, i32) {
    %c0_i32 = arith.constant 0 : i32
    return %arg0, %arg2 : i32, i32
  }
  func.func @transform_1(%arg0: i32, %arg1: i32, %arg2: i32) -> (i32, i32) {
    %c0_i32 = arith.constant 0 : i32
    return %arg2, %arg1 : i32, i32
  }
  func.func @transform_2(%arg0: i32, %arg1: i32, %arg2: i32) -> (i32, i32) {
    %c0_i32 = arith.constant 0 : i32
    %c0_i32_0 = arith.constant 0 : i32
    return %c0_i32, %arg1 : i32, i32
  }
  func.func @transform_3(%arg0: i32, %arg1: i32, %arg2: i32) -> (i32, i32) {
    %c0_i32 = arith.constant 0 : i32
    return %arg0, %arg1 : i32, i32
  }
  func.func @transform_4(%arg0: i32, %arg1: i32, %arg2: i32) -> (i32, i32) {
    %c0_i32 = arith.constant 0 : i32
    return %arg0, %arg1 : i32, i32
  }
}

module attributes {stable_mosaic.version = 11 : i64} {
  func.func @_mm_kernel(%arg0: i32, %arg1: i32, %arg2: i32, %arg3: memref<98x16xbf16, #tpu.memory_space<vmem>>, %arg4: memref<16x32xbf16, #tpu.memory_space<vmem>>, %arg5: memref<1x32xf32, #tpu.memory_space<vmem>>, %arg6: memref<98x32xbf16, #tpu.memory_space<vmem>>, %arg7: memref<98x32xf32, #tpu.memory_space<vmem>>) attributes {dimension_semantics = [#tpu.dimension_semantics<parallel>, #tpu.dimension_semantics<parallel>, #tpu.dimension_semantics<arbitrary>], iteration_bounds = array<i64: 1, 1, 1>, scalar_prefetch = 0 : i64, scratch_operands = 1 : i64, tpu.core_type = #tpu.core_type<tc>, window_params = [{transform_indices = @transform_0, window_bounds = array<i64: 98, 16>}, {transform_indices = @transform_1, window_bounds = array<i64: 16, 32>}, {transform_indices = @transform_2, window_bounds = array<i64: 1, 32>}, {transform_indices = @transform_3, window_bounds = array<i64: 98, 32>}]} {
    %c0_i32 = arith.constant 0 : i32
    %0 = arith.cmpi eq, %arg2, %c0_i32 : i32
    %1 = arith.extui %0 : i1 to i32
    %c0_i32_0 = arith.constant 0 : i32
    %2 = arith.cmpi ne, %1, %c0_i32_0 : i32
    scf.if %2 {
      %cst_10 = arith.constant 0.000000e+00 : f32
      %12 = vector.broadcast %cst_10 : f32 to vector<98x32xf32>
      %c0_11 = arith.constant 0 : index
      %c0_12 = arith.constant 0 : index
      %13 = vector.load %arg7[%c0_11, %c0_12] : memref<98x32xf32, #tpu.memory_space<vmem>>, vector<98x32xf32>
      tpu.vector_store %arg7[%c0_11, %c0_12], %12 {strides = array<i32>} : memref<98x32xf32, #tpu.memory_space<vmem>>, vector<98x32xf32>,
    } else {
    }
    %c0 = arith.constant 0 : index
    %c0_1 = arith.constant 0 : index
    %3 = vector.load %arg7[%c0, %c0_1] : memref<98x32xf32, #tpu.memory_space<vmem>>, vector<98x32xf32>
    %c0_2 = arith.constant 0 : index
    %c0_3 = arith.constant 0 : index
    %4 = vector.load %arg3[%c0_2, %c0_3] : memref<98x16xbf16, #tpu.memory_space<vmem>>, vector<98x16xbf16>
    %c0_4 = arith.constant 0 : index
    %c0_5 = arith.constant 0 : index
    %5 = vector.load %arg4[%c0_4, %c0_5] : memref<16x32xbf16, #tpu.memory_space<vmem>>, vector<16x32xbf16>
    %cst = arith.constant dense<0.000000e+00> : vector<98x32xf32>
    %6 = tpu.matmul %4, %5, %cst {dimension_numbers = #tpu.dot_dimension_numbers<[1], [0], [0], [1], [0, 0, 1, 1], [], []>} : vector<98x16xbf16>, vector<16x32xbf16>, vector<98x32xf32> -> vector<98x32xf32>
    %7 = arith.addf %3, %6 : vector<98x32xf32>
    %c0_6 = arith.constant 0 : index
    %c0_7 = arith.constant 0 : index
    %8 = vector.load %arg7[%c0_6, %c0_7] : memref<98x32xf32, #tpu.memory_space<vmem>>, vector<98x32xf32>
    tpu.vector_store %arg7[%c0_6, %c0_7], %7 {strides = array<i32>} : memref<98x32xf32, #tpu.memory_space<vmem>>, vector<98x32xf32>,
    %c0_i32_8 = arith.constant 0 : i32
    %9 = arith.cmpi eq, %arg2, %c0_i32_8 : i32
    %10 = arith.extui %9 : i1 to i32
    %c0_i32_9 = arith.constant 0 : i32
    %11 = arith.cmpi ne, %10, %c0_i32_9 : i32
    scf.if %11 {
      %c0_10 = arith.constant 0 : index
      %c0_11 = arith.constant 0 : index
      %12 = vector.load %arg7[%c0_10, %c0_11] : memref<98x32xf32, #tpu.memory_space<vmem>>, vector<98x32xf32>
      %c0_12 = arith.constant 0 : index
      %c0_13 = arith.constant 0 : index
      %13 = vector.load %arg5[%c0_12, %c0_13] : memref<1x32xf32, #tpu.memory_space<vmem>>, vector<1x32xf32>
      %14 = vector.broadcast %13 : vector<1x32xf32> to vector<98x32xf32>
      %15 = arith.addf %12, %14 : vector<98x32xf32>
      %16 = arith.truncf %15 : vector<98x32xf32> to vector<98x32xbf16>
      %c0_14 = arith.constant 0 : index
      %c0_15 = arith.constant 0 : index
      %17 = vector.load %arg6[%c0_14, %c0_15] : memref<98x32xbf16, #tpu.memory_space<vmem>>, vector<98x32xbf16>
      tpu.vector_store %arg6[%c0_14, %c0_15], %16 {strides = array<i32>} : memref<98x32xbf16, #tpu.memory_space<vmem>>, vector<98x32xbf16>,
    } else {
    }
    return
  }
  func.func @transform_0(%arg0: i32, %arg1: i32, %arg2: i32) -> (i32, i32) {
    %c0_i32 = arith.constant 0 : i32
    return %arg0, %arg2 : i32, i32
  }
  func.func @transform_1(%arg0: i32, %arg1: i32, %arg2: i32) -> (i32, i32) {
    %c0_i32 = arith.constant 0 : i32
    return %arg2, %arg1 : i32, i32
  }
  func.func @transform_2(%arg0: i32, %arg1: i32, %arg2: i32) -> (i32, i32) {
    %c0_i32 = arith.constant 0 : i32
    %c0_i32_0 = arith.constant 0 : i32
    return %c0_i32, %arg1 : i32, i32
  }
  func.func @transform_3(%arg0: i32, %arg1: i32, %arg2: i32) -> (i32, i32) {
    %c0_i32 = arith.constant 0 : i32
    return %arg0, %arg1 : i32, i32
  }
}

module attributes {stable_mosaic.version = 11 : i64} {
  func.func @_mm_kernel(%arg0: i32, %arg1: i32, %arg2: i32, %arg3: memref<2x1568xbf16, #tpu.memory_space<vmem>>, %arg4: memref<1568x10xbf16, #tpu.memory_space<vmem>>, %arg5: memref<1x10xf32, #tpu.memory_space<vmem>>, %arg6: memref<2x10xf32, #tpu.memory_space<vmem>>, %arg7: memref<2x10xf32, #tpu.memory_space<vmem>>) attributes {dimension_semantics = [#tpu.dimension_semantics<parallel>, #tpu.dimension_semantics<parallel>, #tpu.dimension_semantics<arbitrary>], iteration_bounds = array<i64: 1, 1, 1>, scalar_prefetch = 0 : i64, scratch_operands = 1 : i64, tpu.core_type = #tpu.core_type<tc>, window_params = [{transform_indices = @transform_0, window_bounds = array<i64: 2, 1568>}, {transform_indices = @transform_1, window_bounds = array<i64: 1568, 10>}, {transform_indices = @transform_2, window_bounds = array<i64: 1, 10>}, {transform_indices = @transform_3, window_bounds = array<i64: 2, 10>}]} {
    %c0_i32 = arith.constant 0 : i32
    %0 = arith.cmpi eq, %arg2, %c0_i32 : i32
    %1 = arith.extui %0 : i1 to i32
    %c0_i32_0 = arith.constant 0 : i32
    %2 = arith.cmpi ne, %1, %c0_i32_0 : i32
    scf.if %2 {
      %cst_10 = arith.constant 0.000000e+00 : f32
      %12 = vector.broadcast %cst_10 : f32 to vector<2x10xf32>
      %c0_11 = arith.constant 0 : index
      %c0_12 = arith.constant 0 : index
      %13 = vector.load %arg7[%c0_11, %c0_12] : memref<2x10xf32, #tpu.memory_space<vmem>>, vector<2x10xf32>
      tpu.vector_store %arg7[%c0_11, %c0_12], %12 {strides = array<i32>} : memref<2x10xf32, #tpu.memory_space<vmem>>, vector<2x10xf32>,
    } else {
    }
    %c0 = arith.constant 0 : index
    %c0_1 = arith.constant 0 : index
    %3 = vector.load %arg7[%c0, %c0_1] : memref<2x10xf32, #tpu.memory_space<vmem>>, vector<2x10xf32>
    %c0_2 = arith.constant 0 : index
    %c0_3 = arith.constant 0 : index
    %4 = vector.load %arg3[%c0_2, %c0_3] : memref<2x1568xbf16, #tpu.memory_space<vmem>>, vector<2x1568xbf16>
    %c0_4 = arith.constant 0 : index
    %c0_5 = arith.constant 0 : index
    %5 = vector.load %arg4[%c0_4, %c0_5] : memref<1568x10xbf16, #tpu.memory_space<vmem>>, vector<1568x10xbf16>
    %cst = arith.constant dense<0.000000e+00> : vector<2x10xf32>
    %6 = tpu.matmul %4, %5, %cst {dimension_numbers = #tpu.dot_dimension_numbers<[1], [0], [0], [1], [0, 0, 1, 1], [], []>} : vector<2x1568xbf16>, vector<1568x10xbf16>, vector<2x10xf32> -> vector<2x10xf32>
    %7 = arith.addf %3, %6 : vector<2x10xf32>
    %c0_6 = arith.constant 0 : index
    %c0_7 = arith.constant 0 : index
    %8 = vector.load %arg7[%c0_6, %c0_7] : memref<2x10xf32, #tpu.memory_space<vmem>>, vector<2x10xf32>
    tpu.vector_store %arg7[%c0_6, %c0_7], %7 {strides = array<i32>} : memref<2x10xf32, #tpu.memory_space<vmem>>, vector<2x10xf32>,
    %c0_i32_8 = arith.constant 0 : i32
    %9 = arith.cmpi eq, %arg2, %c0_i32_8 : i32
    %10 = arith.extui %9 : i1 to i32
    %c0_i32_9 = arith.constant 0 : i32
    %11 = arith.cmpi ne, %10, %c0_i32_9 : i32
    scf.if %11 {
      %c0_10 = arith.constant 0 : index
      %c0_11 = arith.constant 0 : index
      %12 = vector.load %arg7[%c0_10, %c0_11] : memref<2x10xf32, #tpu.memory_space<vmem>>, vector<2x10xf32>
      %c0_12 = arith.constant 0 : index
      %c0_13 = arith.constant 0 : index
      %13 = vector.load %arg5[%c0_12, %c0_13] : memref<1x10xf32, #tpu.memory_space<vmem>>, vector<1x10xf32>
      %14 = vector.broadcast %13 : vector<1x10xf32> to vector<2x10xf32>
      %15 = arith.addf %12, %14 : vector<2x10xf32>
      %c0_14 = arith.constant 0 : index
      %c0_15 = arith.constant 0 : index
      %16 = vector.load %arg6[%c0_14, %c0_15] : memref<2x10xf32, #tpu.memory_space<vmem>>, vector<2x10xf32>
      tpu.vector_store %arg6[%c0_14, %c0_15], %15 {strides = array<i32>} : memref<2x10xf32, #tpu.memory_space<vmem>>, vector<2x10xf32>,
    } else {
    }
    return
  }
  func.func @transform_0(%arg0: i32, %arg1: i32, %arg2: i32) -> (i32, i32) {
    %c0_i32 = arith.constant 0 : i32
    return %arg0, %arg2 : i32, i32
  }
  func.func @transform_1(%arg0: i32, %arg1: i32, %arg2: i32) -> (i32, i32) {
    %c0_i32 = arith.constant 0 : i32
    return %arg2, %arg1 : i32, i32
  }
  func.func @transform_2(%arg0: i32, %arg1: i32, %arg2: i32) -> (i32, i32) {
    %c0_i32 = arith.constant 0 : i32
    %c0_i32_0 = arith.constant 0 : i32
    return %c0_i32, %arg1 : i32, i32
  }
  func.func @transform_3(%arg0: i32, %arg1: i32, %arg2: i32) -> (i32, i32) {
    %c0_i32 = arith.constant 0 : i32
    return %arg0, %arg1 : i32, i32
  }
}

</mosaic_0001>

<bundles_post_ra>
// kernel: wrn_forward.11
= control target key start
LH: loop header
LB: loop body
LE: loop exit
PB: predicated region body
PF: predicated region fallthrough
CT: control target
= control target key end

     0   :  { %8 = vsyncpa [#allocation4], 0  ;;  %s2130_s0 = inlined_call_operand.hbm [shape: bf16[1568,147], index: 0, kind: input, shape index: {}]   ;;  %s2131_s1 = inlined_call_operand.hbm [shape: bf16[147,8], index: 1, kind: input, shape index: {}]   ;;  %s2132_s2 = inlined_call_operand.hbm [shape: f32[1,8], index: 2, kind: input, shape index: {}]   ;;  %s2133_s3 = inlined_call_operand.hbm [shape: bf16[1568,8], index: 3, kind: output, shape index: {}]  }
   0x1   :  { %10 = vsyncpa [#allocation4 + $0x1], 0 }
   0x2   :  { %11 = vsyncpa [#allocation7], 0 }
   0x3   :  { %12 = vsyncpa [#allocation5], 0 }
   0x4   :  { %14 = vsyncpa [#allocation5 + $0x1], 0  ;;  %s1673_s12 = smov 0   ;;  %s1675_s13 = smov 0  }
   0x5   :  { %s1677_s14 = smov 0   ;;  %s1679_s15 = smov 0  }
   0x6   :  { %s1681_s16 = smov 0   ;;  %s1683_s17 = smov 0  }
   0x7 LB: > { %s1172_s18 = sadd.s32 4294967295, %s1638_s17   ;;  %s1173_s19 = sadd.s32 4294967294, %s1638_s17   ;;  %s1638_s17 = sphi %s1683_s17, %s20_s17   ;;  %s1634_s16 = sphi %s1681_s16, %s2155_s16   ;;  %s1630_s15 = sphi %s1679_s15, %s2154_s15   ;;  %s1626_s14 = sphi %s1677_s14, %s2153_s14   ;;  %s1622_s13 = sphi %s1675_s13, %s2152_s13   ;;  %s1618_s12 = sphi %s1673_s12, %s2151_s12  }
   0x8   : > { %p61_p0 = scmp.ne.s32.totalorder %s1622_s13, %s1618_s12  ;;  %p1707_p1 = scmp.eq.s32.totalorder %s1172_s18, 0 }
   0x9   : > { %p1711_p2 = scmp.eq.s32.totalorder %s1172_s18, 6  ;;  %p147_p3 = scmp.eq.s32.totalorder %s1173_s19, 6 }
   0xa   : > { %s2138_s20 = scalar_select %p1707_p1, 1, 0 }
   0xb   : > { %s2139_s21 = scalar_select %p1711_p2, 1, 0 }
   0xc   : > { %p1717_p4 = por %p1707_p1, %p61_p0  ;;  %p1174_p5 = scmp.ge.s32.totalorder %s1638_s17, 1 }
   0xd   : > { %p1722_p6 = por %p147_p3, %p61_p0  ;;  %p154_p7 = scmp.lt.s32.totalorder %s1638_s17, 8 }
   0xe   : > { %s2140_s22 = scalar_select %p1717_p4, 1, 0 }
   0xf   : > { %s2141_s23 = scalar_select %p1722_p6, 1, 0 }
  0x10   : > { %p1727_p8 = pnand %p1174_p5, %p154_p7  ;;  %s1640_s25 = smov [#allocation6]  }
  0x11   : > { %s170_s26 = sshll.u32 %s1640_s25, 4  ;;  %s1641_s28 = smov [#allocation8]   ;;  %s171_s26 = int_to_ptr.vmem [resolvable:$true] %s170_s26 }
  0x12   : > { %s2142_s24 = scalar_select %p1727_p8, 1, 0 }
  0x13   : > { %p1334_p9 = pneg %p1727_p8  ;;  %s186_s29 = sshll.u32 %s1641_s28, 4  ;;  %s1739_s29 = int_to_ptr.vmem [resolvable:$true] %s186_s29 }
  0x14   : > { %s1466_s5 = scalar_lea.hbm %s2131_s1, 1216 }
  0x15   : > { %p1735_p10 = pnand %p1334_p9, %p1707_p1  ;;  %p1467_p11 = scmp.ne.s32.totalorder %s2131_s1, %s1466_s5 }
  0x16   : > { %p1473_p3 = scmp.lt.u32.totalorder %s1466_s5, %s2131_s1 }
  0x17   : > { %p1468_p12 = pneg %p1735_p10 }
  0x19   : > { %p1469_p13 = pnand %p1468_p12, %p1467_p11 }
  0x1b   : > { %p1470_p0 = pneg %p1469_p13 }
  0x1d   : > { %p1475_p5 = pnand %p1473_p3, %p1470_p0 }
  0x1f   : > { %1478 = shalt.err (!%p1475_p5)
}
  0x20   : > { %s1479_s10 = scalar_lea.vmem %s171_s26, 1216  ;;  %p1487_p1 = scmp.lt.s32.totalorder %s171_s26, %s171_s26 }
  0x21   : > { %p1480_p7 = scmp.ne.s32.totalorder %s171_s26, %s1479_s10  ;;  %p1488_p4 = scmp.lt.s32.totalorder %s1479_s10, %s1479_s10 }
  0x23   : > { %p1482_p9 = pnand %p1480_p7, %p1468_p12  ;;  %p1489_p8 = por %p1488_p4, %p1487_p1 }
  0x25   : > { %p1483_p6 = pneg %p1482_p9 }
  0x27   : > { %p1490_p2 = pnand %p1489_p8, %p1483_p6 }
  0x29   : > { %1493 = shalt.err (!%p1490_p2)
}
  0x2a   : > { %s1642_s11 = smov 64   ;;  %s1643_s18 = smov 4  }
  0x2b   : > { %1337 = dma.hbm_to_vmem [thread:$0]  (!%p1735_p10), %s2131_s1, 1216, %s171_s26, [#allocation7], %s1642_s11, %s1642_s11, %s1643_s18  }
  0x2c   : > { %s1494_s4 = scalar_lea.hbm %s2132_s2, 16 }
  0x2d   : > { %p1495_p11 = scmp.ne.s32.totalorder %s2132_s2, %s1494_s4  ;;  %p1501_p4 = scmp.lt.u32.totalorder %s1494_s4, %s2132_s2 }
  0x2f   : > { %p1497_p1 = pnand %p1495_p11, %p1468_p12 }
  0x31   : > { %p1498_p2 = pneg %p1497_p1 }
  0x33   : > { %p1503_p6 = pnand %p1501_p4, %p1498_p2 }
  0x35   : > { %1506 = shalt.err (!%p1503_p6)
}
  0x36   : > { %s1507_s26 = scalar_lea.vmem %s1739_s29, 16  ;;  %s1514_s9 = scalar_lea.vmem %s1739_s29, 32 }
  0x37   : > { %p1508_p8 = scmp.ne.s32.totalorder %s1739_s29, %s1507_s26  ;;  %p1515_p3 = scmp.lt.s32.totalorder %s1739_s29, %s1739_s29 }
  0x38   : > { %p1516_p5 = scmp.lt.s32.totalorder %s1514_s9, %s1507_s26 }
  0x39   : > { %p1510_p13 = pnand %p1508_p8, %p1468_p12 }
  0x3a   : > { %p1517_p7 = por %p1516_p5, %p1515_p3 }
  0x3b   : > { %p1511_p0 = pneg %p1510_p13 }
  0x3d   : > { %p1518_p9 = pnand %p1517_p7, %p1511_p0 }
  0x3f   : > { %1521 = shalt.err (!%p1518_p9)
}
  0x40   : > { %1340 = dma.hbm_to_vmem [thread:$0]  (!%p1735_p10), %s2132_s2, 16, %s1739_s29, [#allocation7]  }
  0x41   : > { %s39_s18 = sadd.s32 1, %s1634_s16  ;;  %s48_s19 = sadd.s32 1, %s1626_s14 }
  0x42   : > { %p41_p12 = scmp.ge.s32.totalorder %s39_s18, 7  ;;  %p55_p11 = scmp.ne.s32.totalorder %s1626_s14, %s1622_s13 }
  0x43   : > { %p56_p1 = scmp.eq.s32.totalorder %s1638_s17, 0  ;;  %p1351_p2 = scmp.lt.s32.totalorder %s1638_s17, 7 }
  0x44   : > { %s2157_s18 = smov (%p41_p12, %s39_s18), 0  ;;  %p2144_p6 = scmp.ne.s32.totalorder %s2139_s21, 0 }
  0x45   : > { %p57_p4 = por %p56_p1, %p55_p11  ;;  %s43_s25 = ssub.s32 %s1634_s16, %s2157_s18 }
  0x46   : > { %p1799_p8 = por %p2144_p6, %p55_p11  ;;  %s197_s28 = sand.u32 1, %s1626_s14  }
  0x47   : > { %p46_p13 = scmp.eq.s32.totalorder %s43_s25, 0  ;;  %s1319_s29 = smul.u32 224, %s197_s28 }
  0x48   : > { %p1806_p10 = pnand %p1351_p2, %p57_p4  ;;  %s1298_s5 = smul.u32 3584, %s1634_s16 }
  0x49   : > { %s1811_s4 = scalar_select %p46_p13, %s1626_s14, %s48_s19  }
  0x4a   : > { %s201_s6 = scalar_lea.vmem [#allocation3], %s1319_s29  ;;  %s1817_s26 = scalar_lea.hbm %s2130_s0, %s1298_s5 }
  0x4b   : > { %s211_s7 = sshll.u32 %s201_s6, 4  ;;  %s1821_s9 = scalar_lea.sflag [#allocation4], %s197_s28  ;;  %s1819_s7 = int_to_ptr.vmem [resolvable:$true] %s211_s7 }
  0x4c   : > { %s1522_s10 = scalar_lea.hbm %s1817_s26, 3584  ;;  %p1524_p3 = pneg %p1806_p10 }
  0x4d   : > { %p1523_p0 = scmp.ne.s32.totalorder %s1817_s26, %s1522_s10  ;;  %s1527_s25 = scalar_lea.hbm %s2130_s0, 25088 }
  0x4e   : > { %p1528_p9 = scmp.lt.u32.totalorder %s1817_s26, %s2130_s0  ;;  %p1529_p12 = scmp.lt.u32.totalorder %s1527_s25, %s1522_s10 }
  0x4f   : > { %p1525_p5 = pnand %p1524_p3, %p1523_p0  ;;  %p1531_p1 = scmp.lt.u32.totalorder %s1522_s10, %s1817_s26 }
  0x50   : > { %p1530_p11 = por %p1529_p12, %p1528_p9 }
  0x51   : > { %p1526_p7 = pneg %p1525_p5 }
  0x52   : > { %p1532_p2 = por %p1531_p1, %p1530_p11 }
  0x54   : > { %p1533_p4 = pnand %p1532_p2, %p1526_p7 }
  0x56   : > { %1536 = shalt.err (!%p1533_p4)
}
  0x57   : > { %s1537_s28 = scalar_lea.vmem %s1819_s7, 3584  ;;  %s1644_s6 = smov [#allocation3]  }
  0x58   : > { %p1538_p6 = scmp.ne.s32.totalorder %s1819_s7, %s1537_s28  ;;  %s1542_s21 = sshll.u32 %s1644_s6, 4  ;;  %s1543_s21 = int_to_ptr.vmem [resolvable:$false] %s1542_s21 }
  0x59   : > { %s1544_s8 = scalar_lea.vmem %s1543_s21, 7168  ;;  %p1545_p5 = scmp.lt.s32.totalorder %s1819_s7, %s1543_s21 }
  0x5a   : > { %p1540_p13 = pnand %p1538_p6, %p1524_p3  ;;  %p1546_p9 = scmp.lt.s32.totalorder %s1544_s8, %s1537_s28 }
  0x5c   : > { %p1541_p0 = pneg %p1540_p13  ;;  %p1547_p12 = por %p1546_p9, %p1545_p5 }
  0x5e   : > { %p1548_p11 = pnand %p1547_p12, %p1541_p0 }
  0x60   : > { %1551 = shalt.err (!%p1548_p11)
}
  0x61   : > { %s1645_s10 = smov 128   ;;  %s1646_s11 = smov 8  }
  0x62   : > { %1344 = dma.hbm_to_vmem [thread:$0]  (!%p1806_p10), %s1817_s26, 3584, %s1819_s7, %s1821_s9, %s1645_s10, %s1645_s10, %s1646_s11  }
  0x63   : > { %p2147_p3 = scmp.ne.s32.totalorder %s2142_s24, 0 }
  0x64   : > { %s1852_s19 = sand.u32 (!%p2147_p3), 1, %s1622_s13   ;;  %p2148_p7 = scmp.ne.s32.totalorder (!%p2147_p3), %s2140_s22, 0 }
  0x65   : > { %223 = sbr.rel (%p2147_p3) target bundleno = 447 (0x1bf), region = 32  ;;  %s226_s29 = scalar_lea.sflag (!%p2147_p3), [#allocation4], %s1852_s19 }
  0x66   : > { %s1320_s25 = smul.u32 (!%p2147_p3), 224, %s1852_s19 }
  0x68   : > { %s1856_s5 = scalar_lea.vmem (!%p2147_p3), [#allocation3], %s1320_s25 }
  0x6c   : > { %1605 = dma.done.wait (%p2148_p7), %s226_s29, 3584  }
  0x6d   : > { %1607 = vsyncadd (%p2148_p7), %s226_s29, 4294963712  ;;  %p2149_p10 = scmp.ne.s32.totalorder %s2138_s20, 0 }
  0x6f   : > { %1609 = dma.done.wait (%p2149_p10), [#allocation7], 1232  }
  0x70   : > { %1611 = vsyncadd (%p2149_p10), [#allocation7], 4294966064  ;;  %v1647_v0 = vmov 0   ;;  %vm269_vm0 = vcmask 64512   ;;  %v1648_v1 = vmov 0.0   ;;  %v1414_v2 = vld [vmem:[#allocation6] sm:$0xff]  }
  0x71   : > { %606 = vmatprep.subr.bf16.mxu0 %v1647_v0  ;;  %1299 = vmatprep.subr.bf16.mxu1 %v1647_v0  ;;  %270 = vst.msk [vmem:[#allocation2] sm:$0xff] %vm269_vm0, %v1648_v1  ;;  %271 = vst.msk [vmem:[#allocation2 + $0x8] sm:$0xff] %vm269_vm0, %v1648_v1  ;;  %v1415_v3 = vld [vmem:[#allocation6 + $0x8] sm:$0xff]   ;;  %v1416_v4 = vld [vmem:[#allocation6 + $0x10] sm:$0xff]   ;;  %vm556_vm1 = vcmask 154624   ;;  %vm599_vm2 = vcmask 1040384  }
  0x72   : > { %272 = vst.msk [vmem:[#allocation2 + $0x10] sm:$0xff] %vm269_vm0, %v1648_v1  ;;  %273 = vst.msk [vmem:[#allocation2 + $0x18] sm:$0xff] %vm269_vm0, %v1648_v1  ;;  %607 = vmatpush1.bf16.msra.mxu0 %v1414_v2  ;;  %1309 = vmatpush1.bf16.msra.mxu1 %v1414_v2  ;;  %v1417_v5 = vld [vmem:[#allocation6 + $0x18] sm:$0xff]   ;;  %v1426_v6 = vld [vmem:[%s1856_s5 + $0x4] ss:$8 sps:$4 sm:$0xff]   ;;  %vm600_vm3 = vcmask 1041408  }
  0x73   : > { %274 = vst.msk [vmem:[#allocation2 + $0x20] sm:$0xff] %vm269_vm0, %v1648_v1  ;;  %275 = vst.msk [vmem:[#allocation2 + $0x28] sm:$0xff] %vm269_vm0, %v1648_v1  ;;  %608 = vmatprep.subr.bf16.mxu0 %v1647_v0  ;;  %1300 = vmatprep.subr.bf16.mxu1 %v1647_v0  ;;  %v1429_v7 = vld [vmem:[%s1856_s5 + $0x74] ss:$8 sps:$4 sm:$0xff]   ;;  %v1418_v8 = vld [vmem:[#allocation6 + $0x20] sm:$0xff]   ;;  %v1649_v12 = vmov 65535  }
  0x74   : > { %276 = vst.msk [vmem:[#allocation2 + $0x30] sm:$0xff] %vm269_vm0, %v1648_v1  ;;  %277 = vst.msk [vmem:[#allocation2 + $0x38] sm:$0xff] %vm269_vm0, %v1648_v1  ;;  %1221 = vmatprep.mubr.msk.bf16.mxu0 %vm556_vm1, %v1426_v6  ;;  %1228 = vmatprep.mubr.msk.bf16.mxu1 %vm556_vm1, %v1429_v7  ;;  %v1419_v9 = vld [vmem:[#allocation6 + $0x28] sm:$0xff]   ;;  %v1420_v10 = vld [vmem:[#allocation6 + $0x30] sm:$0xff]   ;;  %v601_v13 = vsel %vm599_vm2, 4294967295, %v1649_v12  ;;  %s1321_s20 = smul.u32 112, %s1852_s19 }
  0x75   : > { %278 = vst.msk [vmem:[#allocation2 + $0x40] sm:$0xff] %vm269_vm0, %v1648_v1  ;;  %279 = vst.msk [vmem:[#allocation2 + $0x48] sm:$0xff] %vm269_vm0, %v1648_v1  ;;  %v1421_v11 = vld [vmem:[#allocation6 + $0x38] sm:$0xff]   ;;  %v1422_v14 = vld [vmem:[#allocation6 + $0x40] sm:$0xff]   ;;  %v602_v16 = vsel %vm600_vm3, %v601_v13, 0  ;;  %vm1014_vm4 = vcmask 60416  }
  0x76   : > { %280 = vst.msk [vmem:[#allocation2 + $0x50] sm:$0xff] %vm269_vm0, %v1648_v1  ;;  %281 = vst.msk [vmem:[#allocation2 + $0x58] sm:$0xff] %vm269_vm0, %v1648_v1  ;;  %609 = vmatpush1.bf16.msra.mxu0 %v1415_v3  ;;  %1310 = vmatpush1.bf16.msra.mxu1 %v1415_v3  ;;  %v1423_v15 = vld [vmem:[#allocation6 + $0x48] ss:$0 sps:$4 sm:$0x33]   ;;  %s1973_s22 = scalar_lea.vmem [#allocation9], %s1321_s20 }
  0x77   : > { %282 = vst.msk [vmem:[#allocation2 + $0x60] sm:$0xff] %vm269_vm0, %v1648_v1  ;;  %283 = vst.msk [vmem:[#allocation2 + $0x68] sm:$0xff] %vm269_vm0, %v1648_v1  ;;  %610 = vmatprep.subr.bf16.mxu0 %v1647_v0  ;;  %1301 = vmatprep.subr.bf16.mxu1 %v1647_v0  ;;  %v604_v17 = vand.u32 %v1423_v15, %v602_v16  ;;  %v1424_v18 = vld [vmem:[%s1856_s5] ss:$8 sps:$4 sm:$0xff]   ;;  %v1427_v19 = vld [vmem:[%s1856_s5 + $0x70] ss:$8 sps:$4 sm:$0xff]  }
  0x78   : > { %284 = vst.msk [vmem:[#allocation2 + $0x70] sm:$0xff] %vm269_vm0, %v1648_v1  ;;  %285 = vst.msk [vmem:[#allocation2 + $0x78] sm:$0xff] %vm269_vm0, %v1648_v1  ;;  %v1430_v20 = vld [vmem:[%s1856_s5 + $0x14] ss:$8 sps:$4 sm:$0xff]   ;;  %v1432_v21 = vld [vmem:[%s1856_s5 + $0x84] ss:$8 sps:$4 sm:$0xff]  }
  0x79   : > { %286 = vst.msk [vmem:[#allocation2 + $0x80] sm:$0xff] %vm269_vm0, %v1648_v1  ;;  %287 = vst.msk [vmem:[#allocation2 + $0x88] sm:$0xff] %vm269_vm0, %v1648_v1  ;;  %v1434_v22 = vld [vmem:[%s1856_s5 + $0x10] ss:$8 sps:$4 sm:$0xff]   ;;  %v1435_v23 = vld [vmem:[%s1856_s5 + $0x80] ss:$8 sps:$4 sm:$0xff]  }
  0x7a   : > { %288 = vst.msk [vmem:[#allocation2 + $0x90] sm:$0xff] %vm269_vm0, %v1648_v1  ;;  %289 = vst.msk [vmem:[#allocation2 + $0x98] sm:$0xff] %vm269_vm0, %v1648_v1  ;;  %611 = vmatpush1.bf16.msra.mxu0 %v1416_v4  ;;  %1311 = vmatpush1.bf16.msra.mxu1 %v1416_v4  ;;  %v1436_v24 = vld [vmem:[%s1856_s5 + $0x24] ss:$8 sps:$4 sm:$0xff]   ;;  %v1438_v25 = vld [vmem:[%s1856_s5 + $0x94] ss:$8 sps:$4 sm:$0xff]  }
  0x7b   : > { %290 = vst.msk [vmem:[#allocation2 + $0xa0] sm:$0xff] %vm269_vm0, %v1648_v1  ;;  %291 = vst.msk [vmem:[#allocation2 + $0xa8] sm:$0xff] %vm269_vm0, %v1648_v1  ;;  %612 = vmatprep.subr.bf16.mxu0 %v1647_v0  ;;  %1302 = vmatprep.subr.bf16.mxu1 %v1647_v0  ;;  %v1440_v26 = vld [vmem:[%s1856_s5 + $0x20] ss:$8 sps:$4 sm:$0xff]   ;;  %v1441_v27 = vld [vmem:[%s1856_s5 + $0x90] ss:$8 sps:$4 sm:$0xff]  }
  0x7c   : > { %292 = vst.msk [vmem:[#allocation2 + $0xb0] sm:$0xff] %vm269_vm0, %v1648_v1  ;;  %293 = vst.msk [vmem:[#allocation2 + $0xb8] sm:$0xff] %vm269_vm0, %v1648_v1  ;;  %v1442_v28 = vld [vmem:[%s1856_s5 + $0x34] ss:$8 sps:$4 sm:$0xff]   ;;  %v1444_v29 = vld [vmem:[%s1856_s5 + $0xa4] ss:$8 sps:$4 sm:$0xff]  }
  0x7d   : > { %294 = vst.msk [vmem:[#allocation2 + $0xc0] sm:$0xff] %vm269_vm0, %v1648_v1  ;;  %295 = vst.msk [vmem:[#allocation2 + $0xc8] sm:$0xff] %vm269_vm0, %v1648_v1  ;;  %v1446_v30 = vld [vmem:[%s1856_s5 + $0x30] ss:$8 sps:$4 sm:$0xff]   ;;  %v1447_v31 = vld [vmem:[%s1856_s5 + $0xa0] ss:$8 sps:$4 sm:$0xff]  }
  0x7e   : > { %296 = vst.msk [vmem:[#allocation2 + $0xd0] sm:$0xff] %vm269_vm0, %v1648_v1  ;;  %297 = vst.msk [vmem:[#allocation2 + $0xd8] sm:$0xff] %vm269_vm0, %v1648_v1  ;;  %613 = vmatpush1.bf16.msra.mxu0 %v1417_v5  ;;  %1312 = vmatpush1.bf16.msra.mxu1 %v1417_v5  ;;  %v1448_v32 = vld [vmem:[%s1856_s5 + $0x44] ss:$8 sps:$4 sm:$0xff]   ;;  %v1450_v33 = vld [vmem:[%s1856_s5 + $0xb4] ss:$8 sps:$4 sm:$0xff]  }
  0x7f   : > { %614 = vmatprep.subr.bf16.mxu0 %v1647_v0  ;;  %1303 = vmatprep.subr.bf16.mxu1 %v1647_v0  ;;  %v1452_v34 = vld [vmem:[%s1856_s5 + $0x40] ss:$8 sps:$4 sm:$0xff]   ;;  %v1453_v35 = vld [vmem:[%s1856_s5 + $0xb0] ss:$8 sps:$4 sm:$0xff]   ;;  %v1454_v36 = vld [vmem:[%s1856_s5 + $0x54] ss:$8 sps:$4 sm:$0xff]  }
  0x80   : > { %v1456_v37 = vld [vmem:[%s1856_s5 + $0xc4] ss:$8 sps:$4 sm:$0xff]   ;;  %v1458_v38 = vld [vmem:[%s1856_s5 + $0x50] ss:$8 sps:$4 sm:$0xff]   ;;  %v1459_v39 = vld [vmem:[%s1856_s5 + $0xc0] ss:$8 sps:$4 sm:$0xff]  }
  0x81   : > { %v1460_v40 = vld [vmem:[%s1856_s5 + $0x64] ss:$8 sps:$4 sm:$0xff]   ;;  %v1462_v41 = vld [vmem:[%s1856_s5 + $0xd4] ss:$8 sps:$4 sm:$0xff]   ;;  %v1464_v42 = vld [vmem:[%s1856_s5 + $0x60] ss:$8 sps:$4 sm:$0xff]  }
  0x82   : > { %615 = vmatpush1.bf16.msra.mxu0 %v1418_v8  ;;  %1313 = vmatpush1.bf16.msra.mxu1 %v1418_v8  ;;  %v1465_v43 = vld [vmem:[%s1856_s5 + $0xd0] ss:$8 sps:$4 sm:$0xff]   ;;  %v298_v44 = vld [vmem:[#allocation2] sm:$0xff]  ;;  %v299_v48 = vld [vmem:[#allocation2 + $0x8] sm:$0xff]  ;;  %s1297_s24 = smul.u32 1792, %s1630_s15  ;;  %s1058_s30 = sshll.u32 %s1973_s22, 4  ;;  %s2074_s30 = int_to_ptr.vmem [resolvable:$true] %s1058_s30 }
  0x83   : > { %616 = vmatprep.subr.bf16.mxu0 %v1647_v0  ;;  %1304 = vmatprep.subr.bf16.mxu1 %v1647_v0  ;;  %v312_v45 = vld [vmem:[#allocation2 + $0x70] sm:$0xff]  ;;  %v313_v49 = vld [vmem:[#allocation2 + $0x78] sm:$0xff]  ;;  %v314_v61 = vld [vmem:[#allocation2 + $0x80] sm:$0xff]  ;;  %s1044_s15 = scalar_lea.sflag [#allocation5], %s1852_s19  ;;  %s1552_s28 = scalar_lea.vmem %s2074_s30, 1792 }
  0x84   : > { %v300_v60 = vld [vmem:[#allocation2 + $0x10] sm:$0xff]  ;;  %v1960_v62 = vld [vmem:[#allocation8] ss:$0 sm:$0xff]  ;;  %v301_v1 = vld [vmem:[#allocation2 + $0x18] sm:$0xff]  ;;  %s2072_s9 = scalar_lea.hbm %s2133_s3, %s1297_s24  ;;  %p1553_p1 = scmp.ne.s32.totalorder %s2074_s30, %s1552_s28 }
  0x85   : > { %v315_v2 = vld [vmem:[#allocation2 + $0x88] sm:$0xff]  ;;  %s1650_s6 = smov [#allocation9]  }
  0x86   : > { %617 = vmatpush1.bf16.msra.mxu0 %v1419_v9  ;;  %1314 = vmatpush1.bf16.msra.mxu1 %v1419_v9  ;;  %p1554_p2 = pnand %p1553_p1, %p1799_p8  ;;  %s1556_s21 = sshll.u32 %s1650_s6, 4  ;;  %s1557_s21 = int_to_ptr.vmem [resolvable:$false] %s1556_s21 }
  0x87   : > { %618 = vmatprep.subr.bf16.mxu0 %v1647_v0  ;;  %1305 = vmatprep.subr.bf16.mxu1 %v1647_v0  ;;  %s1558_s8 = scalar_lea.vmem %s1557_s21, 3584  ;;  %p1559_p6 = scmp.lt.s32.totalorder %s2074_s30, %s1557_s21 }
  0x88   : > { %p1555_p4 = pneg %p1554_p2  ;;  %p1560_p13 = scmp.lt.s32.totalorder %s1558_s8, %s1552_s28 }
  0x8a   : > { %619 = vmatpush1.bf16.msra.mxu0 %v1420_v10  ;;  %1315 = vmatpush1.bf16.msra.mxu1 %v1420_v10  ;;  %p1561_p0 = por %p1560_p13, %p1559_p6 }
  0x8b   : > { %620 = vmatprep.subr.bf16.mxu0 %v1647_v0  ;;  %1306 = vmatprep.subr.bf16.mxu1 %v1647_v0 }
  0x8c   : > { %p1562_p5 = pnand %p1561_p0, %p1555_p4 }
  0x8e   : > { %621 = vmatpush1.bf16.msra.mxu0 %v1421_v11  ;;  %1316 = vmatpush1.bf16.msra.mxu1 %v1421_v11 }
  0x8f   : > { %622 = vmatprep.subr.bf16.mxu0 %v1647_v0  ;;  %1307 = vmatprep.subr.bf16.mxu1 %v1647_v0 }
  0x92   : > { %623 = vmatpush1.bf16.msra.mxu0 %v1422_v14  ;;  %1317 = vmatpush1.bf16.msra.mxu1 %v1422_v14 }
  0x93   : > { %624 = vmatprep.subr.bf16.mxu0 %v1647_v0  ;;  %1308 = vmatprep.subr.bf16.mxu1 %v1647_v0 }
  0x96   : > { %625 = vmatpush1.bf16.msra.mxu0 %v604_v17  ;;  %1318 = vmatpush1.bf16.msra.mxu1 %v604_v17 }
  0x99   : > { %639 = vmatmul.mubr.bf16.vlgmr.msra.gmra.mrb[0].mxu0 %v1424_v18  ;;  %695 = vmatmul.mubr.bf16.vlgmr.msra.gmra.mrb[0].mxu1 %v1427_v19 }
  0x9a   : > { %1222 = vmatprep.mubr.msk.bf16.mxu0 %vm556_vm1, %v1430_v20  ;;  %1229 = vmatprep.mubr.msk.bf16.mxu1 %vm556_vm1, %v1432_v21 }
  0xa1   : > { %647 = vmatmul.mubr.bf16.gmra.mrb[4].mxu0 %v1434_v22  ;;  %703 = vmatmul.mubr.bf16.gmra.mrb[4].mxu1 %v1435_v23  ;;  %v302_v23 = vld [vmem:[#allocation2 + $0x20] sm:$0xff] }
  0xa2   : > { %1223 = vmatprep.mubr.msk.bf16.mxu0 %vm556_vm1, %v1436_v24  ;;  %1230 = vmatprep.mubr.msk.bf16.mxu1 %vm556_vm1, %v1438_v25  ;;  %v316_v24 = vld [vmem:[#allocation2 + $0x90] sm:$0xff] }
  0xa9   : > { %655 = vmatmul.mubr.bf16.gmra.mrb[8].mxu0 %v1440_v26  ;;  %711 = vmatmul.mubr.bf16.gmra.mrb[8].mxu1 %v1441_v27 }
  0xaa   : > { %1224 = vmatprep.mubr.msk.bf16.mxu0 %vm556_vm1, %v1442_v28  ;;  %1231 = vmatprep.mubr.msk.bf16.mxu1 %vm556_vm1, %v1444_v29 }
  0xb1   : > { %663 = vmatmul.mubr.bf16.gmra.mrb[12].mxu0 %v1446_v30  ;;  %719 = vmatmul.mubr.bf16.gmra.mrb[12].mxu1 %v1447_v31  ;;  %v303_v31 = vld [vmem:[#allocation2 + $0x28] sm:$0xff] }
  0xb2   : > { %1225 = vmatprep.mubr.msk.bf16.mxu0 %vm556_vm1, %v1448_v32  ;;  %1232 = vmatprep.mubr.msk.bf16.mxu1 %vm556_vm1, %v1450_v33  ;;  %v317_v32 = vld [vmem:[#allocation2 + $0x98] sm:$0xff] }
  0xb9   : > { %671 = vmatmul.mubr.bf16.gmra.mrb[16].mxu0 %v1452_v34  ;;  %727 = vmatmul.mubr.bf16.gmra.mrb[16].mxu1 %v1453_v35 }
  0xba   : > { %1226 = vmatprep.mubr.msk.bf16.mxu0 %vm556_vm1, %v1454_v36  ;;  %1233 = vmatprep.mubr.msk.bf16.mxu1 %vm556_vm1, %v1456_v37 }
  0xc1   : > { %679 = vmatmul.mubr.bf16.gmra.mrb[20].mxu0 %v1458_v38  ;;  %735 = vmatmul.mubr.bf16.gmra.mrb[20].mxu1 %v1459_v39 }
  0xc2   : > { %1227 = vmatprep.mubr.msk.bf16.mxu0 %vm556_vm1, %v1460_v40  ;;  %1234 = vmatprep.mubr.msk.bf16.mxu1 %vm556_vm1, %v1462_v41 }
  0xc9   : > { %687 = vmatmul.mubr.bf16.gmra.mrb[24].mxu0 %v1464_v42  ;;  %743 = vmatmul.mubr.bf16.gmra.mrb[24].mxu1 %v1465_v43 }
 0x16c   : > { %v640_v46 = vpop.f32.mrb[0].mxu0  ;;  %v696_v47 = vpop.f32.mrb[0].mxu1 }
 0x16d   : > { %v751_v50 = vadd.f32 %v640_v46, %v298_v44  ;;  %v765_v51 = vadd.f32 %v696_v47, %v312_v45  ;;  %v642_v52 = vpop.f32.mrb[1].mxu0  ;;  %v698_v53 = vpop.f32.mrb[1].mxu1 }
 0x16e   : > { %v643_v54 = vpop.f32.mrb[2].mxu0  ;;  %v699_v55 = vpop.f32.mrb[2].mxu1 }
 0x16f   : > { %780 = vst.msk [vmem:[#allocation2] sm:$0xff] %vm269_vm0, %v751_v50  ;;  %794 = vst.msk [vmem:[#allocation2 + $0x70] sm:$0xff] %vm269_vm0, %v765_v51  ;;  %v752_v56 = vadd.f32 %v643_v54, %v299_v48  ;;  %v766_v57 = vadd.f32 %v699_v55, %v313_v49  ;;  %v645_v58 = vpop.f32.mrb[3].mxu0  ;;  %v701_v59 = vpop.f32.mrb[3].mxu1  ;;  %v304_v55 = vld [vmem:[#allocation2 + $0x30] sm:$0xff] }
 0x171   : > { %781 = vst.msk [vmem:[#allocation2 + $0x8] sm:$0xff] %vm269_vm0, %v752_v56  ;;  %795 = vst.msk [vmem:[#allocation2 + $0x78] sm:$0xff] %vm269_vm0, %v766_v57  ;;  %v318_v56 = vld [vmem:[#allocation2 + $0xa0] sm:$0xff] }
 0x174   : > { %v648_v63 = vpop.f32.mrb[4].mxu0  ;;  %v704_v0 = vpop.f32.mrb[4].mxu1 }
 0x175   : > { %v753_v3 = vadd.f32 %v648_v63, %v300_v60  ;;  %v767_v4 = vadd.f32 %v704_v0, %v314_v61  ;;  %v650_v5 = vpop.f32.mrb[5].mxu0  ;;  %v706_v6 = vpop.f32.mrb[5].mxu1  ;;  %v305_v0 = vld [vmem:[#allocation2 + $0x38] sm:$0xff] }
 0x176   : > { %v811_v7 = vld [vmem:[#allocation2] sm:$0xff]  ;;  %v825_v8 = vld [vmem:[#allocation2 + $0x70] sm:$0xff]  ;;  %v651_v9 = vpop.f32.mrb[6].mxu0  ;;  %v707_v10 = vpop.f32.mrb[6].mxu1 }
 0x177   : > { %v846_v11 = vadd.f32 %v1960_v62, %v811_v7  ;;  %v860_v12 = vadd.f32 %v1960_v62, %v825_v8  ;;  %782 = vst.msk [vmem:[#allocation2 + $0x10] sm:$0xff] %vm269_vm0, %v753_v3  ;;  %796 = vst.msk [vmem:[#allocation2 + $0x80] sm:$0xff] %vm269_vm0, %v767_v4  ;;  %v754_v13 = vadd.f32 %v651_v9, %v301_v1  ;;  %v653_v15 = vpop.f32.mrb[7].mxu0  ;;  %v709_v16 = vpop.f32.mrb[7].mxu1  ;;  %v319_v1 = vld [vmem:[#allocation2 + $0xa8] sm:$0xff] }
 0x178   : > { %v768_v14 = vadd.f32 %v707_v10, %v315_v2  ;;  %v812_v17 = vld [vmem:[#allocation2 + $0x8] sm:$0xff]  ;;  %v826_v18 = vld [vmem:[#allocation2 + $0x78] sm:$0xff] }
 0x179   : > { %v874_v19 = vmax.f32 %v846_v11, 0.0  ;;  %v888_v20 = vmax.f32 %v860_v12, 0.0  ;;  %v847_v21 = vadd.f32 %v1960_v62, %v812_v17  ;;  %v861_v22 = vadd.f32 %v1960_v62, %v826_v18  ;;  %783 = vst.msk [vmem:[#allocation2 + $0x18] sm:$0xff] %vm269_vm0, %v754_v13 }
 0x17a   : > { %797 = vst.msk [vmem:[#allocation2 + $0x88] sm:$0xff] %vm269_vm0, %v768_v14 }
 0x17b   : > { %v1269_v25 = vpack.c.bf16 %v874_v19, %v874_v19  ;;  %v1283_v26 = vpack.c.bf16 %v888_v20, %v888_v20  ;;  %v875_v27 = vmax.f32 %v847_v21, 0.0  ;;  %v889_v28 = vmax.f32 %v861_v22, 0.0 }
 0x17c   : > { %v656_v29 = vpop.f32.mrb[8].mxu0  ;;  %v712_v30 = vpop.f32.mrb[8].mxu1 }
 0x17d   : > { %1015 = vst.msk [vmem:[%s1973_s22] sm:$0xf] %vm1014_vm4, %v1269_v25  ;;  %1029 = vst.msk [vmem:[%s1973_s22 + $0x38] sm:$0xf] %vm1014_vm4, %v1283_v26  ;;  %v1270_v33 = vpack.c.bf16 %v875_v27, %v875_v27  ;;  %v1284_v34 = vpack.c.bf16 %v889_v28, %v889_v28  ;;  %v755_v35 = vadd.f32 %v656_v29, %v302_v23  ;;  %v658_v37 = vpop.f32.mrb[9].mxu0  ;;  %v714_v38 = vpop.f32.mrb[9].mxu1 }
 0x17e   : > { %v769_v36 = vadd.f32 %v712_v30, %v316_v24  ;;  %v813_v39 = vld [vmem:[#allocation2 + $0x10] sm:$0xff]  ;;  %v827_v40 = vld [vmem:[#allocation2 + $0x80] sm:$0xff]  ;;  %v659_v41 = vpop.f32.mrb[10].mxu0  ;;  %v715_v42 = vpop.f32.mrb[10].mxu1 }
 0x17f   : > { %1016 = vst.msk [vmem:[%s1973_s22 + $0x4] sm:$0xf] %vm1014_vm4, %v1270_v33  ;;  %1030 = vst.msk [vmem:[%s1973_s22 + $0x3c] sm:$0xf] %vm1014_vm4, %v1284_v34  ;;  %v848_v43 = vadd.f32 %v1960_v62, %v813_v39  ;;  %v862_v44 = vadd.f32 %v1960_v62, %v827_v40  ;;  %v756_v45 = vadd.f32 %v659_v41, %v303_v31  ;;  %v661_v47 = vpop.f32.mrb[11].mxu0  ;;  %v717_v48 = vpop.f32.mrb[11].mxu1 }
 0x180   : > { %784 = vst.msk [vmem:[#allocation2 + $0x20] sm:$0xff] %vm269_vm0, %v755_v35  ;;  %798 = vst.msk [vmem:[#allocation2 + $0x90] sm:$0xff] %vm269_vm0, %v769_v36  ;;  %v770_v46 = vadd.f32 %v715_v42, %v317_v32  ;;  %v814_v49 = vld [vmem:[#allocation2 + $0x18] sm:$0xff]  ;;  %v306_v24 = vld [vmem:[#allocation2 + $0x40] sm:$0xff] }
 0x181   : > { %v828_v50 = vld [vmem:[#allocation2 + $0x88] sm:$0xff]  ;;  %v876_v51 = vmax.f32 %v848_v43, 0.0  ;;  %v890_v52 = vmax.f32 %v862_v44, 0.0  ;;  %v849_v53 = vadd.f32 %v1960_v62, %v814_v49  ;;  %785 = vst.msk [vmem:[#allocation2 + $0x28] sm:$0xff] %vm269_vm0, %v756_v45  ;;  %v320_v25 = vld [vmem:[#allocation2 + $0xb0] sm:$0xff]  ;;  %v321_v33 = vld [vmem:[#allocation2 + $0xb8] sm:$0xff] }
 0x182   : > { %v863_v54 = vadd.f32 %v1960_v62, %v828_v50  ;;  %799 = vst.msk [vmem:[#allocation2 + $0x98] sm:$0xff] %vm269_vm0, %v770_v46  ;;  %v307_v32 = vld [vmem:[#allocation2 + $0x48] sm:$0xff] }
 0x183   : > { %v1271_v57 = vpack.c.bf16 %v876_v51, %v876_v51  ;;  %v1285_v58 = vpack.c.bf16 %v890_v52, %v890_v52  ;;  %v877_v59 = vmax.f32 %v849_v53, 0.0 }
 0x184   : > { %v891_v60 = vmax.f32 %v863_v54, 0.0  ;;  %v664_v61 = vpop.f32.mrb[12].mxu0  ;;  %v720_v63 = vpop.f32.mrb[12].mxu1 }
 0x185   : > { %1017 = vst.msk [vmem:[%s1973_s22 + $0x8] sm:$0xf] %vm1014_vm4, %v1271_v57  ;;  %1031 = vst.msk [vmem:[%s1973_s22 + $0x40] sm:$0xf] %vm1014_vm4, %v1285_v58  ;;  %v1272_v2 = vpack.c.bf16 %v877_v59, %v877_v59  ;;  %v757_v4 = vadd.f32 %v664_v61, %v304_v55  ;;  %v771_v5 = vadd.f32 %v720_v63, %v318_v56  ;;  %v666_v6 = vpop.f32.mrb[13].mxu0  ;;  %v722_v7 = vpop.f32.mrb[13].mxu1 }
 0x186   : > { %v1286_v3 = vpack.c.bf16 %v891_v60, %v891_v60  ;;  %v667_v10 = vpop.f32.mrb[14].mxu0  ;;  %v723_v11 = vpop.f32.mrb[14].mxu1  ;;  %v308_v56 = vld [vmem:[#allocation2 + $0x50] sm:$0xff]  ;;  %v322_v57 = vld [vmem:[#allocation2 + $0xc0] sm:$0xff] }
 0x187   : > { %v815_v8 = vld [vmem:[#allocation2 + $0x20] sm:$0xff]  ;;  %v829_v9 = vld [vmem:[#allocation2 + $0x90] sm:$0xff]  ;;  %1018 = vst.msk [vmem:[%s1973_s22 + $0xc] sm:$0xf] %vm1014_vm4, %v1272_v2  ;;  %v758_v14 = vadd.f32 %v667_v10, %v305_v0  ;;  %v772_v15 = vadd.f32 %v723_v11, %v319_v1  ;;  %v669_v16 = vpop.f32.mrb[15].mxu0  ;;  %v725_v17 = vpop.f32.mrb[15].mxu1 }
 0x188   : > { %1032 = vst.msk [vmem:[%s1973_s22 + $0x44] sm:$0xf] %vm1014_vm4, %v1286_v3  ;;  %v850_v12 = vadd.f32 %v1960_v62, %v815_v8  ;;  %v864_v13 = vadd.f32 %v1960_v62, %v829_v9  ;;  %v816_v18 = vld [vmem:[#allocation2 + $0x28] sm:$0xff]  ;;  %v309_v1 = vld [vmem:[#allocation2 + $0x58] sm:$0xff] }
 0x189   : > { %786 = vst.msk [vmem:[#allocation2 + $0x30] sm:$0xff] %vm269_vm0, %v757_v4  ;;  %800 = vst.msk [vmem:[#allocation2 + $0xa0] sm:$0xff] %vm269_vm0, %v771_v5  ;;  %v830_v19 = vld [vmem:[#allocation2 + $0x98] sm:$0xff]  ;;  %v851_v22 = vadd.f32 %v1960_v62, %v816_v18  ;;  %v323_v2 = vld [vmem:[#allocation2 + $0xc8] sm:$0xff] }
 0x18a   : > { %v878_v20 = vmax.f32 %v850_v12, 0.0  ;;  %v892_v21 = vmax.f32 %v864_v13, 0.0  ;;  %v865_v23 = vadd.f32 %v1960_v62, %v830_v19  ;;  %787 = vst.msk [vmem:[#allocation2 + $0x38] sm:$0xff] %vm269_vm0, %v758_v14  ;;  %801 = vst.msk [vmem:[#allocation2 + $0xa8] sm:$0xff] %vm269_vm0, %v772_v15 }
 0x18b   : > { %v879_v28 = vmax.f32 %v851_v22, 0.0 }
 0x18c   : > { %v1273_v26 = vpack.c.bf16 %v878_v20, %v878_v20  ;;  %v1287_v27 = vpack.c.bf16 %v892_v21, %v892_v21  ;;  %v893_v29 = vmax.f32 %v865_v23, 0.0  ;;  %v672_v30 = vpop.f32.mrb[16].mxu0  ;;  %v728_v31 = vpop.f32.mrb[16].mxu1 }
 0x18d   : > { %v1274_v34 = vpack.c.bf16 %v879_v28, %v879_v28  ;;  %v759_v36 = vadd.f32 %v672_v30, %v306_v24  ;;  %v773_v37 = vadd.f32 %v728_v31, %v320_v25  ;;  %v674_v38 = vpop.f32.mrb[17].mxu0  ;;  %v730_v39 = vpop.f32.mrb[17].mxu1  ;;  %v310_v25 = vld [vmem:[#allocation2 + $0x60] sm:$0xff] }
 0x18e   : > { %1019 = vst.msk [vmem:[%s1973_s22 + $0x10] sm:$0xf] %vm1014_vm4, %v1273_v26  ;;  %1033 = vst.msk [vmem:[%s1973_s22 + $0x48] sm:$0xf] %vm1014_vm4, %v1287_v27  ;;  %v1288_v35 = vpack.c.bf16 %v893_v29, %v893_v29  ;;  %v675_v42 = vpop.f32.mrb[18].mxu0  ;;  %v731_v43 = vpop.f32.mrb[18].mxu1 }
 0x18f   : > { %1020 = vst.msk [vmem:[%s1973_s22 + $0x14] sm:$0xf] %vm1014_vm4, %v1274_v34  ;;  %v760_v46 = vadd.f32 %v675_v42, %v307_v32  ;;  %v774_v47 = vadd.f32 %v731_v43, %v321_v33  ;;  %v677_v48 = vpop.f32.mrb[19].mxu0  ;;  %v733_v49 = vpop.f32.mrb[19].mxu1  ;;  %v324_v26 = vld [vmem:[#allocation2 + $0xd0] sm:$0xff]  ;;  %v311_v33 = vld [vmem:[#allocation2 + $0x68] sm:$0xff] }
 0x190   : > { %v817_v40 = vld [vmem:[#allocation2 + $0x30] sm:$0xff]  ;;  %v831_v41 = vld [vmem:[#allocation2 + $0xa0] sm:$0xff]  ;;  %1034 = vst.msk [vmem:[%s1973_s22 + $0x4c] sm:$0xf] %vm1014_vm4, %v1288_v35  ;;  %v325_v34 = vld [vmem:[#allocation2 + $0xd8] sm:$0xff] }
 0x191   : > { %v852_v44 = vadd.f32 %v1960_v62, %v817_v40  ;;  %v866_v45 = vadd.f32 %v1960_v62, %v831_v41  ;;  %788 = vst.msk [vmem:[#allocation2 + $0x40] sm:$0xff] %vm269_vm0, %v759_v36  ;;  %802 = vst.msk [vmem:[#allocation2 + $0xb0] sm:$0xff] %vm269_vm0, %v773_v37  ;;  %v818_v50 = vld [vmem:[#allocation2 + $0x38] sm:$0xff]  ;;  %v832_v51 = vld [vmem:[#allocation2 + $0xa8] sm:$0xff] }
 0x192   : > { %v853_v54 = vadd.f32 %v1960_v62, %v818_v50  ;;  %v867_v55 = vadd.f32 %v1960_v62, %v832_v51  ;;  %789 = vst.msk [vmem:[#allocation2 + $0x48] sm:$0xff] %vm269_vm0, %v760_v46  ;;  %803 = vst.msk [vmem:[#allocation2 + $0xb8] sm:$0xff] %vm269_vm0, %v774_v47 }
 0x193   : > { %v880_v52 = vmax.f32 %v852_v44, 0.0  ;;  %v894_v53 = vmax.f32 %v866_v45, 0.0 }
 0x194   : > { %v881_v60 = vmax.f32 %v853_v54, 0.0  ;;  %v895_v61 = vmax.f32 %v867_v55, 0.0  ;;  %v680_v63 = vpop.f32.mrb[20].mxu0  ;;  %v736_v0 = vpop.f32.mrb[20].mxu1 }
 0x195   : > { %v1275_v58 = vpack.c.bf16 %v880_v52, %v880_v52  ;;  %v1289_v59 = vpack.c.bf16 %v894_v53, %v894_v53  ;;  %v761_v5 = vadd.f32 %v680_v63, %v308_v56  ;;  %v775_v6 = vadd.f32 %v736_v0, %v322_v57  ;;  %v682_v7 = vpop.f32.mrb[21].mxu0  ;;  %v738_v8 = vpop.f32.mrb[21].mxu1 }
 0x196   : > { %v1276_v3 = vpack.c.bf16 %v881_v60, %v881_v60  ;;  %v1290_v4 = vpack.c.bf16 %v895_v61, %v895_v61  ;;  %v683_v11 = vpop.f32.mrb[22].mxu0  ;;  %v739_v12 = vpop.f32.mrb[22].mxu1 }
 0x197   : > { %1021 = vst.msk [vmem:[%s1973_s22 + $0x18] sm:$0xf] %vm1014_vm4, %v1275_v58  ;;  %1035 = vst.msk [vmem:[%s1973_s22 + $0x50] sm:$0xf] %vm1014_vm4, %v1289_v59  ;;  %v762_v15 = vadd.f32 %v683_v11, %v309_v1  ;;  %v776_v16 = vadd.f32 %v739_v12, %v323_v2  ;;  %v685_v17 = vpop.f32.mrb[23].mxu0  ;;  %v741_v18 = vpop.f32.mrb[23].mxu1 }
 0x198   : > { %v819_v9 = vld [vmem:[#allocation2 + $0x40] sm:$0xff]  ;;  %v833_v10 = vld [vmem:[#allocation2 + $0xb0] sm:$0xff]  ;;  %1022 = vst.msk [vmem:[%s1973_s22 + $0x1c] sm:$0xf] %vm1014_vm4, %v1276_v3  ;;  %1036 = vst.msk [vmem:[%s1973_s22 + $0x54] sm:$0xf] %vm1014_vm4, %v1290_v4 }
 0x199   : > { %v854_v13 = vadd.f32 %v1960_v62, %v819_v9  ;;  %v868_v14 = vadd.f32 %v1960_v62, %v833_v10  ;;  %790 = vst.msk [vmem:[#allocation2 + $0x50] sm:$0xff] %vm269_vm0, %v761_v5  ;;  %804 = vst.msk [vmem:[#allocation2 + $0xc0] sm:$0xff] %vm269_vm0, %v775_v6  ;;  %v820_v19 = vld [vmem:[#allocation2 + $0x48] sm:$0xff]  ;;  %v834_v20 = vld [vmem:[#allocation2 + $0xb8] sm:$0xff] }
 0x19a   : > { %v855_v23 = vadd.f32 %v1960_v62, %v820_v19  ;;  %v869_v24 = vadd.f32 %v1960_v62, %v834_v20  ;;  %791 = vst.msk [vmem:[#allocation2 + $0x58] sm:$0xff] %vm269_vm0, %v762_v15  ;;  %805 = vst.msk [vmem:[#allocation2 + $0xc8] sm:$0xff] %vm269_vm0, %v776_v16 }
 0x19b   : > { %v882_v21 = vmax.f32 %v854_v13, 0.0  ;;  %v896_v22 = vmax.f32 %v868_v14, 0.0 }
 0x19c   : > { %v883_v29 = vmax.f32 %v855_v23, 0.0  ;;  %v897_v30 = vmax.f32 %v869_v24, 0.0  ;;  %v688_v31 = vpop.f32.mrb[24].mxu0  ;;  %v744_v32 = vpop.f32.mrb[24].mxu1 }
 0x19d   : > { %v1277_v27 = vpack.c.bf16 %v882_v21, %v882_v21  ;;  %v1291_v28 = vpack.c.bf16 %v896_v22, %v896_v22  ;;  %v763_v37 = vadd.f32 %v688_v31, %v310_v25  ;;  %v777_v38 = vadd.f32 %v744_v32, %v324_v26  ;;  %v690_v39 = vpop.f32.mrb[25].mxu0  ;;  %v746_v40 = vpop.f32.mrb[25].mxu1 }
 0x19e   : > { %v1278_v35 = vpack.c.bf16 %v883_v29, %v883_v29  ;;  %v1292_v36 = vpack.c.bf16 %v897_v30, %v897_v30  ;;  %v691_v43 = vpop.f32.mrb[26].mxu0  ;;  %v747_v44 = vpop.f32.mrb[26].mxu1 }
 0x19f   : > { %1023 = vst.msk [vmem:[%s1973_s22 + $0x20] sm:$0xf] %vm1014_vm4, %v1277_v27  ;;  %1037 = vst.msk [vmem:[%s1973_s22 + $0x58] sm:$0xf] %vm1014_vm4, %v1291_v28  ;;  %v764_v47 = vadd.f32 %v691_v43, %v311_v33  ;;  %v778_v48 = vadd.f32 %v747_v44, %v325_v34  ;;  %v693_v49 = vpop.f32.mrb[27].mxu0  ;;  %v749_v50 = vpop.f32.mrb[27].mxu1 }
 0x1a0   : > { %v821_v41 = vld [vmem:[#allocation2 + $0x50] sm:$0xff]  ;;  %v835_v42 = vld [vmem:[#allocation2 + $0xc0] sm:$0xff]  ;;  %1024 = vst.msk [vmem:[%s1973_s22 + $0x24] sm:$0xf] %vm1014_vm4, %v1278_v35  ;;  %1038 = vst.msk [vmem:[%s1973_s22 + $0x5c] sm:$0xf] %vm1014_vm4, %v1292_v36 }
 0x1a1   : > { %v856_v45 = vadd.f32 %v1960_v62, %v821_v41  ;;  %v870_v46 = vadd.f32 %v1960_v62, %v835_v42  ;;  %792 = vst.msk [vmem:[#allocation2 + $0x60] sm:$0xff] %vm269_vm0, %v763_v37  ;;  %806 = vst.msk [vmem:[#allocation2 + $0xd0] sm:$0xff] %vm269_vm0, %v777_v38  ;;  %v822_v51 = vld [vmem:[#allocation2 + $0x58] sm:$0xff]  ;;  %v836_v52 = vld [vmem:[#allocation2 + $0xc8] sm:$0xff] }
 0x1a2   : > { %v857_v55 = vadd.f32 %v1960_v62, %v822_v51  ;;  %v871_v56 = vadd.f32 %v1960_v62, %v836_v52  ;;  %793 = vst.msk [vmem:[#allocation2 + $0x68] sm:$0xff] %vm269_vm0, %v764_v47  ;;  %807 = vst.msk [vmem:[#allocation2 + $0xd8] sm:$0xff] %vm269_vm0, %v778_v48 }
 0x1a3   : > { %v884_v53 = vmax.f32 %v856_v45, 0.0  ;;  %v898_v54 = vmax.f32 %v870_v46, 0.0 }
 0x1a4   : > { %v885_v59 = vmax.f32 %v857_v55, 0.0  ;;  %v899_v60 = vmax.f32 %v871_v56, 0.0 }
 0x1a5   : > { %v1279_v57 = vpack.c.bf16 %v884_v53, %v884_v53  ;;  %v1293_v58 = vpack.c.bf16 %v898_v54, %v898_v54 }
 0x1a6   : > { %v1280_v61 = vpack.c.bf16 %v885_v59, %v885_v59  ;;  %v1294_v63 = vpack.c.bf16 %v899_v60, %v899_v60 }
 0x1a7   : > { %1025 = vst.msk [vmem:[%s1973_s22 + $0x28] sm:$0xf] %vm1014_vm4, %v1279_v57  ;;  %1039 = vst.msk [vmem:[%s1973_s22 + $0x60] sm:$0xf] %vm1014_vm4, %v1293_v58 }
 0x1a8   : > { %v823_v0 = vld [vmem:[#allocation2 + $0x60] sm:$0xff]  ;;  %v837_v1 = vld [vmem:[#allocation2 + $0xd0] sm:$0xff]  ;;  %1026 = vst.msk [vmem:[%s1973_s22 + $0x2c] sm:$0xf] %vm1014_vm4, %v1280_v61  ;;  %1040 = vst.msk [vmem:[%s1973_s22 + $0x64] sm:$0xf] %vm1014_vm4, %v1294_v63 }
 0x1a9   : > { %v858_v2 = vadd.f32 %v1960_v62, %v823_v0  ;;  %v872_v3 = vadd.f32 %v1960_v62, %v837_v1  ;;  %v824_v4 = vld [vmem:[#allocation2 + $0x68] sm:$0xff]  ;;  %v838_v5 = vld [vmem:[#allocation2 + $0xd8] sm:$0xff] }
 0x1aa   : > { %v859_v8 = vadd.f32 %v1960_v62, %v824_v4  ;;  %v873_v9 = vadd.f32 %v1960_v62, %v838_v5 }
 0x1ab   : > { %v886_v6 = vmax.f32 %v858_v2, 0.0  ;;  %v900_v7 = vmax.f32 %v872_v3, 0.0 }
 0x1ac   : > { %v887_v12 = vmax.f32 %v859_v8, 0.0  ;;  %v901_v13 = vmax.f32 %v873_v9, 0.0 }
 0x1ad   : > { %v1281_v10 = vpack.c.bf16 %v886_v6, %v886_v6  ;;  %v1295_v11 = vpack.c.bf16 %v900_v7, %v900_v7 }
 0x1ae   : > { %v1282_v62 = vpack.c.bf16 %v887_v12, %v887_v12  ;;  %v1296_v14 = vpack.c.bf16 %v901_v13, %v901_v13 }
 0x1af   : > { %1027 = vst.msk [vmem:[%s1973_s22 + $0x30] sm:$0xf] %vm1014_vm4, %v1281_v10  ;;  %1041 = vst.msk [vmem:[%s1973_s22 + $0x68] sm:$0xf] %vm1014_vm4, %v1295_v11 }
 0x1b0   : > { %1028 = vst.msk [vmem:[%s1973_s22 + $0x34] sm:$0xf] %vm1014_vm4, %v1282_v62  ;;  %1042 = vst.msk [vmem:[%s1973_s22 + $0x6c] sm:$0xf] %vm1014_vm4, %v1296_v14 }
 0x1b1   : > { %1565 = shalt.err (!%p1562_p5)
}
 0x1b2   : > { %s1566_s10 = scalar_lea.hbm %s2072_s9, 1792  ;;  %s1570_s29 = scalar_lea.hbm %s2133_s3, 12544 }
 0x1b3   : > { %p1567_p9 = scmp.ne.s32.totalorder %s2072_s9, %s1566_s10  ;;  %p1571_p3 = scmp.lt.u32.totalorder %s2072_s9, %s2133_s3 }
 0x1b4   : > { %p1572_p7 = scmp.lt.u32.totalorder %s1570_s29, %s1566_s10  ;;  %p1574_p1 = scmp.lt.u32.totalorder %s1566_s10, %s2072_s9 }
 0x1b5   : > { %p1568_p12 = pnand %p1567_p9, %p1799_p8 }
 0x1b6   : > { %p1573_p10 = por %p1572_p7, %p1571_p3 }
 0x1b7   : > { %p1569_p11 = pneg %p1568_p12 }
 0x1b8   : > { %p1575_p2 = por %p1574_p1, %p1573_p10 }
 0x1ba   : > { %p1576_p4 = pnand %p1575_p2, %p1569_p11 }
 0x1bc   : > { %1579 = shalt.err (!%p1576_p4)
}
 0x1bd   : > { %s1651_s22 = smov 64   ;;  %s1652_s24 = smov 4  }
 0x1be   : > { %1332 = dma.vmem_to_hbm [thread:$0]  (%p1799_p8), %s2074_s30, 1792, %s2072_s9, %s1044_s15, %s1651_s22, %s1651_s22, %s1652_s24  }
 0x1bf PF: > { %p1354_p6 = scmp.ge.s32.totalorder %s1638_s17, 2  ;;  %s1073_s7 = sand.u32 1, %s1618_s12  }
 0x1c0   : > { %p2150_p13 = scmp.ne.s32.totalorder %s2141_s23, 0  ;;  %s1074_s26 = scalar_lea.sflag [#allocation5], %s1073_s7 }
 0x1c2   : > { %p1346_p0 = pnand %p1354_p6, %p2150_p13 }
 0x1c4   : > { %1613 = dma.done.wait (!%p1346_p0), %s1074_s26, 1792  }
 0x1c5   : > { %1615 = vsyncadd (!%p1346_p0), %s1074_s26, 4294965504  ;;  %s20_s17 = sadd.s32 1, %s1638_s17   ;;  %s2151_s12 = smov %s1622_s13 }
 0x1c6   : > { %p17_p5 = scmp.ge.s32.totalorder %s20_s17, 9   ;;  %s2152_s13 = smov %s1626_s14 }
 0x1c7   : > { %s2153_s14 = smov %s1811_s4  ;;  %s2154_s15 = smov %s1634_s16 }
 0x1c8   : > { %s2155_s16 = smov %s2157_s18  ;;  %19 = sbr.rel (!%p17_p5) target bundleno = 7 (0x7), region = 95 }
 0x1cf   :  { %1079 = vsyncpa [#allocation4], 1 }
 0x1d0   :  { %1081 = vsyncpa [#allocation4 + $0x1], 1 }
 0x1d1   :  { %1082 = vsyncpa [#allocation7], 1 }
 0x1d2   :  { %1083 = vsyncpa [#allocation5], 1 }
 0x1d3   :  { %1085 = vsyncpa [#allocation5 + $0x1], 1 }

// kernel: wrn_forward.12
= control target key start
LH: loop header
LB: loop body
LE: loop exit
PB: predicated region body
PF: predicated region fallthrough
CT: control target
= control target key end

     0   :  { %vm100_vm0 = vcmask 912384   ;;  %vm104_vm1 = vcmask 910336   ;;  %s283_s0 = inlined_call_operand.vmem [shape: bf16[28,112], index: 0, kind: input, shape index: {}]   ;;  %s284_s1 = inlined_call_operand.vmem [shape: bf16[28,112], index: 1, kind: input, shape index: {}]   ;;  %s285_s2 = inlined_call_operand.vmem [shape: bf16[28,112], index: 2, kind: input, shape index: {}]   ;;  %s286_s3 = inlined_call_operand.vmem [shape: bf16[28,112], index: 3, kind: input, shape index: {}]   ;;  %s287_s4 = inlined_call_operand.vmem [shape: bf16[28,112], index: 4, kind: input, shape index: {}]   ;;  %s288_s5 = inlined_call_operand.vmem [shape: bf16[28,112], index: 5, kind: input, shape index: {}]   ;;  %s289_s6 = inlined_call_operand.vmem [shape: bf16[28,112], index: 6, kind: input, shape index: {}]   ;;  %s290_s7 = inlined_call_operand.vmem [shape: bf16[28,112], index: 7, kind: input, shape index: {}]   ;;  %s291_s8 = inlined_call_operand.vmem [shape: bf16[28,112], index: 8, kind: input, shape index: {}]   ;;  %s292_s9 = inlined_call_operand.vmem [shape: bf16[28,112], index: 9, kind: output, shape index: {}]  }
   0x1   :  { %v32_v0 = vld [vmem:[%s283_s0] sm:$0xf]  ;;  %v33_v6 = vld [vmem:[%s283_s0 + $0x4] sm:$0xf]  ;;  %v34_v15 = vld [vmem:[%s283_s0 + $0x8] sm:$0xf] }
   0x2   :  { %v36_v1 = vld [vmem:[%s284_s1] sm:$0xf]  ;;  %v37_v7 = vld [vmem:[%s284_s1 + $0x4] sm:$0xf]  ;;  %v38_v16 = vld [vmem:[%s284_s1 + $0x8] sm:$0xf] }
   0x3   :  { %v44_v2 = vld [vmem:[%s285_s2] sm:$0xf]  ;;  %v40_v3 = vmax.bf16 %v36_v1, %v32_v0  ;;  %v45_v8 = vld [vmem:[%s285_s2 + $0x4] sm:$0xf]  ;;  %v41_v10 = vmax.bf16 %v37_v7, %v33_v6  ;;  %v46_v17 = vld [vmem:[%s285_s2 + $0x8] sm:$0xf]  ;;  %v42_v20 = vmax.bf16 %v38_v16, %v34_v15 }
   0x4   :  { %v52_v4 = vld [vmem:[%s286_s3] sm:$0xf]  ;;  %v53_v13 = vld [vmem:[%s286_s3 + $0x4] sm:$0xf]  ;;  %v54_v24 = vld [vmem:[%s286_s3 + $0x8] sm:$0xf] }
   0x5   :  { %v48_v5 = vmax.bf16 %v44_v2, %v40_v3  ;;  %v60_v9 = vld [vmem:[%s287_s4] sm:$0xf]  ;;  %v49_v14 = vmax.bf16 %v45_v8, %v41_v10  ;;  %v61_v19 = vld [vmem:[%s287_s4 + $0x4] sm:$0xf]  ;;  %v50_v26 = vmax.bf16 %v46_v17, %v42_v20  ;;  %v35_v27 = vld [vmem:[%s283_s0 + $0xc] sm:$0x3] }
   0x6   :  { %v68_v12 = vld [vmem:[%s288_s5] sm:$0xf]  ;;  %v69_v23 = vld [vmem:[%s288_s5 + $0x4] sm:$0xf]  ;;  %v39_v28 = vld [vmem:[%s284_s1 + $0xc] sm:$0x3] }
   0x7   :  { %v56_v11 = vmax.bf16 %v52_v4, %v48_v5  ;;  %v76_v21 = vld [vmem:[%s289_s6] sm:$0xf]  ;;  %v57_v22 = vmax.bf16 %v53_v13, %v49_v14  ;;  %v47_v29 = vld [vmem:[%s285_s2 + $0xc] sm:$0x3]  ;;  %v62_v32 = vld [vmem:[%s287_s4 + $0x8] sm:$0xf]  ;;  %v43_v33 = vmax.bf16 %v39_v28, %v35_v27  ;;  %v58_v36 = vmax.bf16 %v54_v24, %v50_v26 }
   0x8   :  { %v84_v30 = vld [vmem:[%s290_s7] sm:$0xf]  ;;  %v77_v35 = vld [vmem:[%s289_s6 + $0x4] sm:$0xf]  ;;  %v55_v37 = vld [vmem:[%s286_s3 + $0xc] sm:$0x3] }
   0x9   :  { %v64_v18 = vmax.bf16 %v60_v9, %v56_v11  ;;  %v65_v31 = vmax.bf16 %v61_v19, %v57_v22  ;;  %v92_v38 = vld [vmem:[%s291_s8] sm:$0xf]  ;;  %v70_v40 = vld [vmem:[%s288_s5 + $0x8] sm:$0xf]  ;;  %v51_v41 = vmax.bf16 %v47_v29, %v43_v33  ;;  %v85_v43 = vld [vmem:[%s290_s7 + $0x4] sm:$0xf]  ;;  %v66_v44 = vmax.bf16 %v62_v32, %v58_v36 }
   0xa   :  { %v63_v45 = vld [vmem:[%s287_s4 + $0xc] sm:$0x3]  ;;  %v78_v47 = vld [vmem:[%s289_s6 + $0x8] sm:$0xf]  ;;  %v93_v50 = vld [vmem:[%s291_s8 + $0x4] sm:$0xf] }
   0xb   :  { %v72_v25 = vmax.bf16 %v68_v12, %v64_v18  ;;  %v73_v39 = vmax.bf16 %v69_v23, %v65_v31  ;;  %v59_v48 = vmax.bf16 %v55_v37, %v51_v41  ;;  %v74_v51 = vmax.bf16 %v70_v40, %v66_v44  ;;  %v71_v52 = vld [vmem:[%s288_s5 + $0xc] sm:$0x3]  ;;  %v86_v54 = vld [vmem:[%s290_s7 + $0x8] sm:$0xf] }
   0xc   :  { %v79_v57 = vld [vmem:[%s289_s6 + $0xc] sm:$0x3]  ;;  %v94_v59 = vld [vmem:[%s291_s8 + $0x8] sm:$0xf] }
   0xd   :  { %v80_v34 = vmax.bf16 %v76_v21, %v72_v25  ;;  %v81_v46 = vmax.bf16 %v77_v35, %v73_v39  ;;  %v67_v55 = vmax.bf16 %v63_v45, %v59_v48  ;;  %v82_v56 = vmax.bf16 %v78_v47, %v74_v51  ;;  %v87_v62 = vld [vmem:[%s290_s7 + $0xc] sm:$0x3] }
   0xe   :  { %v95_v1 = vld [vmem:[%s291_s8 + $0xc] sm:$0x3] }
   0xf   :  { %v88_v42 = vmax.bf16 %v84_v30, %v80_v34  ;;  %v89_v53 = vmax.bf16 %v85_v43, %v81_v46  ;;  %v75_v60 = vmax.bf16 %v71_v52, %v67_v55  ;;  %v90_v61 = vmax.bf16 %v86_v54, %v82_v56 }
  0x11   :  { %v96_v49 = vmax.bf16 %v92_v38, %v88_v42  ;;  %v97_v58 = vmax.bf16 %v93_v50, %v89_v53  ;;  %v83_v63 = vmax.bf16 %v79_v57, %v75_v60  ;;  %v98_v0 = vmax.bf16 %v94_v59, %v90_v61 }
  0x13   :  { %101 = vst.msk [vmem:[%s292_s9] sm:$0xf] %vm100_vm0, %v96_v49  ;;  %102 = vst.msk [vmem:[%s292_s9 + $0x4] sm:$0xf] %vm100_vm0, %v97_v58  ;;  %v91_v2 = vmax.bf16 %v87_v62, %v83_v63 }
  0x14   :  { %103 = vst.msk [vmem:[%s292_s9 + $0x8] sm:$0xf] %vm100_vm0, %v98_v0 }
  0x15   :  { %v99_v3 = vmax.bf16 %v95_v1, %v91_v2 }
  0x17   :  { %105 = vst.msk [vmem:[%s292_s9 + $0xc] sm:$0x3] %vm104_vm1, %v99_v3 }

// kernel: wrn_forward.14
= control target key start
LH: loop header
LB: loop body
LE: loop exit
PB: predicated region body
PF: predicated region fallthrough
CT: control target
= control target key end

     0   :  { %8 = vsyncpa [#allocation4], 0  ;;  %s1929_s0 = inlined_call_operand.hbm [shape: bf16[416,8], index: 0, kind: input, shape index: {}]   ;;  %s1930_s1 = inlined_call_operand.hbm [shape: bf16[8,4], index: 1, kind: input, shape index: {}]   ;;  %s1931_s2 = inlined_call_operand.hbm [shape: f32[1,4], index: 2, kind: input, shape index: {}]   ;;  %s1932_s3 = inlined_call_operand.hbm [shape: bf16[416,4], index: 3, kind: output, shape index: {}]  }
   0x1   :  { %10 = vsyncpa [#allocation4 + $0x1], 0 }
   0x2   :  { %11 = vsyncpa [#allocation7], 0 }
   0x3   :  { %12 = vsyncpa [#allocation5], 0 }
   0x4   :  { %14 = vsyncpa [#allocation5 + $0x1], 0  ;;  %s1459_s12 = smov 0   ;;  %s1461_s13 = smov 0  }
   0x5   :  { %s1463_s14 = smov 0   ;;  %s1465_s15 = smov 0  }
   0x6   :  { %s1467_s16 = smov 0   ;;  %s1469_s17 = smov 0  }
   0x7 LB: > { %s987_s18 = sadd.s32 4294967295, %s1427_s17   ;;  %s988_s19 = sadd.s32 4294967294, %s1427_s17   ;;  %s1427_s17 = sphi %s1469_s17, %s20_s17   ;;  %s1423_s16 = sphi %s1467_s16, %s1958_s16   ;;  %s1419_s15 = sphi %s1465_s15, %s1957_s15   ;;  %s1415_s14 = sphi %s1463_s14, %s1956_s14   ;;  %s1411_s13 = sphi %s1461_s13, %s1955_s13   ;;  %s1407_s12 = sphi %s1459_s12, %s1954_s12  }
   0x8   : > { %s48_s20 = sadd.s32 1, %s1415_s14  ;;  %p55_p0 = scmp.ne.s32.totalorder %s1415_s14, %s1411_s13 }
   0x9   : > { %p56_p1 = scmp.eq.s32.totalorder %s1427_s17, 0  ;;  %p61_p2 = scmp.ne.s32.totalorder %s1411_s13, %s1407_s12 }
   0xa   : > { %p1497_p3 = scmp.eq.s32.totalorder %s987_s18, 0  ;;  %p141_p4 = scmp.eq.s32.totalorder %s987_s18, 1 }
   0xb   : > { %p1501_p5 = por %p56_p1, %p55_p0  ;;  %p147_p6 = scmp.eq.s32.totalorder %s988_s19, 1 }
   0xc   : > { %s1939_s21 = scalar_select %p1497_p3, 1, 0 }
   0xd   : > { %p1507_p7 = por %p1497_p3, %p61_p2  ;;  %p1511_p8 = por %p141_p4, %p55_p0 }
   0xe   : > { %p1515_p9 = por %p147_p6, %p61_p2  ;;  %p989_p10 = scmp.ge.s32.totalorder %s1427_s17, 1 }
   0xf   : > { %s1941_s23 = scalar_select %p1507_p7, 1, 0 }
  0x10   : > { %s1942_s24 = scalar_select %p1511_p8, 1, 0 }
  0x11   : > { %s1943_s25 = scalar_select %p1515_p9, 1, 0 }
  0x12   : > { %p154_p11 = scmp.lt.s32.totalorder %s1427_s17, 3  ;;  %s1429_s27 = smov [#allocation6]  }
  0x13   : > { %s170_s28 = sshll.u32 %s1429_s27, 4  ;;  %p1182_p1 = scmp.lt.s32.totalorder %s1427_s17, 2  ;;  %s171_s28 = int_to_ptr.vmem [resolvable:$true] %s170_s28 }
  0x14   : > { %p1522_p13 = pnand %p989_p10, %p154_p11  ;;  %s1430_s30 = smov [#allocation8]  }
  0x15   : > { %p1531_p4 = pnand %p1182_p1, %p1501_p5  ;;  %s183_s4 = sshll.u32 %s1430_s30, 4  ;;  %s1541_s4 = int_to_ptr.vmem [resolvable:$true] %s183_s4 }
  0x16   : > { %s1944_s26 = scalar_select %p1522_p13, 1, 0 }
  0x17   : > { %p1165_p0 = pneg %p1522_p13  ;;  %s1255_s8 = scalar_lea.hbm %s1930_s1, 64 }
  0x18   : > { %s1945_s29 = scalar_select %p1531_p4, 1, 0 }
  0x19   : > { %p1537_p2 = pnand %p1165_p0, %p1497_p3  ;;  %p1256_p5 = scmp.ne.s32.totalorder %s1930_s1, %s1255_s8 }
  0x1a   : > { %p1262_p1 = scmp.lt.u32.totalorder %s1255_s8, %s1930_s1 }
  0x1b   : > { %p1257_p6 = pneg %p1537_p2 }
  0x1d   : > { %p1258_p10 = pnand %p1257_p6, %p1256_p5 }
  0x1f   : > { %p1259_p11 = pneg %p1258_p10 }
  0x21   : > { %p1264_p0 = pnand %p1262_p1, %p1259_p11 }
  0x23   : > { %1267 = shalt.err (!%p1264_p0)
}
  0x24   : > { %s1268_s19 = scalar_lea.vmem %s171_s28, 64  ;;  %p1276_p3 = scmp.lt.s32.totalorder %s171_s28, %s171_s28 }
  0x25   : > { %p1269_p12 = scmp.ne.s32.totalorder %s171_s28, %s1268_s19  ;;  %p1277_p7 = scmp.lt.s32.totalorder %s1268_s19, %s1268_s19 }
  0x27   : > { %p1271_p9 = pnand %p1269_p12, %p1257_p6  ;;  %p1278_p13 = por %p1277_p7, %p1276_p3 }
  0x29   : > { %p1272_p8 = pneg %p1271_p9 }
  0x2b   : > { %p1279_p4 = pnand %p1278_p13, %p1272_p8 }
  0x2d   : > { %1282 = shalt.err (!%p1279_p4)
}
  0x2e   : > { %1168 = dma.hbm_to_vmem [thread:$0]  (!%p1537_p2), %s1930_s1, 64, %s171_s28, [#allocation7]  }
  0x2f   : > { %s1283_s7 = scalar_lea.hbm %s1931_s2, 16 }
  0x30   : > { %p1284_p9 = scmp.ne.s32.totalorder %s1931_s2, %s1283_s7  ;;  %p1290_p8 = scmp.lt.u32.totalorder %s1283_s7, %s1931_s2 }
  0x32   : > { %p1286_p3 = pnand %p1284_p9, %p1257_p6 }
  0x34   : > { %p1287_p7 = pneg %p1286_p3 }
  0x36   : > { %p1292_p12 = pnand %p1290_p8, %p1287_p7 }
  0x38   : > { %1295 = shalt.err (!%p1292_p12)
}
  0x39   : > { %s1296_s28 = scalar_lea.vmem %s1541_s4, 16  ;;  %s1303_s18 = scalar_lea.vmem %s1541_s4, 32 }
  0x3a   : > { %p1297_p13 = scmp.ne.s32.totalorder %s1541_s4, %s1296_s28  ;;  %p1304_p10 = scmp.lt.s32.totalorder %s1541_s4, %s1541_s4 }
  0x3b   : > { %p1305_p11 = scmp.lt.s32.totalorder %s1303_s18, %s1296_s28 }
  0x3c   : > { %p1299_p4 = pnand %p1297_p13, %p1257_p6 }
  0x3d   : > { %p1306_p1 = por %p1305_p11, %p1304_p10 }
  0x3e   : > { %p1300_p5 = pneg %p1299_p4 }
  0x40   : > { %p1307_p0 = pnand %p1306_p1, %p1300_p5 }
  0x42   : > { %1310 = shalt.err (!%p1307_p0)
}
  0x43   : > { %1171 = dma.hbm_to_vmem [thread:$0]  (!%p1537_p2), %s1931_s2, 16, %s1541_s4, [#allocation7]  }
  0x44   : > { %s39_s27 = sadd.s32 1, %s1423_s16  ;;  %s194_s30 = sand.u32 1, %s1415_s14  }
  0x45   : > { %p41_p6 = scmp.ge.s32.totalorder %s39_s27, 2  ;;  %s1151_s6 = smul.u32 104, %s194_s30 }
  0x46   : > { %s1053_s5 = smul.u32 1664, %s1423_s16  ;;  %s1610_s18 = scalar_lea.sflag [#allocation4], %s194_s30 }
  0x47   : > { %s1960_s27 = smov (%p41_p6, %s39_s27), 0  ;;  %s198_s8 = scalar_lea.vmem [#allocation3], %s1151_s6 }
  0x48   : > { %s43_s7 = ssub.s32 %s1423_s16, %s1960_s27  ;;  %s206_s9 = sshll.u32 %s198_s8, 4  ;;  %s1603_s9 = int_to_ptr.vmem [resolvable:$true] %s206_s9 }
  0x49   : > { %p46_p9 = scmp.eq.s32.totalorder %s43_s7, 0  ;;  %s1601_s28 = scalar_lea.hbm %s1929_s0, %s1053_s5 }
  0x4a   : > { %s1311_s19 = scalar_lea.hbm %s1601_s28, 1664  ;;  %p1947_p3 = scmp.ne.s32.totalorder %s1945_s29, 0 }
  0x4b   : > { %s1608_s4 = scalar_select %p46_p9, %s1415_s14, %s48_s20  }
  0x4c   : > { %p1312_p2 = scmp.ne.s32.totalorder %s1601_s28, %s1311_s19  ;;  %p1313_p7 = pneg %p1947_p3 }
  0x4d   : > { %s1316_s5 = scalar_lea.hbm %s1929_s0, 3328  ;;  %p1317_p13 = scmp.lt.u32.totalorder %s1601_s28, %s1929_s0 }
  0x4e   : > { %p1314_p8 = pnand %p1313_p7, %p1312_p2  ;;  %p1318_p4 = scmp.lt.u32.totalorder %s1316_s5, %s1311_s19 }
  0x4f   : > { %p1320_p10 = scmp.lt.u32.totalorder %s1311_s19, %s1601_s28 }
  0x50   : > { %p1315_p12 = pneg %p1314_p8  ;;  %p1319_p5 = por %p1318_p4, %p1317_p13 }
  0x52   : > { %p1321_p11 = por %p1320_p10, %p1319_p5 }
  0x54   : > { %p1322_p1 = pnand %p1321_p11, %p1315_p12 }
  0x56   : > { %1325 = shalt.err (!%p1322_p1)
}
  0x57   : > { %s1326_s20 = scalar_lea.vmem %s1603_s9, 1664  ;;  %s1431_s30 = smov [#allocation3]  }
  0x58   : > { %p1327_p0 = scmp.ne.s32.totalorder %s1603_s9, %s1326_s20  ;;  %s1331_s10 = sshll.u32 %s1431_s30, 4  ;;  %s1332_s10 = int_to_ptr.vmem [resolvable:$false] %s1331_s10 }
  0x59   : > { %s1333_s11 = scalar_lea.vmem %s1332_s10, 3328  ;;  %p1334_p2 = scmp.lt.s32.totalorder %s1603_s9, %s1332_s10 }
  0x5a   : > { %p1329_p6 = pnand %p1327_p0, %p1313_p7  ;;  %p1335_p8 = scmp.lt.s32.totalorder %s1333_s11, %s1326_s20 }
  0x5c   : > { %p1330_p9 = pneg %p1329_p6  ;;  %p1336_p13 = por %p1335_p8, %p1334_p2 }
  0x5e   : > { %p1337_p4 = pnand %p1336_p13, %p1330_p9 }
  0x60   : > { %1340 = shalt.err (!%p1337_p4)
}
  0x61   : > { %s1432_s19 = smov 64   ;;  %s1433_s22 = smov 4  }
  0x62   : > { %1175 = dma.hbm_to_vmem [thread:$0]  (!%p1947_p3), %s1601_s28, 1664, %s1603_s9, %s1610_s18, %s1432_s19, %s1432_s19, %s1433_s22  }
  0x63   : > { %p1948_p7 = scmp.ne.s32.totalorder %s1944_s26, 0 }
  0x64   : > { %s1641_s6 = sand.u32 (!%p1948_p7), 1, %s1411_s13   ;;  %p1949_p12 = scmp.ne.s32.totalorder (!%p1948_p7), %s1941_s23, 0 }
  0x65   : > { %218 = sbr.rel (%p1948_p7) target bundleno = 411 (0x19b), region = 32  ;;  %s221_s7 = scalar_lea.sflag (!%p1948_p7), [#allocation4], %s1641_s6 }
  0x66   : > { %s1152_s5 = smul.u32 (!%p1948_p7), 104, %s1641_s6 }
  0x68   : > { %s1647_s8 = scalar_lea.vmem (!%p1948_p7), [#allocation3], %s1152_s5 }
  0x6c   : > { %1394 = dma.done.wait (%p1949_p12), %s221_s7, 1664  }
  0x6d   : > { %1396 = vsyncadd (%p1949_p12), %s221_s7, 4294965632  ;;  %p1950_p3 = scmp.ne.s32.totalorder %s1939_s21, 0 }
  0x6f   : > { %1398 = dma.done.wait (%p1950_p3), [#allocation7], 80  }
  0x70   : > { %1400 = vsyncadd (%p1950_p3), [#allocation7], 4294967216  ;;  %v1434_v0 = vmov 0.0   ;;  %vm1435_vm0 = vmmov 0   ;;  %vm262_vm1 = vcmask 31744   ;;  %vm447_vm2 = vcmask 1043456  }
  0x71   : > { %1095 = vmatprep.subr.bf16.mxu0 %v1434_v0  ;;  %1097 = vmatprep.mubr.msk.bf16.mxu0 %vm1435_vm0, %v1434_v0  ;;  %263 = vst.msk [vmem:[#allocation2] sm:$0xff] %vm262_vm1, %v1434_v0  ;;  %264 = vst.msk [vmem:[#allocation2 + $0x8] sm:$0xff] %vm262_vm1, %v1434_v0  ;;  %v341_v1 = vld [vmem:[#allocation6] sm:$0xf]  ;;  %v1242_v3 = vld [vmem:[%s1647_s8] sm:$0xff]   ;;  %vm407_vm3 = vcmask 64512  }
  0x72   : > { %1149 = vmatprep.subr.bf16.mxu1 %v1434_v0  ;;  %1125 = vmatprep.mubr.msk.bf16.mxu1 %vm1435_vm0, %v1434_v0  ;;  %265 = vst.msk [vmem:[#allocation2 + $0x10] sm:$0xff] %vm262_vm1, %v1434_v0  ;;  %266 = vst.msk [vmem:[#allocation2 + $0x18] sm:$0xff] %vm262_vm1, %v1434_v0  ;;  %v449_v2 = vsel %vm447_vm2, %v341_v1, 0  ;;  %v1243_v4 = vld [vmem:[%s1647_s8 + $0x38] sm:$0xff]   ;;  %v1244_v5 = vld [vmem:[%s1647_s8 + $0x8] sm:$0xff]   ;;  %vm833_vm4 = vcmask 27648  }
  0x73   : > { %267 = vst.msk [vmem:[#allocation2 + $0x20] sm:$0xff] %vm262_vm1, %v1434_v0  ;;  %268 = vst.msk [vmem:[#allocation2 + $0x28] sm:$0xff] %vm262_vm1, %v1434_v0  ;;  %1096 = vmatpush3.bf16.msra.mxu0 %v449_v2  ;;  %1150 = vmatpush3.bf16.msra.mxu1 %v449_v2  ;;  %v1245_v6 = vld [vmem:[%s1647_s8 + $0x40] sm:$0xff]   ;;  %v1246_v7 = vld [vmem:[%s1647_s8 + $0x10] sm:$0xff]   ;;  %s1779_s21 = scalar_lea.vmem [#allocation9], %s1152_s5  ;;  %s1080_s23 = smul.u32 1664, %s1419_s15 }
  0x74   : > { %269 = vst.msk [vmem:[#allocation2 + $0x30] sm:$0xff] %vm262_vm1, %v1434_v0  ;;  %270 = vst.msk [vmem:[#allocation2 + $0x38] sm:$0xff] %vm262_vm1, %v1434_v0  ;;  %v1247_v8 = vld [vmem:[%s1647_s8 + $0x48] sm:$0xff]   ;;  %v1248_v9 = vld [vmem:[%s1647_s8 + $0x18] sm:$0xff]   ;;  %s875_s26 = sshll.u32 %s1779_s21, 4  ;;  %s861_s15 = scalar_lea.sflag [#allocation5], %s1641_s6  ;;  %s1876_s26 = int_to_ptr.vmem [resolvable:$true] %s875_s26 }
  0x75   : > { %271 = vst.msk [vmem:[#allocation2 + $0x40] sm:$0xff] %vm262_vm1, %v1434_v0  ;;  %272 = vst.msk [vmem:[#allocation2 + $0x48] sm:$0xff] %vm262_vm1, %v1434_v0  ;;  %v1249_v10 = vld [vmem:[%s1647_s8 + $0x50] sm:$0xff]   ;;  %v1250_v11 = vld [vmem:[%s1647_s8 + $0x20] sm:$0xff]   ;;  %s1874_s28 = scalar_lea.hbm %s1932_s3, %s1080_s23  ;;  %s1341_s18 = scalar_lea.vmem %s1876_s26, 1664 }
  0x76   : > { %273 = vst.msk [vmem:[#allocation2 + $0x50] sm:$0xff] %vm262_vm1, %v1434_v0  ;;  %274 = vst.msk [vmem:[#allocation2 + $0x58] sm:$0xff] %vm262_vm1, %v1434_v0  ;;  %1098 = vmatmul.mubr.msk.bf16.vlgmr.msra.gmra.mrb[0].mxu0 %vm407_vm3, %v1242_v3  ;;  %1126 = vmatmul.mubr.msk.bf16.vlgmr.msra.gmra.mrb[0].mxu1 %vm407_vm3, %v1243_v4  ;;  %v1251_v12 = vld [vmem:[%s1647_s8 + $0x58] sm:$0xff]   ;;  %v1252_v13 = vld [vmem:[%s1647_s8 + $0x28] sm:$0xff]   ;;  %p1342_p5 = scmp.ne.s32.totalorder %s1876_s26, %s1341_s18  ;;  %p1951_p10 = scmp.ne.s32.totalorder %s1942_s24, 0 }
  0x77   : > { %275 = vst.msk [vmem:[#allocation2 + $0x60] sm:$0xff] %vm262_vm1, %v1434_v0  ;;  %276 = vst.msk [vmem:[#allocation2 + $0x68] sm:$0xff] %vm262_vm1, %v1434_v0  ;;  %1101 = vmatprep.mubr.msk.bf16.mxu0 %vm1435_vm0, %v1434_v0  ;;  %1129 = vmatprep.mubr.msk.bf16.mxu1 %vm1435_vm0, %v1434_v0  ;;  %v1253_v14 = vld [vmem:[%s1647_s8 + $0x60] sm:$0xff]   ;;  %v1254_v15 = vld [vmem:[%s1647_s8 + $0x30] sm:$0xff]   ;;  %s1436_s20 = smov [#allocation9]  }
  0x78   : > { %277 = vst.msk [vmem:[#allocation2 + $0x70] sm:$0xff] %vm262_vm1, %v1434_v0  ;;  %278 = vst.msk [vmem:[#allocation2 + $0x78] sm:$0xff] %vm262_vm1, %v1434_v0  ;;  %v289_v16 = vld [vmem:[#allocation2] sm:$0xff]  ;;  %v290_v19 = vld [vmem:[#allocation2 + $0x8] sm:$0xff]  ;;  %p1343_p11 = pnand %p1342_p5, %p1951_p10  ;;  %s1345_s30 = sshll.u32 %s1436_s20, 4  ;;  %s1346_s30 = int_to_ptr.vmem [resolvable:$false] %s1345_s30 }
  0x79   : > { %279 = vst.msk [vmem:[#allocation2 + $0x80] sm:$0xff] %vm262_vm1, %v1434_v0  ;;  %280 = vst.msk [vmem:[#allocation2 + $0x88] sm:$0xff] %vm262_vm1, %v1434_v0  ;;  %v291_v32 = vld [vmem:[#allocation2 + $0x10] sm:$0xff]  ;;  %v1767_v34 = vld [vmem:[#allocation8] ss:$0 sm:$0xff]  ;;  %s1347_s10 = scalar_lea.vmem %s1346_s30, 3328  ;;  %p1348_p0 = scmp.lt.s32.totalorder %s1876_s26, %s1346_s30 }
  0x7a   : > { %281 = vst.msk [vmem:[#allocation2 + $0x90] sm:$0xff] %vm262_vm1, %v1434_v0  ;;  %282 = vst.msk [vmem:[#allocation2 + $0x98] sm:$0xff] %vm262_vm1, %v1434_v0  ;;  %v292_v36 = vld [vmem:[#allocation2 + $0x18] sm:$0xff]  ;;  %v293_v59 = vld [vmem:[#allocation2 + $0x20] sm:$0xff]  ;;  %p1344_p1 = pneg %p1343_p11  ;;  %p1349_p6 = scmp.lt.s32.totalorder %s1347_s10, %s1341_s18 }
  0x7b   : > { %283 = vst.msk [vmem:[#allocation2 + $0xa0] sm:$0xff] %vm262_vm1, %v1434_v0  ;;  %284 = vst.msk [vmem:[#allocation2 + $0xa8] sm:$0xff] %vm262_vm1, %v1434_v0  ;;  %v294_v2 = vld [vmem:[#allocation2 + $0x28] sm:$0xff] }
  0x7c   : > { %285 = vst.msk [vmem:[#allocation2 + $0xb0] sm:$0xff] %vm262_vm1, %v1434_v0  ;;  %286 = vst.msk [vmem:[#allocation2 + $0xb8] sm:$0xff] %vm262_vm1, %v1434_v0  ;;  %p1350_p9 = por %p1349_p6, %p1348_p0 }
  0x7d   : > { %287 = vst.msk [vmem:[#allocation2 + $0xc0] sm:$0xff] %vm262_vm1, %v1434_v0  ;;  %288 = vst.msk [vmem:[#allocation2 + $0xc8] sm:$0xff] %vm262_vm1, %v1434_v0 }
  0x7e   : > { %1102 = vmatmul.mubr.msk.bf16.gmra.mrb[4].mxu0 %vm407_vm3, %v1244_v5  ;;  %1130 = vmatmul.mubr.msk.bf16.gmra.mrb[4].mxu1 %vm407_vm3, %v1245_v6  ;;  %p1351_p2 = pnand %p1350_p9, %p1344_p1 }
  0x7f   : > { %1105 = vmatprep.mubr.msk.bf16.mxu0 %vm1435_vm0, %v1434_v0  ;;  %1133 = vmatprep.mubr.msk.bf16.mxu1 %vm1435_vm0, %v1434_v0  ;;  %v303_v17 = vld [vmem:[#allocation2 + $0x70] sm:$0xff]  ;;  %v304_v21 = vld [vmem:[#allocation2 + $0x78] sm:$0xff] }
  0x80   : > { %v305_v33 = vld [vmem:[#allocation2 + $0x80] sm:$0xff]  ;;  %v306_v38 = vld [vmem:[#allocation2 + $0x88] sm:$0xff] }
  0x81   : > { %v307_v60 = vld [vmem:[#allocation2 + $0x90] sm:$0xff]  ;;  %v308_v4 = vld [vmem:[#allocation2 + $0x98] sm:$0xff] }
  0x86   : > { %1106 = vmatmul.mubr.msk.bf16.gmra.mrb[8].mxu0 %vm407_vm3, %v1246_v7  ;;  %1134 = vmatmul.mubr.msk.bf16.gmra.mrb[8].mxu1 %vm407_vm3, %v1247_v8 }
  0x87   : > { %1109 = vmatprep.mubr.msk.bf16.mxu0 %vm1435_vm0, %v1434_v0  ;;  %1137 = vmatprep.mubr.msk.bf16.mxu1 %vm1435_vm0, %v1434_v0 }
  0x8e   : > { %1110 = vmatmul.mubr.msk.bf16.gmra.mrb[12].mxu0 %vm407_vm3, %v1248_v9  ;;  %1138 = vmatmul.mubr.msk.bf16.gmra.mrb[12].mxu1 %vm407_vm3, %v1249_v10 }
  0x8f   : > { %1113 = vmatprep.mubr.msk.bf16.mxu0 %vm1435_vm0, %v1434_v0  ;;  %1141 = vmatprep.mubr.msk.bf16.mxu1 %vm1435_vm0, %v1434_v0 }
  0x96   : > { %1114 = vmatmul.mubr.msk.bf16.gmra.mrb[16].mxu0 %vm407_vm3, %v1250_v11  ;;  %1142 = vmatmul.mubr.msk.bf16.gmra.mrb[16].mxu1 %vm407_vm3, %v1251_v12 }
  0x97   : > { %1117 = vmatprep.mubr.msk.bf16.mxu0 %vm1435_vm0, %v1434_v0  ;;  %1145 = vmatprep.mubr.msk.bf16.mxu1 %vm1435_vm0, %v1434_v0 }
  0x9e   : > { %1118 = vmatmul.mubr.msk.bf16.gmra.mrb[20].mxu0 %vm407_vm3, %v1252_v13  ;;  %1146 = vmatmul.mubr.msk.bf16.gmra.mrb[20].mxu1 %vm407_vm3, %v1253_v14 }
  0x9f   : > { %1121 = vmatprep.mubr.msk.bf16.mxu0 %vm1435_vm0, %v1434_v0 }
  0xa6   : > { %1122 = vmatmul.mubr.msk.bf16.gmra.mrb[24].mxu0 %vm407_vm3, %v1254_v15 }
 0x149   : > { %v485_v18 = vpop.f32.mrb[0].mxu0  ;;  %v541_v20 = vpop.f32.mrb[0].mxu1 }
 0x14a   : > { %v588_v22 = vadd.f32 %v485_v18, %v289_v16  ;;  %v1099_v23 = vpop.f32.mrb[1].mxu0  ;;  %v602_v24 = vadd.f32 %v541_v20, %v303_v17  ;;  %v1127_v25 = vpop.f32.mrb[1].mxu1 }
 0x14b   : > { %v488_v26 = vpop.f32.mrb[2].mxu0  ;;  %v544_v27 = vpop.f32.mrb[2].mxu1 }
 0x14c   : > { %615 = vst.msk [vmem:[#allocation2] sm:$0xff] %vm262_vm1, %v588_v22  ;;  %v589_v28 = vadd.f32 %v488_v26, %v290_v19  ;;  %v1100_v29 = vpop.f32.mrb[3].mxu0  ;;  %629 = vst.msk [vmem:[#allocation2 + $0x70] sm:$0xff] %vm262_vm1, %v602_v24  ;;  %v603_v30 = vadd.f32 %v544_v27, %v304_v21  ;;  %v1128_v31 = vpop.f32.mrb[3].mxu1  ;;  %v295_v27 = vld [vmem:[#allocation2 + $0x30] sm:$0xff] }
 0x14e   : > { %616 = vst.msk [vmem:[#allocation2 + $0x8] sm:$0xff] %vm262_vm1, %v589_v28  ;;  %630 = vst.msk [vmem:[#allocation2 + $0x78] sm:$0xff] %vm262_vm1, %v603_v30  ;;  %v309_v28 = vld [vmem:[#allocation2 + $0xa0] sm:$0xff] }
 0x151   : > { %v493_v35 = vpop.f32.mrb[4].mxu0  ;;  %v549_v37 = vpop.f32.mrb[4].mxu1 }
 0x152   : > { %v590_v39 = vadd.f32 %v493_v35, %v291_v32  ;;  %v1103_v40 = vpop.f32.mrb[5].mxu0  ;;  %v604_v41 = vadd.f32 %v549_v37, %v305_v33  ;;  %v1131_v42 = vpop.f32.mrb[5].mxu1  ;;  %v296_v35 = vld [vmem:[#allocation2 + $0x38] sm:$0xff]  ;;  %v310_v37 = vld [vmem:[#allocation2 + $0xa8] sm:$0xff] }
 0x153   : > { %v644_v43 = vld [vmem:[#allocation2] sm:$0xff]  ;;  %v658_v44 = vld [vmem:[#allocation2 + $0x70] sm:$0xff]  ;;  %v496_v45 = vpop.f32.mrb[6].mxu0  ;;  %v552_v46 = vpop.f32.mrb[6].mxu1 }
 0x154   : > { %v677_v47 = vadd.f32 %v1767_v34, %v644_v43  ;;  %v691_v48 = vadd.f32 %v1767_v34, %v658_v44  ;;  %617 = vst.msk [vmem:[#allocation2 + $0x10] sm:$0xff] %vm262_vm1, %v590_v39  ;;  %v591_v49 = vadd.f32 %v496_v45, %v292_v36  ;;  %v1104_v50 = vpop.f32.mrb[7].mxu0  ;;  %631 = vst.msk [vmem:[#allocation2 + $0x80] sm:$0xff] %vm262_vm1, %v604_v41  ;;  %v1132_v52 = vpop.f32.mrb[7].mxu1 }
 0x155   : > { %v605_v51 = vadd.f32 %v552_v46, %v306_v38  ;;  %v645_v53 = vld [vmem:[#allocation2 + $0x8] sm:$0xff]  ;;  %v659_v54 = vld [vmem:[#allocation2 + $0x78] sm:$0xff] }
 0x156   : > { %v703_v55 = vmax.f32 %v677_v47, 0.0  ;;  %v678_v56 = vadd.f32 %v1767_v34, %v645_v53  ;;  %v717_v57 = vmax.f32 %v691_v48, 0.0  ;;  %v692_v58 = vadd.f32 %v1767_v34, %v659_v54  ;;  %618 = vst.msk [vmem:[#allocation2 + $0x18] sm:$0xff] %vm262_vm1, %v591_v49 }
 0x157   : > { %632 = vst.msk [vmem:[#allocation2 + $0x88] sm:$0xff] %vm262_vm1, %v605_v51 }
 0x158   : > { %v1054_v61 = vpack.c.bf16 %v703_v55, %v703_v55  ;;  %v704_v62 = vmax.f32 %v678_v56, 0.0  ;;  %v1068_v63 = vpack.c.bf16 %v717_v57, %v717_v57  ;;  %v718_v0 = vmax.f32 %v692_v58, 0.0 }
 0x159   : > { %v501_v1 = vpop.f32.mrb[8].mxu0  ;;  %v557_v3 = vpop.f32.mrb[8].mxu1 }
 0x15a   : > { %834 = vst.msk [vmem:[%s1779_s21] sm:$0xf] %vm833_vm4, %v1054_v61  ;;  %v1055_v5 = vpack.c.bf16 %v704_v62, %v704_v62  ;;  %848 = vst.msk [vmem:[%s1779_s21 + $0x38] sm:$0xf] %vm833_vm4, %v1068_v63  ;;  %v1069_v6 = vpack.c.bf16 %v718_v0, %v718_v0  ;;  %v592_v7 = vadd.f32 %v501_v1, %v293_v59  ;;  %v1107_v8 = vpop.f32.mrb[9].mxu0  ;;  %v1135_v10 = vpop.f32.mrb[9].mxu1 }
 0x15b   : > { %v606_v9 = vadd.f32 %v557_v3, %v307_v60  ;;  %v646_v11 = vld [vmem:[#allocation2 + $0x10] sm:$0xff]  ;;  %v660_v12 = vld [vmem:[#allocation2 + $0x80] sm:$0xff]  ;;  %v504_v13 = vpop.f32.mrb[10].mxu0  ;;  %v560_v14 = vpop.f32.mrb[10].mxu1  ;;  %v298_v3 = vld [vmem:[#allocation2 + $0x48] sm:$0xff] }
 0x15c   : > { %835 = vst.msk [vmem:[%s1779_s21 + $0x4] sm:$0xf] %vm833_vm4, %v1055_v5  ;;  %849 = vst.msk [vmem:[%s1779_s21 + $0x3c] sm:$0xf] %vm833_vm4, %v1069_v6  ;;  %v679_v15 = vadd.f32 %v1767_v34, %v646_v11  ;;  %v693_v16 = vadd.f32 %v1767_v34, %v660_v12  ;;  %v593_v17 = vadd.f32 %v504_v13, %v294_v2  ;;  %v1108_v18 = vpop.f32.mrb[11].mxu0  ;;  %v1136_v20 = vpop.f32.mrb[11].mxu1 }
 0x15d   : > { %619 = vst.msk [vmem:[#allocation2 + $0x20] sm:$0xff] %vm262_vm1, %v592_v7  ;;  %633 = vst.msk [vmem:[#allocation2 + $0x90] sm:$0xff] %vm262_vm1, %v606_v9  ;;  %v607_v19 = vadd.f32 %v560_v14, %v308_v4  ;;  %v647_v21 = vld [vmem:[#allocation2 + $0x18] sm:$0xff]  ;;  %v297_v60 = vld [vmem:[#allocation2 + $0x40] sm:$0xff] }
 0x15e   : > { %v661_v22 = vld [vmem:[#allocation2 + $0x88] sm:$0xff]  ;;  %v705_v23 = vmax.f32 %v679_v15, 0.0  ;;  %v680_v24 = vadd.f32 %v1767_v34, %v647_v21  ;;  %v719_v25 = vmax.f32 %v693_v16, 0.0  ;;  %620 = vst.msk [vmem:[#allocation2 + $0x28] sm:$0xff] %vm262_vm1, %v593_v17  ;;  %v311_v61 = vld [vmem:[#allocation2 + $0xb0] sm:$0xff]  ;;  %v312_v5 = vld [vmem:[#allocation2 + $0xb8] sm:$0xff] }
 0x15f   : > { %v694_v26 = vadd.f32 %v1767_v34, %v661_v22  ;;  %634 = vst.msk [vmem:[#allocation2 + $0x98] sm:$0xff] %vm262_vm1, %v607_v19 }
 0x160   : > { %v1056_v29 = vpack.c.bf16 %v705_v23, %v705_v23  ;;  %v706_v30 = vmax.f32 %v680_v24, 0.0  ;;  %v1070_v31 = vpack.c.bf16 %v719_v25, %v719_v25 }
 0x161   : > { %v720_v32 = vmax.f32 %v694_v26, 0.0  ;;  %v509_v33 = vpop.f32.mrb[12].mxu0  ;;  %v565_v36 = vpop.f32.mrb[12].mxu1 }
 0x162   : > { %836 = vst.msk [vmem:[%s1779_s21 + $0x8] sm:$0xf] %vm833_vm4, %v1056_v29  ;;  %v1057_v38 = vpack.c.bf16 %v706_v30, %v706_v30  ;;  %850 = vst.msk [vmem:[%s1779_s21 + $0x40] sm:$0xf] %vm833_vm4, %v1070_v31  ;;  %v594_v40 = vadd.f32 %v509_v33, %v295_v27  ;;  %v1111_v41 = vpop.f32.mrb[13].mxu0  ;;  %v608_v42 = vadd.f32 %v565_v36, %v309_v28  ;;  %v1139_v43 = vpop.f32.mrb[13].mxu1 }
 0x163   : > { %v1071_v39 = vpack.c.bf16 %v720_v32, %v720_v32  ;;  %v512_v46 = vpop.f32.mrb[14].mxu0  ;;  %v568_v47 = vpop.f32.mrb[14].mxu1  ;;  %v299_v28 = vld [vmem:[#allocation2 + $0x50] sm:$0xff]  ;;  %v313_v29 = vld [vmem:[#allocation2 + $0xc0] sm:$0xff]  ;;  %v300_v36 = vld [vmem:[#allocation2 + $0x58] sm:$0xff] }
 0x164   : > { %v648_v44 = vld [vmem:[#allocation2 + $0x20] sm:$0xff]  ;;  %v662_v45 = vld [vmem:[#allocation2 + $0x90] sm:$0xff]  ;;  %837 = vst.msk [vmem:[%s1779_s21 + $0xc] sm:$0xf] %vm833_vm4, %v1057_v38  ;;  %v595_v50 = vadd.f32 %v512_v46, %v296_v35  ;;  %v1112_v51 = vpop.f32.mrb[15].mxu0  ;;  %v609_v52 = vadd.f32 %v568_v47, %v310_v37  ;;  %v1140_v53 = vpop.f32.mrb[15].mxu1 }
 0x165   : > { %851 = vst.msk [vmem:[%s1779_s21 + $0x44] sm:$0xf] %vm833_vm4, %v1071_v39  ;;  %v681_v48 = vadd.f32 %v1767_v34, %v648_v44  ;;  %v695_v49 = vadd.f32 %v1767_v34, %v662_v45  ;;  %v649_v54 = vld [vmem:[#allocation2 + $0x28] sm:$0xff] }
 0x166   : > { %621 = vst.msk [vmem:[#allocation2 + $0x30] sm:$0xff] %vm262_vm1, %v594_v40  ;;  %635 = vst.msk [vmem:[#allocation2 + $0xa0] sm:$0xff] %vm262_vm1, %v608_v42  ;;  %v663_v55 = vld [vmem:[#allocation2 + $0x98] sm:$0xff]  ;;  %v682_v57 = vadd.f32 %v1767_v34, %v649_v54  ;;  %v314_v38 = vld [vmem:[#allocation2 + $0xc8] sm:$0xff] }
 0x167   : > { %v707_v56 = vmax.f32 %v681_v48, 0.0  ;;  %v721_v58 = vmax.f32 %v695_v49, 0.0  ;;  %v696_v59 = vadd.f32 %v1767_v34, %v663_v55  ;;  %622 = vst.msk [vmem:[#allocation2 + $0x38] sm:$0xff] %vm262_vm1, %v595_v50  ;;  %636 = vst.msk [vmem:[#allocation2 + $0xa8] sm:$0xff] %vm262_vm1, %v609_v52 }
 0x168   : > { %v708_v63 = vmax.f32 %v682_v57, 0.0 }
 0x169   : > { %v1058_v62 = vpack.c.bf16 %v707_v56, %v707_v56  ;;  %v1072_v0 = vpack.c.bf16 %v721_v58, %v721_v58  ;;  %v722_v1 = vmax.f32 %v696_v59, 0.0  ;;  %v517_v2 = vpop.f32.mrb[16].mxu0  ;;  %v573_v4 = vpop.f32.mrb[16].mxu1 }
 0x16a   : > { %v1059_v6 = vpack.c.bf16 %v708_v63, %v708_v63  ;;  %v596_v8 = vadd.f32 %v517_v2, %v297_v60  ;;  %v1115_v9 = vpop.f32.mrb[17].mxu0  ;;  %v610_v10 = vadd.f32 %v573_v4, %v311_v61  ;;  %v1143_v11 = vpop.f32.mrb[17].mxu1  ;;  %v301_v61 = vld [vmem:[#allocation2 + $0x60] sm:$0xff] }
 0x16b   : > { %838 = vst.msk [vmem:[%s1779_s21 + $0x10] sm:$0xf] %vm833_vm4, %v1058_v62  ;;  %852 = vst.msk [vmem:[%s1779_s21 + $0x48] sm:$0xf] %vm833_vm4, %v1072_v0  ;;  %v1073_v7 = vpack.c.bf16 %v722_v1, %v722_v1  ;;  %v520_v14 = vpop.f32.mrb[18].mxu0  ;;  %v576_v15 = vpop.f32.mrb[18].mxu1 }
 0x16c   : > { %839 = vst.msk [vmem:[%s1779_s21 + $0x14] sm:$0xf] %vm833_vm4, %v1059_v6  ;;  %v597_v18 = vadd.f32 %v520_v14, %v298_v3  ;;  %v1116_v19 = vpop.f32.mrb[19].mxu0  ;;  %v611_v20 = vadd.f32 %v576_v15, %v312_v5  ;;  %v1144_v21 = vpop.f32.mrb[19].mxu1  ;;  %v302_v3 = vld [vmem:[#allocation2 + $0x68] sm:$0xff] }
 0x16d   : > { %v650_v12 = vld [vmem:[#allocation2 + $0x30] sm:$0xff]  ;;  %v664_v13 = vld [vmem:[#allocation2 + $0xa0] sm:$0xff]  ;;  %853 = vst.msk [vmem:[%s1779_s21 + $0x4c] sm:$0xf] %vm833_vm4, %v1073_v7 }
 0x16e   : > { %v683_v16 = vadd.f32 %v1767_v34, %v650_v12  ;;  %v697_v17 = vadd.f32 %v1767_v34, %v664_v13  ;;  %623 = vst.msk [vmem:[#allocation2 + $0x40] sm:$0xff] %vm262_vm1, %v596_v8  ;;  %637 = vst.msk [vmem:[#allocation2 + $0xb0] sm:$0xff] %vm262_vm1, %v610_v10  ;;  %v651_v22 = vld [vmem:[#allocation2 + $0x38] sm:$0xff]  ;;  %v665_v23 = vld [vmem:[#allocation2 + $0xa8] sm:$0xff] }
 0x16f   : > { %v684_v25 = vadd.f32 %v1767_v34, %v651_v22  ;;  %v698_v27 = vadd.f32 %v1767_v34, %v665_v23  ;;  %624 = vst.msk [vmem:[#allocation2 + $0x48] sm:$0xff] %vm262_vm1, %v597_v18  ;;  %638 = vst.msk [vmem:[#allocation2 + $0xb8] sm:$0xff] %vm262_vm1, %v611_v20 }
 0x170   : > { %v709_v24 = vmax.f32 %v683_v16, 0.0  ;;  %v723_v26 = vmax.f32 %v697_v17, 0.0 }
 0x171   : > { %v710_v31 = vmax.f32 %v684_v25, 0.0  ;;  %v724_v33 = vmax.f32 %v698_v27, 0.0  ;;  %v525_v35 = vpop.f32.mrb[20].mxu0  ;;  %v581_v37 = vpop.f32.mrb[20].mxu1 }
 0x172   : > { %v1060_v30 = vpack.c.bf16 %v709_v24, %v709_v24  ;;  %v1074_v32 = vpack.c.bf16 %v723_v26, %v723_v26  ;;  %v598_v41 = vadd.f32 %v525_v35, %v299_v28  ;;  %v1119_v42 = vpop.f32.mrb[21].mxu0  ;;  %v612_v43 = vadd.f32 %v581_v37, %v313_v29  ;;  %v1147_v44 = vpop.f32.mrb[21].mxu1 }
 0x173   : > { %v1061_v39 = vpack.c.bf16 %v710_v31, %v710_v31  ;;  %v1075_v40 = vpack.c.bf16 %v724_v33, %v724_v33  ;;  %v528_v47 = vpop.f32.mrb[22].mxu0  ;;  %v584_v48 = vpop.f32.mrb[22].mxu1 }
 0x174   : > { %840 = vst.msk [vmem:[%s1779_s21 + $0x18] sm:$0xf] %vm833_vm4, %v1060_v30  ;;  %854 = vst.msk [vmem:[%s1779_s21 + $0x50] sm:$0xf] %vm833_vm4, %v1074_v32  ;;  %v599_v51 = vadd.f32 %v528_v47, %v300_v36  ;;  %v1120_v52 = vpop.f32.mrb[23].mxu0  ;;  %v613_v53 = vadd.f32 %v584_v48, %v314_v38  ;;  %v1148_v54 = vpop.f32.mrb[23].mxu1 }
 0x175   : > { %v652_v45 = vld [vmem:[#allocation2 + $0x40] sm:$0xff]  ;;  %v666_v46 = vld [vmem:[#allocation2 + $0xb0] sm:$0xff]  ;;  %841 = vst.msk [vmem:[%s1779_s21 + $0x1c] sm:$0xf] %vm833_vm4, %v1061_v39  ;;  %855 = vst.msk [vmem:[%s1779_s21 + $0x54] sm:$0xf] %vm833_vm4, %v1075_v40 }
 0x176   : > { %v685_v49 = vadd.f32 %v1767_v34, %v652_v45  ;;  %v699_v50 = vadd.f32 %v1767_v34, %v666_v46  ;;  %625 = vst.msk [vmem:[#allocation2 + $0x50] sm:$0xff] %vm262_vm1, %v598_v41  ;;  %639 = vst.msk [vmem:[#allocation2 + $0xc0] sm:$0xff] %vm262_vm1, %v612_v43  ;;  %v653_v55 = vld [vmem:[#allocation2 + $0x48] sm:$0xff]  ;;  %v667_v56 = vld [vmem:[#allocation2 + $0xb8] sm:$0xff] }
 0x177   : > { %v686_v58 = vadd.f32 %v1767_v34, %v653_v55  ;;  %v700_v60 = vadd.f32 %v1767_v34, %v667_v56  ;;  %626 = vst.msk [vmem:[#allocation2 + $0x58] sm:$0xff] %vm262_vm1, %v599_v51  ;;  %640 = vst.msk [vmem:[#allocation2 + $0xc8] sm:$0xff] %vm262_vm1, %v613_v53 }
 0x178   : > { %v711_v57 = vmax.f32 %v685_v49, 0.0  ;;  %v725_v59 = vmax.f32 %v699_v50, 0.0 }
 0x179   : > { %v712_v63 = vmax.f32 %v686_v58, 0.0  ;;  %v726_v1 = vmax.f32 %v700_v60, 0.0  ;;  %v533_v2 = vpop.f32.mrb[24].mxu0 }
 0x17a   : > { %v1062_v62 = vpack.c.bf16 %v711_v57, %v711_v57  ;;  %v1076_v0 = vpack.c.bf16 %v725_v59, %v725_v59  ;;  %v600_v6 = vadd.f32 %v533_v2, %v301_v61  ;;  %v1123_v7 = vpop.f32.mrb[25].mxu0 }
 0x17b   : > { %v1063_v4 = vpack.c.bf16 %v712_v63, %v712_v63  ;;  %v1077_v5 = vpack.c.bf16 %v726_v1, %v726_v1  ;;  %v536_v10 = vpop.f32.mrb[26].mxu0 }
 0x17c   : > { %842 = vst.msk [vmem:[%s1779_s21 + $0x20] sm:$0xf] %vm833_vm4, %v1062_v62  ;;  %856 = vst.msk [vmem:[%s1779_s21 + $0x58] sm:$0xf] %vm833_vm4, %v1076_v0  ;;  %v601_v13 = vadd.f32 %v536_v10, %v302_v3  ;;  %v1124_v14 = vpop.f32.mrb[27].mxu0 }
 0x17d   : > { %v654_v8 = vld [vmem:[#allocation2 + $0x50] sm:$0xff]  ;;  %v668_v9 = vld [vmem:[#allocation2 + $0xc0] sm:$0xff]  ;;  %843 = vst.msk [vmem:[%s1779_s21 + $0x24] sm:$0xf] %vm833_vm4, %v1063_v4  ;;  %857 = vst.msk [vmem:[%s1779_s21 + $0x5c] sm:$0xf] %vm833_vm4, %v1077_v5 }
 0x17e   : > { %v687_v11 = vadd.f32 %v1767_v34, %v654_v8  ;;  %v701_v12 = vadd.f32 %v1767_v34, %v668_v9  ;;  %627 = vst.msk [vmem:[#allocation2 + $0x60] sm:$0xff] %vm262_vm1, %v600_v6  ;;  %v655_v15 = vld [vmem:[#allocation2 + $0x58] sm:$0xff]  ;;  %v669_v16 = vld [vmem:[#allocation2 + $0xc8] sm:$0xff]  ;;  %628 = vst.msk [vmem:[#allocation2 + $0x68] sm:$0xff] %vm262_vm1, %v601_v13 }
 0x17f   : > { %v688_v18 = vadd.f32 %v1767_v34, %v655_v15  ;;  %v702_v20 = vadd.f32 %v1767_v34, %v669_v16 }
 0x180   : > { %v713_v17 = vmax.f32 %v687_v11, 0.0  ;;  %v727_v19 = vmax.f32 %v701_v12, 0.0 }
 0x181   : > { %v714_v22 = vmax.f32 %v688_v18, 0.0  ;;  %v728_v24 = vmax.f32 %v702_v20, 0.0 }
 0x182   : > { %v1064_v21 = vpack.c.bf16 %v713_v17, %v713_v17  ;;  %v1078_v23 = vpack.c.bf16 %v727_v19, %v727_v19 }
 0x183   : > { %v1065_v25 = vpack.c.bf16 %v714_v22, %v714_v22  ;;  %v1079_v26 = vpack.c.bf16 %v728_v24, %v728_v24 }
 0x184   : > { %844 = vst.msk [vmem:[%s1779_s21 + $0x28] sm:$0xf] %vm833_vm4, %v1064_v21  ;;  %858 = vst.msk [vmem:[%s1779_s21 + $0x60] sm:$0xf] %vm833_vm4, %v1078_v23 }
 0x185   : > { %v656_v27 = vld [vmem:[#allocation2 + $0x60] sm:$0xff]  ;;  %845 = vst.msk [vmem:[%s1779_s21 + $0x2c] sm:$0xf] %vm833_vm4, %v1065_v25  ;;  %859 = vst.msk [vmem:[%s1779_s21 + $0x64] sm:$0xf] %vm833_vm4, %v1079_v26  ;;  %v657_v29 = vld [vmem:[#allocation2 + $0x68] sm:$0xff] }
 0x186   : > { %v689_v28 = vadd.f32 %v1767_v34, %v656_v27  ;;  %v690_v31 = vadd.f32 %v1767_v34, %v657_v29 }
 0x188   : > { %v715_v30 = vmax.f32 %v689_v28, 0.0  ;;  %v716_v33 = vmax.f32 %v690_v31, 0.0 }
 0x18a   : > { %v1066_v32 = vpack.c.bf16 %v715_v30, %v715_v30  ;;  %v1067_v35 = vpack.c.bf16 %v716_v33, %v716_v33 }
 0x18c   : > { %846 = vst.msk [vmem:[%s1779_s21 + $0x30] sm:$0xf] %vm833_vm4, %v1066_v32  ;;  %847 = vst.msk [vmem:[%s1779_s21 + $0x34] sm:$0xf] %vm833_vm4, %v1067_v35 }
 0x18d   : > { %1354 = shalt.err (!%p1351_p2)
}
 0x18e   : > { %s1355_s11 = scalar_lea.hbm %s1874_s28, 1664  ;;  %s1359_s5 = scalar_lea.hbm %s1932_s3, 3328 }
 0x18f   : > { %p1356_p8 = scmp.ne.s32.totalorder %s1874_s28, %s1355_s11  ;;  %p1360_p7 = scmp.lt.u32.totalorder %s1874_s28, %s1932_s3 }
 0x190   : > { %p1361_p12 = scmp.lt.u32.totalorder %s1359_s5, %s1355_s11  ;;  %p1363_p5 = scmp.lt.u32.totalorder %s1355_s11, %s1874_s28 }
 0x191   : > { %p1357_p13 = pnand %p1356_p8, %p1951_p10 }
 0x192   : > { %p1362_p3 = por %p1361_p12, %p1360_p7 }
 0x193   : > { %p1358_p4 = pneg %p1357_p13 }
 0x194   : > { %p1364_p11 = por %p1363_p5, %p1362_p3 }
 0x196   : > { %p1365_p1 = pnand %p1364_p11, %p1358_p4 }
 0x198   : > { %1368 = shalt.err (!%p1365_p1)
}
 0x199   : > { %s1437_s21 = smov 64   ;;  %s1438_s23 = smov 4  }
 0x19a   : > { %1163 = dma.vmem_to_hbm [thread:$0]  (%p1951_p10), %s1876_s26, 1664, %s1874_s28, %s861_s15, %s1437_s21, %s1437_s21, %s1438_s23  }
 0x19b PF: > { %s890_s29 = sand.u32 1, %s1407_s12   ;;  %p1952_p0 = scmp.ne.s32.totalorder %s1943_s25, 0 }
 0x19c   : > { %p1953_p6 = scmp.ge.s32.totalorder %s1427_s17, 2  ;;  %s891_s9 = scalar_lea.sflag [#allocation5], %s890_s29 }
 0x19e   : > { %p1177_p9 = pnand %p1953_p6, %p1952_p0 }
 0x1a0   : > { %1402 = dma.done.wait (!%p1177_p9), %s891_s9, 1664  }
 0x1a1   : > { %1404 = vsyncadd (!%p1177_p9), %s891_s9, 4294965632  ;;  %s20_s17 = sadd.s32 1, %s1427_s17   ;;  %s1954_s12 = smov %s1411_s13 }
 0x1a2   : > { %p17_p2 = scmp.ge.s32.totalorder %s20_s17, 4   ;;  %s1955_s13 = smov %s1415_s14 }
 0x1a3   : > { %s1956_s14 = smov %s1608_s4  ;;  %s1957_s15 = smov %s1423_s16 }
 0x1a4   : > { %s1958_s16 = smov %s1960_s27  ;;  %19 = sbr.rel (!%p17_p2) target bundleno = 7 (0x7), region = 95 }
 0x1ab   :  { %896 = vsyncpa [#allocation4], 1 }
 0x1ac   :  { %898 = vsyncpa [#allocation4 + $0x1], 1 }
 0x1ad   :  { %899 = vsyncpa [#allocation7], 1 }
 0x1ae   :  { %900 = vsyncpa [#allocation5], 1 }
 0x1af   :  { %902 = vsyncpa [#allocation5 + $0x1], 1 }

// kernel: wrn_forward.15
= control target key start
LH: loop header
LB: loop body
LE: loop exit
PB: predicated region body
PF: predicated region fallthrough
CT: control target
= control target key end

     0   :  { %8 = vsyncpa [#allocation4], 0  ;;  %s1984_s0 = inlined_call_operand.hbm [shape: bf16[416,36], index: 0, kind: input, shape index: {}]   ;;  %s1985_s1 = inlined_call_operand.hbm [shape: bf16[36,4], index: 1, kind: input, shape index: {}]   ;;  %s1986_s2 = inlined_call_operand.hbm [shape: f32[1,4], index: 2, kind: input, shape index: {}]   ;;  %s1987_s3 = inlined_call_operand.hbm [shape: bf16[416,4], index: 3, kind: output, shape index: {}]  }
   0x1   :  { %10 = vsyncpa [#allocation4 + $0x1], 0 }
   0x2   :  { %11 = vsyncpa [#allocation7], 0 }
   0x3   :  { %12 = vsyncpa [#allocation5], 0 }
   0x4   :  { %14 = vsyncpa [#allocation5 + $0x1], 0  ;;  %s1499_s12 = smov 0   ;;  %s1501_s13 = smov 0  }
   0x5   :  { %s1503_s14 = smov 0   ;;  %s1505_s15 = smov 0  }
   0x6   :  { %s1507_s16 = smov 0   ;;  %s1509_s17 = smov 0  }
   0x7 LB: > { %s1011_s18 = sadd.s32 4294967295, %s1467_s17   ;;  %s1012_s19 = sadd.s32 4294967294, %s1467_s17   ;;  %s1467_s17 = sphi %s1509_s17, %s20_s17   ;;  %s1463_s16 = sphi %s1507_s16, %s2009_s16   ;;  %s1459_s15 = sphi %s1505_s15, %s2008_s15   ;;  %s1455_s14 = sphi %s1503_s14, %s2007_s14   ;;  %s1451_s13 = sphi %s1501_s13, %s2006_s13   ;;  %s1447_s12 = sphi %s1499_s12, %s2005_s12  }
   0x8   : > { %p61_p0 = scmp.ne.s32.totalorder %s1451_s13, %s1447_s12  ;;  %p1533_p1 = scmp.eq.s32.totalorder %s1011_s18, 0 }
   0x9   : > { %p1537_p2 = scmp.eq.s32.totalorder %s1011_s18, 1  ;;  %p147_p3 = scmp.eq.s32.totalorder %s1012_s19, 1 }
   0xa   : > { %s1992_s20 = scalar_select %p1533_p1, 1, 0 }
   0xb   : > { %p1543_p4 = por %p1533_p1, %p61_p0  ;;  %p1013_p5 = scmp.ge.s32.totalorder %s1467_s17, 1 }
   0xc   : > { %p1548_p6 = por %p147_p3, %p61_p0  ;;  %p154_p7 = scmp.lt.s32.totalorder %s1467_s17, 3 }
   0xd   : > { %s1994_s22 = scalar_select %p1543_p4, 1, 0 }
   0xe   : > { %s1995_s23 = scalar_select %p1548_p6, 1, 0 }
   0xf   : > { %p1553_p8 = pnand %p1013_p5, %p154_p7  ;;  %s1469_s25 = smov [#allocation6]  }
  0x10   : > { %s170_s26 = sshll.u32 %s1469_s25, 4  ;;  %s1470_s28 = smov [#allocation8]   ;;  %s1557_s26 = int_to_ptr.vmem [resolvable:$true] %s170_s26 }
  0x11   : > { %p1202_p9 = pneg %p1553_p8  ;;  %s186_s29 = sshll.u32 %s1470_s28, 4  ;;  %s1568_s29 = int_to_ptr.vmem [resolvable:$true] %s186_s29 }
  0x12   : > { %s1295_s5 = scalar_lea.hbm %s1985_s1, 320 }
  0x13   : > { %p1564_p11 = pnand %p1202_p9, %p1533_p1  ;;  %p1296_p12 = scmp.ne.s32.totalorder %s1985_s1, %s1295_s5 }
  0x14   : > { %p1302_p5 = scmp.lt.u32.totalorder %s1295_s5, %s1985_s1 }
  0x15   : > { %p1297_p13 = pneg %p1564_p11 }
  0x17   : > { %p1298_p0 = pnand %p1297_p13, %p1296_p12 }
  0x19   : > { %p1299_p3 = pneg %p1298_p0 }
  0x1b   : > { %p1304_p7 = pnand %p1302_p5, %p1299_p3 }
  0x1d   : > { %1307 = shalt.err (!%p1304_p7)
}
  0x1e   : > { %s1308_s10 = scalar_lea.vmem %s1557_s26, 320  ;;  %p1316_p1 = scmp.lt.s32.totalorder %s1557_s26, %s1557_s26 }
  0x1f   : > { %p1309_p9 = scmp.ne.s32.totalorder %s1557_s26, %s1308_s10  ;;  %p1317_p12 = scmp.lt.s32.totalorder %s1308_s10, %s1308_s10 }
  0x21   : > { %p1311_p10 = pnand %p1309_p9, %p1297_p13  ;;  %p1318_p0 = por %p1317_p12, %p1316_p1 }
  0x23   : > { %p1312_p6 = pneg %p1311_p10 }
  0x25   : > { %p1319_p4 = pnand %p1318_p0, %p1312_p6 }
  0x27   : > { %1322 = shalt.err (!%p1319_p4)
}
  0x28   : > { %s1471_s11 = smov 64   ;;  %s1472_s18 = smov 4  }
  0x29   : > { %1205 = dma.hbm_to_vmem [thread:$0]  (!%p1564_p11), %s1985_s1, 320, %s1557_s26, [#allocation7], %s1471_s11, %s1471_s11, %s1472_s18  }
  0x2a   : > { %s1323_s4 = scalar_lea.hbm %s1986_s2, 16 }
  0x2b   : > { %p1324_p1 = scmp.ne.s32.totalorder %s1986_s2, %s1323_s4  ;;  %p1330_p10 = scmp.lt.u32.totalorder %s1323_s4, %s1986_s2 }
  0x2d   : > { %p1326_p4 = pnand %p1324_p1, %p1297_p13 }
  0x2f   : > { %p1327_p6 = pneg %p1326_p4 }
  0x31   : > { %p1332_p3 = pnand %p1330_p10, %p1327_p6 }
  0x33   : > { %1335 = shalt.err (!%p1332_p3)
}
  0x34   : > { %s1336_s26 = scalar_lea.vmem %s1568_s29, 16  ;;  %s1343_s9 = scalar_lea.vmem %s1568_s29, 32 }
  0x35   : > { %p1337_p5 = scmp.ne.s32.totalorder %s1568_s29, %s1336_s26  ;;  %p1344_p12 = scmp.lt.s32.totalorder %s1568_s29, %s1568_s29 }
  0x36   : > { %p1345_p0 = scmp.lt.s32.totalorder %s1343_s9, %s1336_s26 }
  0x37   : > { %p1339_p7 = pnand %p1337_p5, %p1297_p13 }
  0x38   : > { %p1346_p1 = por %p1345_p0, %p1344_p12 }
  0x39   : > { %p1340_p9 = pneg %p1339_p7 }
  0x3b   : > { %p1347_p4 = pnand %p1346_p1, %p1340_p9 }
  0x3d   : > { %1350 = shalt.err (!%p1347_p4)
}
  0x3e   : > { %1208 = dma.hbm_to_vmem [thread:$0]  (!%p1564_p11), %s1986_s2, 16, %s1568_s29, [#allocation7]  }
  0x3f   : > { %s39_s25 = sadd.s32 1, %s1463_s16  ;;  %s48_s28 = sadd.s32 1, %s1455_s14 }
  0x40   : > { %p41_p13 = scmp.ge.s32.totalorder %s39_s25, 2  ;;  %p55_p6 = scmp.ne.s32.totalorder %s1455_s14, %s1451_s13 }
  0x41   : > { %p56_p10 = scmp.eq.s32.totalorder %s1467_s17, 0  ;;  %p1219_p3 = scmp.lt.s32.totalorder %s1467_s17, 2 }
  0x42   : > { %s2011_s25 = smov (%p41_p13, %s39_s25), 0  ;;  %p1636_p7 = por %p1537_p2, %p55_p6 }
  0x43   : > { %p57_p5 = por %p56_p10, %p55_p6  ;;  %s43_s30 = ssub.s32 %s1463_s16, %s2011_s25 }
  0x44   : > { %s1998_s27 = scalar_select %p1636_p7, 1, 0 }
  0x45   : > { %s197_s4 = sand.u32 1, %s1455_s14   ;;  %p46_p9 = scmp.eq.s32.totalorder %s43_s30, 0 }
  0x46   : > { %s1188_s29 = smul.u32 104, %s197_s4  ;;  %p1643_p11 = pnand %p1219_p3, %p57_p5 }
  0x47   : > { %s1648_s6 = scalar_select %p46_p9, %s1455_s14, %s48_s28  }
  0x48   : > { %s1080_s7 = smul.u32 1664, %s1463_s16  ;;  %s201_s8 = scalar_lea.vmem [#allocation3], %s1188_s29 }
  0x49   : > { %s209_s26 = sshll.u32 %s201_s8, 4  ;;  %s1658_s19 = scalar_lea.sflag [#allocation4], %s197_s4  ;;  %s1656_s26 = int_to_ptr.vmem [resolvable:$true] %s209_s26 }
  0x4a   : > { %s1654_s10 = scalar_lea.hbm %s1984_s0, %s1080_s7  ;;  %p1353_p12 = pneg %p1643_p11 }
  0x4b   : > { %s1351_s30 = scalar_lea.hbm %s1654_s10, 1664  ;;  %s1356_s7 = scalar_lea.hbm %s1984_s0, 3328 }
  0x4c   : > { %p1352_p2 = scmp.ne.s32.totalorder %s1654_s10, %s1351_s30  ;;  %p1357_p4 = scmp.lt.u32.totalorder %s1654_s10, %s1984_s0 }
  0x4d   : > { %p1358_p13 = scmp.lt.u32.totalorder %s1356_s7, %s1351_s30  ;;  %p1360_p10 = scmp.lt.u32.totalorder %s1351_s30, %s1654_s10 }
  0x4e   : > { %p1354_p0 = pnand %p1353_p12, %p1352_p2 }
  0x4f   : > { %p1359_p6 = por %p1358_p13, %p1357_p4 }
  0x50   : > { %p1355_p1 = pneg %p1354_p0 }
  0x51   : > { %p1361_p3 = por %p1360_p10, %p1359_p6 }
  0x53   : > { %p1362_p5 = pnand %p1361_p3, %p1355_p1 }
  0x55   : > { %1365 = shalt.err (!%p1362_p5)
}
  0x56   : > { %s1366_s4 = scalar_lea.vmem %s1656_s26, 1664  ;;  %s1473_s9 = smov [#allocation3]  }
  0x57   : > { %p1367_p9 = scmp.ne.s32.totalorder %s1656_s26, %s1366_s4  ;;  %s1371_s28 = sshll.u32 %s1473_s9, 4  ;;  %s1372_s28 = int_to_ptr.vmem [resolvable:$false] %s1371_s28 }
  0x58   : > { %s1373_s29 = scalar_lea.vmem %s1372_s28, 3328  ;;  %p1374_p7 = scmp.lt.s32.totalorder %s1656_s26, %s1372_s28 }
  0x59   : > { %p1369_p2 = pnand %p1367_p9, %p1353_p12  ;;  %p1375_p4 = scmp.lt.s32.totalorder %s1373_s29, %s1366_s4 }
  0x5b   : > { %p1370_p0 = pneg %p1369_p2  ;;  %p1376_p13 = por %p1375_p4, %p1374_p7 }
  0x5d   : > { %p1377_p6 = pnand %p1376_p13, %p1370_p0 }
  0x5f   : > { %1380 = shalt.err (!%p1377_p6)
}
  0x60   : > { %1212 = dma.hbm_to_vmem [thread:$0]  (!%p1643_p11), %s1654_s10, 1664, %s1656_s26, %s1658_s19, %s1471_s11, %s1471_s11, %s1472_s18  }
  0x61   : > { %221 = sbr.rel (%p1553_p8) target bundleno = 415 (0x19f), region = 32  ;;  %s1692_s30 = sand.u32 (!%p1553_p8), 1, %s1451_s13  }
  0x62   : > { %s1189_s7 = smul.u32 (!%p1553_p8), 104, %s1692_s30  ;;  %s224_s8 = scalar_lea.sflag (!%p1553_p8), [#allocation4], %s1692_s30 }
  0x63   : > { %p2000_p7 = scmp.ne.s32.totalorder (!%p1553_p8), %s1994_s22, 0 }
  0x64   : > { %s1698_s5 = scalar_lea.vmem (!%p1553_p8), [#allocation3], %s1189_s7 }
  0x68   : > { %1434 = dma.done.wait (%p2000_p7), %s224_s8, 1664  }
  0x69   : > { %1436 = vsyncadd (%p2000_p7), %s224_s8, 4294965632  ;;  %p2001_p11 = scmp.ne.s32.totalorder %s1992_s20, 0 }
  0x6b   : > { %1438 = dma.done.wait (%p2001_p11), [#allocation7], 336  }
  0x6c   : > { %1440 = vsyncadd (%p2001_p11), [#allocation7], 4294966960  ;;  %v1474_v0 = vmov 0.0   ;;  %vm266_vm0 = vcmask 31744   ;;  %vm1475_vm1 = vmmov 0   ;;  %v1279_v1 = vld [vmem:[#allocation6] sm:$0xff]  }
  0x6d   : > { %1124 = vmatprep.subr.bf16.mxu0 %v1474_v0  ;;  %1182 = vmatprep.subr.bf16.mxu1 %v1474_v0  ;;  %267 = vst.msk [vmem:[#allocation2] sm:$0xff] %vm266_vm0, %v1474_v0  ;;  %268 = vst.msk [vmem:[#allocation2 + $0x8] sm:$0xff] %vm266_vm0, %v1474_v0  ;;  %v1280_v2 = vld [vmem:[#allocation6 + $0x8] sm:$0xff]   ;;  %v1281_v3 = vld [vmem:[#allocation6 + $0x10] ss:$0 sps:$4 sm:$0x33]  }
  0x6e   : > { %1130 = vmatprep.mubr.msk.bf16.mxu0 %vm1475_vm1, %v1474_v0  ;;  %1158 = vmatprep.mubr.msk.bf16.mxu1 %vm1475_vm1, %v1474_v0  ;;  %269 = vst.msk [vmem:[#allocation2 + $0x10] sm:$0xff] %vm266_vm0, %v1474_v0  ;;  %270 = vst.msk [vmem:[#allocation2 + $0x18] sm:$0xff] %vm266_vm0, %v1474_v0  ;;  %vm470_vm2 = vcmask 1041408   ;;  %v1282_v5 = vld [vmem:[%s1698_s5] sm:$0xff]   ;;  %v1283_v6 = vld [vmem:[%s1698_s5 + $0x38] sm:$0xff]   ;;  %vm430_vm3 = vcmask 293888  }
  0x6f   : > { %271 = vst.msk [vmem:[#allocation2 + $0x20] sm:$0xff] %vm266_vm0, %v1474_v0  ;;  %272 = vst.msk [vmem:[#allocation2 + $0x28] sm:$0xff] %vm266_vm0, %v1474_v0  ;;  %1125 = vmatpush3.bf16.msra.mxu0 %v1279_v1  ;;  %1185 = vmatpush3.bf16.msra.mxu1 %v1279_v1  ;;  %v472_v4 = vsel %vm470_vm2, %v1281_v3, 0  ;;  %v1284_v7 = vld [vmem:[%s1698_s5 + $0x8] sm:$0xff]   ;;  %v1285_v8 = vld [vmem:[%s1698_s5 + $0x40] sm:$0xff]   ;;  %vm856_vm4 = vcmask 27648  }
  0x70   : > { %273 = vst.msk [vmem:[#allocation2 + $0x30] sm:$0xff] %vm266_vm0, %v1474_v0  ;;  %274 = vst.msk [vmem:[#allocation2 + $0x38] sm:$0xff] %vm266_vm0, %v1474_v0  ;;  %1126 = vmatprep.subr.bf16.mxu0 %v1474_v0  ;;  %1183 = vmatprep.subr.bf16.mxu1 %v1474_v0  ;;  %v1286_v9 = vld [vmem:[%s1698_s5 + $0x10] sm:$0xff]   ;;  %v1287_v10 = vld [vmem:[%s1698_s5 + $0x48] sm:$0xff]   ;;  %s1834_s20 = scalar_lea.vmem [#allocation9], %s1189_s7  ;;  %s1107_s22 = smul.u32 1664, %s1459_s15 }
  0x71   : > { %275 = vst.msk [vmem:[#allocation2 + $0x40] sm:$0xff] %vm266_vm0, %v1474_v0  ;;  %276 = vst.msk [vmem:[#allocation2 + $0x48] sm:$0xff] %vm266_vm0, %v1474_v0  ;;  %v1288_v11 = vld [vmem:[%s1698_s5 + $0x18] sm:$0xff]   ;;  %v1289_v12 = vld [vmem:[%s1698_s5 + $0x50] sm:$0xff]   ;;  %s898_s24 = sshll.u32 %s1834_s20, 4  ;;  %s884_s15 = scalar_lea.sflag [#allocation5], %s1692_s30  ;;  %s1931_s24 = int_to_ptr.vmem [resolvable:$true] %s898_s24 }
  0x72   : > { %277 = vst.msk [vmem:[#allocation2 + $0x50] sm:$0xff] %vm266_vm0, %v1474_v0  ;;  %278 = vst.msk [vmem:[#allocation2 + $0x58] sm:$0xff] %vm266_vm0, %v1474_v0  ;;  %v1290_v13 = vld [vmem:[%s1698_s5 + $0x20] sm:$0xff]   ;;  %v1291_v14 = vld [vmem:[%s1698_s5 + $0x58] sm:$0xff]   ;;  %s1929_s26 = scalar_lea.hbm %s1987_s3, %s1107_s22  ;;  %s1381_s10 = scalar_lea.vmem %s1931_s24, 1664 }
  0x73   : > { %279 = vst.msk [vmem:[#allocation2 + $0x60] sm:$0xff] %vm266_vm0, %v1474_v0  ;;  %280 = vst.msk [vmem:[#allocation2 + $0x68] sm:$0xff] %vm266_vm0, %v1474_v0  ;;  %1127 = vmatpush3.bf16.msra.mxu0 %v1280_v2  ;;  %1186 = vmatpush3.bf16.msra.mxu1 %v1280_v2  ;;  %v1292_v15 = vld [vmem:[%s1698_s5 + $0x28] sm:$0xff]   ;;  %v1293_v16 = vld [vmem:[%s1698_s5 + $0x60] sm:$0xff]   ;;  %p1382_p8 = scmp.ne.s32.totalorder %s1931_s24, %s1381_s10  ;;  %p2002_p12 = scmp.ne.s32.totalorder %s1998_s27, 0 }
  0x74   : > { %281 = vst.msk [vmem:[#allocation2 + $0x70] sm:$0xff] %vm266_vm0, %v1474_v0  ;;  %282 = vst.msk [vmem:[#allocation2 + $0x78] sm:$0xff] %vm266_vm0, %v1474_v0  ;;  %1128 = vmatprep.subr.bf16.mxu0 %v1474_v0  ;;  %1184 = vmatprep.subr.bf16.mxu1 %v1474_v0  ;;  %v1294_v17 = vld [vmem:[%s1698_s5 + $0x30] sm:$0xff]   ;;  %v1822_v36 = vld [vmem:[#allocation8] ss:$0 sm:$0xff]  ;;  %s1476_s19 = smov [#allocation9]  }
  0x75   : > { %283 = vst.msk [vmem:[#allocation2 + $0x80] sm:$0xff] %vm266_vm0, %v1474_v0  ;;  %284 = vst.msk [vmem:[#allocation2 + $0x88] sm:$0xff] %vm266_vm0, %v1474_v0  ;;  %v293_v18 = vld [vmem:[#allocation2] sm:$0xff]  ;;  %v294_v21 = vld [vmem:[#allocation2 + $0x8] sm:$0xff]  ;;  %p1383_p1 = pnand %p1382_p8, %p2002_p12  ;;  %s1385_s21 = sshll.u32 %s1476_s19, 4  ;;  %s1386_s21 = int_to_ptr.vmem [resolvable:$false] %s1385_s21 }
  0x76   : > { %285 = vst.msk [vmem:[#allocation2 + $0x90] sm:$0xff] %vm266_vm0, %v1474_v0  ;;  %286 = vst.msk [vmem:[#allocation2 + $0x98] sm:$0xff] %vm266_vm0, %v1474_v0  ;;  %v295_v34 = vld [vmem:[#allocation2 + $0x10] sm:$0xff]  ;;  %v296_v38 = vld [vmem:[#allocation2 + $0x18] sm:$0xff]  ;;  %s1387_s4 = scalar_lea.vmem %s1386_s21, 3328  ;;  %p1388_p3 = scmp.lt.s32.totalorder %s1931_s24, %s1386_s21 }
  0x77   : > { %287 = vst.msk [vmem:[#allocation2 + $0xa0] sm:$0xff] %vm266_vm0, %v1474_v0  ;;  %288 = vst.msk [vmem:[#allocation2 + $0xa8] sm:$0xff] %vm266_vm0, %v1474_v0  ;;  %1129 = vmatpush3.bf16.msra.mxu0 %v472_v4  ;;  %1187 = vmatpush3.bf16.msra.mxu1 %v472_v4  ;;  %v297_v61 = vld [vmem:[#allocation2 + $0x20] sm:$0xff]  ;;  %v298_v4 = vld [vmem:[#allocation2 + $0x28] sm:$0xff]  ;;  %p1384_p10 = pneg %p1383_p1  ;;  %p1389_p5 = scmp.lt.s32.totalorder %s1387_s4, %s1381_s10 }
  0x78   : > { %289 = vst.msk [vmem:[#allocation2 + $0xb0] sm:$0xff] %vm266_vm0, %v1474_v0  ;;  %290 = vst.msk [vmem:[#allocation2 + $0xb8] sm:$0xff] %vm266_vm0, %v1474_v0 }
  0x79   : > { %291 = vst.msk [vmem:[#allocation2 + $0xc0] sm:$0xff] %vm266_vm0, %v1474_v0  ;;  %292 = vst.msk [vmem:[#allocation2 + $0xc8] sm:$0xff] %vm266_vm0, %v1474_v0  ;;  %p1390_p9 = por %p1389_p5, %p1388_p3 }
  0x7a   : > { %1131 = vmatmul.mubr.msk.bf16.vlgmr.msra.gmra.mrb[0].mxu0 %vm430_vm3, %v1282_v5  ;;  %1159 = vmatmul.mubr.msk.bf16.vlgmr.msra.gmra.mrb[0].mxu1 %vm430_vm3, %v1283_v6 }
  0x7b   : > { %1134 = vmatprep.mubr.msk.bf16.mxu0 %vm1475_vm1, %v1474_v0  ;;  %1162 = vmatprep.mubr.msk.bf16.mxu1 %vm1475_vm1, %v1474_v0  ;;  %v307_v19 = vld [vmem:[#allocation2 + $0x70] sm:$0xff]  ;;  %v308_v23 = vld [vmem:[#allocation2 + $0x78] sm:$0xff]  ;;  %p1391_p2 = pnand %p1390_p9, %p1384_p10 }
  0x7c   : > { %v309_v35 = vld [vmem:[#allocation2 + $0x80] sm:$0xff]  ;;  %v310_v40 = vld [vmem:[#allocation2 + $0x88] sm:$0xff] }
  0x7d   : > { %v311_v62 = vld [vmem:[#allocation2 + $0x90] sm:$0xff]  ;;  %v312_v6 = vld [vmem:[#allocation2 + $0x98] sm:$0xff] }
  0x82   : > { %1135 = vmatmul.mubr.msk.bf16.gmra.mrb[4].mxu0 %vm430_vm3, %v1284_v7  ;;  %1163 = vmatmul.mubr.msk.bf16.gmra.mrb[4].mxu1 %vm430_vm3, %v1285_v8 }
  0x83   : > { %1138 = vmatprep.mubr.msk.bf16.mxu0 %vm1475_vm1, %v1474_v0  ;;  %1166 = vmatprep.mubr.msk.bf16.mxu1 %vm1475_vm1, %v1474_v0 }
  0x8a   : > { %1139 = vmatmul.mubr.msk.bf16.gmra.mrb[8].mxu0 %vm430_vm3, %v1286_v9  ;;  %1167 = vmatmul.mubr.msk.bf16.gmra.mrb[8].mxu1 %vm430_vm3, %v1287_v10 }
  0x8b   : > { %1142 = vmatprep.mubr.msk.bf16.mxu0 %vm1475_vm1, %v1474_v0  ;;  %1170 = vmatprep.mubr.msk.bf16.mxu1 %vm1475_vm1, %v1474_v0 }
  0x92   : > { %1143 = vmatmul.mubr.msk.bf16.gmra.mrb[12].mxu0 %vm430_vm3, %v1288_v11  ;;  %1171 = vmatmul.mubr.msk.bf16.gmra.mrb[12].mxu1 %vm430_vm3, %v1289_v12 }
  0x93   : > { %1146 = vmatprep.mubr.msk.bf16.mxu0 %vm1475_vm1, %v1474_v0  ;;  %1174 = vmatprep.mubr.msk.bf16.mxu1 %vm1475_vm1, %v1474_v0 }
  0x9a   : > { %1147 = vmatmul.mubr.msk.bf16.gmra.mrb[16].mxu0 %vm430_vm3, %v1290_v13  ;;  %1175 = vmatmul.mubr.msk.bf16.gmra.mrb[16].mxu1 %vm430_vm3, %v1291_v14 }
  0x9b   : > { %1150 = vmatprep.mubr.msk.bf16.mxu0 %vm1475_vm1, %v1474_v0  ;;  %1178 = vmatprep.mubr.msk.bf16.mxu1 %vm1475_vm1, %v1474_v0 }
  0xa2   : > { %1151 = vmatmul.mubr.msk.bf16.gmra.mrb[20].mxu0 %vm430_vm3, %v1292_v15  ;;  %1179 = vmatmul.mubr.msk.bf16.gmra.mrb[20].mxu1 %vm430_vm3, %v1293_v16 }
  0xa3   : > { %1154 = vmatprep.mubr.msk.bf16.mxu0 %vm1475_vm1, %v1474_v0 }
  0xaa   : > { %1155 = vmatmul.mubr.msk.bf16.gmra.mrb[24].mxu0 %vm430_vm3, %v1294_v17 }
 0x14d   : > { %v508_v20 = vpop.f32.mrb[0].mxu0  ;;  %v564_v22 = vpop.f32.mrb[0].mxu1 }
 0x14e   : > { %v611_v24 = vadd.f32 %v508_v20, %v293_v18  ;;  %v1132_v25 = vpop.f32.mrb[1].mxu0  ;;  %v625_v26 = vadd.f32 %v564_v22, %v307_v19  ;;  %v1160_v27 = vpop.f32.mrb[1].mxu1 }
 0x14f   : > { %v511_v28 = vpop.f32.mrb[2].mxu0  ;;  %v567_v29 = vpop.f32.mrb[2].mxu1 }
 0x150   : > { %638 = vst.msk [vmem:[#allocation2] sm:$0xff] %vm266_vm0, %v611_v24  ;;  %v612_v30 = vadd.f32 %v511_v28, %v294_v21  ;;  %v1133_v31 = vpop.f32.mrb[3].mxu0  ;;  %652 = vst.msk [vmem:[#allocation2 + $0x70] sm:$0xff] %vm266_vm0, %v625_v26  ;;  %v626_v32 = vadd.f32 %v567_v29, %v308_v23  ;;  %v1161_v33 = vpop.f32.mrb[3].mxu1  ;;  %v299_v29 = vld [vmem:[#allocation2 + $0x30] sm:$0xff] }
 0x152   : > { %639 = vst.msk [vmem:[#allocation2 + $0x8] sm:$0xff] %vm266_vm0, %v612_v30  ;;  %653 = vst.msk [vmem:[#allocation2 + $0x78] sm:$0xff] %vm266_vm0, %v626_v32  ;;  %v313_v30 = vld [vmem:[#allocation2 + $0xa0] sm:$0xff] }
 0x155   : > { %v516_v37 = vpop.f32.mrb[4].mxu0  ;;  %v572_v39 = vpop.f32.mrb[4].mxu1 }
 0x156   : > { %v613_v41 = vadd.f32 %v516_v37, %v295_v34  ;;  %v1136_v42 = vpop.f32.mrb[5].mxu0  ;;  %v627_v43 = vadd.f32 %v572_v39, %v309_v35  ;;  %v1164_v44 = vpop.f32.mrb[5].mxu1  ;;  %v300_v37 = vld [vmem:[#allocation2 + $0x38] sm:$0xff]  ;;  %v314_v39 = vld [vmem:[#allocation2 + $0xa8] sm:$0xff] }
 0x157   : > { %v667_v45 = vld [vmem:[#allocation2] sm:$0xff]  ;;  %v681_v46 = vld [vmem:[#allocation2 + $0x70] sm:$0xff]  ;;  %v519_v47 = vpop.f32.mrb[6].mxu0  ;;  %v575_v48 = vpop.f32.mrb[6].mxu1 }
 0x158   : > { %v700_v49 = vadd.f32 %v1822_v36, %v667_v45  ;;  %v714_v50 = vadd.f32 %v1822_v36, %v681_v46  ;;  %640 = vst.msk [vmem:[#allocation2 + $0x10] sm:$0xff] %vm266_vm0, %v613_v41  ;;  %v614_v51 = vadd.f32 %v519_v47, %v296_v38  ;;  %v1137_v52 = vpop.f32.mrb[7].mxu0  ;;  %654 = vst.msk [vmem:[#allocation2 + $0x80] sm:$0xff] %vm266_vm0, %v627_v43  ;;  %v1165_v54 = vpop.f32.mrb[7].mxu1 }
 0x159   : > { %v628_v53 = vadd.f32 %v575_v48, %v310_v40  ;;  %v668_v55 = vld [vmem:[#allocation2 + $0x8] sm:$0xff]  ;;  %v682_v56 = vld [vmem:[#allocation2 + $0x78] sm:$0xff] }
 0x15a   : > { %v726_v57 = vmax.f32 %v700_v49, 0.0  ;;  %v701_v58 = vadd.f32 %v1822_v36, %v668_v55  ;;  %v740_v59 = vmax.f32 %v714_v50, 0.0  ;;  %v715_v60 = vadd.f32 %v1822_v36, %v682_v56  ;;  %641 = vst.msk [vmem:[#allocation2 + $0x18] sm:$0xff] %vm266_vm0, %v614_v51 }
 0x15b   : > { %655 = vst.msk [vmem:[#allocation2 + $0x88] sm:$0xff] %vm266_vm0, %v628_v53 }
 0x15c   : > { %v1081_v63 = vpack.c.bf16 %v726_v57, %v726_v57  ;;  %v727_v0 = vmax.f32 %v701_v58, 0.0  ;;  %v1095_v1 = vpack.c.bf16 %v740_v59, %v740_v59  ;;  %v741_v2 = vmax.f32 %v715_v60, 0.0 }
 0x15d   : > { %v524_v3 = vpop.f32.mrb[8].mxu0  ;;  %v580_v5 = vpop.f32.mrb[8].mxu1 }
 0x15e   : > { %857 = vst.msk [vmem:[%s1834_s20] sm:$0xf] %vm856_vm4, %v1081_v63  ;;  %v1082_v7 = vpack.c.bf16 %v727_v0, %v727_v0  ;;  %871 = vst.msk [vmem:[%s1834_s20 + $0x38] sm:$0xf] %vm856_vm4, %v1095_v1  ;;  %v1096_v8 = vpack.c.bf16 %v741_v2, %v741_v2  ;;  %v615_v9 = vadd.f32 %v524_v3, %v297_v61  ;;  %v1140_v10 = vpop.f32.mrb[9].mxu0  ;;  %v1168_v12 = vpop.f32.mrb[9].mxu1 }
 0x15f   : > { %v629_v11 = vadd.f32 %v580_v5, %v311_v62  ;;  %v669_v13 = vld [vmem:[#allocation2 + $0x10] sm:$0xff]  ;;  %v683_v14 = vld [vmem:[#allocation2 + $0x80] sm:$0xff]  ;;  %v527_v15 = vpop.f32.mrb[10].mxu0  ;;  %v583_v16 = vpop.f32.mrb[10].mxu1  ;;  %v302_v5 = vld [vmem:[#allocation2 + $0x48] sm:$0xff] }
 0x160   : > { %858 = vst.msk [vmem:[%s1834_s20 + $0x4] sm:$0xf] %vm856_vm4, %v1082_v7  ;;  %872 = vst.msk [vmem:[%s1834_s20 + $0x3c] sm:$0xf] %vm856_vm4, %v1096_v8  ;;  %v702_v17 = vadd.f32 %v1822_v36, %v669_v13  ;;  %v716_v18 = vadd.f32 %v1822_v36, %v683_v14  ;;  %v616_v19 = vadd.f32 %v527_v15, %v298_v4  ;;  %v1141_v20 = vpop.f32.mrb[11].mxu0  ;;  %v1169_v22 = vpop.f32.mrb[11].mxu1 }
 0x161   : > { %642 = vst.msk [vmem:[#allocation2 + $0x20] sm:$0xff] %vm266_vm0, %v615_v9  ;;  %656 = vst.msk [vmem:[#allocation2 + $0x90] sm:$0xff] %vm266_vm0, %v629_v11  ;;  %v630_v21 = vadd.f32 %v583_v16, %v312_v6  ;;  %v670_v23 = vld [vmem:[#allocation2 + $0x18] sm:$0xff]  ;;  %v301_v62 = vld [vmem:[#allocation2 + $0x40] sm:$0xff] }
 0x162   : > { %v684_v24 = vld [vmem:[#allocation2 + $0x88] sm:$0xff]  ;;  %v728_v25 = vmax.f32 %v702_v17, 0.0  ;;  %v703_v26 = vadd.f32 %v1822_v36, %v670_v23  ;;  %v742_v27 = vmax.f32 %v716_v18, 0.0  ;;  %643 = vst.msk [vmem:[#allocation2 + $0x28] sm:$0xff] %vm266_vm0, %v616_v19  ;;  %v315_v63 = vld [vmem:[#allocation2 + $0xb0] sm:$0xff]  ;;  %v316_v7 = vld [vmem:[#allocation2 + $0xb8] sm:$0xff] }
 0x163   : > { %v717_v28 = vadd.f32 %v1822_v36, %v684_v24  ;;  %657 = vst.msk [vmem:[#allocation2 + $0x98] sm:$0xff] %vm266_vm0, %v630_v21 }
 0x164   : > { %v1083_v31 = vpack.c.bf16 %v728_v25, %v728_v25  ;;  %v729_v32 = vmax.f32 %v703_v26, 0.0  ;;  %v1097_v33 = vpack.c.bf16 %v742_v27, %v742_v27 }
 0x165   : > { %v743_v34 = vmax.f32 %v717_v28, 0.0  ;;  %v532_v35 = vpop.f32.mrb[12].mxu0  ;;  %v588_v38 = vpop.f32.mrb[12].mxu1 }
 0x166   : > { %859 = vst.msk [vmem:[%s1834_s20 + $0x8] sm:$0xf] %vm856_vm4, %v1083_v31  ;;  %v1084_v40 = vpack.c.bf16 %v729_v32, %v729_v32  ;;  %873 = vst.msk [vmem:[%s1834_s20 + $0x40] sm:$0xf] %vm856_vm4, %v1097_v33  ;;  %v617_v42 = vadd.f32 %v532_v35, %v299_v29  ;;  %v1144_v43 = vpop.f32.mrb[13].mxu0  ;;  %v631_v44 = vadd.f32 %v588_v38, %v313_v30  ;;  %v1172_v45 = vpop.f32.mrb[13].mxu1 }
 0x167   : > { %v1098_v41 = vpack.c.bf16 %v743_v34, %v743_v34  ;;  %v535_v48 = vpop.f32.mrb[14].mxu0  ;;  %v591_v49 = vpop.f32.mrb[14].mxu1  ;;  %v303_v30 = vld [vmem:[#allocation2 + $0x50] sm:$0xff]  ;;  %v317_v31 = vld [vmem:[#allocation2 + $0xc0] sm:$0xff]  ;;  %v304_v38 = vld [vmem:[#allocation2 + $0x58] sm:$0xff] }
 0x168   : > { %v671_v46 = vld [vmem:[#allocation2 + $0x20] sm:$0xff]  ;;  %v685_v47 = vld [vmem:[#allocation2 + $0x90] sm:$0xff]  ;;  %860 = vst.msk [vmem:[%s1834_s20 + $0xc] sm:$0xf] %vm856_vm4, %v1084_v40  ;;  %v618_v52 = vadd.f32 %v535_v48, %v300_v37  ;;  %v1145_v53 = vpop.f32.mrb[15].mxu0  ;;  %v632_v54 = vadd.f32 %v591_v49, %v314_v39  ;;  %v1173_v55 = vpop.f32.mrb[15].mxu1 }
 0x169   : > { %874 = vst.msk [vmem:[%s1834_s20 + $0x44] sm:$0xf] %vm856_vm4, %v1098_v41  ;;  %v704_v50 = vadd.f32 %v1822_v36, %v671_v46  ;;  %v718_v51 = vadd.f32 %v1822_v36, %v685_v47  ;;  %v672_v56 = vld [vmem:[#allocation2 + $0x28] sm:$0xff] }
 0x16a   : > { %644 = vst.msk [vmem:[#allocation2 + $0x30] sm:$0xff] %vm266_vm0, %v617_v42  ;;  %658 = vst.msk [vmem:[#allocation2 + $0xa0] sm:$0xff] %vm266_vm0, %v631_v44  ;;  %v686_v57 = vld [vmem:[#allocation2 + $0x98] sm:$0xff]  ;;  %v705_v59 = vadd.f32 %v1822_v36, %v672_v56  ;;  %v318_v40 = vld [vmem:[#allocation2 + $0xc8] sm:$0xff] }
 0x16b   : > { %v730_v58 = vmax.f32 %v704_v50, 0.0  ;;  %v744_v60 = vmax.f32 %v718_v51, 0.0  ;;  %v719_v61 = vadd.f32 %v1822_v36, %v686_v57  ;;  %645 = vst.msk [vmem:[#allocation2 + $0x38] sm:$0xff] %vm266_vm0, %v618_v52  ;;  %659 = vst.msk [vmem:[#allocation2 + $0xa8] sm:$0xff] %vm266_vm0, %v632_v54 }
 0x16c   : > { %v731_v1 = vmax.f32 %v705_v59, 0.0 }
 0x16d   : > { %v1085_v0 = vpack.c.bf16 %v730_v58, %v730_v58  ;;  %v1099_v2 = vpack.c.bf16 %v744_v60, %v744_v60  ;;  %v745_v3 = vmax.f32 %v719_v61, 0.0  ;;  %v540_v4 = vpop.f32.mrb[16].mxu0  ;;  %v596_v6 = vpop.f32.mrb[16].mxu1 }
 0x16e   : > { %v1086_v8 = vpack.c.bf16 %v731_v1, %v731_v1  ;;  %v619_v10 = vadd.f32 %v540_v4, %v301_v62  ;;  %v1148_v11 = vpop.f32.mrb[17].mxu0  ;;  %v633_v12 = vadd.f32 %v596_v6, %v315_v63  ;;  %v1176_v13 = vpop.f32.mrb[17].mxu1  ;;  %v305_v63 = vld [vmem:[#allocation2 + $0x60] sm:$0xff] }
 0x16f   : > { %861 = vst.msk [vmem:[%s1834_s20 + $0x10] sm:$0xf] %vm856_vm4, %v1085_v0  ;;  %875 = vst.msk [vmem:[%s1834_s20 + $0x48] sm:$0xf] %vm856_vm4, %v1099_v2  ;;  %v1100_v9 = vpack.c.bf16 %v745_v3, %v745_v3  ;;  %v543_v16 = vpop.f32.mrb[18].mxu0  ;;  %v599_v17 = vpop.f32.mrb[18].mxu1 }
 0x170   : > { %862 = vst.msk [vmem:[%s1834_s20 + $0x14] sm:$0xf] %vm856_vm4, %v1086_v8  ;;  %v620_v20 = vadd.f32 %v543_v16, %v302_v5  ;;  %v1149_v21 = vpop.f32.mrb[19].mxu0  ;;  %v634_v22 = vadd.f32 %v599_v17, %v316_v7  ;;  %v1177_v23 = vpop.f32.mrb[19].mxu1  ;;  %v306_v5 = vld [vmem:[#allocation2 + $0x68] sm:$0xff] }
 0x171   : > { %v673_v14 = vld [vmem:[#allocation2 + $0x30] sm:$0xff]  ;;  %v687_v15 = vld [vmem:[#allocation2 + $0xa0] sm:$0xff]  ;;  %876 = vst.msk [vmem:[%s1834_s20 + $0x4c] sm:$0xf] %vm856_vm4, %v1100_v9 }
 0x172   : > { %v706_v18 = vadd.f32 %v1822_v36, %v673_v14  ;;  %v720_v19 = vadd.f32 %v1822_v36, %v687_v15  ;;  %646 = vst.msk [vmem:[#allocation2 + $0x40] sm:$0xff] %vm266_vm0, %v619_v10  ;;  %660 = vst.msk [vmem:[#allocation2 + $0xb0] sm:$0xff] %vm266_vm0, %v633_v12  ;;  %v674_v24 = vld [vmem:[#allocation2 + $0x38] sm:$0xff]  ;;  %v688_v25 = vld [vmem:[#allocation2 + $0xa8] sm:$0xff] }
 0x173   : > { %v707_v27 = vadd.f32 %v1822_v36, %v674_v24  ;;  %v721_v29 = vadd.f32 %v1822_v36, %v688_v25  ;;  %647 = vst.msk [vmem:[#allocation2 + $0x48] sm:$0xff] %vm266_vm0, %v620_v20  ;;  %661 = vst.msk [vmem:[#allocation2 + $0xb8] sm:$0xff] %vm266_vm0, %v634_v22 }
 0x174   : > { %v732_v26 = vmax.f32 %v706_v18, 0.0  ;;  %v746_v28 = vmax.f32 %v720_v19, 0.0 }
 0x175   : > { %v733_v33 = vmax.f32 %v707_v27, 0.0  ;;  %v747_v35 = vmax.f32 %v721_v29, 0.0  ;;  %v548_v37 = vpop.f32.mrb[20].mxu0  ;;  %v604_v39 = vpop.f32.mrb[20].mxu1 }
 0x176   : > { %v1087_v32 = vpack.c.bf16 %v732_v26, %v732_v26  ;;  %v1101_v34 = vpack.c.bf16 %v746_v28, %v746_v28  ;;  %v621_v43 = vadd.f32 %v548_v37, %v303_v30  ;;  %v1152_v44 = vpop.f32.mrb[21].mxu0  ;;  %v635_v45 = vadd.f32 %v604_v39, %v317_v31  ;;  %v1180_v46 = vpop.f32.mrb[21].mxu1 }
 0x177   : > { %v1088_v41 = vpack.c.bf16 %v733_v33, %v733_v33  ;;  %v1102_v42 = vpack.c.bf16 %v747_v35, %v747_v35  ;;  %v551_v49 = vpop.f32.mrb[22].mxu0  ;;  %v607_v50 = vpop.f32.mrb[22].mxu1 }
 0x178   : > { %863 = vst.msk [vmem:[%s1834_s20 + $0x18] sm:$0xf] %vm856_vm4, %v1087_v32  ;;  %877 = vst.msk [vmem:[%s1834_s20 + $0x50] sm:$0xf] %vm856_vm4, %v1101_v34  ;;  %v622_v53 = vadd.f32 %v551_v49, %v304_v38  ;;  %v1153_v54 = vpop.f32.mrb[23].mxu0  ;;  %v636_v55 = vadd.f32 %v607_v50, %v318_v40  ;;  %v1181_v56 = vpop.f32.mrb[23].mxu1 }
 0x179   : > { %v675_v47 = vld [vmem:[#allocation2 + $0x40] sm:$0xff]  ;;  %v689_v48 = vld [vmem:[#allocation2 + $0xb0] sm:$0xff]  ;;  %864 = vst.msk [vmem:[%s1834_s20 + $0x1c] sm:$0xf] %vm856_vm4, %v1088_v41  ;;  %878 = vst.msk [vmem:[%s1834_s20 + $0x54] sm:$0xf] %vm856_vm4, %v1102_v42 }
 0x17a   : > { %v708_v51 = vadd.f32 %v1822_v36, %v675_v47  ;;  %v722_v52 = vadd.f32 %v1822_v36, %v689_v48  ;;  %648 = vst.msk [vmem:[#allocation2 + $0x50] sm:$0xff] %vm266_vm0, %v621_v43  ;;  %662 = vst.msk [vmem:[#allocation2 + $0xc0] sm:$0xff] %vm266_vm0, %v635_v45  ;;  %v676_v57 = vld [vmem:[#allocation2 + $0x48] sm:$0xff]  ;;  %v690_v58 = vld [vmem:[#allocation2 + $0xb8] sm:$0xff] }
 0x17b   : > { %v709_v60 = vadd.f32 %v1822_v36, %v676_v57  ;;  %v723_v62 = vadd.f32 %v1822_v36, %v690_v58  ;;  %649 = vst.msk [vmem:[#allocation2 + $0x58] sm:$0xff] %vm266_vm0, %v622_v53  ;;  %663 = vst.msk [vmem:[#allocation2 + $0xc8] sm:$0xff] %vm266_vm0, %v636_v55 }
 0x17c   : > { %v734_v59 = vmax.f32 %v708_v51, 0.0  ;;  %v748_v61 = vmax.f32 %v722_v52, 0.0 }
 0x17d   : > { %v735_v1 = vmax.f32 %v709_v60, 0.0  ;;  %v749_v3 = vmax.f32 %v723_v62, 0.0  ;;  %v556_v4 = vpop.f32.mrb[24].mxu0 }
 0x17e   : > { %v1089_v0 = vpack.c.bf16 %v734_v59, %v734_v59  ;;  %v1103_v2 = vpack.c.bf16 %v748_v61, %v748_v61  ;;  %v623_v8 = vadd.f32 %v556_v4, %v305_v63  ;;  %v1156_v9 = vpop.f32.mrb[25].mxu0 }
 0x17f   : > { %v1090_v6 = vpack.c.bf16 %v735_v1, %v735_v1  ;;  %v1104_v7 = vpack.c.bf16 %v749_v3, %v749_v3  ;;  %v559_v12 = vpop.f32.mrb[26].mxu0 }
 0x180   : > { %865 = vst.msk [vmem:[%s1834_s20 + $0x20] sm:$0xf] %vm856_vm4, %v1089_v0  ;;  %879 = vst.msk [vmem:[%s1834_s20 + $0x58] sm:$0xf] %vm856_vm4, %v1103_v2  ;;  %v624_v15 = vadd.f32 %v559_v12, %v306_v5  ;;  %v1157_v16 = vpop.f32.mrb[27].mxu0 }
 0x181   : > { %v677_v10 = vld [vmem:[#allocation2 + $0x50] sm:$0xff]  ;;  %v691_v11 = vld [vmem:[#allocation2 + $0xc0] sm:$0xff]  ;;  %866 = vst.msk [vmem:[%s1834_s20 + $0x24] sm:$0xf] %vm856_vm4, %v1090_v6  ;;  %880 = vst.msk [vmem:[%s1834_s20 + $0x5c] sm:$0xf] %vm856_vm4, %v1104_v7 }
 0x182   : > { %v710_v13 = vadd.f32 %v1822_v36, %v677_v10  ;;  %v724_v14 = vadd.f32 %v1822_v36, %v691_v11  ;;  %650 = vst.msk [vmem:[#allocation2 + $0x60] sm:$0xff] %vm266_vm0, %v623_v8  ;;  %v678_v17 = vld [vmem:[#allocation2 + $0x58] sm:$0xff]  ;;  %v692_v18 = vld [vmem:[#allocation2 + $0xc8] sm:$0xff]  ;;  %651 = vst.msk [vmem:[#allocation2 + $0x68] sm:$0xff] %vm266_vm0, %v624_v15 }
 0x183   : > { %v711_v20 = vadd.f32 %v1822_v36, %v678_v17  ;;  %v725_v22 = vadd.f32 %v1822_v36, %v692_v18 }
 0x184   : > { %v736_v19 = vmax.f32 %v710_v13, 0.0  ;;  %v750_v21 = vmax.f32 %v724_v14, 0.0 }
 0x185   : > { %v737_v24 = vmax.f32 %v711_v20, 0.0  ;;  %v751_v26 = vmax.f32 %v725_v22, 0.0 }
 0x186   : > { %v1091_v23 = vpack.c.bf16 %v736_v19, %v736_v19  ;;  %v1105_v25 = vpack.c.bf16 %v750_v21, %v750_v21 }
 0x187   : > { %v1092_v27 = vpack.c.bf16 %v737_v24, %v737_v24  ;;  %v1106_v28 = vpack.c.bf16 %v751_v26, %v751_v26 }
 0x188   : > { %867 = vst.msk [vmem:[%s1834_s20 + $0x28] sm:$0xf] %vm856_vm4, %v1091_v23  ;;  %881 = vst.msk [vmem:[%s1834_s20 + $0x60] sm:$0xf] %vm856_vm4, %v1105_v25 }
 0x189   : > { %v679_v29 = vld [vmem:[#allocation2 + $0x60] sm:$0xff]  ;;  %868 = vst.msk [vmem:[%s1834_s20 + $0x2c] sm:$0xf] %vm856_vm4, %v1092_v27  ;;  %882 = vst.msk [vmem:[%s1834_s20 + $0x64] sm:$0xf] %vm856_vm4, %v1106_v28  ;;  %v680_v31 = vld [vmem:[#allocation2 + $0x68] sm:$0xff] }
 0x18a   : > { %v712_v30 = vadd.f32 %v1822_v36, %v679_v29  ;;  %v713_v33 = vadd.f32 %v1822_v36, %v680_v31 }
 0x18c   : > { %v738_v32 = vmax.f32 %v712_v30, 0.0  ;;  %v739_v35 = vmax.f32 %v713_v33, 0.0 }
 0x18e   : > { %v1093_v34 = vpack.c.bf16 %v738_v32, %v738_v32  ;;  %v1094_v37 = vpack.c.bf16 %v739_v35, %v739_v35 }
 0x190   : > { %869 = vst.msk [vmem:[%s1834_s20 + $0x30] sm:$0xf] %vm856_vm4, %v1093_v34  ;;  %870 = vst.msk [vmem:[%s1834_s20 + $0x34] sm:$0xf] %vm856_vm4, %v1094_v37 }
 0x191   : > { %1394 = shalt.err (!%p1391_p2)
}
 0x192   : > { %s1395_s9 = scalar_lea.hbm %s1929_s26, 1664  ;;  %s1399_s7 = scalar_lea.hbm %s1987_s3, 3328 }
 0x193   : > { %p1396_p0 = scmp.ne.s32.totalorder %s1929_s26, %s1395_s9  ;;  %p1400_p6 = scmp.lt.u32.totalorder %s1929_s26, %s1987_s3 }
 0x194   : > { %p1401_p7 = scmp.lt.u32.totalorder %s1399_s7, %s1395_s9  ;;  %p1403_p8 = scmp.lt.u32.totalorder %s1395_s9, %s1929_s26 }
 0x195   : > { %p1397_p4 = pnand %p1396_p0, %p2002_p12 }
 0x196   : > { %p1402_p11 = por %p1401_p7, %p1400_p6 }
 0x197   : > { %p1398_p13 = pneg %p1397_p4 }
 0x198   : > { %p1404_p1 = por %p1403_p8, %p1402_p11 }
 0x19a   : > { %p1405_p10 = pnand %p1404_p1, %p1398_p13 }
 0x19c   : > { %1408 = shalt.err (!%p1405_p10)
}
 0x19d   : > { %s1477_s20 = smov 64   ;;  %s1478_s22 = smov 4  }
 0x19e   : > { %1200 = dma.vmem_to_hbm [thread:$0]  (%p2002_p12), %s1931_s24, 1664, %s1929_s26, %s884_s15, %s1477_s20, %s1477_s20, %s1478_s22  }
 0x19f PF: > { %s913_s11 = sand.u32 1, %s1447_s12   ;;  %p2003_p3 = scmp.ne.s32.totalorder %s1995_s23, 0 }
 0x1a0   : > { %p2004_p5 = scmp.ge.s32.totalorder %s1467_s17, 2  ;;  %s914_s18 = scalar_lea.sflag [#allocation5], %s913_s11 }
 0x1a2   : > { %p1214_p9 = pnand %p2004_p5, %p2003_p3 }
 0x1a4   : > { %1442 = dma.done.wait (!%p1214_p9), %s914_s18, 1664  }
 0x1a5   : > { %1444 = vsyncadd (!%p1214_p9), %s914_s18, 4294965632  ;;  %s20_s17 = sadd.s32 1, %s1467_s17   ;;  %s2005_s12 = smov %s1451_s13 }
 0x1a6   : > { %p17_p2 = scmp.ge.s32.totalorder %s20_s17, 4   ;;  %s2006_s13 = smov %s1455_s14 }
 0x1a7   : > { %s2007_s14 = smov %s1648_s6  ;;  %s2008_s15 = smov %s1463_s16 }
 0x1a8   : > { %s2009_s16 = smov %s2011_s25  ;;  %19 = sbr.rel (!%p17_p2) target bundleno = 7 (0x7), region = 95 }
 0x1af   :  { %919 = vsyncpa [#allocation4], 1 }
 0x1b0   :  { %921 = vsyncpa [#allocation4 + $0x1], 1 }
 0x1b1   :  { %922 = vsyncpa [#allocation7], 1 }
 0x1b2   :  { %923 = vsyncpa [#allocation5], 1 }
 0x1b3   :  { %925 = vsyncpa [#allocation5 + $0x1], 1 }

// kernel: wrn_forward.13
= control target key start
LH: loop header
LB: loop body
LE: loop exit
PB: predicated region body
PF: predicated region fallthrough
CT: control target
= control target key end

     0   :  { %8 = vsyncpa [#allocation4], 0  ;;  %s1903_s0 = inlined_call_operand.hbm [shape: bf16[416,8], index: 0, kind: input, shape index: {}]   ;;  %s1904_s1 = inlined_call_operand.hbm [shape: bf16[8,16], index: 1, kind: input, shape index: {}]   ;;  %s1905_s2 = inlined_call_operand.hbm [shape: f32[1,16], index: 2, kind: input, shape index: {}]   ;;  %s1906_s3 = inlined_call_operand.hbm [shape: bf16[416,16], index: 3, kind: output, shape index: {}]  }
   0x1   :  { %10 = vsyncpa [#allocation4 + $0x1], 0 }
   0x2   :  { %11 = vsyncpa [#allocation7], 0 }
   0x3   :  { %12 = vsyncpa [#allocation5], 0 }
   0x4   :  { %14 = vsyncpa [#allocation5 + $0x1], 0  ;;  %s1433_s12 = smov 0   ;;  %s1435_s13 = smov 0  }
   0x5   :  { %s1437_s14 = smov 0   ;;  %s1439_s15 = smov 0  }
   0x6   :  { %s1441_s16 = smov 0   ;;  %s1443_s17 = smov 0  }
   0x7 LB: > { %s961_s18 = sadd.s32 4294967295, %s1401_s17   ;;  %s962_s19 = sadd.s32 4294967294, %s1401_s17   ;;  %s1401_s17 = sphi %s1443_s17, %s20_s17   ;;  %s1397_s16 = sphi %s1441_s16, %s1932_s16   ;;  %s1393_s15 = sphi %s1439_s15, %s1931_s15   ;;  %s1389_s14 = sphi %s1437_s14, %s1930_s14   ;;  %s1385_s13 = sphi %s1435_s13, %s1929_s13   ;;  %s1381_s12 = sphi %s1433_s12, %s1928_s12  }
   0x8   : > { %s48_s20 = sadd.s32 1, %s1389_s14  ;;  %p55_p0 = scmp.ne.s32.totalorder %s1389_s14, %s1385_s13 }
   0x9   : > { %p56_p1 = scmp.eq.s32.totalorder %s1401_s17, 0  ;;  %p61_p2 = scmp.ne.s32.totalorder %s1385_s13, %s1381_s12 }
   0xa   : > { %p1471_p3 = scmp.eq.s32.totalorder %s961_s18, 0  ;;  %p141_p4 = scmp.eq.s32.totalorder %s961_s18, 1 }
   0xb   : > { %p1475_p5 = por %p56_p1, %p55_p0  ;;  %p147_p6 = scmp.eq.s32.totalorder %s962_s19, 1 }
   0xc   : > { %s1913_s21 = scalar_select %p1471_p3, 1, 0 }
   0xd   : > { %p1481_p7 = por %p1471_p3, %p61_p2  ;;  %p1485_p8 = por %p141_p4, %p55_p0 }
   0xe   : > { %p1489_p9 = por %p147_p6, %p61_p2  ;;  %p963_p10 = scmp.ge.s32.totalorder %s1401_s17, 1 }
   0xf   : > { %s1915_s23 = scalar_select %p1481_p7, 1, 0 }
  0x10   : > { %s1916_s24 = scalar_select %p1485_p8, 1, 0 }
  0x11   : > { %s1917_s25 = scalar_select %p1489_p9, 1, 0 }
  0x12   : > { %p154_p11 = scmp.lt.s32.totalorder %s1401_s17, 3  ;;  %s1403_s27 = smov [#allocation6]  }
  0x13   : > { %s170_s28 = sshll.u32 %s1403_s27, 4  ;;  %p1156_p1 = scmp.lt.s32.totalorder %s1401_s17, 2  ;;  %s171_s28 = int_to_ptr.vmem [resolvable:$true] %s170_s28 }
  0x14   : > { %p1496_p13 = pnand %p963_p10, %p154_p11  ;;  %s1404_s30 = smov [#allocation8]  }
  0x15   : > { %p1505_p4 = pnand %p1156_p1, %p1475_p5  ;;  %s183_s4 = sshll.u32 %s1404_s30, 4  ;;  %s1515_s4 = int_to_ptr.vmem [resolvable:$true] %s183_s4 }
  0x16   : > { %s1918_s26 = scalar_select %p1496_p13, 1, 0 }
  0x17   : > { %p1139_p0 = pneg %p1496_p13  ;;  %s1229_s8 = scalar_lea.hbm %s1904_s1, 64 }
  0x18   : > { %s1919_s29 = scalar_select %p1505_p4, 1, 0 }
  0x19   : > { %p1511_p2 = pnand %p1139_p0, %p1471_p3  ;;  %p1230_p5 = scmp.ne.s32.totalorder %s1904_s1, %s1229_s8 }
  0x1a   : > { %p1236_p1 = scmp.lt.u32.totalorder %s1229_s8, %s1904_s1 }
  0x1b   : > { %p1231_p6 = pneg %p1511_p2 }
  0x1d   : > { %p1232_p10 = pnand %p1231_p6, %p1230_p5 }
  0x1f   : > { %p1233_p11 = pneg %p1232_p10 }
  0x21   : > { %p1238_p0 = pnand %p1236_p1, %p1233_p11 }
  0x23   : > { %1241 = shalt.err (!%p1238_p0)
}
  0x24   : > { %s1242_s19 = scalar_lea.vmem %s171_s28, 64  ;;  %p1250_p3 = scmp.lt.s32.totalorder %s171_s28, %s171_s28 }
  0x25   : > { %p1243_p12 = scmp.ne.s32.totalorder %s171_s28, %s1242_s19  ;;  %p1251_p7 = scmp.lt.s32.totalorder %s1242_s19, %s1242_s19 }
  0x27   : > { %p1245_p9 = pnand %p1243_p12, %p1231_p6  ;;  %p1252_p13 = por %p1251_p7, %p1250_p3 }
  0x29   : > { %p1246_p8 = pneg %p1245_p9 }
  0x2b   : > { %p1253_p4 = pnand %p1252_p13, %p1246_p8 }
  0x2d   : > { %1256 = shalt.err (!%p1253_p4)
}
  0x2e   : > { %1142 = dma.hbm_to_vmem [thread:$0]  (!%p1511_p2), %s1904_s1, 64, %s171_s28, [#allocation7]  }
  0x2f   : > { %s1257_s7 = scalar_lea.hbm %s1905_s2, 16 }
  0x30   : > { %p1258_p9 = scmp.ne.s32.totalorder %s1905_s2, %s1257_s7  ;;  %p1264_p8 = scmp.lt.u32.totalorder %s1257_s7, %s1905_s2 }
  0x32   : > { %p1260_p3 = pnand %p1258_p9, %p1231_p6 }
  0x34   : > { %p1261_p7 = pneg %p1260_p3 }
  0x36   : > { %p1266_p12 = pnand %p1264_p8, %p1261_p7 }
  0x38   : > { %1269 = shalt.err (!%p1266_p12)
}
  0x39   : > { %s1270_s28 = scalar_lea.vmem %s1515_s4, 16  ;;  %s1277_s18 = scalar_lea.vmem %s1515_s4, 32 }
  0x3a   : > { %p1271_p13 = scmp.ne.s32.totalorder %s1515_s4, %s1270_s28  ;;  %p1278_p10 = scmp.lt.s32.totalorder %s1515_s4, %s1515_s4 }
  0x3b   : > { %p1279_p11 = scmp.lt.s32.totalorder %s1277_s18, %s1270_s28 }
  0x3c   : > { %p1273_p4 = pnand %p1271_p13, %p1231_p6 }
  0x3d   : > { %p1280_p1 = por %p1279_p11, %p1278_p10 }
  0x3e   : > { %p1274_p5 = pneg %p1273_p4 }
  0x40   : > { %p1281_p0 = pnand %p1280_p1, %p1274_p5 }
  0x42   : > { %1284 = shalt.err (!%p1281_p0)
}
  0x43   : > { %1145 = dma.hbm_to_vmem [thread:$0]  (!%p1511_p2), %s1905_s2, 16, %s1515_s4, [#allocation7]  }
  0x44   : > { %s39_s27 = sadd.s32 1, %s1397_s16  ;;  %s194_s30 = sand.u32 1, %s1389_s14  }
  0x45   : > { %p41_p6 = scmp.ge.s32.totalorder %s39_s27, 2  ;;  %s1125_s6 = smul.u32 104, %s194_s30 }
  0x46   : > { %s1027_s5 = smul.u32 1664, %s1397_s16  ;;  %s1584_s18 = scalar_lea.sflag [#allocation4], %s194_s30 }
  0x47   : > { %s1934_s27 = smov (%p41_p6, %s39_s27), 0  ;;  %s198_s8 = scalar_lea.vmem [#allocation3], %s1125_s6 }
  0x48   : > { %s43_s7 = ssub.s32 %s1397_s16, %s1934_s27  ;;  %s206_s9 = sshll.u32 %s198_s8, 4  ;;  %s1577_s9 = int_to_ptr.vmem [resolvable:$true] %s206_s9 }
  0x49   : > { %p46_p9 = scmp.eq.s32.totalorder %s43_s7, 0  ;;  %s1575_s28 = scalar_lea.hbm %s1903_s0, %s1027_s5 }
  0x4a   : > { %s1285_s19 = scalar_lea.hbm %s1575_s28, 1664  ;;  %p1921_p3 = scmp.ne.s32.totalorder %s1919_s29, 0 }
  0x4b   : > { %s1582_s4 = scalar_select %p46_p9, %s1389_s14, %s48_s20  }
  0x4c   : > { %p1286_p2 = scmp.ne.s32.totalorder %s1575_s28, %s1285_s19  ;;  %p1287_p7 = pneg %p1921_p3 }
  0x4d   : > { %s1290_s5 = scalar_lea.hbm %s1903_s0, 3328  ;;  %p1291_p13 = scmp.lt.u32.totalorder %s1575_s28, %s1903_s0 }
  0x4e   : > { %p1288_p8 = pnand %p1287_p7, %p1286_p2  ;;  %p1292_p4 = scmp.lt.u32.totalorder %s1290_s5, %s1285_s19 }
  0x4f   : > { %p1294_p10 = scmp.lt.u32.totalorder %s1285_s19, %s1575_s28 }
  0x50   : > { %p1289_p12 = pneg %p1288_p8  ;;  %p1293_p5 = por %p1292_p4, %p1291_p13 }
  0x52   : > { %p1295_p11 = por %p1294_p10, %p1293_p5 }
  0x54   : > { %p1296_p1 = pnand %p1295_p11, %p1289_p12 }
  0x56   : > { %1299 = shalt.err (!%p1296_p1)
}
  0x57   : > { %s1300_s20 = scalar_lea.vmem %s1577_s9, 1664  ;;  %s1405_s30 = smov [#allocation3]  }
  0x58   : > { %p1301_p0 = scmp.ne.s32.totalorder %s1577_s9, %s1300_s20  ;;  %s1305_s10 = sshll.u32 %s1405_s30, 4  ;;  %s1306_s10 = int_to_ptr.vmem [resolvable:$false] %s1305_s10 }
  0x59   : > { %s1307_s11 = scalar_lea.vmem %s1306_s10, 3328  ;;  %p1308_p2 = scmp.lt.s32.totalorder %s1577_s9, %s1306_s10 }
  0x5a   : > { %p1303_p6 = pnand %p1301_p0, %p1287_p7  ;;  %p1309_p8 = scmp.lt.s32.totalorder %s1307_s11, %s1300_s20 }
  0x5c   : > { %p1304_p9 = pneg %p1303_p6  ;;  %p1310_p13 = por %p1309_p8, %p1308_p2 }
  0x5e   : > { %p1311_p4 = pnand %p1310_p13, %p1304_p9 }
  0x60   : > { %1314 = shalt.err (!%p1311_p4)
}
  0x61   : > { %s1406_s19 = smov 64   ;;  %s1407_s22 = smov 4  }
  0x62   : > { %1149 = dma.hbm_to_vmem [thread:$0]  (!%p1921_p3), %s1575_s28, 1664, %s1577_s9, %s1584_s18, %s1406_s19, %s1406_s19, %s1407_s22  }
  0x63   : > { %p1922_p7 = scmp.ne.s32.totalorder %s1918_s26, 0 }
  0x64   : > { %s1615_s6 = sand.u32 (!%p1922_p7), 1, %s1385_s13   ;;  %p1923_p12 = scmp.ne.s32.totalorder (!%p1922_p7), %s1915_s23, 0 }
  0x65   : > { %218 = sbr.rel (%p1922_p7) target bundleno = 409 (0x199), region = 32  ;;  %s221_s7 = scalar_lea.sflag (!%p1922_p7), [#allocation4], %s1615_s6 }
  0x66   : > { %s1126_s5 = smul.u32 (!%p1922_p7), 104, %s1615_s6 }
  0x68   : > { %s1621_s8 = scalar_lea.vmem (!%p1922_p7), [#allocation3], %s1126_s5 }
  0x6c   : > { %1368 = dma.done.wait (%p1923_p12), %s221_s7, 1664  }
  0x6d   : > { %1370 = vsyncadd (%p1923_p12), %s221_s7, 4294965632  ;;  %p1924_p3 = scmp.ne.s32.totalorder %s1913_s21, 0 }
  0x6f   : > { %1372 = dma.done.wait (%p1924_p3), [#allocation7], 80  }
  0x70   : > { %1374 = vsyncadd (%p1924_p3), [#allocation7], 4294967216  ;;  %v1408_v0 = vmov 0.0   ;;  %vm1409_vm0 = vmmov 0   ;;  %vm262_vm1 = vcmask 130048   ;;  %vm447_vm2 = vcmask 1043456  }
  0x71   : > { %1069 = vmatprep.subr.bf16.mxu0 %v1408_v0  ;;  %1071 = vmatprep.mubr.msk.bf16.mxu0 %vm1409_vm0, %v1408_v0  ;;  %263 = vst.msk [vmem:[#allocation2] sm:$0xff] %vm262_vm1, %v1408_v0  ;;  %264 = vst.msk [vmem:[#allocation2 + $0x8] sm:$0xff] %vm262_vm1, %v1408_v0  ;;  %v341_v1 = vld [vmem:[#allocation6] sm:$0xf]  ;;  %v1216_v3 = vld [vmem:[%s1621_s8] sm:$0xff]   ;;  %vm407_vm3 = vcmask 64512  }
  0x72   : > { %1123 = vmatprep.subr.bf16.mxu1 %v1408_v0  ;;  %1099 = vmatprep.mubr.msk.bf16.mxu1 %vm1409_vm0, %v1408_v0  ;;  %265 = vst.msk [vmem:[#allocation2 + $0x10] sm:$0xff] %vm262_vm1, %v1408_v0  ;;  %266 = vst.msk [vmem:[#allocation2 + $0x18] sm:$0xff] %vm262_vm1, %v1408_v0  ;;  %v449_v2 = vsel %vm447_vm2, %v341_v1, 0  ;;  %v1217_v4 = vld [vmem:[%s1621_s8 + $0x38] sm:$0xff]   ;;  %v1218_v5 = vld [vmem:[%s1621_s8 + $0x8] sm:$0xff]   ;;  %vm807_vm4 = vcmask 125952  }
  0x73   : > { %267 = vst.msk [vmem:[#allocation2 + $0x20] sm:$0xff] %vm262_vm1, %v1408_v0  ;;  %268 = vst.msk [vmem:[#allocation2 + $0x28] sm:$0xff] %vm262_vm1, %v1408_v0  ;;  %1070 = vmatpush3.bf16.msra.mxu0 %v449_v2  ;;  %1124 = vmatpush3.bf16.msra.mxu1 %v449_v2  ;;  %v1219_v6 = vld [vmem:[%s1621_s8 + $0x40] sm:$0xff]   ;;  %v1220_v7 = vld [vmem:[%s1621_s8 + $0x10] sm:$0xff]   ;;  %s1753_s21 = scalar_lea.vmem [#allocation9], %s1126_s5  ;;  %s1054_s23 = smul.u32 1664, %s1393_s15 }
  0x74   : > { %269 = vst.msk [vmem:[#allocation2 + $0x30] sm:$0xff] %vm262_vm1, %v1408_v0  ;;  %270 = vst.msk [vmem:[#allocation2 + $0x38] sm:$0xff] %vm262_vm1, %v1408_v0  ;;  %v1221_v8 = vld [vmem:[%s1621_s8 + $0x48] sm:$0xff]   ;;  %v1222_v9 = vld [vmem:[%s1621_s8 + $0x18] sm:$0xff]   ;;  %s849_s26 = sshll.u32 %s1753_s21, 4  ;;  %s835_s15 = scalar_lea.sflag [#allocation5], %s1615_s6  ;;  %s1850_s26 = int_to_ptr.vmem [resolvable:$true] %s849_s26 }
  0x75   : > { %271 = vst.msk [vmem:[#allocation2 + $0x40] sm:$0xff] %vm262_vm1, %v1408_v0  ;;  %272 = vst.msk [vmem:[#allocation2 + $0x48] sm:$0xff] %vm262_vm1, %v1408_v0  ;;  %v1223_v10 = vld [vmem:[%s1621_s8 + $0x50] sm:$0xff]   ;;  %v1224_v11 = vld [vmem:[%s1621_s8 + $0x20] sm:$0xff]   ;;  %s1848_s28 = scalar_lea.hbm %s1906_s3, %s1054_s23  ;;  %s1315_s18 = scalar_lea.vmem %s1850_s26, 1664 }
  0x76   : > { %273 = vst.msk [vmem:[#allocation2 + $0x50] sm:$0xff] %vm262_vm1, %v1408_v0  ;;  %274 = vst.msk [vmem:[#allocation2 + $0x58] sm:$0xff] %vm262_vm1, %v1408_v0  ;;  %1072 = vmatmul.mubr.msk.bf16.vlgmr.msra.gmra.mrb[0].mxu0 %vm407_vm3, %v1216_v3  ;;  %1100 = vmatmul.mubr.msk.bf16.vlgmr.msra.gmra.mrb[0].mxu1 %vm407_vm3, %v1217_v4  ;;  %v1225_v12 = vld [vmem:[%s1621_s8 + $0x58] sm:$0xff]   ;;  %v1226_v13 = vld [vmem:[%s1621_s8 + $0x28] sm:$0xff]   ;;  %p1316_p5 = scmp.ne.s32.totalorder %s1850_s26, %s1315_s18  ;;  %p1925_p10 = scmp.ne.s32.totalorder %s1916_s24, 0 }
  0x77   : > { %275 = vst.msk [vmem:[#allocation2 + $0x60] sm:$0xff] %vm262_vm1, %v1408_v0  ;;  %276 = vst.msk [vmem:[#allocation2 + $0x68] sm:$0xff] %vm262_vm1, %v1408_v0  ;;  %1075 = vmatprep.mubr.msk.bf16.mxu0 %vm1409_vm0, %v1408_v0  ;;  %1103 = vmatprep.mubr.msk.bf16.mxu1 %vm1409_vm0, %v1408_v0  ;;  %v1227_v14 = vld [vmem:[%s1621_s8 + $0x60] sm:$0xff]   ;;  %v1228_v15 = vld [vmem:[%s1621_s8 + $0x30] sm:$0xff]   ;;  %s1410_s20 = smov [#allocation9]  }
  0x78   : > { %277 = vst.msk [vmem:[#allocation2 + $0x70] sm:$0xff] %vm262_vm1, %v1408_v0  ;;  %278 = vst.msk [vmem:[#allocation2 + $0x78] sm:$0xff] %vm262_vm1, %v1408_v0  ;;  %v289_v16 = vld [vmem:[#allocation2] sm:$0xff]  ;;  %v290_v19 = vld [vmem:[#allocation2 + $0x8] sm:$0xff]  ;;  %p1317_p11 = pnand %p1316_p5, %p1925_p10  ;;  %s1319_s30 = sshll.u32 %s1410_s20, 4  ;;  %s1320_s30 = int_to_ptr.vmem [resolvable:$false] %s1319_s30 }
  0x79   : > { %279 = vst.msk [vmem:[#allocation2 + $0x80] sm:$0xff] %vm262_vm1, %v1408_v0  ;;  %280 = vst.msk [vmem:[#allocation2 + $0x88] sm:$0xff] %vm262_vm1, %v1408_v0  ;;  %v291_v32 = vld [vmem:[#allocation2 + $0x10] sm:$0xff]  ;;  %v1741_v34 = vld [vmem:[#allocation8] ss:$0 sm:$0xff]  ;;  %s1321_s10 = scalar_lea.vmem %s1320_s30, 3328  ;;  %p1322_p0 = scmp.lt.s32.totalorder %s1850_s26, %s1320_s30 }
  0x7a   : > { %281 = vst.msk [vmem:[#allocation2 + $0x90] sm:$0xff] %vm262_vm1, %v1408_v0  ;;  %282 = vst.msk [vmem:[#allocation2 + $0x98] sm:$0xff] %vm262_vm1, %v1408_v0  ;;  %v292_v36 = vld [vmem:[#allocation2 + $0x18] sm:$0xff]  ;;  %v293_v59 = vld [vmem:[#allocation2 + $0x20] sm:$0xff]  ;;  %p1318_p1 = pneg %p1317_p11  ;;  %p1323_p6 = scmp.lt.s32.totalorder %s1321_s10, %s1315_s18 }
  0x7b   : > { %283 = vst.msk [vmem:[#allocation2 + $0xa0] sm:$0xff] %vm262_vm1, %v1408_v0  ;;  %284 = vst.msk [vmem:[#allocation2 + $0xa8] sm:$0xff] %vm262_vm1, %v1408_v0 }
  0x7c   : > { %285 = vst.msk [vmem:[#allocation2 + $0xb0] sm:$0xff] %vm262_vm1, %v1408_v0  ;;  %286 = vst.msk [vmem:[#allocation2 + $0xb8] sm:$0xff] %vm262_vm1, %v1408_v0  ;;  %p1324_p9 = por %p1323_p6, %p1322_p0 }
  0x7d   : > { %287 = vst.msk [vmem:[#allocation2 + $0xc0] sm:$0xff] %vm262_vm1, %v1408_v0  ;;  %288 = vst.msk [vmem:[#allocation2 + $0xc8] sm:$0xff] %vm262_vm1, %v1408_v0 }
  0x7e   : > { %1076 = vmatmul.mubr.msk.bf16.gmra.mrb[4].mxu0 %vm407_vm3, %v1218_v5  ;;  %1104 = vmatmul.mubr.msk.bf16.gmra.mrb[4].mxu1 %vm407_vm3, %v1219_v6  ;;  %p1325_p2 = pnand %p1324_p9, %p1318_p1 }
  0x7f   : > { %1079 = vmatprep.mubr.msk.bf16.mxu0 %vm1409_vm0, %v1408_v0  ;;  %1107 = vmatprep.mubr.msk.bf16.mxu1 %vm1409_vm0, %v1408_v0  ;;  %v303_v17 = vld [vmem:[#allocation2 + $0x70] sm:$0xff]  ;;  %v304_v21 = vld [vmem:[#allocation2 + $0x78] sm:$0xff] }
  0x80   : > { %v305_v33 = vld [vmem:[#allocation2 + $0x80] sm:$0xff]  ;;  %v306_v38 = vld [vmem:[#allocation2 + $0x88] sm:$0xff] }
  0x81   : > { %v307_v60 = vld [vmem:[#allocation2 + $0x90] sm:$0xff]  ;;  %v308_v2 = vld [vmem:[#allocation2 + $0x98] sm:$0xff] }
  0x86   : > { %1080 = vmatmul.mubr.msk.bf16.gmra.mrb[8].mxu0 %vm407_vm3, %v1220_v7  ;;  %1108 = vmatmul.mubr.msk.bf16.gmra.mrb[8].mxu1 %vm407_vm3, %v1221_v8 }
  0x87   : > { %1083 = vmatprep.mubr.msk.bf16.mxu0 %vm1409_vm0, %v1408_v0  ;;  %1111 = vmatprep.mubr.msk.bf16.mxu1 %vm1409_vm0, %v1408_v0 }
  0x8e   : > { %1084 = vmatmul.mubr.msk.bf16.gmra.mrb[12].mxu0 %vm407_vm3, %v1222_v9  ;;  %1112 = vmatmul.mubr.msk.bf16.gmra.mrb[12].mxu1 %vm407_vm3, %v1223_v10 }
  0x8f   : > { %1087 = vmatprep.mubr.msk.bf16.mxu0 %vm1409_vm0, %v1408_v0  ;;  %1115 = vmatprep.mubr.msk.bf16.mxu1 %vm1409_vm0, %v1408_v0 }
  0x96   : > { %1088 = vmatmul.mubr.msk.bf16.gmra.mrb[16].mxu0 %vm407_vm3, %v1224_v11  ;;  %1116 = vmatmul.mubr.msk.bf16.gmra.mrb[16].mxu1 %vm407_vm3, %v1225_v12 }
  0x97   : > { %1091 = vmatprep.mubr.msk.bf16.mxu0 %vm1409_vm0, %v1408_v0  ;;  %1119 = vmatprep.mubr.msk.bf16.mxu1 %vm1409_vm0, %v1408_v0 }
  0x9e   : > { %1092 = vmatmul.mubr.msk.bf16.gmra.mrb[20].mxu0 %vm407_vm3, %v1226_v13  ;;  %1120 = vmatmul.mubr.msk.bf16.gmra.mrb[20].mxu1 %vm407_vm3, %v1227_v14 }
  0x9f   : > { %1095 = vmatprep.mubr.msk.bf16.mxu0 %vm1409_vm0, %v1408_v0  ;;  %v294_v0 = vld [vmem:[#allocation2 + $0x28] sm:$0xff] }
  0xa6   : > { %1096 = vmatmul.mubr.msk.bf16.gmra.mrb[24].mxu0 %vm407_vm3, %v1228_v15 }
 0x149   : > { %v485_v18 = vpop.f32.mrb[0].mxu0  ;;  %v541_v20 = vpop.f32.mrb[0].mxu1 }
 0x14a   : > { %v588_v22 = vadd.f32 %v485_v18, %v289_v16  ;;  %v1073_v23 = vpop.f32.mrb[1].mxu0  ;;  %v602_v24 = vadd.f32 %v541_v20, %v303_v17  ;;  %v1101_v25 = vpop.f32.mrb[1].mxu1 }
 0x14b   : > { %v488_v26 = vpop.f32.mrb[2].mxu0  ;;  %v544_v27 = vpop.f32.mrb[2].mxu1  ;;  %v295_v23 = vld [vmem:[#allocation2 + $0x30] sm:$0xff] }
 0x14c   : > { %615 = vst.msk [vmem:[#allocation2] sm:$0xff] %vm262_vm1, %v588_v22  ;;  %v589_v28 = vadd.f32 %v488_v26, %v290_v19  ;;  %v1074_v29 = vpop.f32.mrb[3].mxu0  ;;  %629 = vst.msk [vmem:[#allocation2 + $0x70] sm:$0xff] %vm262_vm1, %v602_v24  ;;  %v603_v30 = vadd.f32 %v544_v27, %v304_v21  ;;  %v1102_v31 = vpop.f32.mrb[3].mxu1  ;;  %v309_v24 = vld [vmem:[#allocation2 + $0xa0] sm:$0xff] }
 0x14e   : > { %616 = vst.msk [vmem:[#allocation2 + $0x8] sm:$0xff] %vm262_vm1, %v589_v28  ;;  %630 = vst.msk [vmem:[#allocation2 + $0x78] sm:$0xff] %vm262_vm1, %v603_v30  ;;  %v296_v28 = vld [vmem:[#allocation2 + $0x38] sm:$0xff]  ;;  %v310_v30 = vld [vmem:[#allocation2 + $0xa8] sm:$0xff] }
 0x151   : > { %v493_v35 = vpop.f32.mrb[4].mxu0  ;;  %v549_v37 = vpop.f32.mrb[4].mxu1 }
 0x152   : > { %v590_v39 = vadd.f32 %v493_v35, %v291_v32  ;;  %v1077_v40 = vpop.f32.mrb[5].mxu0  ;;  %v604_v41 = vadd.f32 %v549_v37, %v305_v33  ;;  %v1105_v42 = vpop.f32.mrb[5].mxu1 }
 0x153   : > { %v644_v43 = vld [vmem:[#allocation2] sm:$0xff]  ;;  %v658_v44 = vld [vmem:[#allocation2 + $0x70] sm:$0xff]  ;;  %v496_v45 = vpop.f32.mrb[6].mxu0  ;;  %v552_v46 = vpop.f32.mrb[6].mxu1 }
 0x154   : > { %v677_v47 = vadd.f32 %v1741_v34, %v644_v43  ;;  %v691_v48 = vadd.f32 %v1741_v34, %v658_v44  ;;  %617 = vst.msk [vmem:[#allocation2 + $0x10] sm:$0xff] %vm262_vm1, %v590_v39  ;;  %v591_v49 = vadd.f32 %v496_v45, %v292_v36  ;;  %v1078_v50 = vpop.f32.mrb[7].mxu0  ;;  %631 = vst.msk [vmem:[#allocation2 + $0x80] sm:$0xff] %vm262_vm1, %v604_v41  ;;  %v1106_v52 = vpop.f32.mrb[7].mxu1 }
 0x155   : > { %v605_v51 = vadd.f32 %v552_v46, %v306_v38  ;;  %v645_v53 = vld [vmem:[#allocation2 + $0x8] sm:$0xff]  ;;  %v659_v54 = vld [vmem:[#allocation2 + $0x78] sm:$0xff]  ;;  %v297_v52 = vld [vmem:[#allocation2 + $0x40] sm:$0xff] }
 0x156   : > { %v1028_v55 = vpack.c.bf16 %v677_v47, %v677_v47  ;;  %v678_v56 = vadd.f32 %v1741_v34, %v645_v53  ;;  %v1042_v57 = vpack.c.bf16 %v691_v48, %v691_v48  ;;  %v692_v58 = vadd.f32 %v1741_v34, %v659_v54  ;;  %618 = vst.msk [vmem:[#allocation2 + $0x18] sm:$0xff] %vm262_vm1, %v591_v49  ;;  %v311_v53 = vld [vmem:[#allocation2 + $0xb0] sm:$0xff] }
 0x157   : > { %632 = vst.msk [vmem:[#allocation2 + $0x88] sm:$0xff] %vm262_vm1, %v605_v51 }
 0x158   : > { %808 = vst.msk [vmem:[%s1753_s21] sm:$0xf] %vm807_vm4, %v1028_v55  ;;  %v1029_v61 = vpack.c.bf16 %v678_v56, %v678_v56  ;;  %822 = vst.msk [vmem:[%s1753_s21 + $0x38] sm:$0xf] %vm807_vm4, %v1042_v57  ;;  %v1043_v62 = vpack.c.bf16 %v692_v58, %v692_v58  ;;  %v298_v57 = vld [vmem:[#allocation2 + $0x48] sm:$0xff] }
 0x159   : > { %v501_v63 = vpop.f32.mrb[8].mxu0  ;;  %v557_v1 = vpop.f32.mrb[8].mxu1 }
 0x15a   : > { %809 = vst.msk [vmem:[%s1753_s21 + $0x4] sm:$0xf] %vm807_vm4, %v1029_v61  ;;  %823 = vst.msk [vmem:[%s1753_s21 + $0x3c] sm:$0xf] %vm807_vm4, %v1043_v62  ;;  %v592_v3 = vadd.f32 %v501_v63, %v293_v59  ;;  %v1081_v4 = vpop.f32.mrb[9].mxu0  ;;  %v606_v5 = vadd.f32 %v557_v1, %v307_v60  ;;  %v1109_v6 = vpop.f32.mrb[9].mxu1 }
 0x15b   : > { %v646_v7 = vld [vmem:[#allocation2 + $0x10] sm:$0xff]  ;;  %v660_v8 = vld [vmem:[#allocation2 + $0x80] sm:$0xff]  ;;  %v504_v9 = vpop.f32.mrb[10].mxu0  ;;  %v560_v10 = vpop.f32.mrb[10].mxu1  ;;  %v312_v59 = vld [vmem:[#allocation2 + $0xb8] sm:$0xff] }
 0x15c   : > { %v679_v11 = vadd.f32 %v1741_v34, %v646_v7  ;;  %v693_v12 = vadd.f32 %v1741_v34, %v660_v8  ;;  %619 = vst.msk [vmem:[#allocation2 + $0x20] sm:$0xff] %vm262_vm1, %v592_v3  ;;  %v593_v13 = vadd.f32 %v504_v9, %v294_v0  ;;  %v1082_v14 = vpop.f32.mrb[11].mxu0  ;;  %633 = vst.msk [vmem:[#allocation2 + $0x90] sm:$0xff] %vm262_vm1, %v606_v5  ;;  %v1110_v16 = vpop.f32.mrb[11].mxu1 }
 0x15d   : > { %v607_v15 = vadd.f32 %v560_v10, %v308_v2  ;;  %v647_v17 = vld [vmem:[#allocation2 + $0x18] sm:$0xff]  ;;  %v299_v16 = vld [vmem:[#allocation2 + $0x50] sm:$0xff] }
 0x15e   : > { %v661_v18 = vld [vmem:[#allocation2 + $0x88] sm:$0xff]  ;;  %v1030_v19 = vpack.c.bf16 %v679_v11, %v679_v11  ;;  %v680_v20 = vadd.f32 %v1741_v34, %v647_v17  ;;  %v1044_v21 = vpack.c.bf16 %v693_v12, %v693_v12  ;;  %620 = vst.msk [vmem:[#allocation2 + $0x28] sm:$0xff] %vm262_vm1, %v593_v13  ;;  %v313_v17 = vld [vmem:[#allocation2 + $0xc0] sm:$0xff] }
 0x15f   : > { %v694_v22 = vadd.f32 %v1741_v34, %v661_v18  ;;  %634 = vst.msk [vmem:[#allocation2 + $0x98] sm:$0xff] %vm262_vm1, %v607_v15 }
 0x160   : > { %810 = vst.msk [vmem:[%s1753_s21 + $0x8] sm:$0xf] %vm807_vm4, %v1030_v19  ;;  %v1031_v25 = vpack.c.bf16 %v680_v20, %v680_v20  ;;  %824 = vst.msk [vmem:[%s1753_s21 + $0x40] sm:$0xf] %vm807_vm4, %v1044_v21  ;;  %v300_v21 = vld [vmem:[#allocation2 + $0x58] sm:$0xff] }
 0x161   : > { %v1045_v26 = vpack.c.bf16 %v694_v22, %v694_v22  ;;  %v509_v27 = vpop.f32.mrb[12].mxu0  ;;  %v565_v29 = vpop.f32.mrb[12].mxu1 }
 0x162   : > { %811 = vst.msk [vmem:[%s1753_s21 + $0xc] sm:$0xf] %vm807_vm4, %v1031_v25  ;;  %v594_v31 = vadd.f32 %v509_v27, %v295_v23  ;;  %v1085_v32 = vpop.f32.mrb[13].mxu0  ;;  %v608_v33 = vadd.f32 %v565_v29, %v309_v24  ;;  %v1113_v35 = vpop.f32.mrb[13].mxu1  ;;  %v314_v23 = vld [vmem:[#allocation2 + $0xc8] sm:$0xff] }
 0x163   : > { %825 = vst.msk [vmem:[%s1753_s21 + $0x44] sm:$0xf] %vm807_vm4, %v1045_v26  ;;  %v648_v36 = vld [vmem:[#allocation2 + $0x20] sm:$0xff]  ;;  %v662_v37 = vld [vmem:[#allocation2 + $0x90] sm:$0xff]  ;;  %v512_v38 = vpop.f32.mrb[14].mxu0  ;;  %v568_v39 = vpop.f32.mrb[14].mxu1 }
 0x164   : > { %v681_v40 = vadd.f32 %v1741_v34, %v648_v36  ;;  %v695_v41 = vadd.f32 %v1741_v34, %v662_v37  ;;  %621 = vst.msk [vmem:[#allocation2 + $0x30] sm:$0xff] %vm262_vm1, %v594_v31  ;;  %v595_v42 = vadd.f32 %v512_v38, %v296_v28  ;;  %v1086_v43 = vpop.f32.mrb[15].mxu0  ;;  %635 = vst.msk [vmem:[#allocation2 + $0xa0] sm:$0xff] %vm262_vm1, %v608_v33  ;;  %v1114_v45 = vpop.f32.mrb[15].mxu1 }
 0x165   : > { %v609_v44 = vadd.f32 %v568_v39, %v310_v30  ;;  %v649_v46 = vld [vmem:[#allocation2 + $0x28] sm:$0xff]  ;;  %v301_v45 = vld [vmem:[#allocation2 + $0x60] sm:$0xff] }
 0x166   : > { %v663_v47 = vld [vmem:[#allocation2 + $0x98] sm:$0xff]  ;;  %v1032_v48 = vpack.c.bf16 %v681_v40, %v681_v40  ;;  %v682_v49 = vadd.f32 %v1741_v34, %v649_v46  ;;  %v1046_v50 = vpack.c.bf16 %v695_v41, %v695_v41  ;;  %622 = vst.msk [vmem:[#allocation2 + $0x38] sm:$0xff] %vm262_vm1, %v595_v42 }
 0x167   : > { %v696_v51 = vadd.f32 %v1741_v34, %v663_v47  ;;  %636 = vst.msk [vmem:[#allocation2 + $0xa8] sm:$0xff] %vm262_vm1, %v609_v44 }
 0x168   : > { %812 = vst.msk [vmem:[%s1753_s21 + $0x10] sm:$0xf] %vm807_vm4, %v1032_v48  ;;  %v1033_v54 = vpack.c.bf16 %v682_v49, %v682_v49  ;;  %826 = vst.msk [vmem:[%s1753_s21 + $0x48] sm:$0xf] %vm807_vm4, %v1046_v50  ;;  %v302_v49 = vld [vmem:[#allocation2 + $0x68] sm:$0xff] }
 0x169   : > { %v1047_v55 = vpack.c.bf16 %v696_v51, %v696_v51  ;;  %v517_v56 = vpop.f32.mrb[16].mxu0  ;;  %v573_v58 = vpop.f32.mrb[16].mxu1 }
 0x16a   : > { %813 = vst.msk [vmem:[%s1753_s21 + $0x14] sm:$0xf] %vm807_vm4, %v1033_v54  ;;  %v596_v60 = vadd.f32 %v517_v56, %v297_v52  ;;  %v1089_v61 = vpop.f32.mrb[17].mxu0  ;;  %v610_v62 = vadd.f32 %v573_v58, %v311_v53  ;;  %v1117_v63 = vpop.f32.mrb[17].mxu1 }
 0x16b   : > { %827 = vst.msk [vmem:[%s1753_s21 + $0x4c] sm:$0xf] %vm807_vm4, %v1047_v55  ;;  %v650_v0 = vld [vmem:[#allocation2 + $0x30] sm:$0xff]  ;;  %v664_v1 = vld [vmem:[#allocation2 + $0xa0] sm:$0xff]  ;;  %v520_v2 = vpop.f32.mrb[18].mxu0  ;;  %v576_v3 = vpop.f32.mrb[18].mxu1 }
 0x16c   : > { %v683_v4 = vadd.f32 %v1741_v34, %v650_v0  ;;  %v697_v5 = vadd.f32 %v1741_v34, %v664_v1  ;;  %623 = vst.msk [vmem:[#allocation2 + $0x40] sm:$0xff] %vm262_vm1, %v596_v60  ;;  %v597_v6 = vadd.f32 %v520_v2, %v298_v57  ;;  %v1090_v7 = vpop.f32.mrb[19].mxu0  ;;  %637 = vst.msk [vmem:[#allocation2 + $0xb0] sm:$0xff] %vm262_vm1, %v610_v62  ;;  %v1118_v9 = vpop.f32.mrb[19].mxu1 }
 0x16d   : > { %v611_v8 = vadd.f32 %v576_v3, %v312_v59  ;;  %v651_v10 = vld [vmem:[#allocation2 + $0x38] sm:$0xff] }
 0x16e   : > { %v665_v11 = vld [vmem:[#allocation2 + $0xa8] sm:$0xff]  ;;  %v1034_v12 = vpack.c.bf16 %v683_v4, %v683_v4  ;;  %v684_v13 = vadd.f32 %v1741_v34, %v651_v10  ;;  %v1048_v14 = vpack.c.bf16 %v697_v5, %v697_v5  ;;  %624 = vst.msk [vmem:[#allocation2 + $0x48] sm:$0xff] %vm262_vm1, %v597_v6 }
 0x16f   : > { %v698_v15 = vadd.f32 %v1741_v34, %v665_v11  ;;  %638 = vst.msk [vmem:[#allocation2 + $0xb8] sm:$0xff] %vm262_vm1, %v611_v8 }
 0x170   : > { %814 = vst.msk [vmem:[%s1753_s21 + $0x18] sm:$0xf] %vm807_vm4, %v1034_v12  ;;  %v1035_v18 = vpack.c.bf16 %v684_v13, %v684_v13  ;;  %828 = vst.msk [vmem:[%s1753_s21 + $0x50] sm:$0xf] %vm807_vm4, %v1048_v14 }
 0x171   : > { %v1049_v19 = vpack.c.bf16 %v698_v15, %v698_v15  ;;  %v525_v20 = vpop.f32.mrb[20].mxu0  ;;  %v581_v22 = vpop.f32.mrb[20].mxu1 }
 0x172   : > { %815 = vst.msk [vmem:[%s1753_s21 + $0x1c] sm:$0xf] %vm807_vm4, %v1035_v18  ;;  %v598_v24 = vadd.f32 %v525_v20, %v299_v16  ;;  %v1093_v25 = vpop.f32.mrb[21].mxu0  ;;  %v612_v26 = vadd.f32 %v581_v22, %v313_v17  ;;  %v1121_v27 = vpop.f32.mrb[21].mxu1 }
 0x173   : > { %829 = vst.msk [vmem:[%s1753_s21 + $0x54] sm:$0xf] %vm807_vm4, %v1049_v19  ;;  %v652_v28 = vld [vmem:[#allocation2 + $0x40] sm:$0xff]  ;;  %v666_v29 = vld [vmem:[#allocation2 + $0xb0] sm:$0xff]  ;;  %v528_v30 = vpop.f32.mrb[22].mxu0  ;;  %v584_v31 = vpop.f32.mrb[22].mxu1 }
 0x174   : > { %v685_v32 = vadd.f32 %v1741_v34, %v652_v28  ;;  %v699_v33 = vadd.f32 %v1741_v34, %v666_v29  ;;  %625 = vst.msk [vmem:[#allocation2 + $0x50] sm:$0xff] %vm262_vm1, %v598_v24  ;;  %v599_v35 = vadd.f32 %v528_v30, %v300_v21  ;;  %v1094_v36 = vpop.f32.mrb[23].mxu0  ;;  %639 = vst.msk [vmem:[#allocation2 + $0xc0] sm:$0xff] %vm262_vm1, %v612_v26  ;;  %v1122_v38 = vpop.f32.mrb[23].mxu1 }
 0x175   : > { %v613_v37 = vadd.f32 %v584_v31, %v314_v23  ;;  %v653_v39 = vld [vmem:[#allocation2 + $0x48] sm:$0xff] }
 0x176   : > { %v667_v40 = vld [vmem:[#allocation2 + $0xb8] sm:$0xff]  ;;  %v1036_v41 = vpack.c.bf16 %v685_v32, %v685_v32  ;;  %v686_v42 = vadd.f32 %v1741_v34, %v653_v39  ;;  %v1050_v43 = vpack.c.bf16 %v699_v33, %v699_v33  ;;  %626 = vst.msk [vmem:[#allocation2 + $0x58] sm:$0xff] %vm262_vm1, %v599_v35 }
 0x177   : > { %v700_v44 = vadd.f32 %v1741_v34, %v667_v40  ;;  %640 = vst.msk [vmem:[#allocation2 + $0xc8] sm:$0xff] %vm262_vm1, %v613_v37 }
 0x178   : > { %816 = vst.msk [vmem:[%s1753_s21 + $0x20] sm:$0xf] %vm807_vm4, %v1036_v41  ;;  %v1037_v46 = vpack.c.bf16 %v686_v42, %v686_v42  ;;  %830 = vst.msk [vmem:[%s1753_s21 + $0x58] sm:$0xf] %vm807_vm4, %v1050_v43 }
 0x179   : > { %v1051_v47 = vpack.c.bf16 %v700_v44, %v700_v44  ;;  %v533_v48 = vpop.f32.mrb[24].mxu0 }
 0x17a   : > { %817 = vst.msk [vmem:[%s1753_s21 + $0x24] sm:$0xf] %vm807_vm4, %v1037_v46  ;;  %v600_v50 = vadd.f32 %v533_v48, %v301_v45  ;;  %v1097_v51 = vpop.f32.mrb[25].mxu0 }
 0x17b   : > { %831 = vst.msk [vmem:[%s1753_s21 + $0x5c] sm:$0xf] %vm807_vm4, %v1051_v47  ;;  %v654_v52 = vld [vmem:[#allocation2 + $0x50] sm:$0xff]  ;;  %v668_v53 = vld [vmem:[#allocation2 + $0xc0] sm:$0xff]  ;;  %v536_v54 = vpop.f32.mrb[26].mxu0 }
 0x17c   : > { %v687_v55 = vadd.f32 %v1741_v34, %v654_v52  ;;  %v701_v56 = vadd.f32 %v1741_v34, %v668_v53  ;;  %627 = vst.msk [vmem:[#allocation2 + $0x60] sm:$0xff] %vm262_vm1, %v600_v50  ;;  %v601_v57 = vadd.f32 %v536_v54, %v302_v49  ;;  %v1098_v58 = vpop.f32.mrb[27].mxu0 }
 0x17d   : > { %v655_v59 = vld [vmem:[#allocation2 + $0x58] sm:$0xff] }
 0x17e   : > { %v669_v60 = vld [vmem:[#allocation2 + $0xc8] sm:$0xff]  ;;  %v1038_v61 = vpack.c.bf16 %v687_v55, %v687_v55  ;;  %v688_v62 = vadd.f32 %v1741_v34, %v655_v59  ;;  %v1052_v63 = vpack.c.bf16 %v701_v56, %v701_v56  ;;  %628 = vst.msk [vmem:[#allocation2 + $0x68] sm:$0xff] %vm262_vm1, %v601_v57 }
 0x17f   : > { %v702_v0 = vadd.f32 %v1741_v34, %v669_v60 }
 0x180   : > { %818 = vst.msk [vmem:[%s1753_s21 + $0x28] sm:$0xf] %vm807_vm4, %v1038_v61  ;;  %v1039_v1 = vpack.c.bf16 %v688_v62, %v688_v62  ;;  %832 = vst.msk [vmem:[%s1753_s21 + $0x60] sm:$0xf] %vm807_vm4, %v1052_v63 }
 0x181   : > { %v1053_v2 = vpack.c.bf16 %v702_v0, %v702_v0 }
 0x182   : > { %819 = vst.msk [vmem:[%s1753_s21 + $0x2c] sm:$0xf] %vm807_vm4, %v1039_v1 }
 0x183   : > { %833 = vst.msk [vmem:[%s1753_s21 + $0x64] sm:$0xf] %vm807_vm4, %v1053_v2  ;;  %v656_v3 = vld [vmem:[#allocation2 + $0x60] sm:$0xff] }
 0x184   : > { %v689_v4 = vadd.f32 %v1741_v34, %v656_v3 }
 0x185   : > { %v657_v5 = vld [vmem:[#allocation2 + $0x68] sm:$0xff] }
 0x186   : > { %v1040_v6 = vpack.c.bf16 %v689_v4, %v689_v4  ;;  %v690_v7 = vadd.f32 %v1741_v34, %v657_v5 }
 0x188   : > { %820 = vst.msk [vmem:[%s1753_s21 + $0x30] sm:$0xf] %vm807_vm4, %v1040_v6  ;;  %v1041_v8 = vpack.c.bf16 %v690_v7, %v690_v7 }
 0x18a   : > { %821 = vst.msk [vmem:[%s1753_s21 + $0x34] sm:$0xf] %vm807_vm4, %v1041_v8 }
 0x18b   : > { %1328 = shalt.err (!%p1325_p2)
}
 0x18c   : > { %s1329_s11 = scalar_lea.hbm %s1848_s28, 1664  ;;  %s1333_s5 = scalar_lea.hbm %s1906_s3, 3328 }
 0x18d   : > { %p1330_p8 = scmp.ne.s32.totalorder %s1848_s28, %s1329_s11  ;;  %p1334_p7 = scmp.lt.u32.totalorder %s1848_s28, %s1906_s3 }
 0x18e   : > { %p1335_p12 = scmp.lt.u32.totalorder %s1333_s5, %s1329_s11  ;;  %p1337_p5 = scmp.lt.u32.totalorder %s1329_s11, %s1848_s28 }
 0x18f   : > { %p1331_p13 = pnand %p1330_p8, %p1925_p10 }
 0x190   : > { %p1336_p3 = por %p1335_p12, %p1334_p7 }
 0x191   : > { %p1332_p4 = pneg %p1331_p13 }
 0x192   : > { %p1338_p11 = por %p1337_p5, %p1336_p3 }
 0x194   : > { %p1339_p1 = pnand %p1338_p11, %p1332_p4 }
 0x196   : > { %1342 = shalt.err (!%p1339_p1)
}
 0x197   : > { %s1411_s21 = smov 64   ;;  %s1412_s23 = smov 4  }
 0x198   : > { %1137 = dma.vmem_to_hbm [thread:$0]  (%p1925_p10), %s1850_s26, 1664, %s1848_s28, %s835_s15, %s1411_s21, %s1411_s21, %s1412_s23  }
 0x199 PF: > { %s864_s29 = sand.u32 1, %s1381_s12   ;;  %p1926_p0 = scmp.ne.s32.totalorder %s1917_s25, 0 }
 0x19a   : > { %p1927_p6 = scmp.ge.s32.totalorder %s1401_s17, 2  ;;  %s865_s9 = scalar_lea.sflag [#allocation5], %s864_s29 }
 0x19c   : > { %p1151_p9 = pnand %p1927_p6, %p1926_p0 }
 0x19e   : > { %1376 = dma.done.wait (!%p1151_p9), %s865_s9, 1664  }
 0x19f   : > { %1378 = vsyncadd (!%p1151_p9), %s865_s9, 4294965632  ;;  %s20_s17 = sadd.s32 1, %s1401_s17   ;;  %s1928_s12 = smov %s1385_s13 }
 0x1a0   : > { %p17_p2 = scmp.ge.s32.totalorder %s20_s17, 4   ;;  %s1929_s13 = smov %s1389_s14 }
 0x1a1   : > { %s1930_s14 = smov %s1582_s4  ;;  %s1931_s15 = smov %s1397_s16 }
 0x1a2   : > { %s1932_s16 = smov %s1934_s27  ;;  %19 = sbr.rel (!%p17_p2) target bundleno = 7 (0x7), region = 95 }
 0x1a9   :  { %870 = vsyncpa [#allocation4], 1 }
 0x1aa   :  { %872 = vsyncpa [#allocation4 + $0x1], 1 }
 0x1ab   :  { %873 = vsyncpa [#allocation7], 1 }
 0x1ac   :  { %874 = vsyncpa [#allocation5], 1 }
 0x1ad   :  { %876 = vsyncpa [#allocation5 + $0x1], 1 }

// kernel: wrn_forward.16
= control target key start
LH: loop header
LB: loop body
LE: loop exit
PB: predicated region body
PF: predicated region fallthrough
CT: control target
= control target key end

     0   :  { %s2286_s0 = inlined_call_operand.hbm [shape: bf16[416,4], index: 0, kind: input, shape index: {}]   ;;  %s2287_s1 = inlined_call_operand.hbm [shape: bf16[4,16], index: 1, kind: input, shape index: {}]   ;;  %s2288_s2 = inlined_call_operand.hbm [shape: f32[1,16], index: 2, kind: input, shape index: {}]   ;;  %s2289_s3 = inlined_call_operand.hbm [shape: bf16[416,16], index: 3, kind: input, shape index: {}]   ;;  %s2290_s4 = inlined_call_operand.hbm [shape: bf16[416,16], index: 4, kind: output, shape index: {}]  }
   0x1   :  { %2298 = sst [smem:[#allocation16_spill]] %s2286_s0 }
   0x2   :  { %2299 = sst [smem:[#allocation17_spill]] %s2287_s1 }
   0x3   :  { %2300 = sst [smem:[#allocation18_spill]] %s2288_s2 }
   0x4   :  { %9 = vsyncpa [#allocation4], 0 }
   0x5   :  { %11 = vsyncpa [#allocation4 + $0x1], 0 }
   0x6   :  { %12 = vsyncpa [#allocation7], 0 }
   0x7   :  { %13 = vsyncpa [#allocation10], 0 }
   0x8   :  { %15 = vsyncpa [#allocation10 + $0x1], 0 }
   0x9   :  { %16 = vsyncpa [#allocation5], 0 }
   0xa   :  { %18 = vsyncpa [#allocation5 + $0x1], 0  ;;  %s1745_s15 = smov 0   ;;  %s1747_s16 = smov 0  }
   0xb   :  { %s1749_s17 = smov 0   ;;  %s1751_s18 = smov 0  }
   0xc   :  { %s1753_s19 = smov 0   ;;  %s1755_s20 = smov 0  }
   0xd LB: > { %s1161_s21 = sadd.s32 4294967295, %s1707_s20   ;;  %s1162_s22 = sadd.s32 4294967294, %s1707_s20   ;;  %s1707_s20 = sphi %s1755_s20, %s24_s20   ;;  %s1703_s19 = sphi %s1753_s19, %s2324_s19   ;;  %s1699_s18 = sphi %s1751_s18, %s2323_s18   ;;  %s1695_s17 = sphi %s1749_s17, %s2322_s17   ;;  %s1691_s16 = sphi %s1747_s16, %s2321_s16   ;;  %s1687_s15 = sphi %s1745_s15, %s2320_s15  }
   0xe   : > { %s52_s23 = sadd.s32 1, %s1695_s17  ;;  %p59_p0 = scmp.ne.s32.totalorder %s1695_s17, %s1691_s16 }
   0xf   : > { %p60_p1 = scmp.eq.s32.totalorder %s1707_s20, 0  ;;  %p65_p2 = scmp.ne.s32.totalorder %s1691_s16, %s1687_s15 }
  0x10   : > { %p1783_p3 = scmp.eq.s32.totalorder %s1161_s21, 0  ;;  %p173_p4 = scmp.eq.s32.totalorder %s1161_s21, 1 }
  0x11   : > { %p1787_p5 = por %p60_p1, %p59_p0  ;;  %p179_p6 = scmp.eq.s32.totalorder %s1162_s22, 1 }
  0x12   : > { %s2301_s24 = scalar_select %p1783_p3, 1, 0 }
  0x13   : > { %p1793_p7 = por %p1783_p3, %p65_p2  ;;  %p1797_p8 = por %p173_p4, %p59_p0 }
  0x14   : > { %p1801_p9 = por %p179_p6, %p65_p2  ;;  %p1163_p10 = scmp.ge.s32.totalorder %s1707_s20, 1 }
  0x15   : > { %s2303_s26 = scalar_select %p1793_p7, 1, 0 }
  0x16   : > { %s2304_s27 = scalar_select %p1797_p8, 1, 0 }
  0x17   : > { %s2305_s28 = scalar_select %p1801_p9, 1, 0 }
  0x18   : > { %p186_p11 = scmp.lt.s32.totalorder %s1707_s20, 3  ;;  %s1709_s30 = smov [#allocation6]  }
  0x19   : > { %s202_s5 = sshll.u32 %s1709_s30, 4  ;;  %p1428_p1 = scmp.lt.s32.totalorder %s1707_s20, 2  ;;  %s203_s5 = int_to_ptr.vmem [resolvable:$true] %s202_s5 }
  0x1a   : > { %p1808_p13 = pnand %p1163_p10, %p186_p11  ;;  %s1710_s7 = smov [#allocation8]  }
  0x1b   : > { %p1817_p4 = pnand %p1428_p1, %p1787_p5  ;;  %s215_s8 = sshll.u32 %s1710_s7, 4  ;;  %s1827_s8 = int_to_ptr.vmem [resolvable:$true] %s215_s8 }
  0x1c   : > { %s2306_s29 = scalar_select %p1808_p13, 1, 0 }
  0x1d   : > { %p1408_p0 = pneg %p1808_p13  ;;  %s2309_s1 = sld [smem:[#allocation17_spill]] }
  0x1e   : > { %s2307_s6 = scalar_select %p1817_p4, 1, 0 }
  0x1f   : > { %p1823_p2 = pnand %p1408_p0, %p1783_p3 }
  0x21   : > { %p1503_p6 = pneg %p1823_p2 }
  0x23   : > { %s1501_s12 = scalar_lea.hbm %s2309_s1, 32 }
  0x24   : > { %p1502_p5 = scmp.ne.s32.totalorder %s2309_s1, %s1501_s12  ;;  %p1508_p1 = scmp.lt.u32.totalorder %s1501_s12, %s2309_s1 }
  0x26   : > { %p1504_p10 = pnand %p1503_p6, %p1502_p5 }
  0x28   : > { %p1505_p11 = pneg %p1504_p10 }
  0x2a   : > { %p1510_p0 = pnand %p1508_p1, %p1505_p11 }
  0x2c   : > { %1513 = shalt.err (!%p1510_p0)
}
  0x2d   : > { %s1514_s25 = scalar_lea.vmem %s203_s5, 32  ;;  %p1522_p3 = scmp.lt.s32.totalorder %s203_s5, %s203_s5 }
  0x2e   : > { %p1515_p12 = scmp.ne.s32.totalorder %s203_s5, %s1514_s25  ;;  %p1523_p7 = scmp.lt.s32.totalorder %s1514_s25, %s1514_s25 }
  0x30   : > { %p1517_p9 = pnand %p1515_p12, %p1503_p6  ;;  %p1524_p13 = por %p1523_p7, %p1522_p3 }
  0x32   : > { %p1518_p8 = pneg %p1517_p9 }
  0x34   : > { %p1525_p4 = pnand %p1524_p13, %p1518_p8 }
  0x36   : > { %1528 = shalt.err (!%p1525_p4)
}
  0x37   : > { %1411 = dma.hbm_to_vmem [thread:$0]  (!%p1823_p2), %s2309_s1, 32, %s203_s5, [#allocation7]  }
  0x38   : > { %s2310_s2 = sld [smem:[#allocation18_spill]] }
  0x3e   : > { %s1529_s12 = scalar_lea.hbm %s2310_s2, 16 }
  0x3f   : > { %p1530_p9 = scmp.ne.s32.totalorder %s2310_s2, %s1529_s12  ;;  %p1536_p8 = scmp.lt.u32.totalorder %s1529_s12, %s2310_s2 }
  0x41   : > { %p1532_p3 = pnand %p1530_p9, %p1503_p6 }
  0x43   : > { %p1533_p7 = pneg %p1532_p3 }
  0x45   : > { %p1538_p12 = pnand %p1536_p8, %p1533_p7 }
  0x47   : > { %1541 = shalt.err (!%p1538_p12)
}
  0x48   : > { %s1542_s5 = scalar_lea.vmem %s1827_s8, 16  ;;  %s1549_s25 = scalar_lea.vmem %s1827_s8, 32 }
  0x49   : > { %p1543_p13 = scmp.ne.s32.totalorder %s1827_s8, %s1542_s5  ;;  %p1550_p10 = scmp.lt.s32.totalorder %s1827_s8, %s1827_s8 }
  0x4a   : > { %p1551_p11 = scmp.lt.s32.totalorder %s1549_s25, %s1542_s5 }
  0x4b   : > { %p1545_p4 = pnand %p1543_p13, %p1503_p6 }
  0x4c   : > { %p1552_p1 = por %p1551_p11, %p1550_p10 }
  0x4d   : > { %p1546_p5 = pneg %p1545_p4 }
  0x4f   : > { %p1553_p0 = pnand %p1552_p1, %p1546_p5 }
  0x51   : > { %1556 = shalt.err (!%p1553_p0)
}
  0x52   : > { %1414 = dma.hbm_to_vmem [thread:$0]  (!%p1823_p2), %s2310_s2, 16, %s1827_s8, [#allocation7]  }
  0x53   : > { %s43_s10 = sadd.s32 1, %s1703_s19  ;;  %s1879_s11 = sand.u32 1, %s1695_s17  }
  0x54   : > { %p45_p6 = scmp.ge.s32.totalorder %s43_s10, 2  ;;  %s2297_s9 = smul.u32 104, %s1879_s11 }
  0x55   : > { %s1228_s12 = smul.u32 1664, %s1703_s19  ;;  %s2311_s0 = sld [smem:[#allocation16_spill]] }
  0x56   : > { %s2326_s10 = smov (%p45_p6, %s43_s10), 0  ;;  %s230_s14 = scalar_lea.vmem [#allocation3], %s2297_s9 }
  0x57   : > { %s47_s13 = ssub.s32 %s1703_s19, %s2326_s10  ;;  %s238_s21 = sshll.u32 %s230_s14, 4  ;;  %s1896_s21 = int_to_ptr.vmem [resolvable:$true] %s238_s21 }
  0x58   : > { %p50_p9 = scmp.eq.s32.totalorder %s47_s13, 0  ;;  %s227_s30 = scalar_lea.sflag [#allocation4], %s1879_s11 }
  0x59   : > { %p2312_p3 = scmp.ne.s32.totalorder %s2307_s6, 0 }
  0x5a   : > { %s1901_s25 = scalar_select %p50_p9, %s1695_s17, %s52_s23  }
  0x5b   : > { %s1894_s5 = scalar_lea.hbm %s2311_s0, %s1228_s12  ;;  %p1559_p7 = pneg %p2312_p3 }
  0x5c   : > { %s1557_s7 = scalar_lea.hbm %s1894_s5, 1664  ;;  %s1562_s8 = scalar_lea.hbm %s2311_s0, 3328 }
  0x5d   : > { %p1558_p2 = scmp.ne.s32.totalorder %s1894_s5, %s1557_s7  ;;  %p1563_p13 = scmp.lt.u32.totalorder %s1894_s5, %s2311_s0 }
  0x5e   : > { %p1564_p4 = scmp.lt.u32.totalorder %s1562_s8, %s1557_s7  ;;  %p1566_p10 = scmp.lt.u32.totalorder %s1557_s7, %s1894_s5 }
  0x5f   : > { %p1560_p8 = pnand %p1559_p7, %p1558_p2 }
  0x60   : > { %p1565_p5 = por %p1564_p4, %p1563_p13 }
  0x61   : > { %p1561_p12 = pneg %p1560_p8 }
  0x62   : > { %p1567_p11 = por %p1566_p10, %p1565_p5 }
  0x64   : > { %p1568_p1 = pnand %p1567_p11, %p1561_p12 }
  0x66   : > { %1571 = shalt.err (!%p1568_p1)
}
  0x67   : > { %s1572_s23 = scalar_lea.vmem %s1896_s21, 1664  ;;  %s1711_s13 = smov [#allocation3]  }
  0x68   : > { %p1573_p0 = scmp.ne.s32.totalorder %s1896_s21, %s1572_s23  ;;  %s1577_s14 = sshll.u32 %s1711_s13, 4  ;;  %s1578_s14 = int_to_ptr.vmem [resolvable:$false] %s1577_s14 }
  0x69   : > { %s1579_s9 = scalar_lea.vmem %s1578_s14, 3328  ;;  %p1580_p2 = scmp.lt.s32.totalorder %s1896_s21, %s1578_s14 }
  0x6a   : > { %p1575_p6 = pnand %p1573_p0, %p1559_p7  ;;  %p1581_p8 = scmp.lt.s32.totalorder %s1579_s9, %s1572_s23 }
  0x6c   : > { %p1576_p9 = pneg %p1575_p6  ;;  %p1582_p13 = por %p1581_p8, %p1580_p2 }
  0x6e   : > { %p1583_p4 = pnand %p1582_p13, %p1576_p9 }
  0x70   : > { %1586 = shalt.err (!%p1583_p4)
}
  0x71   : > { %s1712_s7 = smov 64   ;;  %s1713_s8 = smov 4  }
  0x72   : > { %1418 = dma.hbm_to_vmem [thread:$0]  (!%p2312_p3), %s1894_s5, 1664, %s1896_s21, %s227_s30, %s1712_s7, %s1712_s7, %s1713_s8  }
  0x73   : > { %s1939_s13 = scalar_lea.hbm %s2289_s3, %s1228_s12  ;;  %s2313_s14 = smul.u32 104, %s1879_s11 }
  0x74   : > { %s249_s1 = scalar_lea.sflag [#allocation10], %s1879_s11  ;;  %s1587_s2 = scalar_lea.hbm %s1939_s13, 1664 }
  0x75   : > { %s252_s9 = scalar_lea.vmem [#allocation9], %s2313_s14  ;;  %p1588_p12 = scmp.ne.s32.totalorder %s1939_s13, %s1587_s2 }
  0x76   : > { %s260_s0 = sshll.u32 %s252_s9, 4  ;;  %s1592_s12 = scalar_lea.hbm %s2289_s3, 3328  ;;  %s1943_s0 = int_to_ptr.vmem [resolvable:$true] %s260_s0 }
  0x77   : > { %p1590_p5 = pnand %p1588_p12, %p1559_p7  ;;  %p1593_p11 = scmp.lt.u32.totalorder %s1939_s13, %s2289_s3 }
  0x78   : > { %p1594_p1 = scmp.lt.u32.totalorder %s1592_s12, %s1587_s2  ;;  %p1596_p6 = scmp.lt.u32.totalorder %s1587_s2, %s1939_s13 }
  0x79   : > { %p1591_p10 = pneg %p1590_p5 }
  0x7a   : > { %p1595_p0 = por %p1594_p1, %p1593_p11 }
  0x7c   : > { %p1597_p9 = por %p1596_p6, %p1595_p0 }
  0x7e   : > { %p1598_p2 = pnand %p1597_p9, %p1591_p10 }
  0x80   : > { %1601 = shalt.err (!%p1598_p2)
}
  0x81   : > { %s1602_s23 = scalar_lea.vmem %s1943_s0, 1664  ;;  %s1714_s14 = smov [#allocation9]  }
  0x82   : > { %p1603_p8 = scmp.ne.s32.totalorder %s1943_s0, %s1602_s23  ;;  %s1607_s9 = sshll.u32 %s1714_s14, 4  ;;  %s1608_s9 = int_to_ptr.vmem [resolvable:$false] %s1607_s9 }
  0x83   : > { %s1609_s21 = scalar_lea.vmem %s1608_s9, 3328  ;;  %p1610_p12 = scmp.lt.s32.totalorder %s1943_s0, %s1608_s9 }
  0x84   : > { %p1605_p13 = pnand %p1603_p8, %p1559_p7  ;;  %p1611_p5 = scmp.lt.s32.totalorder %s1609_s21, %s1602_s23 }
  0x86   : > { %p1606_p4 = pneg %p1605_p13  ;;  %p1612_p11 = por %p1611_p5, %p1610_p12 }
  0x88   : > { %p1613_p1 = pnand %p1612_p11, %p1606_p4 }
  0x8a   : > { %1616 = shalt.err (!%p1613_p1)
}
  0x8b   : > { %1421 = dma.hbm_to_vmem [thread:$0]  (!%p2312_p3), %s1939_s13, 1664, %s1943_s0, %s249_s1, %s1712_s7, %s1712_s7, %s1713_s8  }
  0x8c   : > { %p2314_p7 = scmp.ne.s32.totalorder %s2306_s29, 0 }
  0x8d   : > { %s1977_s2 = sand.u32 (!%p2314_p7), 1, %s1691_s16   ;;  %p2315_p10 = scmp.ne.s32.totalorder (!%p2314_p7), %s2303_s26, 0 }
  0x8e   : > { %272 = sbr.rel (%p2314_p7) target bundleno = 456 (0x1c8), region = 36  ;;  %s275_s6 = scalar_lea.sflag (!%p2314_p7), [#allocation4], %s1977_s2 }
  0x8f   : > { %s1980_s5 = smul.u32 (!%p2314_p7), 104, %s1977_s2 }
  0x91   : > { %s1984_s12 = scalar_lea.vmem (!%p2314_p7), [#allocation3], %s1980_s5 }
  0x95   : > { %1670 = dma.done.wait (%p2315_p10), %s275_s6, 1664  }
  0x96   : > { %1672 = vsyncadd (%p2315_p10), %s275_s6, 4294965632  ;;  %p2316_p3 = scmp.ne.s32.totalorder %s2301_s24, 0 }
  0x98   : > { %1674 = dma.done.wait (%p2316_p3), [#allocation7], 48  }
  0x99   : > { %1676 = vsyncadd (%p2316_p3), [#allocation7], 4294967248  ;;  %s292_s0 = scalar_lea.sflag [#allocation10], %s1977_s2  ;;  %s1996_s1 = scalar_lea.vmem [#allocation9], %s1980_s5 }
  0x9a   : > { %1678 = dma.done.wait (%p2315_p10), %s292_s0, 1664  }
  0x9b   : > { %1680 = vsyncadd (%p2315_p10), %s292_s0, 4294965632  ;;  %v1715_v0 = vmov 0.0   ;;  %vm1716_vm0 = vmmov 0   ;;  %vm333_vm1 = vcmask 130048   ;;  %vm518_vm2 = vcmask 1041408   ;;  %v1488_v3 = vld [vmem:[%s1984_s12] sm:$0xff]  }
  0x9c   : > { %1335 = vmatprep.subr.bf16.mxu0 %v1715_v0  ;;  %1337 = vmatprep.mubr.msk.bf16.mxu0 %vm1716_vm0, %v1715_v0  ;;  %334 = vst.msk [vmem:[#allocation2] sm:$0xff] %vm333_vm1, %v1715_v0  ;;  %335 = vst.msk [vmem:[#allocation2 + $0x8] sm:$0xff] %vm333_vm1, %v1715_v0  ;;  %v412_v1 = vld [vmem:[#allocation6] sm:$0x3]  ;;  %vm478_vm3 = vcmask 31744   ;;  %v1489_v4 = vld [vmem:[%s1984_s12 + $0x38] sm:$0xff]  }
  0x9d   : > { %1389 = vmatprep.subr.bf16.mxu1 %v1715_v0  ;;  %1365 = vmatprep.mubr.msk.bf16.mxu1 %vm1716_vm0, %v1715_v0  ;;  %336 = vst.msk [vmem:[#allocation2 + $0x10] sm:$0xff] %vm333_vm1, %v1715_v0  ;;  %337 = vst.msk [vmem:[#allocation2 + $0x18] sm:$0xff] %vm333_vm1, %v1715_v0  ;;  %v520_v2 = vsel %vm518_vm2, %v412_v1, 0  ;;  %v1490_v5 = vld [vmem:[%s1984_s12 + $0x8] sm:$0xff]   ;;  %v1491_v6 = vld [vmem:[%s1984_s12 + $0x40] sm:$0xff]   ;;  %vm982_vm4 = vcmask 125952  }
  0x9e   : > { %338 = vst.msk [vmem:[#allocation2 + $0x20] sm:$0xff] %vm333_vm1, %v1715_v0  ;;  %339 = vst.msk [vmem:[#allocation2 + $0x28] sm:$0xff] %vm333_vm1, %v1715_v0  ;;  %1336 = vmatpush3.bf16.msra.mxu0 %v520_v2  ;;  %1390 = vmatpush3.bf16.msra.mxu1 %v520_v2  ;;  %v1492_v7 = vld [vmem:[%s1984_s12 + $0x10] sm:$0xff]   ;;  %v1493_v8 = vld [vmem:[%s1984_s12 + $0x48] sm:$0xff]   ;;  %s2127_s24 = scalar_lea.vmem [#allocation11], %s1980_s5  ;;  %s1256_s26 = smul.u32 1664, %s1699_s18 }
  0x9f   : > { %340 = vst.msk [vmem:[#allocation2 + $0x30] sm:$0xff] %vm333_vm1, %v1715_v0  ;;  %341 = vst.msk [vmem:[#allocation2 + $0x38] sm:$0xff] %vm333_vm1, %v1715_v0  ;;  %v1494_v9 = vld [vmem:[%s1984_s12 + $0x18] sm:$0xff]   ;;  %v1495_v10 = vld [vmem:[%s1984_s12 + $0x50] sm:$0xff]   ;;  %s1024_s29 = sshll.u32 %s2127_s24, 4  ;;  %s1010_s18 = scalar_lea.sflag [#allocation5], %s1977_s2  ;;  %s2233_s29 = int_to_ptr.vmem [resolvable:$true] %s1024_s29 }
  0xa0   : > { %342 = vst.msk [vmem:[#allocation2 + $0x40] sm:$0xff] %vm333_vm1, %v1715_v0  ;;  %343 = vst.msk [vmem:[#allocation2 + $0x48] sm:$0xff] %vm333_vm1, %v1715_v0  ;;  %v1496_v11 = vld [vmem:[%s1984_s12 + $0x20] sm:$0xff]   ;;  %v1497_v12 = vld [vmem:[%s1984_s12 + $0x58] sm:$0xff]   ;;  %s2231_s8 = scalar_lea.hbm %s2290_s4, %s1256_s26  ;;  %s1617_s13 = scalar_lea.vmem %s2233_s29, 1664 }
  0xa1   : > { %344 = vst.msk [vmem:[#allocation2 + $0x50] sm:$0xff] %vm333_vm1, %v1715_v0  ;;  %345 = vst.msk [vmem:[#allocation2 + $0x58] sm:$0xff] %vm333_vm1, %v1715_v0  ;;  %1338 = vmatmul.mubr.msk.bf16.vlgmr.msra.gmra.mrb[0].mxu0 %vm478_vm3, %v1488_v3  ;;  %1366 = vmatmul.mubr.msk.bf16.vlgmr.msra.gmra.mrb[0].mxu1 %vm478_vm3, %v1489_v4  ;;  %v1498_v13 = vld [vmem:[%s1984_s12 + $0x28] sm:$0xff]   ;;  %v1499_v14 = vld [vmem:[%s1984_s12 + $0x60] sm:$0xff]   ;;  %p1618_p0 = scmp.ne.s32.totalorder %s2233_s29, %s1617_s13  ;;  %p2317_p6 = scmp.ne.s32.totalorder %s2304_s27, 0 }
  0xa2   : > { %346 = vst.msk [vmem:[#allocation2 + $0x60] sm:$0xff] %vm333_vm1, %v1715_v0  ;;  %347 = vst.msk [vmem:[#allocation2 + $0x68] sm:$0xff] %vm333_vm1, %v1715_v0  ;;  %1341 = vmatprep.mubr.msk.bf16.mxu0 %vm1716_vm0, %v1715_v0  ;;  %1369 = vmatprep.mubr.msk.bf16.mxu1 %vm1716_vm0, %v1715_v0  ;;  %v1500_v15 = vld [vmem:[%s1984_s12 + $0x30] sm:$0xff]   ;;  %v1309_v1 = vld [vmem:[%s1996_s1 + $0x8] sm:$0xff]   ;;  %s1717_s30 = smov [#allocation11]  }
  0xa3   : > { %348 = vst.msk [vmem:[#allocation2 + $0x70] sm:$0xff] %vm333_vm1, %v1715_v0  ;;  %349 = vst.msk [vmem:[#allocation2 + $0x78] sm:$0xff] %vm333_vm1, %v1715_v0  ;;  %v360_v16 = vld [vmem:[#allocation2] sm:$0xff]  ;;  %v361_v19 = vld [vmem:[#allocation2 + $0x8] sm:$0xff]  ;;  %p1619_p9 = pnand %p1618_p0, %p2317_p6  ;;  %s1621_s22 = sshll.u32 %s1717_s30, 4  ;;  %s1622_s22 = int_to_ptr.vmem [resolvable:$false] %s1621_s22 }
  0xa4   : > { %350 = vst.msk [vmem:[#allocation2 + $0x80] sm:$0xff] %vm333_vm1, %v1715_v0  ;;  %351 = vst.msk [vmem:[#allocation2 + $0x88] sm:$0xff] %vm333_vm1, %v1715_v0  ;;  %v362_v32 = vld [vmem:[#allocation2 + $0x10] sm:$0xff]  ;;  %v1315_v34 = vld [vmem:[%s1996_s1 + $0x38] sm:$0xff]   ;;  %s1623_s23 = scalar_lea.vmem %s1622_s22, 3328  ;;  %p1624_p8 = scmp.lt.s32.totalorder %s2233_s29, %s1622_s22 }
  0xa5   : > { %352 = vst.msk [vmem:[#allocation2 + $0x90] sm:$0xff] %vm333_vm1, %v1715_v0  ;;  %353 = vst.msk [vmem:[#allocation2 + $0x98] sm:$0xff] %vm333_vm1, %v1715_v0  ;;  %v1258_v33 = vld [vmem:[%s1996_s1] sm:$0xff]   ;;  %v2114_v36 = vld [vmem:[#allocation8] ss:$0 sm:$0xff]  ;;  %v1287_v42 = vunpack.c.l.bf16 %v1315_v34  ;;  %v1288_v50 = vunpack.c.h.bf16 %v1315_v34  ;;  %p1620_p2 = pneg %p1619_p9  ;;  %p1625_p13 = scmp.lt.s32.totalorder %s1623_s23, %s1617_s13 }
  0xa6   : > { %354 = vst.msk [vmem:[#allocation2 + $0xa0] sm:$0xff] %vm333_vm1, %v1715_v0  ;;  %355 = vst.msk [vmem:[#allocation2 + $0xa8] sm:$0xff] %vm333_vm1, %v1715_v0  ;;  %v363_v38 = vld [vmem:[#allocation2 + $0x18] sm:$0xff]  ;;  %v1259_v41 = vunpack.c.l.bf16 %v1258_v33  ;;  %v1260_v48 = vunpack.c.h.bf16 %v1258_v33  ;;  %v1316_v2 = vld [vmem:[%s1996_s1 + $0x40] sm:$0xff]  }
  0xa7   : > { %356 = vst.msk [vmem:[#allocation2 + $0xb0] sm:$0xff] %vm333_vm1, %v1715_v0  ;;  %357 = vst.msk [vmem:[#allocation2 + $0xb8] sm:$0xff] %vm333_vm1, %v1715_v0  ;;  %p1626_p4 = por %p1625_p13, %p1624_p8 }
  0xa8   : > { %358 = vst.msk [vmem:[#allocation2 + $0xc0] sm:$0xff] %vm333_vm1, %v1715_v0  ;;  %359 = vst.msk [vmem:[#allocation2 + $0xc8] sm:$0xff] %vm333_vm1, %v1715_v0 }
  0xa9   : > { %1342 = vmatmul.mubr.msk.bf16.gmra.mrb[4].mxu0 %vm478_vm3, %v1490_v5  ;;  %1370 = vmatmul.mubr.msk.bf16.gmra.mrb[4].mxu1 %vm478_vm3, %v1491_v6  ;;  %p1627_p12 = pnand %p1626_p4, %p1620_p2 }
  0xaa   : > { %1345 = vmatprep.mubr.msk.bf16.mxu0 %vm1716_vm0, %v1715_v0  ;;  %1373 = vmatprep.mubr.msk.bf16.mxu1 %vm1716_vm0, %v1715_v0  ;;  %v374_v17 = vld [vmem:[#allocation2 + $0x70] sm:$0xff]  ;;  %v375_v21 = vld [vmem:[#allocation2 + $0x78] sm:$0xff] }
  0xab   : > { %v376_v35 = vld [vmem:[#allocation2 + $0x80] sm:$0xff]  ;;  %v377_v40 = vld [vmem:[#allocation2 + $0x88] sm:$0xff] }
  0xb1   : > { %1346 = vmatmul.mubr.msk.bf16.gmra.mrb[8].mxu0 %vm478_vm3, %v1492_v7  ;;  %1374 = vmatmul.mubr.msk.bf16.gmra.mrb[8].mxu1 %vm478_vm3, %v1493_v8  ;;  %v364_v7 = vld [vmem:[#allocation2 + $0x20] sm:$0xff]  ;;  %v378_v8 = vld [vmem:[#allocation2 + $0x90] sm:$0xff] }
  0xb2   : > { %1349 = vmatprep.mubr.msk.bf16.mxu0 %vm1716_vm0, %v1715_v0  ;;  %1377 = vmatprep.mubr.msk.bf16.mxu1 %vm1716_vm0, %v1715_v0 }
  0xb9   : > { %1350 = vmatmul.mubr.msk.bf16.gmra.mrb[12].mxu0 %vm478_vm3, %v1494_v9  ;;  %1378 = vmatmul.mubr.msk.bf16.gmra.mrb[12].mxu1 %vm478_vm3, %v1495_v10  ;;  %v1263_v9 = vunpack.c.l.bf16 %v1309_v1  ;;  %v1291_v10 = vunpack.c.l.bf16 %v1316_v2 }
  0xba   : > { %1353 = vmatprep.mubr.msk.bf16.mxu0 %vm1716_vm0, %v1715_v0  ;;  %1381 = vmatprep.mubr.msk.bf16.mxu1 %vm1716_vm0, %v1715_v0 }
  0xc1   : > { %1354 = vmatmul.mubr.msk.bf16.gmra.mrb[16].mxu0 %vm478_vm3, %v1496_v11  ;;  %1382 = vmatmul.mubr.msk.bf16.gmra.mrb[16].mxu1 %vm478_vm3, %v1497_v12 }
  0xc2   : > { %1357 = vmatprep.mubr.msk.bf16.mxu0 %vm1716_vm0, %v1715_v0  ;;  %1385 = vmatprep.mubr.msk.bf16.mxu1 %vm1716_vm0, %v1715_v0 }
  0xc9   : > { %1358 = vmatmul.mubr.msk.bf16.gmra.mrb[20].mxu0 %vm478_vm3, %v1498_v13  ;;  %1386 = vmatmul.mubr.msk.bf16.gmra.mrb[20].mxu1 %vm478_vm3, %v1499_v14 }
  0xca   : > { %1361 = vmatprep.mubr.msk.bf16.mxu0 %vm1716_vm0, %v1715_v0 }
  0xd1   : > { %1362 = vmatmul.mubr.msk.bf16.gmra.mrb[24].mxu0 %vm478_vm3, %v1500_v15 }
 0x174   : > { %v556_v18 = vpop.f32.mrb[0].mxu0  ;;  %v612_v20 = vpop.f32.mrb[0].mxu1 }
 0x175   : > { %v659_v22 = vadd.f32 %v556_v18, %v360_v16  ;;  %v1339_v23 = vpop.f32.mrb[1].mxu0  ;;  %v673_v24 = vadd.f32 %v612_v20, %v374_v17  ;;  %v1367_v25 = vpop.f32.mrb[1].mxu1  ;;  %v365_v18 = vld [vmem:[#allocation2 + $0x28] sm:$0xff]  ;;  %v379_v20 = vld [vmem:[#allocation2 + $0x98] sm:$0xff] }
 0x176   : > { %v559_v26 = vpop.f32.mrb[2].mxu0  ;;  %v615_v27 = vpop.f32.mrb[2].mxu1 }
 0x177   : > { %686 = vst.msk [vmem:[#allocation2] sm:$0xff] %vm333_vm1, %v659_v22  ;;  %v660_v28 = vadd.f32 %v559_v26, %v361_v19  ;;  %v1340_v29 = vpop.f32.mrb[3].mxu0  ;;  %700 = vst.msk [vmem:[#allocation2 + $0x70] sm:$0xff] %vm333_vm1, %v673_v24  ;;  %v674_v30 = vadd.f32 %v615_v27, %v375_v21  ;;  %v1368_v31 = vpop.f32.mrb[3].mxu1  ;;  %v1264_v22 = vunpack.c.h.bf16 %v1309_v1  ;;  %v1292_v24 = vunpack.c.h.bf16 %v1316_v2 }
 0x179   : > { %687 = vst.msk [vmem:[#allocation2 + $0x8] sm:$0xff] %vm333_vm1, %v660_v28  ;;  %701 = vst.msk [vmem:[#allocation2 + $0x78] sm:$0xff] %vm333_vm1, %v674_v30 }
 0x17c   : > { %v564_v37 = vpop.f32.mrb[4].mxu0  ;;  %v620_v39 = vpop.f32.mrb[4].mxu1 }
 0x17d   : > { %v661_v43 = vadd.f32 %v564_v37, %v362_v32  ;;  %v1343_v44 = vpop.f32.mrb[5].mxu0  ;;  %v675_v45 = vadd.f32 %v620_v39, %v376_v35  ;;  %v1371_v46 = vpop.f32.mrb[5].mxu1 }
 0x17e   : > { %v715_v47 = vld [vmem:[#allocation2] sm:$0xff]  ;;  %v729_v49 = vld [vmem:[#allocation2 + $0x70] sm:$0xff]  ;;  %v567_v51 = vpop.f32.mrb[6].mxu0  ;;  %v623_v52 = vpop.f32.mrb[6].mxu1 }
 0x17f   : > { %v748_v53 = vadd.f32 %v2114_v36, %v715_v47  ;;  %v762_v54 = vadd.f32 %v2114_v36, %v729_v49  ;;  %688 = vst.msk [vmem:[#allocation2 + $0x10] sm:$0xff] %vm333_vm1, %v661_v43  ;;  %v662_v55 = vadd.f32 %v567_v51, %v363_v38  ;;  %v1344_v56 = vpop.f32.mrb[7].mxu0  ;;  %702 = vst.msk [vmem:[#allocation2 + $0x80] sm:$0xff] %vm333_vm1, %v675_v45  ;;  %v1372_v58 = vpop.f32.mrb[7].mxu1  ;;  %v366_v44 = vld [vmem:[#allocation2 + $0x30] sm:$0xff]  ;;  %v380_v51 = vld [vmem:[#allocation2 + $0xa0] sm:$0xff] }
 0x180   : > { %v676_v57 = vadd.f32 %v623_v52, %v377_v40  ;;  %v716_v59 = vld [vmem:[#allocation2 + $0x8] sm:$0xff]  ;;  %v730_v60 = vld [vmem:[#allocation2 + $0x78] sm:$0xff] }
 0x181   : > { %v826_v61 = vadd.f32 %v1259_v41, %v748_v53  ;;  %v749_v62 = vadd.f32 %v2114_v36, %v716_v59  ;;  %v840_v63 = vadd.f32 %v1287_v42, %v762_v54  ;;  %v763_v0 = vadd.f32 %v2114_v36, %v730_v60  ;;  %689 = vst.msk [vmem:[#allocation2 + $0x18] sm:$0xff] %vm333_vm1, %v662_v55  ;;  %v1310_v49 = vld [vmem:[%s1996_s1 + $0x10] sm:$0xff]   ;;  %v381_v55 = vld [vmem:[#allocation2 + $0xa8] sm:$0xff] }
 0x182   : > { %703 = vst.msk [vmem:[#allocation2 + $0x88] sm:$0xff] %vm333_vm1, %v676_v57  ;;  %v367_v53 = vld [vmem:[#allocation2 + $0x38] sm:$0xff] }
 0x183   : > { %v852_v3 = vmax.f32 %v826_v61, 0.0  ;;  %v827_v4 = vadd.f32 %v1260_v48, %v749_v62  ;;  %v866_v5 = vmax.f32 %v840_v63, 0.0  ;;  %v841_v6 = vadd.f32 %v1288_v50, %v763_v0  ;;  %v1317_v50 = vld [vmem:[%s1996_s1 + $0x48] sm:$0xff]  }
 0x184   : > { %v572_v11 = vpop.f32.mrb[8].mxu0  ;;  %v628_v12 = vpop.f32.mrb[8].mxu1  ;;  %v1267_v62 = vunpack.c.l.bf16 %v1310_v49  ;;  %v1295_v63 = vunpack.c.l.bf16 %v1317_v50 }
 0x185   : > { %v1230_v13 = vpack.c.bf16 %v852_v3, %v852_v3  ;;  %v853_v14 = vmax.f32 %v827_v4, 0.0  ;;  %v1244_v15 = vpack.c.bf16 %v866_v5, %v866_v5  ;;  %v867_v16 = vmax.f32 %v841_v6, 0.0  ;;  %v1347_v17 = vpop.f32.mrb[9].mxu0  ;;  %v1375_v19 = vpop.f32.mrb[9].mxu1 }
 0x186   : > { %v717_v21 = vld [vmem:[#allocation2 + $0x10] sm:$0xff]  ;;  %v731_v23 = vld [vmem:[#allocation2 + $0x80] sm:$0xff]  ;;  %v663_v25 = vadd.f32 %v572_v11, %v364_v7  ;;  %v575_v26 = vpop.f32.mrb[10].mxu0  ;;  %v677_v27 = vadd.f32 %v628_v12, %v378_v8  ;;  %v631_v28 = vpop.f32.mrb[10].mxu1 }
 0x187   : > { %983 = vst.msk [vmem:[%s2127_s24] sm:$0xf] %vm982_vm4, %v1230_v13  ;;  %v1231_v29 = vpack.c.bf16 %v853_v14, %v853_v14  ;;  %997 = vst.msk [vmem:[%s2127_s24 + $0x38] sm:$0xf] %vm982_vm4, %v1244_v15  ;;  %v1245_v30 = vpack.c.bf16 %v867_v16, %v867_v16  ;;  %v750_v31 = vadd.f32 %v2114_v36, %v717_v21  ;;  %v1348_v33 = vpop.f32.mrb[11].mxu0  ;;  %v1376_v34 = vpop.f32.mrb[11].mxu1  ;;  %v1268_v13 = vunpack.c.h.bf16 %v1310_v49 }
 0x188   : > { %v764_v32 = vadd.f32 %v2114_v36, %v731_v23  ;;  %v718_v35 = vld [vmem:[#allocation2 + $0x18] sm:$0xff]  ;;  %690 = vst.msk [vmem:[#allocation2 + $0x20] sm:$0xff] %vm333_vm1, %v663_v25  ;;  %v664_v38 = vadd.f32 %v575_v26, %v365_v18  ;;  %704 = vst.msk [vmem:[#allocation2 + $0x90] sm:$0xff] %vm333_vm1, %v677_v27  ;;  %v678_v39 = vadd.f32 %v631_v28, %v379_v20  ;;  %v1296_v15 = vunpack.c.h.bf16 %v1317_v50  ;;  %v368_v18 = vld [vmem:[#allocation2 + $0x40] sm:$0xff] }
 0x189   : > { %v732_v37 = vld [vmem:[#allocation2 + $0x88] sm:$0xff]  ;;  %984 = vst.msk [vmem:[%s2127_s24 + $0x4] sm:$0xf] %vm982_vm4, %v1231_v29  ;;  %998 = vst.msk [vmem:[%s2127_s24 + $0x3c] sm:$0xf] %vm982_vm4, %v1245_v30  ;;  %v828_v40 = vadd.f32 %v1263_v9, %v750_v31  ;;  %v751_v41 = vadd.f32 %v2114_v36, %v718_v35  ;;  %v382_v25 = vld [vmem:[#allocation2 + $0xb0] sm:$0xff] }
 0x18a   : > { %v842_v42 = vadd.f32 %v1291_v10, %v764_v32  ;;  %v765_v43 = vadd.f32 %v2114_v36, %v732_v37  ;;  %691 = vst.msk [vmem:[#allocation2 + $0x28] sm:$0xff] %vm333_vm1, %v664_v38  ;;  %705 = vst.msk [vmem:[#allocation2 + $0x98] sm:$0xff] %vm333_vm1, %v678_v39  ;;  %v1311_v23 = vld [vmem:[%s1996_s1 + $0x18] sm:$0xff]  }
 0x18b   : > { %v854_v45 = vmax.f32 %v828_v40, 0.0  ;;  %v829_v46 = vadd.f32 %v1264_v22, %v751_v41  ;;  %v369_v31 = vld [vmem:[#allocation2 + $0x48] sm:$0xff]  ;;  %v383_v33 = vld [vmem:[#allocation2 + $0xb8] sm:$0xff]  ;;  %v1271_v34 = vunpack.c.l.bf16 %v1311_v23 }
 0x18c   : > { %v868_v47 = vmax.f32 %v842_v42, 0.0  ;;  %v843_v48 = vadd.f32 %v1292_v24, %v765_v43  ;;  %v580_v52 = vpop.f32.mrb[12].mxu0  ;;  %v636_v54 = vpop.f32.mrb[12].mxu1  ;;  %v1318_v24 = vld [vmem:[%s1996_s1 + $0x50] sm:$0xff]  }
 0x18d   : > { %v1232_v56 = vpack.c.bf16 %v854_v45, %v854_v45  ;;  %v855_v57 = vmax.f32 %v829_v46, 0.0  ;;  %v1351_v60 = vpop.f32.mrb[13].mxu0  ;;  %v1379_v61 = vpop.f32.mrb[13].mxu1  ;;  %v665_v0 = vadd.f32 %v580_v52, %v366_v44  ;;  %v679_v2 = vadd.f32 %v636_v54, %v380_v51 }
 0x18e   : > { %v1246_v58 = vpack.c.bf16 %v868_v47, %v868_v47  ;;  %v869_v59 = vmax.f32 %v843_v48, 0.0  ;;  %v583_v1 = vpop.f32.mrb[14].mxu0  ;;  %v639_v3 = vpop.f32.mrb[14].mxu1  ;;  %v1299_v35 = vunpack.c.l.bf16 %v1318_v24  ;;  %v1272_v48 = vunpack.c.h.bf16 %v1311_v23 }
 0x18f   : > { %985 = vst.msk [vmem:[%s2127_s24 + $0x8] sm:$0xf] %vm982_vm4, %v1232_v56  ;;  %v1233_v4 = vpack.c.bf16 %v855_v57, %v855_v57  ;;  %v719_v6 = vld [vmem:[#allocation2 + $0x20] sm:$0xff]  ;;  %v733_v7 = vld [vmem:[#allocation2 + $0x90] sm:$0xff]  ;;  %v666_v8 = vadd.f32 %v583_v1, %v367_v53  ;;  %v1352_v9 = vpop.f32.mrb[15].mxu0  ;;  %v680_v10 = vadd.f32 %v639_v3, %v381_v55  ;;  %v1380_v11 = vpop.f32.mrb[15].mxu1  ;;  %v1300_v50 = vunpack.c.h.bf16 %v1318_v24 }
 0x190   : > { %999 = vst.msk [vmem:[%s2127_s24 + $0x40] sm:$0xf] %vm982_vm4, %v1246_v58  ;;  %v1247_v5 = vpack.c.bf16 %v869_v59, %v869_v59  ;;  %v752_v12 = vadd.f32 %v2114_v36, %v719_v6  ;;  %v766_v14 = vadd.f32 %v2114_v36, %v733_v7  ;;  %v370_v3 = vld [vmem:[#allocation2 + $0x50] sm:$0xff] }
 0x191   : > { %692 = vst.msk [vmem:[#allocation2 + $0x30] sm:$0xff] %vm333_vm1, %v665_v0  ;;  %706 = vst.msk [vmem:[#allocation2 + $0xa0] sm:$0xff] %vm333_vm1, %v679_v2  ;;  %v720_v16 = vld [vmem:[#allocation2 + $0x28] sm:$0xff]  ;;  %v734_v17 = vld [vmem:[#allocation2 + $0x98] sm:$0xff] }
 0x192   : > { %986 = vst.msk [vmem:[%s2127_s24 + $0xc] sm:$0xf] %vm982_vm4, %v1233_v4  ;;  %1000 = vst.msk [vmem:[%s2127_s24 + $0x44] sm:$0xf] %vm982_vm4, %v1247_v5  ;;  %v830_v19 = vadd.f32 %v1267_v62, %v752_v12  ;;  %v753_v20 = vadd.f32 %v2114_v36, %v720_v16  ;;  %v844_v21 = vadd.f32 %v1295_v63, %v766_v14  ;;  %v1312_v63 = vld [vmem:[%s1996_s1 + $0x20] sm:$0xff]   ;;  %v1319_v0 = vld [vmem:[%s1996_s1 + $0x58] sm:$0xff]  }
 0x193   : > { %693 = vst.msk [vmem:[#allocation2 + $0x38] sm:$0xff] %vm333_vm1, %v666_v8  ;;  %707 = vst.msk [vmem:[#allocation2 + $0xa8] sm:$0xff] %vm333_vm1, %v680_v10  ;;  %v767_v22 = vadd.f32 %v2114_v36, %v734_v17  ;;  %v384_v4 = vld [vmem:[#allocation2 + $0xc0] sm:$0xff]  ;;  %v1275_v9 = vunpack.c.l.bf16 %v1312_v63  ;;  %v1303_v10 = vunpack.c.l.bf16 %v1319_v0  ;;  %v371_v17 = vld [vmem:[#allocation2 + $0x58] sm:$0xff]  ;;  %v1276_v24 = vunpack.c.h.bf16 %v1312_v63 }
 0x194   : > { %v856_v26 = vmax.f32 %v830_v19, 0.0  ;;  %v831_v27 = vadd.f32 %v1268_v13, %v753_v20  ;;  %v870_v28 = vmax.f32 %v844_v21, 0.0  ;;  %v588_v30 = vpop.f32.mrb[16].mxu0  ;;  %v644_v32 = vpop.f32.mrb[16].mxu1  ;;  %v385_v20 = vld [vmem:[#allocation2 + $0xc8] sm:$0xff] }
 0x195   : > { %v845_v29 = vadd.f32 %v1296_v15, %v767_v22  ;;  %v667_v37 = vadd.f32 %v588_v30, %v368_v18  ;;  %v1355_v38 = vpop.f32.mrb[17].mxu0  ;;  %v681_v39 = vadd.f32 %v644_v32, %v382_v25  ;;  %v1383_v40 = vpop.f32.mrb[17].mxu1 }
 0x196   : > { %v1234_v41 = vpack.c.bf16 %v856_v26, %v856_v26  ;;  %v857_v42 = vmax.f32 %v831_v27, 0.0  ;;  %v1248_v43 = vpack.c.bf16 %v870_v28, %v870_v28  ;;  %v591_v45 = vpop.f32.mrb[18].mxu0  ;;  %v647_v46 = vpop.f32.mrb[18].mxu1  ;;  %v1304_v26 = vunpack.c.h.bf16 %v1319_v0 }
 0x197   : > { %v871_v44 = vmax.f32 %v845_v29, 0.0  ;;  %694 = vst.msk [vmem:[#allocation2 + $0x40] sm:$0xff] %vm333_vm1, %v667_v37  ;;  %v668_v51 = vadd.f32 %v591_v45, %v369_v31  ;;  %v1356_v52 = vpop.f32.mrb[19].mxu0  ;;  %708 = vst.msk [vmem:[#allocation2 + $0xb0] sm:$0xff] %vm333_vm1, %v681_v39  ;;  %v682_v53 = vadd.f32 %v647_v46, %v383_v33  ;;  %v1384_v54 = vpop.f32.mrb[19].mxu1  ;;  %v1320_v45 = vld [vmem:[%s1996_s1 + $0x60] sm:$0xff]  }
 0x198   : > { %v721_v47 = vld [vmem:[#allocation2 + $0x30] sm:$0xff]  ;;  %v735_v49 = vld [vmem:[#allocation2 + $0xa0] sm:$0xff]  ;;  %987 = vst.msk [vmem:[%s2127_s24 + $0x10] sm:$0xf] %vm982_vm4, %v1234_v41  ;;  %v1235_v55 = vpack.c.bf16 %v857_v42, %v857_v42  ;;  %1001 = vst.msk [vmem:[%s2127_s24 + $0x48] sm:$0xf] %vm982_vm4, %v1248_v43  ;;  %v1307_v52 = vunpack.c.l.bf16 %v1320_v45 }
 0x199   : > { %v1249_v56 = vpack.c.bf16 %v871_v44, %v871_v44  ;;  %v754_v57 = vadd.f32 %v2114_v36, %v721_v47  ;;  %v768_v59 = vadd.f32 %v2114_v36, %v735_v49  ;;  %695 = vst.msk [vmem:[#allocation2 + $0x48] sm:$0xff] %vm333_vm1, %v668_v51  ;;  %709 = vst.msk [vmem:[#allocation2 + $0xb8] sm:$0xff] %vm333_vm1, %v682_v53  ;;  %v1313_v44 = vld [vmem:[%s1996_s1 + $0x28] sm:$0xff]  }
 0x19a   : > { %v722_v58 = vld [vmem:[#allocation2 + $0x38] sm:$0xff]  ;;  %v736_v60 = vld [vmem:[#allocation2 + $0xa8] sm:$0xff]  ;;  %988 = vst.msk [vmem:[%s2127_s24 + $0x14] sm:$0xf] %vm982_vm4, %v1235_v55  ;;  %v1279_v51 = vunpack.c.l.bf16 %v1313_v44 }
 0x19b   : > { %v755_v61 = vadd.f32 %v2114_v36, %v722_v58  ;;  %v769_v62 = vadd.f32 %v2114_v36, %v736_v60  ;;  %1002 = vst.msk [vmem:[%s2127_s24 + $0x4c] sm:$0xf] %vm982_vm4, %v1249_v56  ;;  %v832_v1 = vadd.f32 %v1271_v34, %v754_v57  ;;  %v846_v2 = vadd.f32 %v1299_v35, %v768_v59  ;;  %v373_v59 = vld [vmem:[#allocation2 + $0x68] sm:$0xff] }
 0x19c   : > { %v596_v11 = vpop.f32.mrb[20].mxu0  ;;  %v652_v12 = vpop.f32.mrb[20].mxu1 }
 0x19d   : > { %v833_v5 = vadd.f32 %v1272_v48, %v755_v61  ;;  %v847_v6 = vadd.f32 %v1300_v50, %v769_v62  ;;  %v858_v7 = vmax.f32 %v832_v1, 0.0  ;;  %v872_v8 = vmax.f32 %v846_v2, 0.0  ;;  %v1359_v16 = vpop.f32.mrb[21].mxu0  ;;  %v1387_v19 = vpop.f32.mrb[21].mxu1  ;;  %v372_v50 = vld [vmem:[#allocation2 + $0x60] sm:$0xff] }
 0x19e   : > { %v669_v15 = vadd.f32 %v596_v11, %v370_v3  ;;  %v683_v18 = vadd.f32 %v652_v12, %v384_v4  ;;  %v723_v23 = vld [vmem:[#allocation2 + $0x40] sm:$0xff]  ;;  %v737_v25 = vld [vmem:[#allocation2 + $0xb0] sm:$0xff]  ;;  %v599_v27 = vpop.f32.mrb[22].mxu0  ;;  %v655_v28 = vpop.f32.mrb[22].mxu1 }
 0x19f   : > { %v859_v13 = vmax.f32 %v833_v5, 0.0  ;;  %v873_v14 = vmax.f32 %v847_v6, 0.0  ;;  %v1236_v21 = vpack.c.bf16 %v858_v7, %v858_v7  ;;  %v1250_v22 = vpack.c.bf16 %v872_v8, %v872_v8  ;;  %v1360_v33 = vpop.f32.mrb[23].mxu0  ;;  %v1388_v34 = vpop.f32.mrb[23].mxu1  ;;  %v1314_v16 = vld [vmem:[%s1996_s1 + $0x30] sm:$0xff]  }
 0x1a0   : > { %v756_v31 = vadd.f32 %v2114_v36, %v723_v23  ;;  %v770_v32 = vadd.f32 %v2114_v36, %v737_v25  ;;  %696 = vst.msk [vmem:[#allocation2 + $0x50] sm:$0xff] %vm333_vm1, %v669_v15  ;;  %710 = vst.msk [vmem:[#allocation2 + $0xc0] sm:$0xff] %vm333_vm1, %v683_v18  ;;  %v724_v35 = vld [vmem:[#allocation2 + $0x48] sm:$0xff]  ;;  %v738_v37 = vld [vmem:[#allocation2 + $0xb8] sm:$0xff]  ;;  %v670_v38 = vadd.f32 %v599_v27, %v371_v17  ;;  %v1280_v5 = vunpack.c.h.bf16 %v1313_v44 }
 0x1a1   : > { %v1237_v29 = vpack.c.bf16 %v859_v13, %v859_v13  ;;  %v1251_v30 = vpack.c.bf16 %v873_v14, %v873_v14  ;;  %989 = vst.msk [vmem:[%s2127_s24 + $0x18] sm:$0xf] %vm982_vm4, %v1236_v21  ;;  %1003 = vst.msk [vmem:[%s2127_s24 + $0x50] sm:$0xf] %vm982_vm4, %v1250_v22  ;;  %v684_v39 = vadd.f32 %v655_v28, %v385_v20  ;;  %v1308_v6 = vunpack.c.h.bf16 %v1320_v45 }
 0x1a2   : > { %v834_v40 = vadd.f32 %v1275_v9, %v756_v31  ;;  %v757_v41 = vadd.f32 %v2114_v36, %v724_v35  ;;  %v848_v42 = vadd.f32 %v1303_v10, %v770_v32  ;;  %v771_v43 = vadd.f32 %v2114_v36, %v738_v37  ;;  %697 = vst.msk [vmem:[#allocation2 + $0x58] sm:$0xff] %vm333_vm1, %v670_v38 }
 0x1a3   : > { %990 = vst.msk [vmem:[%s2127_s24 + $0x1c] sm:$0xf] %vm982_vm4, %v1237_v29  ;;  %1004 = vst.msk [vmem:[%s2127_s24 + $0x54] sm:$0xf] %vm982_vm4, %v1251_v30  ;;  %v1283_v23 = vunpack.c.l.bf16 %v1314_v16  ;;  %v1284_v28 = vunpack.c.h.bf16 %v1314_v16 }
 0x1a4   : > { %711 = vst.msk [vmem:[#allocation2 + $0xc8] sm:$0xff] %vm333_vm1, %v684_v39  ;;  %v860_v46 = vmax.f32 %v834_v40, 0.0  ;;  %v835_v47 = vadd.f32 %v1276_v24, %v757_v41  ;;  %v874_v48 = vmax.f32 %v848_v42, 0.0  ;;  %v849_v49 = vadd.f32 %v1304_v26, %v771_v43  ;;  %v604_v53 = vpop.f32.mrb[24].mxu0 }
 0x1a5   : > { %v1363_v58 = vpop.f32.mrb[25].mxu0  ;;  %v671_v62 = vadd.f32 %v604_v53, %v372_v50 }
 0x1a6   : > { %v1238_v54 = vpack.c.bf16 %v860_v46, %v860_v46  ;;  %v861_v55 = vmax.f32 %v835_v47, 0.0  ;;  %v1252_v56 = vpack.c.bf16 %v874_v48, %v874_v48  ;;  %v875_v57 = vmax.f32 %v849_v49, 0.0  ;;  %v607_v63 = vpop.f32.mrb[26].mxu0 }
 0x1a7   : > { %v725_v60 = vld [vmem:[#allocation2 + $0x50] sm:$0xff]  ;;  %v739_v61 = vld [vmem:[#allocation2 + $0xc0] sm:$0xff]  ;;  %v1364_v4 = vpop.f32.mrb[27].mxu0  ;;  %698 = vst.msk [vmem:[#allocation2 + $0x60] sm:$0xff] %vm333_vm1, %v671_v62  ;;  %v672_v7 = vadd.f32 %v607_v63, %v373_v59 }
 0x1a8   : > { %991 = vst.msk [vmem:[%s2127_s24 + $0x20] sm:$0xf] %vm982_vm4, %v1238_v54  ;;  %v1239_v0 = vpack.c.bf16 %v861_v55, %v861_v55  ;;  %1005 = vst.msk [vmem:[%s2127_s24 + $0x58] sm:$0xf] %vm982_vm4, %v1252_v56  ;;  %v1253_v1 = vpack.c.bf16 %v875_v57, %v875_v57  ;;  %v758_v2 = vadd.f32 %v2114_v36, %v725_v60 }
 0x1a9   : > { %v772_v3 = vadd.f32 %v2114_v36, %v739_v61  ;;  %v726_v9 = vld [vmem:[#allocation2 + $0x58] sm:$0xff]  ;;  %699 = vst.msk [vmem:[#allocation2 + $0x68] sm:$0xff] %vm333_vm1, %v672_v7 }
 0x1aa   : > { %992 = vst.msk [vmem:[%s2127_s24 + $0x24] sm:$0xf] %vm982_vm4, %v1239_v0  ;;  %1006 = vst.msk [vmem:[%s2127_s24 + $0x5c] sm:$0xf] %vm982_vm4, %v1253_v1  ;;  %v836_v8 = vadd.f32 %v1279_v51, %v758_v2  ;;  %v759_v12 = vadd.f32 %v2114_v36, %v726_v9 }
 0x1ab   : > { %v850_v10 = vadd.f32 %v1307_v52, %v772_v3  ;;  %v740_v11 = vld [vmem:[#allocation2 + $0xc8] sm:$0xff] }
 0x1ac   : > { %v773_v13 = vadd.f32 %v2114_v36, %v740_v11  ;;  %v862_v14 = vmax.f32 %v836_v8, 0.0  ;;  %v837_v17 = vadd.f32 %v1280_v5, %v759_v12 }
 0x1ad   : > { %v876_v15 = vmax.f32 %v850_v10, 0.0 }
 0x1ae   : > { %v851_v18 = vadd.f32 %v1308_v6, %v773_v13  ;;  %v1240_v19 = vpack.c.bf16 %v862_v14, %v862_v14  ;;  %v863_v21 = vmax.f32 %v837_v17, 0.0  ;;  %v727_v24 = vld [vmem:[#allocation2 + $0x60] sm:$0xff] }
 0x1af   : > { %v1254_v20 = vpack.c.bf16 %v876_v15, %v876_v15  ;;  %v760_v27 = vadd.f32 %v2114_v36, %v727_v24 }
 0x1b0   : > { %v877_v22 = vmax.f32 %v851_v18, 0.0  ;;  %993 = vst.msk [vmem:[%s2127_s24 + $0x28] sm:$0xf] %vm982_vm4, %v1240_v19  ;;  %v1241_v25 = vpack.c.bf16 %v863_v21, %v863_v21  ;;  %v728_v29 = vld [vmem:[#allocation2 + $0x68] sm:$0xff] }
 0x1b1   : > { %1007 = vst.msk [vmem:[%s2127_s24 + $0x60] sm:$0xf] %vm982_vm4, %v1254_v20  ;;  %v838_v30 = vadd.f32 %v1283_v23, %v760_v27  ;;  %v761_v31 = vadd.f32 %v2114_v36, %v728_v29 }
 0x1b2   : > { %v1255_v26 = vpack.c.bf16 %v877_v22, %v877_v22  ;;  %994 = vst.msk [vmem:[%s2127_s24 + $0x2c] sm:$0xf] %vm982_vm4, %v1241_v25 }
 0x1b3   : > { %v864_v32 = vmax.f32 %v838_v30, 0.0  ;;  %v839_v33 = vadd.f32 %v1284_v28, %v761_v31 }
 0x1b4   : > { %1008 = vst.msk [vmem:[%s2127_s24 + $0x64] sm:$0xf] %vm982_vm4, %v1255_v26 }
 0x1b5   : > { %v1242_v34 = vpack.c.bf16 %v864_v32, %v864_v32  ;;  %v865_v35 = vmax.f32 %v839_v33, 0.0 }
 0x1b7   : > { %995 = vst.msk [vmem:[%s2127_s24 + $0x30] sm:$0xf] %vm982_vm4, %v1242_v34  ;;  %v1243_v37 = vpack.c.bf16 %v865_v35, %v865_v35 }
 0x1b9   : > { %996 = vst.msk [vmem:[%s2127_s24 + $0x34] sm:$0xf] %vm982_vm4, %v1243_v37 }
 0x1ba   : > { %1630 = shalt.err (!%p1627_p12)
}
 0x1bb   : > { %s1631_s14 = scalar_lea.hbm %s2231_s8, 1664  ;;  %s1635_s5 = scalar_lea.hbm %s2290_s4, 3328 }
 0x1bc   : > { %p1632_p5 = scmp.ne.s32.totalorder %s2231_s8, %s1631_s14  ;;  %p1636_p7 = scmp.lt.u32.totalorder %s2231_s8, %s2290_s4 }
 0x1bd   : > { %p1637_p10 = scmp.lt.u32.totalorder %s1635_s5, %s1631_s14  ;;  %p1639_p0 = scmp.lt.u32.totalorder %s1631_s14, %s2231_s8 }
 0x1be   : > { %p1633_p11 = pnand %p1632_p5, %p2317_p6 }
 0x1bf   : > { %p1638_p3 = por %p1637_p10, %p1636_p7 }
 0x1c0   : > { %p1634_p1 = pneg %p1633_p11 }
 0x1c1   : > { %p1640_p9 = por %p1639_p0, %p1638_p3 }
 0x1c3   : > { %p1641_p2 = pnand %p1640_p9, %p1634_p1 }
 0x1c5   : > { %1644 = shalt.err (!%p1641_p2)
}
 0x1c6   : > { %s1718_s0 = smov 64   ;;  %s1719_s1 = smov 4  }
 0x1c7   : > { %1406 = dma.vmem_to_hbm [thread:$0]  (%p2317_p6), %s2233_s29, 1664, %s2231_s8, %s1010_s18, %s1718_s0, %s1718_s0, %s1719_s1  }
 0x1c8 PF: > { %s1039_s24 = sand.u32 1, %s1687_s15   ;;  %p2318_p8 = scmp.ne.s32.totalorder %s2305_s28, 0 }
 0x1c9   : > { %p2319_p13 = scmp.ge.s32.totalorder %s1707_s20, 2  ;;  %s1040_s26 = scalar_lea.sflag [#allocation5], %s1039_s24 }
 0x1cb   : > { %p1423_p4 = pnand %p2319_p13, %p2318_p8 }
 0x1cd   : > { %1682 = dma.done.wait (!%p1423_p4), %s1040_s26, 1664  }
 0x1ce   : > { %1684 = vsyncadd (!%p1423_p4), %s1040_s26, 4294965632  ;;  %s24_s20 = sadd.s32 1, %s1707_s20   ;;  %s2320_s15 = smov %s1691_s16 }
 0x1cf   : > { %p21_p12 = scmp.ge.s32.totalorder %s24_s20, 4   ;;  %s2321_s16 = smov %s1695_s17 }
 0x1d0   : > { %s2322_s17 = smov %s1901_s25  ;;  %s2323_s18 = smov %s1703_s19 }
 0x1d1   : > { %s2324_s19 = smov %s2326_s10  ;;  %23 = sbr.rel (!%p21_p12) target bundleno = 13 (0xd), region = 112 }
 0x1d8   :  { %1045 = vsyncpa [#allocation4], 1 }
 0x1d9   :  { %1047 = vsyncpa [#allocation4 + $0x1], 1 }
 0x1da   :  { %1048 = vsyncpa [#allocation7], 1 }
 0x1db   :  { %1049 = vsyncpa [#allocation10], 1 }
 0x1dc   :  { %1051 = vsyncpa [#allocation10 + $0x1], 1 }
 0x1dd   :  { %1052 = vsyncpa [#allocation5], 1 }
 0x1de   :  { %1054 = vsyncpa [#allocation5 + $0x1], 1 }

// kernel: wrn_forward.18
= control target key start
LH: loop header
LB: loop body
LE: loop exit
PB: predicated region body
PF: predicated region fallthrough
CT: control target
= control target key end

     0   :  { %8 = vsyncpa [#allocation4], 0  ;;  %s1950_s0 = inlined_call_operand.hbm [shape: bf16[416,16], index: 0, kind: input, shape index: {}]   ;;  %s1951_s1 = inlined_call_operand.hbm [shape: bf16[16,8], index: 1, kind: input, shape index: {}]   ;;  %s1952_s2 = inlined_call_operand.hbm [shape: f32[1,8], index: 2, kind: input, shape index: {}]   ;;  %s1953_s3 = inlined_call_operand.hbm [shape: bf16[416,8], index: 3, kind: output, shape index: {}]  }
   0x1   :  { %10 = vsyncpa [#allocation4 + $0x1], 0 }
   0x2   :  { %11 = vsyncpa [#allocation7], 0 }
   0x3   :  { %12 = vsyncpa [#allocation5], 0 }
   0x4   :  { %14 = vsyncpa [#allocation5 + $0x1], 0  ;;  %s1469_s12 = smov 0   ;;  %s1471_s13 = smov 0  }
   0x5   :  { %s1473_s14 = smov 0   ;;  %s1475_s15 = smov 0  }
   0x6   :  { %s1477_s16 = smov 0   ;;  %s1479_s17 = smov 0  }
   0x7 LB: > { %s995_s18 = sadd.s32 4294967295, %s1437_s17   ;;  %s996_s19 = sadd.s32 4294967294, %s1437_s17   ;;  %s1437_s17 = sphi %s1479_s17, %s20_s17   ;;  %s1433_s16 = sphi %s1477_s16, %s1975_s16   ;;  %s1429_s15 = sphi %s1475_s15, %s1974_s15   ;;  %s1425_s14 = sphi %s1473_s14, %s1973_s14   ;;  %s1421_s13 = sphi %s1471_s13, %s1972_s13   ;;  %s1417_s12 = sphi %s1469_s12, %s1971_s12  }
   0x8   : > { %p61_p0 = scmp.ne.s32.totalorder %s1421_s13, %s1417_s12  ;;  %p1503_p1 = scmp.eq.s32.totalorder %s995_s18, 0 }
   0x9   : > { %p1507_p2 = scmp.eq.s32.totalorder %s995_s18, 1  ;;  %p147_p3 = scmp.eq.s32.totalorder %s996_s19, 1 }
   0xa   : > { %s1958_s20 = scalar_select %p1503_p1, 1, 0 }
   0xb   : > { %p1513_p4 = por %p1503_p1, %p61_p0  ;;  %p997_p5 = scmp.ge.s32.totalorder %s1437_s17, 1 }
   0xc   : > { %p1518_p6 = por %p147_p3, %p61_p0  ;;  %p154_p7 = scmp.lt.s32.totalorder %s1437_s17, 3 }
   0xd   : > { %s1960_s22 = scalar_select %p1513_p4, 1, 0 }
   0xe   : > { %s1961_s23 = scalar_select %p1518_p6, 1, 0 }
   0xf   : > { %p1523_p8 = pnand %p997_p5, %p154_p7  ;;  %s1439_s25 = smov [#allocation6]  }
  0x10   : > { %s170_s26 = sshll.u32 %s1439_s25, 4  ;;  %s1440_s28 = smov [#allocation8]   ;;  %s1527_s26 = int_to_ptr.vmem [resolvable:$true] %s170_s26 }
  0x11   : > { %p1174_p9 = pneg %p1523_p8  ;;  %s186_s29 = sshll.u32 %s1440_s28, 4  ;;  %s1538_s29 = int_to_ptr.vmem [resolvable:$true] %s186_s29 }
  0x12   : > { %s1265_s5 = scalar_lea.hbm %s1951_s1, 128 }
  0x13   : > { %p1534_p11 = pnand %p1174_p9, %p1503_p1  ;;  %p1266_p12 = scmp.ne.s32.totalorder %s1951_s1, %s1265_s5 }
  0x14   : > { %p1272_p5 = scmp.lt.u32.totalorder %s1265_s5, %s1951_s1 }
  0x15   : > { %p1267_p13 = pneg %p1534_p11 }
  0x17   : > { %p1268_p0 = pnand %p1267_p13, %p1266_p12 }
  0x19   : > { %p1269_p3 = pneg %p1268_p0 }
  0x1b   : > { %p1274_p7 = pnand %p1272_p5, %p1269_p3 }
  0x1d   : > { %1277 = shalt.err (!%p1274_p7)
}
  0x1e   : > { %s1278_s10 = scalar_lea.vmem %s1527_s26, 128  ;;  %p1286_p1 = scmp.lt.s32.totalorder %s1527_s26, %s1527_s26 }
  0x1f   : > { %p1279_p9 = scmp.ne.s32.totalorder %s1527_s26, %s1278_s10  ;;  %p1287_p12 = scmp.lt.s32.totalorder %s1278_s10, %s1278_s10 }
  0x21   : > { %p1281_p10 = pnand %p1279_p9, %p1267_p13  ;;  %p1288_p0 = por %p1287_p12, %p1286_p1 }
  0x23   : > { %p1282_p6 = pneg %p1281_p10 }
  0x25   : > { %p1289_p4 = pnand %p1288_p0, %p1282_p6 }
  0x27   : > { %1292 = shalt.err (!%p1289_p4)
}
  0x28   : > { %s1441_s11 = smov 64   ;;  %s1442_s18 = smov 4  }
  0x29   : > { %1177 = dma.hbm_to_vmem [thread:$0]  (!%p1534_p11), %s1951_s1, 128, %s1527_s26, [#allocation7], %s1441_s11, %s1441_s11, %s1442_s18  }
  0x2a   : > { %s1293_s4 = scalar_lea.hbm %s1952_s2, 16 }
  0x2b   : > { %p1294_p1 = scmp.ne.s32.totalorder %s1952_s2, %s1293_s4  ;;  %p1300_p10 = scmp.lt.u32.totalorder %s1293_s4, %s1952_s2 }
  0x2d   : > { %p1296_p4 = pnand %p1294_p1, %p1267_p13 }
  0x2f   : > { %p1297_p6 = pneg %p1296_p4 }
  0x31   : > { %p1302_p3 = pnand %p1300_p10, %p1297_p6 }
  0x33   : > { %1305 = shalt.err (!%p1302_p3)
}
  0x34   : > { %s1306_s26 = scalar_lea.vmem %s1538_s29, 16  ;;  %s1313_s9 = scalar_lea.vmem %s1538_s29, 32 }
  0x35   : > { %p1307_p5 = scmp.ne.s32.totalorder %s1538_s29, %s1306_s26  ;;  %p1314_p12 = scmp.lt.s32.totalorder %s1538_s29, %s1538_s29 }
  0x36   : > { %p1315_p0 = scmp.lt.s32.totalorder %s1313_s9, %s1306_s26 }
  0x37   : > { %p1309_p7 = pnand %p1307_p5, %p1267_p13 }
  0x38   : > { %p1316_p1 = por %p1315_p0, %p1314_p12 }
  0x39   : > { %p1310_p9 = pneg %p1309_p7 }
  0x3b   : > { %p1317_p4 = pnand %p1316_p1, %p1310_p9 }
  0x3d   : > { %1320 = shalt.err (!%p1317_p4)
}
  0x3e   : > { %1180 = dma.hbm_to_vmem [thread:$0]  (!%p1534_p11), %s1952_s2, 16, %s1538_s29, [#allocation7]  }
  0x3f   : > { %s39_s25 = sadd.s32 1, %s1433_s16  ;;  %s48_s28 = sadd.s32 1, %s1425_s14 }
  0x40   : > { %p41_p13 = scmp.ge.s32.totalorder %s39_s25, 2  ;;  %p55_p6 = scmp.ne.s32.totalorder %s1425_s14, %s1421_s13 }
  0x41   : > { %p56_p10 = scmp.eq.s32.totalorder %s1437_s17, 0  ;;  %p1191_p3 = scmp.lt.s32.totalorder %s1437_s17, 2 }
  0x42   : > { %s1977_s25 = smov (%p41_p13, %s39_s25), 0  ;;  %p1606_p7 = por %p1507_p2, %p55_p6 }
  0x43   : > { %p57_p5 = por %p56_p10, %p55_p6  ;;  %s43_s30 = ssub.s32 %s1433_s16, %s1977_s25 }
  0x44   : > { %s1964_s27 = scalar_select %p1606_p7, 1, 0 }
  0x45   : > { %s197_s4 = sand.u32 1, %s1425_s14   ;;  %p46_p9 = scmp.eq.s32.totalorder %s43_s30, 0 }
  0x46   : > { %s1160_s29 = smul.u32 104, %s197_s4  ;;  %p1613_p11 = pnand %p1191_p3, %p57_p5 }
  0x47   : > { %s1618_s6 = scalar_select %p46_p9, %s1425_s14, %s48_s28  }
  0x48   : > { %s1062_s7 = smul.u32 1664, %s1433_s16  ;;  %s201_s8 = scalar_lea.vmem [#allocation3], %s1160_s29 }
  0x49   : > { %s209_s26 = sshll.u32 %s201_s8, 4  ;;  %s1628_s19 = scalar_lea.sflag [#allocation4], %s197_s4  ;;  %s1626_s26 = int_to_ptr.vmem [resolvable:$true] %s209_s26 }
  0x4a   : > { %s1624_s10 = scalar_lea.hbm %s1950_s0, %s1062_s7  ;;  %p1323_p12 = pneg %p1613_p11 }
  0x4b   : > { %s1321_s30 = scalar_lea.hbm %s1624_s10, 1664  ;;  %s1326_s7 = scalar_lea.hbm %s1950_s0, 3328 }
  0x4c   : > { %p1322_p2 = scmp.ne.s32.totalorder %s1624_s10, %s1321_s30  ;;  %p1327_p4 = scmp.lt.u32.totalorder %s1624_s10, %s1950_s0 }
  0x4d   : > { %p1328_p13 = scmp.lt.u32.totalorder %s1326_s7, %s1321_s30  ;;  %p1330_p10 = scmp.lt.u32.totalorder %s1321_s30, %s1624_s10 }
  0x4e   : > { %p1324_p0 = pnand %p1323_p12, %p1322_p2 }
  0x4f   : > { %p1329_p6 = por %p1328_p13, %p1327_p4 }
  0x50   : > { %p1325_p1 = pneg %p1324_p0 }
  0x51   : > { %p1331_p3 = por %p1330_p10, %p1329_p6 }
  0x53   : > { %p1332_p5 = pnand %p1331_p3, %p1325_p1 }
  0x55   : > { %1335 = shalt.err (!%p1332_p5)
}
  0x56   : > { %s1336_s4 = scalar_lea.vmem %s1626_s26, 1664  ;;  %s1443_s9 = smov [#allocation3]  }
  0x57   : > { %p1337_p9 = scmp.ne.s32.totalorder %s1626_s26, %s1336_s4  ;;  %s1341_s28 = sshll.u32 %s1443_s9, 4  ;;  %s1342_s28 = int_to_ptr.vmem [resolvable:$false] %s1341_s28 }
  0x58   : > { %s1343_s29 = scalar_lea.vmem %s1342_s28, 3328  ;;  %p1344_p7 = scmp.lt.s32.totalorder %s1626_s26, %s1342_s28 }
  0x59   : > { %p1339_p2 = pnand %p1337_p9, %p1323_p12  ;;  %p1345_p4 = scmp.lt.s32.totalorder %s1343_s29, %s1336_s4 }
  0x5b   : > { %p1340_p0 = pneg %p1339_p2  ;;  %p1346_p13 = por %p1345_p4, %p1344_p7 }
  0x5d   : > { %p1347_p6 = pnand %p1346_p13, %p1340_p0 }
  0x5f   : > { %1350 = shalt.err (!%p1347_p6)
}
  0x60   : > { %1184 = dma.hbm_to_vmem [thread:$0]  (!%p1613_p11), %s1624_s10, 1664, %s1626_s26, %s1628_s19, %s1441_s11, %s1441_s11, %s1442_s18  }
  0x61   : > { %221 = sbr.rel (%p1523_p8) target bundleno = 407 (0x197), region = 32  ;;  %s1662_s30 = sand.u32 (!%p1523_p8), 1, %s1421_s13  }
  0x62   : > { %s1161_s7 = smul.u32 (!%p1523_p8), 104, %s1662_s30  ;;  %s224_s8 = scalar_lea.sflag (!%p1523_p8), [#allocation4], %s1662_s30 }
  0x63   : > { %p1966_p7 = scmp.ne.s32.totalorder (!%p1523_p8), %s1960_s22, 0 }
  0x64   : > { %s1668_s5 = scalar_lea.vmem (!%p1523_p8), [#allocation3], %s1161_s7 }
  0x68   : > { %1404 = dma.done.wait (%p1966_p7), %s224_s8, 1664  }
  0x69   : > { %1406 = vsyncadd (%p1966_p7), %s224_s8, 4294965632  ;;  %p1967_p11 = scmp.ne.s32.totalorder %s1958_s20, 0 }
  0x6b   : > { %1408 = dma.done.wait (%p1967_p11), [#allocation7], 144  }
  0x6c   : > { %1410 = vsyncadd (%p1967_p11), [#allocation7], 4294967152  ;;  %v1444_v0 = vmov 0.0   ;;  %vm1445_vm0 = vmmov 0   ;;  %vm266_vm1 = vcmask 64512   ;;  %v1251_v1 = vld [vmem:[#allocation6] sm:$0xff]  }
  0x6d   : > { %1104 = vmatprep.subr.bf16.mxu0 %v1444_v0  ;;  %1106 = vmatprep.mubr.msk.bf16.mxu0 %vm1445_vm0, %v1444_v0  ;;  %267 = vst.msk [vmem:[#allocation2] sm:$0xff] %vm266_vm1, %v1444_v0  ;;  %268 = vst.msk [vmem:[#allocation2 + $0x8] sm:$0xff] %vm266_vm1, %v1444_v0  ;;  %v1252_v2 = vld [vmem:[%s1668_s5] sm:$0xff]   ;;  %vm418_vm2 = vcmask 130048   ;;  %v1253_v3 = vld [vmem:[%s1668_s5 + $0x38] sm:$0xff]   ;;  %vm840_vm3 = vcmask 60416  }
  0x6e   : > { %1158 = vmatprep.subr.bf16.mxu1 %v1444_v0  ;;  %1134 = vmatprep.mubr.msk.bf16.mxu1 %vm1445_vm0, %v1444_v0  ;;  %269 = vst.msk [vmem:[#allocation2 + $0x10] sm:$0xff] %vm266_vm1, %v1444_v0  ;;  %270 = vst.msk [vmem:[#allocation2 + $0x18] sm:$0xff] %vm266_vm1, %v1444_v0  ;;  %v1254_v4 = vld [vmem:[%s1668_s5 + $0x8] sm:$0xff]   ;;  %v1255_v5 = vld [vmem:[%s1668_s5 + $0x40] sm:$0xff]   ;;  %s1800_s20 = scalar_lea.vmem [#allocation9], %s1161_s7  ;;  %s1089_s22 = smul.u32 1664, %s1429_s15 }
  0x6f   : > { %271 = vst.msk [vmem:[#allocation2 + $0x20] sm:$0xff] %vm266_vm1, %v1444_v0  ;;  %272 = vst.msk [vmem:[#allocation2 + $0x28] sm:$0xff] %vm266_vm1, %v1444_v0  ;;  %1105 = vmatpush3.bf16.msra.mxu0 %v1251_v1  ;;  %1159 = vmatpush3.bf16.msra.mxu1 %v1251_v1  ;;  %v1256_v6 = vld [vmem:[%s1668_s5 + $0x10] sm:$0xff]   ;;  %v1257_v7 = vld [vmem:[%s1668_s5 + $0x48] sm:$0xff]   ;;  %s882_s24 = sshll.u32 %s1800_s20, 4  ;;  %s868_s15 = scalar_lea.sflag [#allocation5], %s1662_s30  ;;  %s1897_s24 = int_to_ptr.vmem [resolvable:$true] %s882_s24 }
  0x70   : > { %273 = vst.msk [vmem:[#allocation2 + $0x30] sm:$0xff] %vm266_vm1, %v1444_v0  ;;  %274 = vst.msk [vmem:[#allocation2 + $0x38] sm:$0xff] %vm266_vm1, %v1444_v0  ;;  %v1258_v8 = vld [vmem:[%s1668_s5 + $0x18] sm:$0xff]   ;;  %v1259_v9 = vld [vmem:[%s1668_s5 + $0x50] sm:$0xff]   ;;  %s1895_s26 = scalar_lea.hbm %s1953_s3, %s1089_s22  ;;  %s1351_s10 = scalar_lea.vmem %s1897_s24, 1664 }
  0x71   : > { %275 = vst.msk [vmem:[#allocation2 + $0x40] sm:$0xff] %vm266_vm1, %v1444_v0  ;;  %276 = vst.msk [vmem:[#allocation2 + $0x48] sm:$0xff] %vm266_vm1, %v1444_v0  ;;  %v1260_v10 = vld [vmem:[%s1668_s5 + $0x20] sm:$0xff]   ;;  %v1261_v11 = vld [vmem:[%s1668_s5 + $0x58] sm:$0xff]   ;;  %p1352_p8 = scmp.ne.s32.totalorder %s1897_s24, %s1351_s10  ;;  %p1968_p12 = scmp.ne.s32.totalorder %s1964_s27, 0 }
  0x72   : > { %277 = vst.msk [vmem:[#allocation2 + $0x50] sm:$0xff] %vm266_vm1, %v1444_v0  ;;  %278 = vst.msk [vmem:[#allocation2 + $0x58] sm:$0xff] %vm266_vm1, %v1444_v0  ;;  %1107 = vmatmul.mubr.msk.bf16.vlgmr.msra.gmra.mrb[0].mxu0 %vm418_vm2, %v1252_v2  ;;  %1135 = vmatmul.mubr.msk.bf16.vlgmr.msra.gmra.mrb[0].mxu1 %vm418_vm2, %v1253_v3  ;;  %v1262_v12 = vld [vmem:[%s1668_s5 + $0x28] sm:$0xff]   ;;  %v1263_v13 = vld [vmem:[%s1668_s5 + $0x60] sm:$0xff]   ;;  %s1446_s19 = smov [#allocation9]  }
  0x73   : > { %279 = vst.msk [vmem:[#allocation2 + $0x60] sm:$0xff] %vm266_vm1, %v1444_v0  ;;  %280 = vst.msk [vmem:[#allocation2 + $0x68] sm:$0xff] %vm266_vm1, %v1444_v0  ;;  %1110 = vmatprep.mubr.msk.bf16.mxu0 %vm1445_vm0, %v1444_v0  ;;  %1138 = vmatprep.mubr.msk.bf16.mxu1 %vm1445_vm0, %v1444_v0  ;;  %v1264_v14 = vld [vmem:[%s1668_s5 + $0x30] sm:$0xff]   ;;  %p1353_p1 = pnand %p1352_p8, %p1968_p12  ;;  %s1355_s21 = sshll.u32 %s1446_s19, 4  ;;  %s1356_s21 = int_to_ptr.vmem [resolvable:$false] %s1355_s21 }
  0x74   : > { %281 = vst.msk [vmem:[#allocation2 + $0x70] sm:$0xff] %vm266_vm1, %v1444_v0  ;;  %282 = vst.msk [vmem:[#allocation2 + $0x78] sm:$0xff] %vm266_vm1, %v1444_v0  ;;  %v293_v15 = vld [vmem:[#allocation2] sm:$0xff]  ;;  %v294_v18 = vld [vmem:[#allocation2 + $0x8] sm:$0xff]  ;;  %s1357_s4 = scalar_lea.vmem %s1356_s21, 3328  ;;  %p1358_p3 = scmp.lt.s32.totalorder %s1897_s24, %s1356_s21 }
  0x75   : > { %283 = vst.msk [vmem:[#allocation2 + $0x80] sm:$0xff] %vm266_vm1, %v1444_v0  ;;  %284 = vst.msk [vmem:[#allocation2 + $0x88] sm:$0xff] %vm266_vm1, %v1444_v0  ;;  %v295_v31 = vld [vmem:[#allocation2 + $0x10] sm:$0xff]  ;;  %v1788_v33 = vld [vmem:[#allocation8] ss:$0 sm:$0xff]  ;;  %p1354_p10 = pneg %p1353_p1  ;;  %p1359_p5 = scmp.lt.s32.totalorder %s1357_s4, %s1351_s10 }
  0x76   : > { %285 = vst.msk [vmem:[#allocation2 + $0x90] sm:$0xff] %vm266_vm1, %v1444_v0  ;;  %286 = vst.msk [vmem:[#allocation2 + $0x98] sm:$0xff] %vm266_vm1, %v1444_v0  ;;  %v296_v35 = vld [vmem:[#allocation2 + $0x18] sm:$0xff]  ;;  %v297_v58 = vld [vmem:[#allocation2 + $0x20] sm:$0xff] }
  0x77   : > { %287 = vst.msk [vmem:[#allocation2 + $0xa0] sm:$0xff] %vm266_vm1, %v1444_v0  ;;  %288 = vst.msk [vmem:[#allocation2 + $0xa8] sm:$0xff] %vm266_vm1, %v1444_v0  ;;  %v298_v1 = vld [vmem:[#allocation2 + $0x28] sm:$0xff]  ;;  %p1360_p9 = por %p1359_p5, %p1358_p3 }
  0x78   : > { %289 = vst.msk [vmem:[#allocation2 + $0xb0] sm:$0xff] %vm266_vm1, %v1444_v0  ;;  %290 = vst.msk [vmem:[#allocation2 + $0xb8] sm:$0xff] %vm266_vm1, %v1444_v0 }
  0x79   : > { %291 = vst.msk [vmem:[#allocation2 + $0xc0] sm:$0xff] %vm266_vm1, %v1444_v0  ;;  %292 = vst.msk [vmem:[#allocation2 + $0xc8] sm:$0xff] %vm266_vm1, %v1444_v0  ;;  %p1361_p2 = pnand %p1360_p9, %p1354_p10 }
  0x7a   : > { %1111 = vmatmul.mubr.msk.bf16.gmra.mrb[4].mxu0 %vm418_vm2, %v1254_v4  ;;  %1139 = vmatmul.mubr.msk.bf16.gmra.mrb[4].mxu1 %vm418_vm2, %v1255_v5 }
  0x7b   : > { %1114 = vmatprep.mubr.msk.bf16.mxu0 %vm1445_vm0, %v1444_v0  ;;  %1142 = vmatprep.mubr.msk.bf16.mxu1 %vm1445_vm0, %v1444_v0  ;;  %v307_v16 = vld [vmem:[#allocation2 + $0x70] sm:$0xff]  ;;  %v308_v20 = vld [vmem:[#allocation2 + $0x78] sm:$0xff] }
  0x7c   : > { %v309_v32 = vld [vmem:[#allocation2 + $0x80] sm:$0xff]  ;;  %v310_v37 = vld [vmem:[#allocation2 + $0x88] sm:$0xff] }
  0x7d   : > { %v311_v59 = vld [vmem:[#allocation2 + $0x90] sm:$0xff]  ;;  %v312_v3 = vld [vmem:[#allocation2 + $0x98] sm:$0xff] }
  0x82   : > { %1115 = vmatmul.mubr.msk.bf16.gmra.mrb[8].mxu0 %vm418_vm2, %v1256_v6  ;;  %1143 = vmatmul.mubr.msk.bf16.gmra.mrb[8].mxu1 %vm418_vm2, %v1257_v7 }
  0x83   : > { %1118 = vmatprep.mubr.msk.bf16.mxu0 %vm1445_vm0, %v1444_v0  ;;  %1146 = vmatprep.mubr.msk.bf16.mxu1 %vm1445_vm0, %v1444_v0 }
  0x8a   : > { %1119 = vmatmul.mubr.msk.bf16.gmra.mrb[12].mxu0 %vm418_vm2, %v1258_v8  ;;  %1147 = vmatmul.mubr.msk.bf16.gmra.mrb[12].mxu1 %vm418_vm2, %v1259_v9 }
  0x8b   : > { %1122 = vmatprep.mubr.msk.bf16.mxu0 %vm1445_vm0, %v1444_v0  ;;  %1150 = vmatprep.mubr.msk.bf16.mxu1 %vm1445_vm0, %v1444_v0 }
  0x92   : > { %1123 = vmatmul.mubr.msk.bf16.gmra.mrb[16].mxu0 %vm418_vm2, %v1260_v10  ;;  %1151 = vmatmul.mubr.msk.bf16.gmra.mrb[16].mxu1 %vm418_vm2, %v1261_v11 }
  0x93   : > { %1126 = vmatprep.mubr.msk.bf16.mxu0 %vm1445_vm0, %v1444_v0  ;;  %1154 = vmatprep.mubr.msk.bf16.mxu1 %vm1445_vm0, %v1444_v0 }
  0x9a   : > { %1127 = vmatmul.mubr.msk.bf16.gmra.mrb[20].mxu0 %vm418_vm2, %v1262_v12  ;;  %1155 = vmatmul.mubr.msk.bf16.gmra.mrb[20].mxu1 %vm418_vm2, %v1263_v13 }
  0x9b   : > { %1130 = vmatprep.mubr.msk.bf16.mxu0 %vm1445_vm0, %v1444_v0 }
  0xa2   : > { %1131 = vmatmul.mubr.msk.bf16.gmra.mrb[24].mxu0 %vm418_vm2, %v1264_v14 }
 0x145   : > { %v492_v17 = vpop.f32.mrb[0].mxu0  ;;  %v548_v19 = vpop.f32.mrb[0].mxu1 }
 0x146   : > { %v595_v21 = vadd.f32 %v492_v17, %v293_v15  ;;  %v1108_v22 = vpop.f32.mrb[1].mxu0  ;;  %v609_v23 = vadd.f32 %v548_v19, %v307_v16  ;;  %v1136_v24 = vpop.f32.mrb[1].mxu1 }
 0x147   : > { %v495_v25 = vpop.f32.mrb[2].mxu0  ;;  %v551_v26 = vpop.f32.mrb[2].mxu1 }
 0x148   : > { %622 = vst.msk [vmem:[#allocation2] sm:$0xff] %vm266_vm1, %v595_v21  ;;  %v596_v27 = vadd.f32 %v495_v25, %v294_v18  ;;  %v1109_v28 = vpop.f32.mrb[3].mxu0  ;;  %636 = vst.msk [vmem:[#allocation2 + $0x70] sm:$0xff] %vm266_vm1, %v609_v23  ;;  %v610_v29 = vadd.f32 %v551_v26, %v308_v20  ;;  %v1137_v30 = vpop.f32.mrb[3].mxu1  ;;  %v299_v26 = vld [vmem:[#allocation2 + $0x30] sm:$0xff] }
 0x14a   : > { %623 = vst.msk [vmem:[#allocation2 + $0x8] sm:$0xff] %vm266_vm1, %v596_v27  ;;  %637 = vst.msk [vmem:[#allocation2 + $0x78] sm:$0xff] %vm266_vm1, %v610_v29  ;;  %v313_v27 = vld [vmem:[#allocation2 + $0xa0] sm:$0xff] }
 0x14d   : > { %v500_v34 = vpop.f32.mrb[4].mxu0  ;;  %v556_v36 = vpop.f32.mrb[4].mxu1 }
 0x14e   : > { %v597_v38 = vadd.f32 %v500_v34, %v295_v31  ;;  %v1112_v39 = vpop.f32.mrb[5].mxu0  ;;  %v611_v40 = vadd.f32 %v556_v36, %v309_v32  ;;  %v1140_v41 = vpop.f32.mrb[5].mxu1  ;;  %v300_v34 = vld [vmem:[#allocation2 + $0x38] sm:$0xff]  ;;  %v314_v36 = vld [vmem:[#allocation2 + $0xa8] sm:$0xff] }
 0x14f   : > { %v651_v42 = vld [vmem:[#allocation2] sm:$0xff]  ;;  %v665_v43 = vld [vmem:[#allocation2 + $0x70] sm:$0xff]  ;;  %v503_v44 = vpop.f32.mrb[6].mxu0  ;;  %v559_v45 = vpop.f32.mrb[6].mxu1 }
 0x150   : > { %v684_v46 = vadd.f32 %v1788_v33, %v651_v42  ;;  %v698_v47 = vadd.f32 %v1788_v33, %v665_v43  ;;  %624 = vst.msk [vmem:[#allocation2 + $0x10] sm:$0xff] %vm266_vm1, %v597_v38  ;;  %v598_v48 = vadd.f32 %v503_v44, %v296_v35  ;;  %v1113_v49 = vpop.f32.mrb[7].mxu0  ;;  %638 = vst.msk [vmem:[#allocation2 + $0x80] sm:$0xff] %vm266_vm1, %v611_v40  ;;  %v1141_v51 = vpop.f32.mrb[7].mxu1 }
 0x151   : > { %v612_v50 = vadd.f32 %v559_v45, %v310_v37  ;;  %v652_v52 = vld [vmem:[#allocation2 + $0x8] sm:$0xff]  ;;  %v666_v53 = vld [vmem:[#allocation2 + $0x78] sm:$0xff] }
 0x152   : > { %v710_v54 = vmax.f32 %v684_v46, 0.0  ;;  %v685_v55 = vadd.f32 %v1788_v33, %v652_v52  ;;  %v724_v56 = vmax.f32 %v698_v47, 0.0  ;;  %v699_v57 = vadd.f32 %v1788_v33, %v666_v53  ;;  %625 = vst.msk [vmem:[#allocation2 + $0x18] sm:$0xff] %vm266_vm1, %v598_v48 }
 0x153   : > { %639 = vst.msk [vmem:[#allocation2 + $0x88] sm:$0xff] %vm266_vm1, %v612_v50 }
 0x154   : > { %v1063_v60 = vpack.c.bf16 %v710_v54, %v710_v54  ;;  %v711_v61 = vmax.f32 %v685_v55, 0.0  ;;  %v1077_v62 = vpack.c.bf16 %v724_v56, %v724_v56  ;;  %v725_v63 = vmax.f32 %v699_v57, 0.0 }
 0x155   : > { %v508_v0 = vpop.f32.mrb[8].mxu0  ;;  %v564_v2 = vpop.f32.mrb[8].mxu1 }
 0x156   : > { %841 = vst.msk [vmem:[%s1800_s20] sm:$0xf] %vm840_vm3, %v1063_v60  ;;  %v1064_v4 = vpack.c.bf16 %v711_v61, %v711_v61  ;;  %855 = vst.msk [vmem:[%s1800_s20 + $0x38] sm:$0xf] %vm840_vm3, %v1077_v62  ;;  %v1078_v5 = vpack.c.bf16 %v725_v63, %v725_v63  ;;  %v599_v6 = vadd.f32 %v508_v0, %v297_v58  ;;  %v1116_v7 = vpop.f32.mrb[9].mxu0  ;;  %v1144_v9 = vpop.f32.mrb[9].mxu1 }
 0x157   : > { %v613_v8 = vadd.f32 %v564_v2, %v311_v59  ;;  %v653_v10 = vld [vmem:[#allocation2 + $0x10] sm:$0xff]  ;;  %v667_v11 = vld [vmem:[#allocation2 + $0x80] sm:$0xff]  ;;  %v511_v12 = vpop.f32.mrb[10].mxu0  ;;  %v567_v13 = vpop.f32.mrb[10].mxu1  ;;  %v302_v2 = vld [vmem:[#allocation2 + $0x48] sm:$0xff] }
 0x158   : > { %842 = vst.msk [vmem:[%s1800_s20 + $0x4] sm:$0xf] %vm840_vm3, %v1064_v4  ;;  %856 = vst.msk [vmem:[%s1800_s20 + $0x3c] sm:$0xf] %vm840_vm3, %v1078_v5  ;;  %v686_v14 = vadd.f32 %v1788_v33, %v653_v10  ;;  %v700_v15 = vadd.f32 %v1788_v33, %v667_v11  ;;  %v600_v16 = vadd.f32 %v511_v12, %v298_v1  ;;  %v1117_v17 = vpop.f32.mrb[11].mxu0  ;;  %v1145_v19 = vpop.f32.mrb[11].mxu1 }
 0x159   : > { %626 = vst.msk [vmem:[#allocation2 + $0x20] sm:$0xff] %vm266_vm1, %v599_v6  ;;  %640 = vst.msk [vmem:[#allocation2 + $0x90] sm:$0xff] %vm266_vm1, %v613_v8  ;;  %v614_v18 = vadd.f32 %v567_v13, %v312_v3  ;;  %v654_v20 = vld [vmem:[#allocation2 + $0x18] sm:$0xff]  ;;  %v301_v59 = vld [vmem:[#allocation2 + $0x40] sm:$0xff] }
 0x15a   : > { %v668_v21 = vld [vmem:[#allocation2 + $0x88] sm:$0xff]  ;;  %v712_v22 = vmax.f32 %v686_v14, 0.0  ;;  %v687_v23 = vadd.f32 %v1788_v33, %v654_v20  ;;  %v726_v24 = vmax.f32 %v700_v15, 0.0  ;;  %627 = vst.msk [vmem:[#allocation2 + $0x28] sm:$0xff] %vm266_vm1, %v600_v16  ;;  %v315_v60 = vld [vmem:[#allocation2 + $0xb0] sm:$0xff]  ;;  %v316_v4 = vld [vmem:[#allocation2 + $0xb8] sm:$0xff] }
 0x15b   : > { %v701_v25 = vadd.f32 %v1788_v33, %v668_v21  ;;  %641 = vst.msk [vmem:[#allocation2 + $0x98] sm:$0xff] %vm266_vm1, %v614_v18 }
 0x15c   : > { %v1065_v28 = vpack.c.bf16 %v712_v22, %v712_v22  ;;  %v713_v29 = vmax.f32 %v687_v23, 0.0  ;;  %v1079_v30 = vpack.c.bf16 %v726_v24, %v726_v24 }
 0x15d   : > { %v727_v31 = vmax.f32 %v701_v25, 0.0  ;;  %v516_v32 = vpop.f32.mrb[12].mxu0  ;;  %v572_v35 = vpop.f32.mrb[12].mxu1 }
 0x15e   : > { %843 = vst.msk [vmem:[%s1800_s20 + $0x8] sm:$0xf] %vm840_vm3, %v1065_v28  ;;  %v1066_v37 = vpack.c.bf16 %v713_v29, %v713_v29  ;;  %857 = vst.msk [vmem:[%s1800_s20 + $0x40] sm:$0xf] %vm840_vm3, %v1079_v30  ;;  %v601_v39 = vadd.f32 %v516_v32, %v299_v26  ;;  %v1120_v40 = vpop.f32.mrb[13].mxu0  ;;  %v615_v41 = vadd.f32 %v572_v35, %v313_v27  ;;  %v1148_v42 = vpop.f32.mrb[13].mxu1 }
 0x15f   : > { %v1080_v38 = vpack.c.bf16 %v727_v31, %v727_v31  ;;  %v519_v45 = vpop.f32.mrb[14].mxu0  ;;  %v575_v46 = vpop.f32.mrb[14].mxu1  ;;  %v303_v27 = vld [vmem:[#allocation2 + $0x50] sm:$0xff]  ;;  %v317_v28 = vld [vmem:[#allocation2 + $0xc0] sm:$0xff]  ;;  %v304_v35 = vld [vmem:[#allocation2 + $0x58] sm:$0xff] }
 0x160   : > { %v655_v43 = vld [vmem:[#allocation2 + $0x20] sm:$0xff]  ;;  %v669_v44 = vld [vmem:[#allocation2 + $0x90] sm:$0xff]  ;;  %844 = vst.msk [vmem:[%s1800_s20 + $0xc] sm:$0xf] %vm840_vm3, %v1066_v37  ;;  %v602_v49 = vadd.f32 %v519_v45, %v300_v34  ;;  %v1121_v50 = vpop.f32.mrb[15].mxu0  ;;  %v616_v51 = vadd.f32 %v575_v46, %v314_v36  ;;  %v1149_v52 = vpop.f32.mrb[15].mxu1 }
 0x161   : > { %858 = vst.msk [vmem:[%s1800_s20 + $0x44] sm:$0xf] %vm840_vm3, %v1080_v38  ;;  %v688_v47 = vadd.f32 %v1788_v33, %v655_v43  ;;  %v702_v48 = vadd.f32 %v1788_v33, %v669_v44  ;;  %v656_v53 = vld [vmem:[#allocation2 + $0x28] sm:$0xff] }
 0x162   : > { %628 = vst.msk [vmem:[#allocation2 + $0x30] sm:$0xff] %vm266_vm1, %v601_v39  ;;  %642 = vst.msk [vmem:[#allocation2 + $0xa0] sm:$0xff] %vm266_vm1, %v615_v41  ;;  %v670_v54 = vld [vmem:[#allocation2 + $0x98] sm:$0xff]  ;;  %v689_v56 = vadd.f32 %v1788_v33, %v656_v53  ;;  %v318_v37 = vld [vmem:[#allocation2 + $0xc8] sm:$0xff] }
 0x163   : > { %v714_v55 = vmax.f32 %v688_v47, 0.0  ;;  %v728_v57 = vmax.f32 %v702_v48, 0.0  ;;  %v703_v58 = vadd.f32 %v1788_v33, %v670_v54  ;;  %629 = vst.msk [vmem:[#allocation2 + $0x38] sm:$0xff] %vm266_vm1, %v602_v49  ;;  %643 = vst.msk [vmem:[#allocation2 + $0xa8] sm:$0xff] %vm266_vm1, %v616_v51 }
 0x164   : > { %v715_v62 = vmax.f32 %v689_v56, 0.0 }
 0x165   : > { %v1067_v61 = vpack.c.bf16 %v714_v55, %v714_v55  ;;  %v1081_v63 = vpack.c.bf16 %v728_v57, %v728_v57  ;;  %v729_v0 = vmax.f32 %v703_v58, 0.0  ;;  %v524_v1 = vpop.f32.mrb[16].mxu0  ;;  %v580_v3 = vpop.f32.mrb[16].mxu1 }
 0x166   : > { %v1068_v5 = vpack.c.bf16 %v715_v62, %v715_v62  ;;  %v603_v7 = vadd.f32 %v524_v1, %v301_v59  ;;  %v1124_v8 = vpop.f32.mrb[17].mxu0  ;;  %v617_v9 = vadd.f32 %v580_v3, %v315_v60  ;;  %v1152_v10 = vpop.f32.mrb[17].mxu1  ;;  %v305_v60 = vld [vmem:[#allocation2 + $0x60] sm:$0xff] }
 0x167   : > { %845 = vst.msk [vmem:[%s1800_s20 + $0x10] sm:$0xf] %vm840_vm3, %v1067_v61  ;;  %859 = vst.msk [vmem:[%s1800_s20 + $0x48] sm:$0xf] %vm840_vm3, %v1081_v63  ;;  %v1082_v6 = vpack.c.bf16 %v729_v0, %v729_v0  ;;  %v527_v13 = vpop.f32.mrb[18].mxu0  ;;  %v583_v14 = vpop.f32.mrb[18].mxu1 }
 0x168   : > { %846 = vst.msk [vmem:[%s1800_s20 + $0x14] sm:$0xf] %vm840_vm3, %v1068_v5  ;;  %v604_v17 = vadd.f32 %v527_v13, %v302_v2  ;;  %v1125_v18 = vpop.f32.mrb[19].mxu0  ;;  %v618_v19 = vadd.f32 %v583_v14, %v316_v4  ;;  %v1153_v20 = vpop.f32.mrb[19].mxu1  ;;  %v306_v2 = vld [vmem:[#allocation2 + $0x68] sm:$0xff] }
 0x169   : > { %v657_v11 = vld [vmem:[#allocation2 + $0x30] sm:$0xff]  ;;  %v671_v12 = vld [vmem:[#allocation2 + $0xa0] sm:$0xff]  ;;  %860 = vst.msk [vmem:[%s1800_s20 + $0x4c] sm:$0xf] %vm840_vm3, %v1082_v6 }
 0x16a   : > { %v690_v15 = vadd.f32 %v1788_v33, %v657_v11  ;;  %v704_v16 = vadd.f32 %v1788_v33, %v671_v12  ;;  %630 = vst.msk [vmem:[#allocation2 + $0x40] sm:$0xff] %vm266_vm1, %v603_v7  ;;  %644 = vst.msk [vmem:[#allocation2 + $0xb0] sm:$0xff] %vm266_vm1, %v617_v9  ;;  %v658_v21 = vld [vmem:[#allocation2 + $0x38] sm:$0xff]  ;;  %v672_v22 = vld [vmem:[#allocation2 + $0xa8] sm:$0xff] }
 0x16b   : > { %v691_v24 = vadd.f32 %v1788_v33, %v658_v21  ;;  %v705_v26 = vadd.f32 %v1788_v33, %v672_v22  ;;  %631 = vst.msk [vmem:[#allocation2 + $0x48] sm:$0xff] %vm266_vm1, %v604_v17  ;;  %645 = vst.msk [vmem:[#allocation2 + $0xb8] sm:$0xff] %vm266_vm1, %v618_v19 }
 0x16c   : > { %v716_v23 = vmax.f32 %v690_v15, 0.0  ;;  %v730_v25 = vmax.f32 %v704_v16, 0.0 }
 0x16d   : > { %v717_v30 = vmax.f32 %v691_v24, 0.0  ;;  %v731_v32 = vmax.f32 %v705_v26, 0.0  ;;  %v532_v34 = vpop.f32.mrb[20].mxu0  ;;  %v588_v36 = vpop.f32.mrb[20].mxu1 }
 0x16e   : > { %v1069_v29 = vpack.c.bf16 %v716_v23, %v716_v23  ;;  %v1083_v31 = vpack.c.bf16 %v730_v25, %v730_v25  ;;  %v605_v40 = vadd.f32 %v532_v34, %v303_v27  ;;  %v1128_v41 = vpop.f32.mrb[21].mxu0  ;;  %v619_v42 = vadd.f32 %v588_v36, %v317_v28  ;;  %v1156_v43 = vpop.f32.mrb[21].mxu1 }
 0x16f   : > { %v1070_v38 = vpack.c.bf16 %v717_v30, %v717_v30  ;;  %v1084_v39 = vpack.c.bf16 %v731_v32, %v731_v32  ;;  %v535_v46 = vpop.f32.mrb[22].mxu0  ;;  %v591_v47 = vpop.f32.mrb[22].mxu1 }
 0x170   : > { %847 = vst.msk [vmem:[%s1800_s20 + $0x18] sm:$0xf] %vm840_vm3, %v1069_v29  ;;  %861 = vst.msk [vmem:[%s1800_s20 + $0x50] sm:$0xf] %vm840_vm3, %v1083_v31  ;;  %v606_v50 = vadd.f32 %v535_v46, %v304_v35  ;;  %v1129_v51 = vpop.f32.mrb[23].mxu0  ;;  %v620_v52 = vadd.f32 %v591_v47, %v318_v37  ;;  %v1157_v53 = vpop.f32.mrb[23].mxu1 }
 0x171   : > { %v659_v44 = vld [vmem:[#allocation2 + $0x40] sm:$0xff]  ;;  %v673_v45 = vld [vmem:[#allocation2 + $0xb0] sm:$0xff]  ;;  %848 = vst.msk [vmem:[%s1800_s20 + $0x1c] sm:$0xf] %vm840_vm3, %v1070_v38  ;;  %862 = vst.msk [vmem:[%s1800_s20 + $0x54] sm:$0xf] %vm840_vm3, %v1084_v39 }
 0x172   : > { %v692_v48 = vadd.f32 %v1788_v33, %v659_v44  ;;  %v706_v49 = vadd.f32 %v1788_v33, %v673_v45  ;;  %632 = vst.msk [vmem:[#allocation2 + $0x50] sm:$0xff] %vm266_vm1, %v605_v40  ;;  %646 = vst.msk [vmem:[#allocation2 + $0xc0] sm:$0xff] %vm266_vm1, %v619_v42  ;;  %v660_v54 = vld [vmem:[#allocation2 + $0x48] sm:$0xff]  ;;  %v674_v55 = vld [vmem:[#allocation2 + $0xb8] sm:$0xff] }
 0x173   : > { %v693_v57 = vadd.f32 %v1788_v33, %v660_v54  ;;  %v707_v59 = vadd.f32 %v1788_v33, %v674_v55  ;;  %633 = vst.msk [vmem:[#allocation2 + $0x58] sm:$0xff] %vm266_vm1, %v606_v50  ;;  %647 = vst.msk [vmem:[#allocation2 + $0xc8] sm:$0xff] %vm266_vm1, %v620_v52 }
 0x174   : > { %v718_v56 = vmax.f32 %v692_v48, 0.0  ;;  %v732_v58 = vmax.f32 %v706_v49, 0.0 }
 0x175   : > { %v719_v62 = vmax.f32 %v693_v57, 0.0  ;;  %v733_v0 = vmax.f32 %v707_v59, 0.0  ;;  %v540_v1 = vpop.f32.mrb[24].mxu0 }
 0x176   : > { %v1071_v61 = vpack.c.bf16 %v718_v56, %v718_v56  ;;  %v1085_v63 = vpack.c.bf16 %v732_v58, %v732_v58  ;;  %v607_v5 = vadd.f32 %v540_v1, %v305_v60  ;;  %v1132_v6 = vpop.f32.mrb[25].mxu0 }
 0x177   : > { %v1072_v3 = vpack.c.bf16 %v719_v62, %v719_v62  ;;  %v1086_v4 = vpack.c.bf16 %v733_v0, %v733_v0  ;;  %v543_v9 = vpop.f32.mrb[26].mxu0 }
 0x178   : > { %849 = vst.msk [vmem:[%s1800_s20 + $0x20] sm:$0xf] %vm840_vm3, %v1071_v61  ;;  %863 = vst.msk [vmem:[%s1800_s20 + $0x58] sm:$0xf] %vm840_vm3, %v1085_v63  ;;  %v608_v12 = vadd.f32 %v543_v9, %v306_v2  ;;  %v1133_v13 = vpop.f32.mrb[27].mxu0 }
 0x179   : > { %v661_v7 = vld [vmem:[#allocation2 + $0x50] sm:$0xff]  ;;  %v675_v8 = vld [vmem:[#allocation2 + $0xc0] sm:$0xff]  ;;  %850 = vst.msk [vmem:[%s1800_s20 + $0x24] sm:$0xf] %vm840_vm3, %v1072_v3  ;;  %864 = vst.msk [vmem:[%s1800_s20 + $0x5c] sm:$0xf] %vm840_vm3, %v1086_v4 }
 0x17a   : > { %v694_v10 = vadd.f32 %v1788_v33, %v661_v7  ;;  %v708_v11 = vadd.f32 %v1788_v33, %v675_v8  ;;  %634 = vst.msk [vmem:[#allocation2 + $0x60] sm:$0xff] %vm266_vm1, %v607_v5  ;;  %v662_v14 = vld [vmem:[#allocation2 + $0x58] sm:$0xff]  ;;  %v676_v15 = vld [vmem:[#allocation2 + $0xc8] sm:$0xff]  ;;  %635 = vst.msk [vmem:[#allocation2 + $0x68] sm:$0xff] %vm266_vm1, %v608_v12 }
 0x17b   : > { %v695_v17 = vadd.f32 %v1788_v33, %v662_v14  ;;  %v709_v19 = vadd.f32 %v1788_v33, %v676_v15 }
 0x17c   : > { %v720_v16 = vmax.f32 %v694_v10, 0.0  ;;  %v734_v18 = vmax.f32 %v708_v11, 0.0 }
 0x17d   : > { %v721_v21 = vmax.f32 %v695_v17, 0.0  ;;  %v735_v23 = vmax.f32 %v709_v19, 0.0 }
 0x17e   : > { %v1073_v20 = vpack.c.bf16 %v720_v16, %v720_v16  ;;  %v1087_v22 = vpack.c.bf16 %v734_v18, %v734_v18 }
 0x17f   : > { %v1074_v24 = vpack.c.bf16 %v721_v21, %v721_v21  ;;  %v1088_v25 = vpack.c.bf16 %v735_v23, %v735_v23 }
 0x180   : > { %851 = vst.msk [vmem:[%s1800_s20 + $0x28] sm:$0xf] %vm840_vm3, %v1073_v20  ;;  %865 = vst.msk [vmem:[%s1800_s20 + $0x60] sm:$0xf] %vm840_vm3, %v1087_v22 }
 0x181   : > { %v663_v26 = vld [vmem:[#allocation2 + $0x60] sm:$0xff]  ;;  %852 = vst.msk [vmem:[%s1800_s20 + $0x2c] sm:$0xf] %vm840_vm3, %v1074_v24  ;;  %866 = vst.msk [vmem:[%s1800_s20 + $0x64] sm:$0xf] %vm840_vm3, %v1088_v25  ;;  %v664_v28 = vld [vmem:[#allocation2 + $0x68] sm:$0xff] }
 0x182   : > { %v696_v27 = vadd.f32 %v1788_v33, %v663_v26  ;;  %v697_v30 = vadd.f32 %v1788_v33, %v664_v28 }
 0x184   : > { %v722_v29 = vmax.f32 %v696_v27, 0.0  ;;  %v723_v32 = vmax.f32 %v697_v30, 0.0 }
 0x186   : > { %v1075_v31 = vpack.c.bf16 %v722_v29, %v722_v29  ;;  %v1076_v34 = vpack.c.bf16 %v723_v32, %v723_v32 }
 0x188   : > { %853 = vst.msk [vmem:[%s1800_s20 + $0x30] sm:$0xf] %vm840_vm3, %v1075_v31  ;;  %854 = vst.msk [vmem:[%s1800_s20 + $0x34] sm:$0xf] %vm840_vm3, %v1076_v34 }
 0x189   : > { %1364 = shalt.err (!%p1361_p2)
}
 0x18a   : > { %s1365_s9 = scalar_lea.hbm %s1895_s26, 1664  ;;  %s1369_s7 = scalar_lea.hbm %s1953_s3, 3328 }
 0x18b   : > { %p1366_p0 = scmp.ne.s32.totalorder %s1895_s26, %s1365_s9  ;;  %p1370_p6 = scmp.lt.u32.totalorder %s1895_s26, %s1953_s3 }
 0x18c   : > { %p1371_p7 = scmp.lt.u32.totalorder %s1369_s7, %s1365_s9  ;;  %p1373_p8 = scmp.lt.u32.totalorder %s1365_s9, %s1895_s26 }
 0x18d   : > { %p1367_p4 = pnand %p1366_p0, %p1968_p12 }
 0x18e   : > { %p1372_p11 = por %p1371_p7, %p1370_p6 }
 0x18f   : > { %p1368_p13 = pneg %p1367_p4 }
 0x190   : > { %p1374_p1 = por %p1373_p8, %p1372_p11 }
 0x192   : > { %p1375_p10 = pnand %p1374_p1, %p1368_p13 }
 0x194   : > { %1378 = shalt.err (!%p1375_p10)
}
 0x195   : > { %s1447_s20 = smov 64   ;;  %s1448_s22 = smov 4  }
 0x196   : > { %1172 = dma.vmem_to_hbm [thread:$0]  (%p1968_p12), %s1897_s24, 1664, %s1895_s26, %s868_s15, %s1447_s20, %s1447_s20, %s1448_s22  }
 0x197 PF: > { %s897_s11 = sand.u32 1, %s1417_s12   ;;  %p1969_p3 = scmp.ne.s32.totalorder %s1961_s23, 0 }
 0x198   : > { %p1970_p5 = scmp.ge.s32.totalorder %s1437_s17, 2  ;;  %s898_s18 = scalar_lea.sflag [#allocation5], %s897_s11 }
 0x19a   : > { %p1186_p9 = pnand %p1970_p5, %p1969_p3 }
 0x19c   : > { %1412 = dma.done.wait (!%p1186_p9), %s898_s18, 1664  }
 0x19d   : > { %1414 = vsyncadd (!%p1186_p9), %s898_s18, 4294965632  ;;  %s20_s17 = sadd.s32 1, %s1437_s17   ;;  %s1971_s12 = smov %s1421_s13 }
 0x19e   : > { %p17_p2 = scmp.ge.s32.totalorder %s20_s17, 4   ;;  %s1972_s13 = smov %s1425_s14 }
 0x19f   : > { %s1973_s14 = smov %s1618_s6  ;;  %s1974_s15 = smov %s1433_s16 }
 0x1a0   : > { %s1975_s16 = smov %s1977_s25  ;;  %19 = sbr.rel (!%p17_p2) target bundleno = 7 (0x7), region = 95 }
 0x1a7   :  { %903 = vsyncpa [#allocation4], 1 }
 0x1a8   :  { %905 = vsyncpa [#allocation4 + $0x1], 1 }
 0x1a9   :  { %906 = vsyncpa [#allocation7], 1 }
 0x1aa   :  { %907 = vsyncpa [#allocation5], 1 }
 0x1ab   :  { %909 = vsyncpa [#allocation5 + $0x1], 1 }

// kernel: wrn_forward.19
= control target key start
LH: loop header
LB: loop body
LE: loop exit
PB: predicated region body
PF: predicated region fallthrough
CT: control target
= control target key end

     0   :  { %8 = vsyncpa [#allocation4], 0  ;;  %s855_s0 = inlined_call_operand.hbm [shape: bf16[98,72], index: 0, kind: input, shape index: {}]   ;;  %s856_s1 = inlined_call_operand.hbm [shape: bf16[72,8], index: 1, kind: input, shape index: {}]   ;;  %s857_s2 = inlined_call_operand.hbm [shape: f32[1,8], index: 2, kind: input, shape index: {}]   ;;  %s858_s3 = inlined_call_operand.hbm [shape: bf16[98,8], index: 3, kind: output, shape index: {}]  }
   0x1   :  { %9 = vsyncpa [#allocation7], 0 }
   0x2   :  { %10 = vsyncpa [#allocation5], 0  ;;  %s666_s12 = smov [#allocation6]   ;;  %s667_s14 = smov [#allocation3]  }
   0x3   :  { %s28_s13 = sshll.u32 %s666_s12, 4  ;;  %s16_s15 = sshll.u32 %s667_s14, 4  ;;  %s29_s13 = int_to_ptr.vmem [resolvable:$true] %s28_s13  ;;  %s694_s15 = int_to_ptr.vmem [resolvable:$true] %s16_s15 }
   0x4   :  { %s572_s18 = scalar_lea.hbm %s856_s1, 576 }
   0x5   :  { %p573_p0 = scmp.ne.s32.totalorder %s856_s1, %s572_s18  ;;  %p576_p1 = scmp.lt.u32.totalorder %s572_s18, %s856_s1 }
   0x7   :  { %p578_p2 = pnand %p576_p1, %p573_p0 }
   0x9   :  { %581 = shalt.err (!%p578_p2)
}
   0xa   :  { %s582_s23 = scalar_lea.vmem %s29_s13, 576  ;;  %p587_p4 = scmp.lt.s32.totalorder %s29_s13, %s29_s13 }
   0xb   :  { %p583_p3 = scmp.ne.s32.totalorder %s29_s13, %s582_s23  ;;  %p588_p5 = scmp.lt.s32.totalorder %s582_s23, %s582_s23 }
   0xd   :  { %p589_p6 = por %p588_p5, %p587_p4 }
   0xf   :  { %p590_p7 = pnand %p589_p6, %p583_p3 }
  0x11   :  { %593 = shalt.err (!%p590_p7)
}
  0x12   :  { %s668_s24 = smov 64   ;;  %s669_s25 = smov 4  }
  0x13   :  { %34 = dma.hbm_to_vmem [thread:$0]  %s856_s1, 576, %s29_s13, [#allocation7], %s668_s24, %s668_s24, %s669_s25  }
  0x14   :  { %s594_s30 = scalar_lea.hbm %s855_s0, 832 }
  0x15   :  { %p595_p8 = scmp.ne.s32.totalorder %s855_s0, %s594_s30  ;;  %p598_p9 = scmp.lt.u32.totalorder %s594_s30, %s855_s0 }
  0x17   :  { %p600_p10 = pnand %p598_p9, %p595_p8 }
  0x19   :  { %603 = shalt.err (!%p600_p10)
}
  0x1a   :  { %s604_s8 = scalar_lea.vmem %s694_s15, 832  ;;  %p609_p12 = scmp.lt.s32.totalorder %s694_s15, %s694_s15 }
  0x1b   :  { %p605_p11 = scmp.ne.s32.totalorder %s694_s15, %s604_s8  ;;  %p610_p13 = scmp.lt.s32.totalorder %s604_s8, %s604_s8 }
  0x1d   :  { %p611_p0 = por %p610_p13, %p609_p12 }
  0x1f   :  { %p612_p1 = pnand %p611_p0, %p605_p11 }
  0x21   :  { %615 = shalt.err (!%p612_p1)
}
  0x22   :  { %22 = dma.hbm_to_vmem [thread:$0]  %s855_s0, 832, %s694_s15, [#allocation4], %s668_s24, %s668_s24, %s669_s25  }
  0x23   :  { %s670_s10 = smov [#allocation8]   ;;  %s616_s14 = scalar_lea.hbm %s857_s2, 16 }
  0x24   :  { %s41_s11 = sshll.u32 %s670_s10, 4  ;;  %p617_p2 = scmp.ne.s32.totalorder %s857_s2, %s616_s14  ;;  %s42_s11 = int_to_ptr.vmem [resolvable:$true] %s41_s11 }
  0x25   :  { %p620_p3 = scmp.lt.u32.totalorder %s616_s14, %s857_s2 }
  0x27   :  { %p622_p4 = pnand %p620_p3, %p617_p2 }
  0x29   :  { %625 = shalt.err (!%p622_p4)
}
  0x2a   :  { %s626_s20 = scalar_lea.vmem %s42_s11, 16  ;;  %s630_s0 = scalar_lea.vmem %s42_s11, 32 }
  0x2b   :  { %p627_p5 = scmp.ne.s32.totalorder %s42_s11, %s626_s20  ;;  %p631_p6 = scmp.lt.s32.totalorder %s42_s11, %s42_s11 }
  0x2c   :  { %p632_p7 = scmp.lt.s32.totalorder %s630_s0, %s626_s20 }
  0x2e   :  { %p633_p8 = por %p632_p7, %p631_p6 }
  0x30   :  { %p634_p9 = pnand %p633_p8, %p627_p5 }
  0x32   :  { %637 = shalt.err (!%p634_p9)
}
  0x33   :  { %44 = dma.hbm_to_vmem [thread:$0]  %s857_s2, 16, %s42_s11, [#allocation7]  }
  0x34   :  { %660 = dma.done.wait [#allocation4], 832  }
  0x35   :  { %661 = vsyncadd [#allocation4], 4294966464 }
  0x36   :  { %662 = dma.done.wait [#allocation7], 592  }
  0x37   :  { %663 = vsyncadd [#allocation7], 4294966704  ;;  %v671_v0 = vmov 0.0   ;;  %vm59_vm0 = vcmask 64512   ;;  %vm672_vm1 = vmmov 0   ;;  %v560_v1 = vld [vmem:[#allocation6] sm:$0xff]  }
  0x38   :  { %504 = vmatprep.subr.bf16.mxu0 %v671_v0  ;;  %542 = vmatprep.subr.bf16.mxu1 %v671_v0  ;;  %60 = vst.msk [vmem:[#allocation2] sm:$0xff] %vm59_vm0, %v671_v0  ;;  %61 = vst.msk [vmem:[#allocation2 + $0x8] sm:$0xff] %vm59_vm0, %v671_v0  ;;  %v561_v2 = vld [vmem:[#allocation6 + $0x8] sm:$0xff]   ;;  %v562_v3 = vld [vmem:[#allocation6 + $0x10] sm:$0xff]   ;;  %vm191_vm2 = vcmask 1043456   ;;  %vm169_vm3 = vcmask 588800  }
  0x39   :  { %514 = vmatprep.mubr.msk.bf16.mxu0 %vm672_vm1, %v671_v0  ;;  %530 = vmatprep.mubr.msk.bf16.mxu1 %vm672_vm1, %v671_v0  ;;  %62 = vst.msk [vmem:[#allocation2 + $0x10] sm:$0xff] %vm59_vm0, %v671_v0  ;;  %63 = vst.msk [vmem:[#allocation2 + $0x18] sm:$0xff] %vm59_vm0, %v671_v0  ;;  %v563_v4 = vld [vmem:[#allocation6 + $0x18] sm:$0xff]   ;;  %v564_v5 = vld [vmem:[#allocation6 + $0x20] ss:$0 sps:$4 sm:$0xff]   ;;  %vm72_vm4 = vcmask 58368  }
  0x3a   :  { %64 = vst.msk [vmem:[#allocation2 + $0x20] sm:$0xff] %vm59_vm0, %v671_v0  ;;  %65 = vst.msk [vmem:[#allocation2 + $0x28] sm:$0xff] %vm59_vm0, %v671_v0  ;;  %505 = vmatpush3.bf16.msra.mxu0 %v560_v1  ;;  %547 = vmatpush3.bf16.msra.mxu1 %v560_v1  ;;  %v193_v6 = vsel %vm191_vm2, %v564_v5, 0  ;;  %v565_v7 = vld [vmem:[#allocation3] sm:$0xff]   ;;  %v567_v9 = vld [vmem:[#allocation3 + $0x8] sm:$0xff]   ;;  %vm413_vm5 = vcmask 60416  }
  0x3b   :  { %66 = vst.msk [vmem:[#allocation2 + $0x30] sm:$0xff] %vm59_vm0, %v671_v0  ;;  %67 = vst.msk [vmem:[#allocation2 + $0x38] sm:$0xff] %vm59_vm0, %v671_v0  ;;  %506 = vmatprep.subr.bf16.mxu0 %v671_v0  ;;  %543 = vmatprep.subr.bf16.mxu1 %v671_v0  ;;  %v566_v8 = vld [vmem:[#allocation3 + $0x20] sm:$0xff]   ;;  %v568_v10 = vld [vmem:[#allocation3 + $0x28] sm:$0xff]   ;;  %vm426_vm6 = vcmask 57344   ;;  %s673_s2 = smov [#allocation9]  }
  0x3c   :  { %68 = vst.msk [vmem:[#allocation2 + $0x40] sm:$0xff] %vm59_vm0, %v671_v0  ;;  %69 = vst.msk [vmem:[#allocation2 + $0x48] sm:$0xff] %vm59_vm0, %v671_v0  ;;  %v569_v11 = vld [vmem:[#allocation3 + $0x10] sm:$0xff]   ;;  %v571_v13 = vld [vmem:[#allocation3 + $0x18] sm:$0xff]   ;;  %s433_s22 = sshll.u32 %s673_s2, 4  ;;  %s434_s22 = int_to_ptr.vmem [resolvable:$true] %s433_s22 }
  0x3d   :  { %70 = vst.msk [vmem:[#allocation2 + $0x50] sm:$0xff] %vm59_vm0, %v671_v0  ;;  %71 = vst.msk [vmem:[#allocation2 + $0x58] sm:$0xff] %vm59_vm0, %v671_v0  ;;  %v570_v12 = vld [vmem:[#allocation3 + $0x30] ss:$0 sps:$4 sm:$0x11]   ;;  %s638_s23 = scalar_lea.vmem %s434_s22, 832  ;;  %p643_p11 = scmp.lt.s32.totalorder %s434_s22, %s434_s22 }
  0x3e   :  { %507 = vmatpush3.bf16.msra.mxu0 %v561_v2  ;;  %548 = vmatpush3.bf16.msra.mxu1 %v561_v2  ;;  %73 = vst.msk [vmem:[#allocation2 + $0x60] sm:$0x3] %vm72_vm4, %v671_v0  ;;  %v804_v32 = vld [vmem:[#allocation8] ss:$0 sm:$0xff]  ;;  %p639_p10 = scmp.ne.s32.totalorder %s434_s22, %s638_s23  ;;  %p644_p12 = scmp.lt.s32.totalorder %s638_s23, %s638_s23 }
  0x3f   :  { %508 = vmatprep.subr.bf16.mxu0 %v671_v0  ;;  %544 = vmatprep.subr.bf16.mxu1 %v671_v0  ;;  %v74_v14 = vld [vmem:[#allocation2] sm:$0xff]  ;;  %v75_v17 = vld [vmem:[#allocation2 + $0x8] sm:$0xff] }
  0x40   :  { %v76_v30 = vld [vmem:[#allocation2 + $0x10] sm:$0xff]  ;;  %v77_v34 = vld [vmem:[#allocation2 + $0x18] sm:$0xff]  ;;  %p645_p13 = por %p644_p12, %p643_p11 }
  0x41   :  { %v78_v57 = vld [vmem:[#allocation2 + $0x20] sm:$0xff] }
  0x42   :  { %509 = vmatpush3.bf16.msra.mxu0 %v562_v3  ;;  %549 = vmatpush3.bf16.msra.mxu1 %v562_v3  ;;  %p646_p0 = pnand %p645_p13, %p639_p10 }
  0x43   :  { %510 = vmatprep.subr.bf16.mxu0 %v671_v0  ;;  %545 = vmatprep.subr.bf16.mxu1 %v671_v0  ;;  %v82_v15 = vld [vmem:[#allocation2 + $0x40] sm:$0xff]  ;;  %v83_v19 = vld [vmem:[#allocation2 + $0x48] sm:$0xff] }
  0x44   :  { %v84_v31 = vld [vmem:[#allocation2 + $0x50] sm:$0xff]  ;;  %v85_v36 = vld [vmem:[#allocation2 + $0x58] sm:$0xff] }
  0x45   :  { %v86_v58 = vld [vmem:[#allocation2 + $0x60] sm:$0x3] }
  0x46   :  { %511 = vmatpush3.bf16.msra.mxu0 %v563_v4  ;;  %550 = vmatpush3.bf16.msra.mxu1 %v563_v4 }
  0x47   :  { %512 = vmatprep.subr.bf16.mxu0 %v671_v0  ;;  %546 = vmatprep.subr.bf16.mxu1 %v671_v0 }
  0x4a   :  { %513 = vmatpush3.bf16.msra.mxu0 %v193_v6  ;;  %551 = vmatpush3.bf16.msra.mxu1 %v193_v6 }
  0x4d   :  { %515 = vmatmul.mubr.msk.bf16.vlgmr.msra.gmra.mrb[0].mxu0 %vm169_vm3, %v565_v7  ;;  %531 = vmatmul.mubr.msk.bf16.vlgmr.msra.gmra.mrb[0].mxu1 %vm169_vm3, %v566_v8 }
  0x4e   :  { %518 = vmatprep.mubr.msk.bf16.mxu0 %vm672_vm1, %v671_v0  ;;  %534 = vmatprep.mubr.msk.bf16.mxu1 %vm672_vm1, %v671_v0 }
  0x55   :  { %519 = vmatmul.mubr.msk.bf16.gmra.mrb[4].mxu0 %vm169_vm3, %v567_v9  ;;  %535 = vmatmul.mubr.msk.bf16.gmra.mrb[4].mxu1 %vm169_vm3, %v568_v10 }
  0x56   :  { %522 = vmatprep.mubr.msk.bf16.mxu0 %vm672_vm1, %v671_v0  ;;  %538 = vmatprep.mubr.msk.bf16.mxu1 %vm672_vm1, %v671_v0 }
  0x5d   :  { %523 = vmatmul.mubr.msk.bf16.gmra.mrb[8].mxu0 %vm169_vm3, %v569_v11  ;;  %539 = vmatmul.mubr.msk.bf16.gmra.mrb[8].mxu1 %vm169_vm3, %v570_v12 }
  0x5e   :  { %526 = vmatprep.mubr.msk.bf16.mxu0 %vm672_vm1, %v671_v0  ;;  %v79_v0 = vld [vmem:[#allocation2 + $0x28] sm:$0xff] }
  0x65   :  { %527 = vmatmul.mubr.msk.bf16.gmra.mrb[12].mxu0 %vm169_vm3, %v571_v13 }
 0x120   :  { %v229_v16 = vpop.f32.mrb[0].mxu0  ;;  %v261_v18 = vpop.f32.mrb[0].mxu1 }
 0x121   :  { %v283_v20 = vadd.f32 %v229_v16, %v74_v14  ;;  %v516_v21 = vpop.f32.mrb[1].mxu0  ;;  %v291_v22 = vadd.f32 %v261_v18, %v82_v15  ;;  %v532_v23 = vpop.f32.mrb[1].mxu1 }
 0x122   :  { %v232_v24 = vpop.f32.mrb[2].mxu0  ;;  %v264_v25 = vpop.f32.mrb[2].mxu1  ;;  %v80_v23 = vld [vmem:[#allocation2 + $0x30] sm:$0xff] }
 0x123   :  { %297 = vst.msk [vmem:[#allocation2] sm:$0xff] %vm59_vm0, %v283_v20  ;;  %v284_v26 = vadd.f32 %v232_v24, %v75_v17  ;;  %v517_v27 = vpop.f32.mrb[3].mxu0  ;;  %305 = vst.msk [vmem:[#allocation2 + $0x40] sm:$0xff] %vm59_vm0, %v291_v22  ;;  %v292_v28 = vadd.f32 %v264_v25, %v83_v19  ;;  %v533_v29 = vpop.f32.mrb[3].mxu1 }
 0x124   :  { %v81_v29 = vld [vmem:[#allocation2 + $0x38] sm:$0xff] }
 0x125   :  { %298 = vst.msk [vmem:[#allocation2 + $0x8] sm:$0xff] %vm59_vm0, %v284_v26  ;;  %306 = vst.msk [vmem:[#allocation2 + $0x48] sm:$0xff] %vm59_vm0, %v292_v28 }
 0x128   :  { %v237_v33 = vpop.f32.mrb[4].mxu0  ;;  %v269_v35 = vpop.f32.mrb[4].mxu1 }
 0x129   :  { %v285_v37 = vadd.f32 %v237_v33, %v76_v30  ;;  %v520_v38 = vpop.f32.mrb[5].mxu0  ;;  %v293_v39 = vadd.f32 %v269_v35, %v84_v31  ;;  %v536_v40 = vpop.f32.mrb[5].mxu1 }
 0x12a   :  { %v314_v41 = vld [vmem:[#allocation2] sm:$0xff]  ;;  %v240_v43 = vpop.f32.mrb[6].mxu0  ;;  %v272_v44 = vpop.f32.mrb[6].mxu1 }
 0x12b   :  { %v322_v42 = vld [vmem:[#allocation2 + $0x40] sm:$0xff]  ;;  %v334_v45 = vadd.f32 %v804_v32, %v314_v41  ;;  %299 = vst.msk [vmem:[#allocation2 + $0x10] sm:$0xff] %vm59_vm0, %v285_v37  ;;  %v286_v47 = vadd.f32 %v240_v43, %v77_v34  ;;  %v521_v48 = vpop.f32.mrb[7].mxu0  ;;  %307 = vst.msk [vmem:[#allocation2 + $0x50] sm:$0xff] %vm59_vm0, %v293_v39  ;;  %v294_v49 = vadd.f32 %v272_v44, %v85_v36  ;;  %v537_v50 = vpop.f32.mrb[7].mxu1 }
 0x12c   :  { %v342_v46 = vadd.f32 %v804_v32, %v322_v42  ;;  %v315_v51 = vld [vmem:[#allocation2 + $0x8] sm:$0xff] }
 0x12d   :  { %v323_v52 = vld [vmem:[#allocation2 + $0x48] sm:$0xff]  ;;  %v347_v53 = vmax.f32 %v334_v45, 0.0  ;;  %v335_v54 = vadd.f32 %v804_v32, %v315_v51  ;;  %300 = vst.msk [vmem:[#allocation2 + $0x18] sm:$0xff] %vm59_vm0, %v286_v47  ;;  %308 = vst.msk [vmem:[#allocation2 + $0x58] sm:$0xff] %vm59_vm0, %v294_v49 }
 0x12e   :  { %v355_v55 = vmax.f32 %v342_v46, 0.0  ;;  %v343_v56 = vadd.f32 %v804_v32, %v323_v52 }
 0x12f   :  { %v479_v59 = vpack.c.bf16 %v347_v53, %v347_v53  ;;  %v348_v60 = vmax.f32 %v335_v54, 0.0 }
 0x130   :  { %v487_v61 = vpack.c.bf16 %v355_v55, %v355_v55  ;;  %v356_v62 = vmax.f32 %v343_v56, 0.0  ;;  %v245_v63 = vpop.f32.mrb[8].mxu0  ;;  %v277_v1 = vpop.f32.mrb[8].mxu1 }
 0x131   :  { %414 = vst.msk [vmem:[#allocation9] sm:$0xf] %vm413_vm5, %v479_v59  ;;  %v480_v2 = vpack.c.bf16 %v348_v60, %v348_v60  ;;  %v287_v4 = vadd.f32 %v245_v63, %v78_v57  ;;  %v524_v5 = vpop.f32.mrb[9].mxu0  ;;  %v295_v6 = vadd.f32 %v277_v1, %v86_v58  ;;  %v540_v7 = vpop.f32.mrb[9].mxu1 }
 0x132   :  { %422 = vst.msk [vmem:[#allocation9 + $0x20] sm:$0xf] %vm413_vm5, %v487_v61  ;;  %v488_v3 = vpack.c.bf16 %v356_v62, %v356_v62  ;;  %v316_v8 = vld [vmem:[#allocation2 + $0x10] sm:$0xff]  ;;  %v248_v10 = vpop.f32.mrb[10].mxu0  ;;  %v280_v11 = vpop.f32.mrb[10].mxu1 }
 0x133   :  { %v324_v9 = vld [vmem:[#allocation2 + $0x50] sm:$0xff]  ;;  %415 = vst.msk [vmem:[#allocation9 + $0x4] sm:$0xf] %vm413_vm5, %v480_v2  ;;  %v336_v12 = vadd.f32 %v804_v32, %v316_v8  ;;  %v288_v14 = vadd.f32 %v248_v10, %v79_v0  ;;  %v525_v15 = vpop.f32.mrb[11].mxu0  ;;  %v541_v16 = vpop.f32.mrb[11].mxu1 }
 0x134   :  { %423 = vst.msk [vmem:[#allocation9 + $0x24] sm:$0xf] %vm413_vm5, %v488_v3  ;;  %v344_v13 = vadd.f32 %v804_v32, %v324_v9  ;;  %v317_v17 = vld [vmem:[#allocation2 + $0x18] sm:$0xff] }
 0x135   :  { %301 = vst.msk [vmem:[#allocation2 + $0x20] sm:$0xff] %vm59_vm0, %v287_v4  ;;  %v325_v18 = vld [vmem:[#allocation2 + $0x58] sm:$0xff]  ;;  %v349_v19 = vmax.f32 %v336_v12, 0.0  ;;  %v337_v20 = vadd.f32 %v804_v32, %v317_v17  ;;  %302 = vst.msk [vmem:[#allocation2 + $0x28] sm:$0xff] %vm59_vm0, %v288_v14 }
 0x136   :  { %310 = vst.msk [vmem:[#allocation2 + $0x60] sm:$0x3] %vm72_vm4, %v295_v6  ;;  %v357_v21 = vmax.f32 %v344_v13, 0.0  ;;  %v345_v22 = vadd.f32 %v804_v32, %v325_v18 }
 0x137   :  { %v481_v24 = vpack.c.bf16 %v349_v19, %v349_v19  ;;  %v350_v25 = vmax.f32 %v337_v20, 0.0 }
 0x138   :  { %v489_v26 = vpack.c.bf16 %v357_v21, %v357_v21  ;;  %v358_v27 = vmax.f32 %v345_v22, 0.0  ;;  %v253_v28 = vpop.f32.mrb[12].mxu0 }
 0x139   :  { %416 = vst.msk [vmem:[#allocation9 + $0x8] sm:$0xf] %vm413_vm5, %v481_v24  ;;  %v482_v30 = vpack.c.bf16 %v350_v25, %v350_v25  ;;  %v289_v33 = vadd.f32 %v253_v28, %v80_v23  ;;  %v528_v34 = vpop.f32.mrb[13].mxu0 }
 0x13a   :  { %424 = vst.msk [vmem:[#allocation9 + $0x28] sm:$0xf] %vm413_vm5, %v489_v26  ;;  %v490_v31 = vpack.c.bf16 %v358_v27, %v358_v27  ;;  %v256_v37 = vpop.f32.mrb[14].mxu0 }
 0x13b   :  { %417 = vst.msk [vmem:[#allocation9 + $0xc] sm:$0xf] %vm413_vm5, %v482_v30  ;;  %v290_v40 = vadd.f32 %v256_v37, %v81_v29  ;;  %v529_v41 = vpop.f32.mrb[15].mxu0 }
 0x13c   :  { %v318_v35 = vld [vmem:[#allocation2 + $0x20] sm:$0xff]  ;;  %425 = vst.msk [vmem:[#allocation9 + $0x2c] sm:$0xf] %vm413_vm5, %v490_v31  ;;  %v319_v42 = vld [vmem:[#allocation2 + $0x28] sm:$0xff] }
 0x13d   :  { %v326_v36 = vld [vmem:[#allocation2 + $0x60] sm:$0x3]  ;;  %v338_v38 = vadd.f32 %v804_v32, %v318_v35  ;;  %303 = vst.msk [vmem:[#allocation2 + $0x30] sm:$0xff] %vm59_vm0, %v289_v33  ;;  %v339_v44 = vadd.f32 %v804_v32, %v319_v42  ;;  %304 = vst.msk [vmem:[#allocation2 + $0x38] sm:$0xff] %vm59_vm0, %v290_v40 }
 0x13e   :  { %v346_v39 = vadd.f32 %v804_v32, %v326_v36 }
 0x13f   :  { %v351_v43 = vmax.f32 %v338_v38, 0.0  ;;  %v352_v47 = vmax.f32 %v339_v44, 0.0 }
 0x140   :  { %v359_v45 = vmax.f32 %v346_v39, 0.0 }
 0x141   :  { %v483_v46 = vpack.c.bf16 %v351_v43, %v351_v43  ;;  %v484_v49 = vpack.c.bf16 %v352_v47, %v352_v47 }
 0x142   :  { %v491_v48 = vpack.c.bf16 %v359_v45, %v359_v45 }
 0x143   :  { %418 = vst.msk [vmem:[#allocation9 + $0x10] sm:$0xf] %vm413_vm5, %v483_v46  ;;  %419 = vst.msk [vmem:[#allocation9 + $0x14] sm:$0xf] %vm413_vm5, %v484_v49 }
 0x144   :  { %427 = vst.msk [vmem:[#allocation9 + $0x30] sm:$0x1] %vm426_vm6, %v491_v48  ;;  %v320_v50 = vld [vmem:[#allocation2 + $0x30] sm:$0xff]  ;;  %v321_v52 = vld [vmem:[#allocation2 + $0x38] sm:$0xff] }
 0x145   :  { %v340_v51 = vadd.f32 %v804_v32, %v320_v50  ;;  %v341_v54 = vadd.f32 %v804_v32, %v321_v52 }
 0x147   :  { %v353_v53 = vmax.f32 %v340_v51, 0.0  ;;  %v354_v56 = vmax.f32 %v341_v54, 0.0 }
 0x149   :  { %v485_v55 = vpack.c.bf16 %v353_v53, %v353_v53  ;;  %v486_v57 = vpack.c.bf16 %v354_v56, %v354_v56 }
 0x14b   :  { %420 = vst.msk [vmem:[#allocation9 + $0x18] sm:$0xf] %vm413_vm5, %v485_v55  ;;  %421 = vst.msk [vmem:[#allocation9 + $0x1c] sm:$0xf] %vm413_vm5, %v486_v57 }
 0x14c   :  { %649 = shalt.err (!%p646_p0)
}
 0x14d   :  { %s650_s28 = scalar_lea.hbm %s858_s3, 832 }
 0x14e   :  { %p651_p1 = scmp.ne.s32.totalorder %s858_s3, %s650_s28  ;;  %p654_p2 = scmp.lt.u32.totalorder %s650_s28, %s858_s3 }
 0x150   :  { %p656_p3 = pnand %p654_p2, %p651_p1 }
 0x152   :  { %659 = shalt.err (!%p656_p3)
}
 0x153   :  { %439 = dma.vmem_to_hbm [thread:$0]  %s434_s22, 832, %s858_s3, [#allocation5], %s668_s24, %s668_s24, %s669_s25  }
 0x154   :  { %664 = dma.done.wait [#allocation5], 832  }
 0x155   :  { %665 = vsyncadd [#allocation5], 4294966464 }
 0x156   :  { %443 = vsyncpa [#allocation4], 1 }
 0x157   :  { %444 = vsyncpa [#allocation7], 1 }
 0x158   :  { %445 = vsyncpa [#allocation5], 1 }

// kernel: wrn_forward.20
= control target key start
LH: loop header
LB: loop body
LE: loop exit
PB: predicated region body
PF: predicated region fallthrough
CT: control target
= control target key end

     0   :  { %9 = vsyncpa [#allocation4], 0  ;;  %s894_s0 = inlined_call_operand.hbm [shape: bf16[98,8], index: 0, kind: input, shape index: {}]   ;;  %s895_s1 = inlined_call_operand.hbm [shape: bf16[8,32], index: 1, kind: input, shape index: {}]   ;;  %s896_s2 = inlined_call_operand.hbm [shape: f32[1,32], index: 2, kind: input, shape index: {}]   ;;  %s897_s3 = inlined_call_operand.hbm [shape: bf16[98,32], index: 3, kind: input, shape index: {}]   ;;  %s898_s4 = inlined_call_operand.hbm [shape: bf16[98,32], index: 4, kind: output, shape index: {}]  }
   0x1   :  { %10 = vsyncpa [#allocation7], 0 }
   0x2   :  { %11 = vsyncpa [#allocation10], 0 }
   0x3   :  { %12 = vsyncpa [#allocation5], 0  ;;  %s710_s15 = smov [#allocation6]   ;;  %s711_s17 = smov [#allocation3]  }
   0x4   :  { %s31_s16 = sshll.u32 %s710_s15, 4  ;;  %s18_s18 = sshll.u32 %s711_s17, 4  ;;  %s32_s16 = int_to_ptr.vmem [resolvable:$true] %s31_s16  ;;  %s744_s18 = int_to_ptr.vmem [resolvable:$true] %s18_s18 }
   0x5   :  { %s592_s21 = scalar_lea.hbm %s895_s1, 64 }
   0x6   :  { %p593_p0 = scmp.ne.s32.totalorder %s895_s1, %s592_s21  ;;  %p596_p1 = scmp.lt.u32.totalorder %s592_s21, %s895_s1 }
   0x8   :  { %p598_p2 = pnand %p596_p1, %p593_p0 }
   0xa   :  { %601 = shalt.err (!%p598_p2)
}
   0xb   :  { %s602_s26 = scalar_lea.vmem %s32_s16, 64  ;;  %p607_p4 = scmp.lt.s32.totalorder %s32_s16, %s32_s16 }
   0xc   :  { %p603_p3 = scmp.ne.s32.totalorder %s32_s16, %s602_s26  ;;  %p608_p5 = scmp.lt.s32.totalorder %s602_s26, %s602_s26 }
   0xe   :  { %p609_p6 = por %p608_p5, %p607_p4 }
  0x10   :  { %p610_p7 = pnand %p609_p6, %p603_p3 }
  0x12   :  { %613 = shalt.err (!%p610_p7)
}
  0x13   :  { %34 = dma.hbm_to_vmem [thread:$0]  %s895_s1, 64, %s32_s16, [#allocation7]  }
  0x14   :  { %s614_s5 = scalar_lea.hbm %s894_s0, 832 }
  0x15   :  { %p615_p8 = scmp.ne.s32.totalorder %s894_s0, %s614_s5  ;;  %p618_p9 = scmp.lt.u32.totalorder %s614_s5, %s894_s0 }
  0x17   :  { %p620_p10 = pnand %p618_p9, %p615_p8 }
  0x19   :  { %623 = shalt.err (!%p620_p10)
}
  0x1a   :  { %s624_s10 = scalar_lea.vmem %s744_s18, 832  ;;  %p629_p12 = scmp.lt.s32.totalorder %s744_s18, %s744_s18 }
  0x1b   :  { %p625_p11 = scmp.ne.s32.totalorder %s744_s18, %s624_s10  ;;  %p630_p13 = scmp.lt.s32.totalorder %s624_s10, %s624_s10 }
  0x1d   :  { %p631_p0 = por %p630_p13, %p629_p12 }
  0x1f   :  { %p632_p1 = pnand %p631_p0, %p625_p11 }
  0x21   :  { %635 = shalt.err (!%p632_p1)
}
  0x22   :  { %s712_s1 = smov 64   ;;  %s713_s11 = smov 4  }
  0x23   :  { %24 = dma.hbm_to_vmem [thread:$0]  %s894_s0, 832, %s744_s18, [#allocation4], %s712_s1, %s712_s1, %s713_s11  }
  0x24   :  { %s714_s14 = smov [#allocation8]   ;;  %s715_s16 = smov [#allocation9]  }
  0x25   :  { %s41_s15 = sshll.u32 %s714_s14, 4  ;;  %s50_s17 = sshll.u32 %s715_s16, 4  ;;  %s42_s15 = int_to_ptr.vmem [resolvable:$true] %s41_s15  ;;  %s778_s17 = int_to_ptr.vmem [resolvable:$true] %s50_s17 }
  0x26   :  { %s636_s21 = scalar_lea.hbm %s896_s2, 16 }
  0x27   :  { %p637_p2 = scmp.ne.s32.totalorder %s896_s2, %s636_s21  ;;  %p640_p3 = scmp.lt.u32.totalorder %s636_s21, %s896_s2 }
  0x29   :  { %p642_p4 = pnand %p640_p3, %p637_p2 }
  0x2b   :  { %645 = shalt.err (!%p642_p4)
}
  0x2c   :  { %s646_s0 = scalar_lea.vmem %s42_s15, 16  ;;  %s650_s18 = scalar_lea.vmem %s42_s15, 32 }
  0x2d   :  { %p647_p5 = scmp.ne.s32.totalorder %s42_s15, %s646_s0  ;;  %p651_p6 = scmp.lt.s32.totalorder %s42_s15, %s42_s15 }
  0x2e   :  { %p652_p7 = scmp.lt.s32.totalorder %s650_s18, %s646_s0 }
  0x30   :  { %p653_p8 = por %p652_p7, %p651_p6 }
  0x32   :  { %p654_p9 = pnand %p653_p8, %p647_p5 }
  0x34   :  { %657 = shalt.err (!%p654_p9)
}
  0x35   :  { %44 = dma.hbm_to_vmem [thread:$0]  %s896_s2, 16, %s42_s15, [#allocation7]  }
  0x36   :  { %s658_s30 = scalar_lea.hbm %s897_s3, 832 }
  0x37   :  { %p659_p10 = scmp.ne.s32.totalorder %s897_s3, %s658_s30  ;;  %p662_p11 = scmp.lt.u32.totalorder %s658_s30, %s897_s3 }
  0x39   :  { %p664_p12 = pnand %p662_p11, %p659_p10 }
  0x3b   :  { %667 = shalt.err (!%p664_p12)
}
  0x3c   :  { %s668_s9 = scalar_lea.vmem %s778_s17, 832  ;;  %p673_p0 = scmp.lt.s32.totalorder %s778_s17, %s778_s17 }
  0x3d   :  { %p669_p13 = scmp.ne.s32.totalorder %s778_s17, %s668_s9  ;;  %p674_p1 = scmp.lt.s32.totalorder %s668_s9, %s668_s9 }
  0x3f   :  { %p675_p2 = por %p674_p1, %p673_p0 }
  0x41   :  { %p676_p3 = pnand %p675_p2, %p669_p13 }
  0x43   :  { %679 = shalt.err (!%p676_p3)
}
  0x44   :  { %56 = dma.hbm_to_vmem [thread:$0]  %s897_s3, 832, %s778_s17, [#allocation10], %s712_s1, %s712_s1, %s713_s11  }
  0x45   :  { %702 = dma.done.wait [#allocation4], 832  }
  0x46   :  { %703 = vsyncadd [#allocation4], 4294966464 }
  0x47   :  { %704 = dma.done.wait [#allocation7], 80  }
  0x48   :  { %705 = vsyncadd [#allocation7], 4294967216 }
  0x49   :  { %706 = dma.done.wait [#allocation10], 832  }
  0x4a   :  { %707 = vsyncadd [#allocation10], 4294966464  ;;  %v716_v0 = vmov 0.0   ;;  %vm717_vm0 = vmmov 0   ;;  %vm74_vm1 = vcmask 261120   ;;  %vm171_vm2 = vcmask 1043456  }
  0x4b   :  { %544 = vmatprep.subr.bf16.mxu0 %v716_v0  ;;  %546 = vmatprep.mubr.msk.bf16.mxu0 %vm717_vm0, %v716_v0  ;;  %75 = vst.msk [vmem:[#allocation2] sm:$0xff] %vm74_vm1, %v716_v0  ;;  %76 = vst.msk [vmem:[#allocation2 + $0x8] sm:$0xff] %vm74_vm1, %v716_v0  ;;  %v115_v1 = vld [vmem:[#allocation6] sm:$0xf]  ;;  %v585_v3 = vld [vmem:[#allocation3] sm:$0xff]   ;;  %vm149_vm3 = vcmask 64512  }
  0x4c   :  { %574 = vmatprep.subr.bf16.mxu1 %v716_v0  ;;  %562 = vmatprep.mubr.msk.bf16.mxu1 %vm717_vm0, %v716_v0  ;;  %77 = vst.msk [vmem:[#allocation2 + $0x10] sm:$0xff] %vm74_vm1, %v716_v0  ;;  %78 = vst.msk [vmem:[#allocation2 + $0x18] sm:$0xff] %vm74_vm1, %v716_v0  ;;  %v173_v2 = vsel %vm171_vm2, %v115_v1, 0  ;;  %v586_v4 = vld [vmem:[#allocation3 + $0x20] sm:$0xff]   ;;  %v587_v5 = vld [vmem:[#allocation3 + $0x8] sm:$0xff]   ;;  %vm87_vm4 = vcmask 254976  }
  0x4d   :  { %79 = vst.msk [vmem:[#allocation2 + $0x20] sm:$0xff] %vm74_vm1, %v716_v0  ;;  %80 = vst.msk [vmem:[#allocation2 + $0x28] sm:$0xff] %vm74_vm1, %v716_v0  ;;  %545 = vmatpush3.bf16.msra.mxu0 %v173_v2  ;;  %575 = vmatpush3.bf16.msra.mxu1 %v173_v2  ;;  %v588_v6 = vld [vmem:[#allocation3 + $0x28] sm:$0xff]   ;;  %v589_v7 = vld [vmem:[#allocation3 + $0x10] sm:$0xff]   ;;  %vm432_vm5 = vcmask 257024   ;;  %vm445_vm6 = vcmask 253952  }
  0x4e   :  { %81 = vst.msk [vmem:[#allocation2 + $0x30] sm:$0xff] %vm74_vm1, %v716_v0  ;;  %82 = vst.msk [vmem:[#allocation2 + $0x38] sm:$0xff] %vm74_vm1, %v716_v0  ;;  %v590_v8 = vld [vmem:[#allocation3 + $0x30] ss:$0 sps:$4 sm:$0x11]   ;;  %v591_v9 = vld [vmem:[#allocation3 + $0x18] sm:$0xff]  }
  0x4f   :  { %83 = vst.msk [vmem:[#allocation2 + $0x40] sm:$0xff] %vm74_vm1, %v716_v0  ;;  %84 = vst.msk [vmem:[#allocation2 + $0x48] sm:$0xff] %vm74_vm1, %v716_v0  ;;  %v508_v27 = vld [vmem:[#allocation9] sm:$0xff]   ;;  %v843_v30 = vld [vmem:[#allocation8] ss:$0 sm:$0xff]  ;;  %s718_s3 = smov [#allocation11]  }
  0x50   :  { %85 = vst.msk [vmem:[#allocation2 + $0x50] sm:$0xff] %vm74_vm1, %v716_v0  ;;  %86 = vst.msk [vmem:[#allocation2 + $0x58] sm:$0xff] %vm74_vm1, %v716_v0  ;;  %547 = vmatmul.mubr.msk.bf16.vlgmr.msra.gmra.mrb[0].mxu0 %vm149_vm3, %v585_v3  ;;  %563 = vmatmul.mubr.msk.bf16.vlgmr.msra.gmra.mrb[0].mxu1 %vm149_vm3, %v586_v4  ;;  %v534_v28 = vld [vmem:[#allocation9 + $0x20] sm:$0xff]   ;;  %v509_v35 = vunpack.c.l.bf16 %v508_v27  ;;  %v510_v42 = vunpack.c.h.bf16 %v508_v27  ;;  %v531_v58 = vld [vmem:[#allocation9 + $0x8] sm:$0xff]   ;;  %s452_s12 = sshll.u32 %s718_s3, 4  ;;  %s453_s12 = int_to_ptr.vmem [resolvable:$true] %s452_s12 }
  0x51   :  { %550 = vmatprep.mubr.msk.bf16.mxu0 %vm717_vm0, %v716_v0  ;;  %566 = vmatprep.mubr.msk.bf16.mxu1 %vm717_vm0, %v716_v0  ;;  %88 = vst.msk [vmem:[#allocation2 + $0x60] sm:$0x3] %vm87_vm4, %v716_v0  ;;  %v525_v36 = vunpack.c.l.bf16 %v534_v28  ;;  %v526_v44 = vunpack.c.h.bf16 %v534_v28  ;;  %v535_v60 = vld [vmem:[#allocation9 + $0x28] sm:$0xff]   ;;  %v513_v3 = vunpack.c.l.bf16 %v531_v58  ;;  %s680_s13 = scalar_lea.vmem %s453_s12, 832  ;;  %p685_p5 = scmp.lt.s32.totalorder %s453_s12, %s453_s12 }
  0x52   :  { %v89_v10 = vld [vmem:[#allocation2] sm:$0xff]  ;;  %v90_v13 = vld [vmem:[#allocation2 + $0x8] sm:$0xff]  ;;  %v529_v4 = vunpack.c.l.bf16 %v535_v60  ;;  %p681_p4 = scmp.ne.s32.totalorder %s453_s12, %s680_s13  ;;  %p686_p6 = scmp.lt.s32.totalorder %s680_s13, %s680_s13 }
  0x53   :  { %v91_v26 = vld [vmem:[#allocation2 + $0x10] sm:$0xff]  ;;  %v92_v32 = vld [vmem:[#allocation2 + $0x18] sm:$0xff] }
  0x54   :  { %v93_v1 = vld [vmem:[#allocation2 + $0x20] sm:$0xff]  ;;  %p687_p7 = por %p686_p6, %p685_p5 }
  0x56   :  { %v97_v11 = vld [vmem:[#allocation2 + $0x40] sm:$0xff]  ;;  %v98_v15 = vld [vmem:[#allocation2 + $0x48] sm:$0xff]  ;;  %p688_p8 = pnand %p687_p7, %p681_p4 }
  0x57   :  { %v99_v29 = vld [vmem:[#allocation2 + $0x50] sm:$0xff]  ;;  %v100_v34 = vld [vmem:[#allocation2 + $0x58] sm:$0xff] }
  0x58   :  { %551 = vmatmul.mubr.msk.bf16.gmra.mrb[4].mxu0 %vm149_vm3, %v587_v5  ;;  %567 = vmatmul.mubr.msk.bf16.gmra.mrb[4].mxu1 %vm149_vm3, %v588_v6  ;;  %v101_v2 = vld [vmem:[#allocation2 + $0x60] sm:$0x3] }
  0x59   :  { %554 = vmatprep.mubr.msk.bf16.mxu0 %vm717_vm0, %v716_v0  ;;  %570 = vmatprep.mubr.msk.bf16.mxu1 %vm717_vm0, %v716_v0 }
  0x60   :  { %555 = vmatmul.mubr.msk.bf16.gmra.mrb[8].mxu0 %vm149_vm3, %v589_v7  ;;  %571 = vmatmul.mubr.msk.bf16.gmra.mrb[8].mxu1 %vm149_vm3, %v590_v8 }
  0x61   :  { %558 = vmatprep.mubr.msk.bf16.mxu0 %vm717_vm0, %v716_v0 }
  0x68   :  { %559 = vmatmul.mubr.msk.bf16.gmra.mrb[12].mxu0 %vm149_vm3, %v591_v9 }
 0x123   :  { %v209_v12 = vpop.f32.mrb[0].mxu0  ;;  %v241_v14 = vpop.f32.mrb[0].mxu1 }
 0x124   :  { %v263_v16 = vadd.f32 %v209_v12, %v89_v10  ;;  %v548_v17 = vpop.f32.mrb[1].mxu0  ;;  %v271_v18 = vadd.f32 %v241_v14, %v97_v11  ;;  %v564_v19 = vpop.f32.mrb[1].mxu1  ;;  %v94_v12 = vld [vmem:[#allocation2 + $0x28] sm:$0xff] }
 0x125   :  { %v212_v20 = vpop.f32.mrb[2].mxu0  ;;  %v244_v21 = vpop.f32.mrb[2].mxu1 }
 0x126   :  { %277 = vst.msk [vmem:[#allocation2] sm:$0xff] %vm74_vm1, %v263_v16  ;;  %v264_v22 = vadd.f32 %v212_v20, %v90_v13  ;;  %v549_v23 = vpop.f32.mrb[3].mxu0  ;;  %285 = vst.msk [vmem:[#allocation2 + $0x40] sm:$0xff] %vm74_vm1, %v271_v18  ;;  %v272_v24 = vadd.f32 %v244_v21, %v98_v15  ;;  %v565_v25 = vpop.f32.mrb[3].mxu1  ;;  %v514_v15 = vunpack.c.h.bf16 %v531_v58  ;;  %v530_v18 = vunpack.c.h.bf16 %v535_v60 }
 0x128   :  { %278 = vst.msk [vmem:[#allocation2 + $0x8] sm:$0xff] %vm74_vm1, %v264_v22  ;;  %286 = vst.msk [vmem:[#allocation2 + $0x48] sm:$0xff] %vm74_vm1, %v272_v24 }
 0x12b   :  { %v217_v31 = vpop.f32.mrb[4].mxu0  ;;  %v249_v33 = vpop.f32.mrb[4].mxu1 }
 0x12c   :  { %v265_v37 = vadd.f32 %v217_v31, %v91_v26  ;;  %v552_v38 = vpop.f32.mrb[5].mxu0  ;;  %v273_v39 = vadd.f32 %v249_v33, %v99_v29  ;;  %v568_v40 = vpop.f32.mrb[5].mxu1 }
 0x12d   :  { %v294_v41 = vld [vmem:[#allocation2] sm:$0xff]  ;;  %v220_v45 = vpop.f32.mrb[6].mxu0  ;;  %v252_v46 = vpop.f32.mrb[6].mxu1 }
 0x12e   :  { %v302_v43 = vld [vmem:[#allocation2 + $0x40] sm:$0xff]  ;;  %v314_v47 = vadd.f32 %v843_v30, %v294_v41  ;;  %279 = vst.msk [vmem:[#allocation2 + $0x10] sm:$0xff] %vm74_vm1, %v265_v37  ;;  %v266_v49 = vadd.f32 %v220_v45, %v92_v32  ;;  %v553_v50 = vpop.f32.mrb[7].mxu0  ;;  %287 = vst.msk [vmem:[#allocation2 + $0x50] sm:$0xff] %vm74_vm1, %v273_v39  ;;  %v274_v51 = vadd.f32 %v252_v46, %v100_v34  ;;  %v569_v52 = vpop.f32.mrb[7].mxu1  ;;  %v532_v39 = vld [vmem:[#allocation9 + $0x10] sm:$0xff]  }
 0x12f   :  { %v322_v48 = vadd.f32 %v843_v30, %v302_v43  ;;  %v295_v53 = vld [vmem:[#allocation2 + $0x8] sm:$0xff]  ;;  %v339_v41 = vld [vmem:[#allocation9 + $0x30] sm:$0x1]  ;;  %v517_v50 = vunpack.c.l.bf16 %v532_v39 }
 0x130   :  { %v303_v54 = vld [vmem:[#allocation2 + $0x48] sm:$0xff]  ;;  %v353_v55 = vadd.f32 %v509_v35, %v314_v47  ;;  %v315_v56 = vadd.f32 %v843_v30, %v295_v53  ;;  %280 = vst.msk [vmem:[#allocation2 + $0x18] sm:$0xff] %vm74_vm1, %v266_v49  ;;  %288 = vst.msk [vmem:[#allocation2 + $0x58] sm:$0xff] %vm74_vm1, %v274_v51  ;;  %v352_v51 = vunpack.c.l.bf16 %v339_v41 }
 0x131   :  { %v361_v57 = vadd.f32 %v525_v36, %v322_v48  ;;  %v323_v59 = vadd.f32 %v843_v30, %v303_v54 }
 0x132   :  { %v366_v61 = vmax.f32 %v353_v55, 0.0  ;;  %v354_v62 = vadd.f32 %v510_v42, %v315_v56  ;;  %v95_v42 = vld [vmem:[#allocation2 + $0x30] sm:$0xff] }
 0x133   :  { %v374_v63 = vmax.f32 %v361_v57, 0.0  ;;  %v362_v0 = vadd.f32 %v526_v44, %v323_v59  ;;  %v225_v5 = vpop.f32.mrb[8].mxu0  ;;  %v257_v6 = vpop.f32.mrb[8].mxu1  ;;  %v96_v44 = vld [vmem:[#allocation2 + $0x38] sm:$0xff] }
 0x134   :  { %v494_v7 = vpack.c.bf16 %v366_v61, %v366_v61  ;;  %v367_v8 = vmax.f32 %v354_v62, 0.0  ;;  %v556_v11 = vpop.f32.mrb[9].mxu0  ;;  %v572_v13 = vpop.f32.mrb[9].mxu1  ;;  %v267_v17 = vadd.f32 %v225_v5, %v93_v1  ;;  %v275_v20 = vadd.f32 %v257_v6, %v101_v2 }
 0x135   :  { %v502_v9 = vpack.c.bf16 %v374_v63, %v374_v63  ;;  %v375_v10 = vmax.f32 %v362_v0, 0.0  ;;  %v296_v14 = vld [vmem:[#allocation2 + $0x10] sm:$0xff]  ;;  %v228_v19 = vpop.f32.mrb[10].mxu0  ;;  %v260_v21 = vpop.f32.mrb[10].mxu1  ;;  %v518_v61 = vunpack.c.h.bf16 %v532_v39 }
 0x136   :  { %v304_v16 = vld [vmem:[#allocation2 + $0x50] sm:$0xff]  ;;  %433 = vst.msk [vmem:[#allocation11] sm:$0xf] %vm432_vm5, %v494_v7  ;;  %v495_v22 = vpack.c.bf16 %v367_v8, %v367_v8  ;;  %v316_v23 = vadd.f32 %v843_v30, %v296_v14  ;;  %v557_v26 = vpop.f32.mrb[11].mxu0  ;;  %v573_v27 = vpop.f32.mrb[11].mxu1  ;;  %v268_v31 = vadd.f32 %v228_v19, %v94_v12 }
 0x137   :  { %441 = vst.msk [vmem:[#allocation11 + $0x20] sm:$0xf] %vm432_vm5, %v502_v9  ;;  %v503_v24 = vpack.c.bf16 %v375_v10, %v375_v10  ;;  %v324_v25 = vadd.f32 %v843_v30, %v304_v16  ;;  %v297_v28 = vld [vmem:[#allocation2 + $0x18] sm:$0xff] }
 0x138   :  { %281 = vst.msk [vmem:[#allocation2 + $0x20] sm:$0xff] %vm74_vm1, %v267_v17  ;;  %v305_v29 = vld [vmem:[#allocation2 + $0x58] sm:$0xff]  ;;  %v355_v32 = vadd.f32 %v513_v3, %v316_v23  ;;  %v317_v33 = vadd.f32 %v843_v30, %v297_v28  ;;  %282 = vst.msk [vmem:[#allocation2 + $0x28] sm:$0xff] %vm74_vm1, %v268_v31 }
 0x139   :  { %290 = vst.msk [vmem:[#allocation2 + $0x60] sm:$0x3] %vm87_vm4, %v275_v20  ;;  %v363_v34 = vadd.f32 %v529_v4, %v324_v25  ;;  %v325_v35 = vadd.f32 %v843_v30, %v305_v29  ;;  %v533_v3 = vld [vmem:[#allocation9 + $0x18] sm:$0xff]  }
 0x13a   :  { %434 = vst.msk [vmem:[#allocation11 + $0x4] sm:$0xf] %vm432_vm5, %v495_v22  ;;  %442 = vst.msk [vmem:[#allocation11 + $0x24] sm:$0xf] %vm432_vm5, %v503_v24  ;;  %v368_v36 = vmax.f32 %v355_v32, 0.0  ;;  %v356_v37 = vadd.f32 %v514_v15, %v317_v33  ;;  %v521_v10 = vunpack.c.l.bf16 %v533_v3  ;;  %v522_v12 = vunpack.c.h.bf16 %v533_v3 }
 0x13b   :  { %v376_v38 = vmax.f32 %v363_v34, 0.0  ;;  %v364_v40 = vadd.f32 %v530_v18, %v325_v35  ;;  %v233_v43 = vpop.f32.mrb[12].mxu0 }
 0x13c   :  { %v496_v45 = vpack.c.bf16 %v368_v36, %v368_v36  ;;  %v369_v46 = vmax.f32 %v356_v37, 0.0  ;;  %v560_v49 = vpop.f32.mrb[13].mxu0  ;;  %v269_v52 = vadd.f32 %v233_v43, %v95_v42 }
 0x13d   :  { %v504_v47 = vpack.c.bf16 %v376_v38, %v376_v38  ;;  %v377_v48 = vmax.f32 %v364_v40, 0.0  ;;  %v236_v53 = vpop.f32.mrb[14].mxu0 }
 0x13e   :  { %435 = vst.msk [vmem:[#allocation11 + $0x8] sm:$0xf] %vm432_vm5, %v496_v45  ;;  %v497_v54 = vpack.c.bf16 %v369_v46, %v369_v46  ;;  %v270_v58 = vadd.f32 %v236_v53, %v96_v44  ;;  %v561_v59 = vpop.f32.mrb[15].mxu0 }
 0x13f   :  { %443 = vst.msk [vmem:[#allocation11 + $0x28] sm:$0xf] %vm432_vm5, %v504_v47  ;;  %v298_v55 = vld [vmem:[#allocation2 + $0x20] sm:$0xff]  ;;  %v505_v56 = vpack.c.bf16 %v377_v48, %v377_v48  ;;  %v299_v63 = vld [vmem:[#allocation2 + $0x28] sm:$0xff] }
 0x140   :  { %v306_v57 = vld [vmem:[#allocation2 + $0x60] sm:$0x3]  ;;  %v318_v60 = vadd.f32 %v843_v30, %v298_v55  ;;  %283 = vst.msk [vmem:[#allocation2 + $0x30] sm:$0xff] %vm74_vm1, %v269_v52  ;;  %284 = vst.msk [vmem:[#allocation2 + $0x38] sm:$0xff] %vm74_vm1, %v270_v58  ;;  %v319_v1 = vadd.f32 %v843_v30, %v299_v63 }
 0x141   :  { %v326_v62 = vadd.f32 %v843_v30, %v306_v57  ;;  %436 = vst.msk [vmem:[#allocation11 + $0xc] sm:$0xf] %vm432_vm5, %v497_v54  ;;  %444 = vst.msk [vmem:[#allocation11 + $0x2c] sm:$0xf] %vm432_vm5, %v505_v56 }
 0x142   :  { %v357_v0 = vadd.f32 %v517_v50, %v318_v60  ;;  %v358_v5 = vadd.f32 %v518_v61, %v319_v1 }
 0x143   :  { %v365_v2 = vadd.f32 %v352_v51, %v326_v62 }
 0x144   :  { %v370_v4 = vmax.f32 %v357_v0, 0.0  ;;  %v371_v8 = vmax.f32 %v358_v5, 0.0 }
 0x145   :  { %v378_v6 = vmax.f32 %v365_v2, 0.0 }
 0x146   :  { %v498_v7 = vpack.c.bf16 %v370_v4, %v370_v4  ;;  %v499_v13 = vpack.c.bf16 %v371_v8, %v371_v8 }
 0x147   :  { %v506_v9 = vpack.c.bf16 %v378_v6, %v378_v6  ;;  %v300_v11 = vld [vmem:[#allocation2 + $0x30] sm:$0xff]  ;;  %v301_v15 = vld [vmem:[#allocation2 + $0x38] sm:$0xff] }
 0x148   :  { %437 = vst.msk [vmem:[#allocation11 + $0x10] sm:$0xf] %vm432_vm5, %v498_v7  ;;  %v320_v14 = vadd.f32 %v843_v30, %v300_v11  ;;  %v321_v16 = vadd.f32 %v843_v30, %v301_v15  ;;  %438 = vst.msk [vmem:[#allocation11 + $0x14] sm:$0xf] %vm432_vm5, %v499_v13 }
 0x149   :  { %446 = vst.msk [vmem:[#allocation11 + $0x30] sm:$0x1] %vm445_vm6, %v506_v9 }
 0x14a   :  { %v359_v17 = vadd.f32 %v521_v10, %v320_v14  ;;  %v360_v18 = vadd.f32 %v522_v12, %v321_v16 }
 0x14c   :  { %v372_v19 = vmax.f32 %v359_v17, 0.0  ;;  %v373_v20 = vmax.f32 %v360_v18, 0.0 }
 0x14e   :  { %v500_v21 = vpack.c.bf16 %v372_v19, %v372_v19  ;;  %v501_v22 = vpack.c.bf16 %v373_v20, %v373_v20 }
 0x150   :  { %439 = vst.msk [vmem:[#allocation11 + $0x18] sm:$0xf] %vm432_vm5, %v500_v21  ;;  %440 = vst.msk [vmem:[#allocation11 + $0x1c] sm:$0xf] %vm432_vm5, %v501_v22 }
 0x151   :  { %691 = shalt.err (!%p688_p8)
}
 0x152   :  { %s692_s16 = scalar_lea.hbm %s898_s4, 832 }
 0x153   :  { %p693_p9 = scmp.ne.s32.totalorder %s898_s4, %s692_s16  ;;  %p696_p10 = scmp.lt.u32.totalorder %s692_s16, %s898_s4 }
 0x155   :  { %p698_p11 = pnand %p696_p10, %p693_p9 }
 0x157   :  { %701 = shalt.err (!%p698_p11)
}
 0x158   :  { %458 = dma.vmem_to_hbm [thread:$0]  %s453_s12, 832, %s898_s4, [#allocation5], %s712_s1, %s712_s1, %s713_s11  }
 0x159   :  { %708 = dma.done.wait [#allocation5], 832  }
 0x15a   :  { %709 = vsyncadd [#allocation5], 4294966464 }
 0x15b   :  { %462 = vsyncpa [#allocation4], 1 }
 0x15c   :  { %463 = vsyncpa [#allocation7], 1 }
 0x15d   :  { %464 = vsyncpa [#allocation10], 1 }
 0x15e   :  { %465 = vsyncpa [#allocation5], 1 }

// kernel: wrn_forward.17
= control target key start
LH: loop header
LB: loop body
LE: loop exit
PB: predicated region body
PF: predicated region fallthrough
CT: control target
= control target key end

     0   :  { %8 = vsyncpa [#allocation4], 0  ;;  %s752_s0 = inlined_call_operand.hbm [shape: bf16[98,16], index: 0, kind: input, shape index: {}]   ;;  %s753_s1 = inlined_call_operand.hbm [shape: bf16[16,32], index: 1, kind: input, shape index: {}]   ;;  %s754_s2 = inlined_call_operand.hbm [shape: f32[1,32], index: 2, kind: input, shape index: {}]   ;;  %s755_s3 = inlined_call_operand.hbm [shape: bf16[98,32], index: 3, kind: output, shape index: {}]  }
   0x1   :  { %9 = vsyncpa [#allocation7], 0 }
   0x2   :  { %10 = vsyncpa [#allocation5], 0  ;;  %s593_s12 = smov [#allocation6]   ;;  %s594_s14 = smov [#allocation3]  }
   0x3   :  { %s28_s13 = sshll.u32 %s593_s12, 4  ;;  %s16_s15 = sshll.u32 %s594_s14, 4  ;;  %s29_s13 = int_to_ptr.vmem [resolvable:$true] %s28_s13  ;;  %s621_s15 = int_to_ptr.vmem [resolvable:$true] %s16_s15 }
   0x4   :  { %s499_s18 = scalar_lea.hbm %s753_s1, 128 }
   0x5   :  { %p500_p0 = scmp.ne.s32.totalorder %s753_s1, %s499_s18  ;;  %p503_p1 = scmp.lt.u32.totalorder %s499_s18, %s753_s1 }
   0x7   :  { %p505_p2 = pnand %p503_p1, %p500_p0 }
   0x9   :  { %508 = shalt.err (!%p505_p2)
}
   0xa   :  { %s509_s23 = scalar_lea.vmem %s29_s13, 128  ;;  %p514_p4 = scmp.lt.s32.totalorder %s29_s13, %s29_s13 }
   0xb   :  { %p510_p3 = scmp.ne.s32.totalorder %s29_s13, %s509_s23  ;;  %p515_p5 = scmp.lt.s32.totalorder %s509_s23, %s509_s23 }
   0xd   :  { %p516_p6 = por %p515_p5, %p514_p4 }
   0xf   :  { %p517_p7 = pnand %p516_p6, %p510_p3 }
  0x11   :  { %520 = shalt.err (!%p517_p7)
}
  0x12   :  { %s595_s24 = smov 64   ;;  %s596_s25 = smov 4  }
  0x13   :  { %34 = dma.hbm_to_vmem [thread:$0]  %s753_s1, 128, %s29_s13, [#allocation7], %s595_s24, %s595_s24, %s596_s25  }
  0x14   :  { %s521_s30 = scalar_lea.hbm %s752_s0, 832 }
  0x15   :  { %p522_p8 = scmp.ne.s32.totalorder %s752_s0, %s521_s30  ;;  %p525_p9 = scmp.lt.u32.totalorder %s521_s30, %s752_s0 }
  0x17   :  { %p527_p10 = pnand %p525_p9, %p522_p8 }
  0x19   :  { %530 = shalt.err (!%p527_p10)
}
  0x1a   :  { %s531_s8 = scalar_lea.vmem %s621_s15, 832  ;;  %p536_p12 = scmp.lt.s32.totalorder %s621_s15, %s621_s15 }
  0x1b   :  { %p532_p11 = scmp.ne.s32.totalorder %s621_s15, %s531_s8  ;;  %p537_p13 = scmp.lt.s32.totalorder %s531_s8, %s531_s8 }
  0x1d   :  { %p538_p0 = por %p537_p13, %p536_p12 }
  0x1f   :  { %p539_p1 = pnand %p538_p0, %p532_p11 }
  0x21   :  { %542 = shalt.err (!%p539_p1)
}
  0x22   :  { %22 = dma.hbm_to_vmem [thread:$0]  %s752_s0, 832, %s621_s15, [#allocation4], %s595_s24, %s595_s24, %s596_s25  }
  0x23   :  { %s597_s10 = smov [#allocation8]   ;;  %s543_s14 = scalar_lea.hbm %s754_s2, 16 }
  0x24   :  { %s41_s11 = sshll.u32 %s597_s10, 4  ;;  %p544_p2 = scmp.ne.s32.totalorder %s754_s2, %s543_s14  ;;  %s42_s11 = int_to_ptr.vmem [resolvable:$true] %s41_s11 }
  0x25   :  { %p547_p3 = scmp.lt.u32.totalorder %s543_s14, %s754_s2 }
  0x27   :  { %p549_p4 = pnand %p547_p3, %p544_p2 }
  0x29   :  { %552 = shalt.err (!%p549_p4)
}
  0x2a   :  { %s553_s20 = scalar_lea.vmem %s42_s11, 16  ;;  %s557_s0 = scalar_lea.vmem %s42_s11, 32 }
  0x2b   :  { %p554_p5 = scmp.ne.s32.totalorder %s42_s11, %s553_s20  ;;  %p558_p6 = scmp.lt.s32.totalorder %s42_s11, %s42_s11 }
  0x2c   :  { %p559_p7 = scmp.lt.s32.totalorder %s557_s0, %s553_s20 }
  0x2e   :  { %p560_p8 = por %p559_p7, %p558_p6 }
  0x30   :  { %p561_p9 = pnand %p560_p8, %p554_p5 }
  0x32   :  { %564 = shalt.err (!%p561_p9)
}
  0x33   :  { %44 = dma.hbm_to_vmem [thread:$0]  %s754_s2, 16, %s42_s11, [#allocation7]  }
  0x34   :  { %587 = dma.done.wait [#allocation4], 832  }
  0x35   :  { %588 = vsyncadd [#allocation4], 4294966464 }
  0x36   :  { %589 = dma.done.wait [#allocation7], 144  }
  0x37   :  { %590 = vsyncadd [#allocation7], 4294967152  ;;  %vm59_vm0 = vcmask 261120   ;;  %v598_v0 = vmov 0.0   ;;  %vm599_vm1 = vmmov 0   ;;  %v491_v1 = vld [vmem:[#allocation6] sm:$0xff]  }
  0x38   :  { %451 = vmatprep.subr.bf16.mxu0 %v598_v0  ;;  %453 = vmatprep.mubr.msk.bf16.mxu0 %vm599_vm1, %v598_v0  ;;  %60 = vst.msk [vmem:[#allocation2] sm:$0xff] %vm59_vm0, %v598_v0  ;;  %61 = vst.msk [vmem:[#allocation2 + $0x8] sm:$0xff] %vm59_vm0, %v598_v0  ;;  %v492_v2 = vld [vmem:[#allocation3] sm:$0xff]   ;;  %vm141_vm2 = vcmask 130048   ;;  %v494_v4 = vld [vmem:[#allocation3 + $0x8] sm:$0xff]   ;;  %vm72_vm3 = vcmask 254976  }
  0x39   :  { %62 = vst.msk [vmem:[#allocation2 + $0x10] sm:$0xff] %vm59_vm0, %v598_v0  ;;  %63 = vst.msk [vmem:[#allocation2 + $0x18] sm:$0xff] %vm59_vm0, %v598_v0  ;;  %481 = vmatprep.subr.bf16.mxu1 %v598_v0  ;;  %469 = vmatprep.mubr.msk.bf16.mxu1 %vm599_vm1, %v598_v0  ;;  %v493_v3 = vld [vmem:[#allocation3 + $0x20] sm:$0xff]   ;;  %v495_v5 = vld [vmem:[#allocation3 + $0x28] sm:$0xff]   ;;  %vm368_vm4 = vcmask 257024   ;;  %vm381_vm5 = vcmask 253952  }
  0x3a   :  { %64 = vst.msk [vmem:[#allocation2 + $0x20] sm:$0xff] %vm59_vm0, %v598_v0  ;;  %65 = vst.msk [vmem:[#allocation2 + $0x28] sm:$0xff] %vm59_vm0, %v598_v0  ;;  %452 = vmatpush3.bf16.msra.mxu0 %v491_v1  ;;  %482 = vmatpush3.bf16.msra.mxu1 %v491_v1  ;;  %v496_v6 = vld [vmem:[#allocation3 + $0x10] sm:$0xff]   ;;  %v498_v8 = vld [vmem:[#allocation3 + $0x18] sm:$0xff]   ;;  %s600_s2 = smov [#allocation9]  }
  0x3b   :  { %66 = vst.msk [vmem:[#allocation2 + $0x30] sm:$0xff] %vm59_vm0, %v598_v0  ;;  %67 = vst.msk [vmem:[#allocation2 + $0x38] sm:$0xff] %vm59_vm0, %v598_v0  ;;  %v497_v7 = vld [vmem:[#allocation3 + $0x30] ss:$0 sps:$4 sm:$0x11]   ;;  %s388_s22 = sshll.u32 %s600_s2, 4  ;;  %s389_s22 = int_to_ptr.vmem [resolvable:$true] %s388_s22 }
  0x3c   :  { %68 = vst.msk [vmem:[#allocation2 + $0x40] sm:$0xff] %vm59_vm0, %v598_v0  ;;  %69 = vst.msk [vmem:[#allocation2 + $0x48] sm:$0xff] %vm59_vm0, %v598_v0  ;;  %v701_v27 = vld [vmem:[#allocation8] ss:$0 sm:$0xff]  ;;  %s565_s23 = scalar_lea.vmem %s389_s22, 832  ;;  %p570_p11 = scmp.lt.s32.totalorder %s389_s22, %s389_s22 }
  0x3d   :  { %70 = vst.msk [vmem:[#allocation2 + $0x50] sm:$0xff] %vm59_vm0, %v598_v0  ;;  %71 = vst.msk [vmem:[#allocation2 + $0x58] sm:$0xff] %vm59_vm0, %v598_v0  ;;  %454 = vmatmul.mubr.msk.bf16.vlgmr.msra.gmra.mrb[0].mxu0 %vm141_vm2, %v492_v2  ;;  %470 = vmatmul.mubr.msk.bf16.vlgmr.msra.gmra.mrb[0].mxu1 %vm141_vm2, %v493_v3  ;;  %p566_p10 = scmp.ne.s32.totalorder %s389_s22, %s565_s23  ;;  %p571_p12 = scmp.lt.s32.totalorder %s565_s23, %s565_s23 }
  0x3e   :  { %457 = vmatprep.mubr.msk.bf16.mxu0 %vm599_vm1, %v598_v0  ;;  %473 = vmatprep.mubr.msk.bf16.mxu1 %vm599_vm1, %v598_v0  ;;  %73 = vst.msk [vmem:[#allocation2 + $0x60] sm:$0x3] %vm72_vm3, %v598_v0 }
  0x3f   :  { %v74_v9 = vld [vmem:[#allocation2] sm:$0xff]  ;;  %v75_v12 = vld [vmem:[#allocation2 + $0x8] sm:$0xff]  ;;  %p572_p13 = por %p571_p12, %p570_p11 }
  0x40   :  { %v76_v25 = vld [vmem:[#allocation2 + $0x10] sm:$0xff]  ;;  %v77_v29 = vld [vmem:[#allocation2 + $0x18] sm:$0xff] }
  0x41   :  { %v78_v52 = vld [vmem:[#allocation2 + $0x20] sm:$0xff]  ;;  %v79_v57 = vld [vmem:[#allocation2 + $0x28] sm:$0xff]  ;;  %p573_p0 = pnand %p572_p13, %p566_p10 }
  0x43   :  { %v82_v10 = vld [vmem:[#allocation2 + $0x40] sm:$0xff]  ;;  %v83_v14 = vld [vmem:[#allocation2 + $0x48] sm:$0xff] }
  0x44   :  { %v84_v26 = vld [vmem:[#allocation2 + $0x50] sm:$0xff]  ;;  %v85_v31 = vld [vmem:[#allocation2 + $0x58] sm:$0xff] }
  0x45   :  { %458 = vmatmul.mubr.msk.bf16.gmra.mrb[4].mxu0 %vm141_vm2, %v494_v4  ;;  %474 = vmatmul.mubr.msk.bf16.gmra.mrb[4].mxu1 %vm141_vm2, %v495_v5  ;;  %v86_v53 = vld [vmem:[#allocation2 + $0x60] sm:$0x3] }
  0x46   :  { %461 = vmatprep.mubr.msk.bf16.mxu0 %vm599_vm1, %v598_v0  ;;  %477 = vmatprep.mubr.msk.bf16.mxu1 %vm599_vm1, %v598_v0 }
  0x4d   :  { %462 = vmatmul.mubr.msk.bf16.gmra.mrb[8].mxu0 %vm141_vm2, %v496_v6  ;;  %478 = vmatmul.mubr.msk.bf16.gmra.mrb[8].mxu1 %vm141_vm2, %v497_v7 }
  0x4e   :  { %465 = vmatprep.mubr.msk.bf16.mxu0 %vm599_vm1, %v598_v0 }
  0x55   :  { %466 = vmatmul.mubr.msk.bf16.gmra.mrb[12].mxu0 %vm141_vm2, %v498_v8 }
 0x110   :  { %v197_v11 = vpop.f32.mrb[0].mxu0  ;;  %v229_v13 = vpop.f32.mrb[0].mxu1 }
 0x111   :  { %v251_v15 = vadd.f32 %v197_v11, %v74_v9  ;;  %v455_v16 = vpop.f32.mrb[1].mxu0  ;;  %v259_v17 = vadd.f32 %v229_v13, %v82_v10  ;;  %v471_v18 = vpop.f32.mrb[1].mxu1 }
 0x112   :  { %v200_v19 = vpop.f32.mrb[2].mxu0  ;;  %v232_v20 = vpop.f32.mrb[2].mxu1  ;;  %v81_v18 = vld [vmem:[#allocation2 + $0x38] sm:$0xff] }
 0x113   :  { %265 = vst.msk [vmem:[#allocation2] sm:$0xff] %vm59_vm0, %v251_v15  ;;  %v252_v21 = vadd.f32 %v200_v19, %v75_v12  ;;  %v456_v22 = vpop.f32.mrb[3].mxu0  ;;  %273 = vst.msk [vmem:[#allocation2 + $0x40] sm:$0xff] %vm59_vm0, %v259_v17  ;;  %v260_v23 = vadd.f32 %v232_v20, %v83_v14  ;;  %v472_v24 = vpop.f32.mrb[3].mxu1  ;;  %v80_v14 = vld [vmem:[#allocation2 + $0x30] sm:$0xff] }
 0x115   :  { %266 = vst.msk [vmem:[#allocation2 + $0x8] sm:$0xff] %vm59_vm0, %v252_v21  ;;  %274 = vst.msk [vmem:[#allocation2 + $0x48] sm:$0xff] %vm59_vm0, %v260_v23 }
 0x118   :  { %v205_v28 = vpop.f32.mrb[4].mxu0  ;;  %v237_v30 = vpop.f32.mrb[4].mxu1 }
 0x119   :  { %v253_v32 = vadd.f32 %v205_v28, %v76_v25  ;;  %v459_v33 = vpop.f32.mrb[5].mxu0  ;;  %v261_v34 = vadd.f32 %v237_v30, %v84_v26  ;;  %v475_v35 = vpop.f32.mrb[5].mxu1 }
 0x11a   :  { %v282_v36 = vld [vmem:[#allocation2] sm:$0xff]  ;;  %v208_v38 = vpop.f32.mrb[6].mxu0  ;;  %v240_v39 = vpop.f32.mrb[6].mxu1 }
 0x11b   :  { %v290_v37 = vld [vmem:[#allocation2 + $0x40] sm:$0xff]  ;;  %v302_v40 = vadd.f32 %v701_v27, %v282_v36  ;;  %267 = vst.msk [vmem:[#allocation2 + $0x10] sm:$0xff] %vm59_vm0, %v253_v32  ;;  %v254_v42 = vadd.f32 %v208_v38, %v77_v29  ;;  %v460_v43 = vpop.f32.mrb[7].mxu0  ;;  %275 = vst.msk [vmem:[#allocation2 + $0x50] sm:$0xff] %vm59_vm0, %v261_v34  ;;  %v262_v44 = vadd.f32 %v240_v39, %v85_v31  ;;  %v476_v45 = vpop.f32.mrb[7].mxu1 }
 0x11c   :  { %v310_v41 = vadd.f32 %v701_v27, %v290_v37  ;;  %v283_v46 = vld [vmem:[#allocation2 + $0x8] sm:$0xff] }
 0x11d   :  { %v291_v47 = vld [vmem:[#allocation2 + $0x48] sm:$0xff]  ;;  %v430_v48 = vpack.c.bf16 %v302_v40, %v302_v40  ;;  %v303_v49 = vadd.f32 %v701_v27, %v283_v46  ;;  %268 = vst.msk [vmem:[#allocation2 + $0x18] sm:$0xff] %vm59_vm0, %v254_v42  ;;  %276 = vst.msk [vmem:[#allocation2 + $0x58] sm:$0xff] %vm59_vm0, %v262_v44 }
 0x11e   :  { %v438_v50 = vpack.c.bf16 %v310_v41, %v310_v41  ;;  %v311_v51 = vadd.f32 %v701_v27, %v291_v47 }
 0x11f   :  { %369 = vst.msk [vmem:[#allocation9] sm:$0xf] %vm368_vm4, %v430_v48  ;;  %v431_v54 = vpack.c.bf16 %v303_v49, %v303_v49 }
 0x120   :  { %377 = vst.msk [vmem:[#allocation9 + $0x20] sm:$0xf] %vm368_vm4, %v438_v50  ;;  %v439_v55 = vpack.c.bf16 %v311_v51, %v311_v51  ;;  %v213_v56 = vpop.f32.mrb[8].mxu0  ;;  %v245_v58 = vpop.f32.mrb[8].mxu1 }
 0x121   :  { %370 = vst.msk [vmem:[#allocation9 + $0x4] sm:$0xf] %vm368_vm4, %v431_v54  ;;  %v255_v59 = vadd.f32 %v213_v56, %v78_v52  ;;  %v463_v60 = vpop.f32.mrb[9].mxu0  ;;  %v263_v61 = vadd.f32 %v245_v58, %v86_v53  ;;  %v479_v62 = vpop.f32.mrb[9].mxu1 }
 0x122   :  { %378 = vst.msk [vmem:[#allocation9 + $0x24] sm:$0xf] %vm368_vm4, %v439_v55  ;;  %v284_v63 = vld [vmem:[#allocation2 + $0x10] sm:$0xff]  ;;  %v216_v1 = vpop.f32.mrb[10].mxu0  ;;  %v248_v2 = vpop.f32.mrb[10].mxu1 }
 0x123   :  { %v292_v0 = vld [vmem:[#allocation2 + $0x50] sm:$0xff]  ;;  %v304_v3 = vadd.f32 %v701_v27, %v284_v63  ;;  %269 = vst.msk [vmem:[#allocation2 + $0x20] sm:$0xff] %vm59_vm0, %v255_v59  ;;  %v256_v5 = vadd.f32 %v216_v1, %v79_v57  ;;  %v464_v6 = vpop.f32.mrb[11].mxu0  ;;  %v480_v7 = vpop.f32.mrb[11].mxu1 }
 0x124   :  { %v312_v4 = vadd.f32 %v701_v27, %v292_v0  ;;  %278 = vst.msk [vmem:[#allocation2 + $0x60] sm:$0x3] %vm72_vm3, %v263_v61  ;;  %v285_v8 = vld [vmem:[#allocation2 + $0x18] sm:$0xff] }
 0x125   :  { %v293_v9 = vld [vmem:[#allocation2 + $0x58] sm:$0xff]  ;;  %v432_v10 = vpack.c.bf16 %v304_v3, %v304_v3  ;;  %v305_v11 = vadd.f32 %v701_v27, %v285_v8  ;;  %270 = vst.msk [vmem:[#allocation2 + $0x28] sm:$0xff] %vm59_vm0, %v256_v5 }
 0x126   :  { %v440_v12 = vpack.c.bf16 %v312_v4, %v312_v4  ;;  %v313_v13 = vadd.f32 %v701_v27, %v293_v9 }
 0x127   :  { %371 = vst.msk [vmem:[#allocation9 + $0x8] sm:$0xf] %vm368_vm4, %v432_v10  ;;  %v433_v15 = vpack.c.bf16 %v305_v11, %v305_v11 }
 0x128   :  { %379 = vst.msk [vmem:[#allocation9 + $0x28] sm:$0xf] %vm368_vm4, %v440_v12  ;;  %v441_v16 = vpack.c.bf16 %v313_v13, %v313_v13  ;;  %v221_v17 = vpop.f32.mrb[12].mxu0 }
 0x129   :  { %372 = vst.msk [vmem:[#allocation9 + $0xc] sm:$0xf] %vm368_vm4, %v433_v15  ;;  %v257_v19 = vadd.f32 %v221_v17, %v80_v14  ;;  %v467_v20 = vpop.f32.mrb[13].mxu0 }
 0x12a   :  { %380 = vst.msk [vmem:[#allocation9 + $0x2c] sm:$0xf] %vm368_vm4, %v441_v16  ;;  %v286_v21 = vld [vmem:[#allocation2 + $0x20] sm:$0xff]  ;;  %v224_v23 = vpop.f32.mrb[14].mxu0 }
 0x12b   :  { %v294_v22 = vld [vmem:[#allocation2 + $0x60] sm:$0x3]  ;;  %v306_v24 = vadd.f32 %v701_v27, %v286_v21  ;;  %271 = vst.msk [vmem:[#allocation2 + $0x30] sm:$0xff] %vm59_vm0, %v257_v19  ;;  %v258_v26 = vadd.f32 %v224_v23, %v81_v18  ;;  %v468_v28 = vpop.f32.mrb[15].mxu0 }
 0x12c   :  { %v314_v25 = vadd.f32 %v701_v27, %v294_v22  ;;  %v287_v29 = vld [vmem:[#allocation2 + $0x28] sm:$0xff] }
 0x12d   :  { %v434_v30 = vpack.c.bf16 %v306_v24, %v306_v24  ;;  %v307_v31 = vadd.f32 %v701_v27, %v287_v29  ;;  %272 = vst.msk [vmem:[#allocation2 + $0x38] sm:$0xff] %vm59_vm0, %v258_v26 }
 0x12e   :  { %v442_v32 = vpack.c.bf16 %v314_v25, %v314_v25 }
 0x12f   :  { %373 = vst.msk [vmem:[#allocation9 + $0x10] sm:$0xf] %vm368_vm4, %v434_v30  ;;  %v435_v33 = vpack.c.bf16 %v307_v31, %v307_v31 }
 0x130   :  { %382 = vst.msk [vmem:[#allocation9 + $0x30] sm:$0x1] %vm381_vm5, %v442_v32 }
 0x131   :  { %374 = vst.msk [vmem:[#allocation9 + $0x14] sm:$0xf] %vm368_vm4, %v435_v33 }
 0x132   :  { %v288_v34 = vld [vmem:[#allocation2 + $0x30] sm:$0xff] }
 0x133   :  { %v308_v35 = vadd.f32 %v701_v27, %v288_v34 }
 0x134   :  { %v289_v36 = vld [vmem:[#allocation2 + $0x38] sm:$0xff] }
 0x135   :  { %v436_v37 = vpack.c.bf16 %v308_v35, %v308_v35  ;;  %v309_v38 = vadd.f32 %v701_v27, %v289_v36 }
 0x137   :  { %375 = vst.msk [vmem:[#allocation9 + $0x18] sm:$0xf] %vm368_vm4, %v436_v37  ;;  %v437_v39 = vpack.c.bf16 %v309_v38, %v309_v38 }
 0x139   :  { %376 = vst.msk [vmem:[#allocation9 + $0x1c] sm:$0xf] %vm368_vm4, %v437_v39 }
 0x13a   :  { %576 = shalt.err (!%p573_p0)
}
 0x13b   :  { %s577_s28 = scalar_lea.hbm %s755_s3, 832 }
 0x13c   :  { %p578_p1 = scmp.ne.s32.totalorder %s755_s3, %s577_s28  ;;  %p581_p2 = scmp.lt.u32.totalorder %s577_s28, %s755_s3 }
 0x13e   :  { %p583_p3 = pnand %p581_p2, %p578_p1 }
 0x140   :  { %586 = shalt.err (!%p583_p3)
}
 0x141   :  { %394 = dma.vmem_to_hbm [thread:$0]  %s389_s22, 832, %s755_s3, [#allocation5], %s595_s24, %s595_s24, %s596_s25  }
 0x142   :  { %591 = dma.done.wait [#allocation5], 832  }
 0x143   :  { %592 = vsyncadd [#allocation5], 4294966464 }
 0x144   :  { %398 = vsyncpa [#allocation4], 1 }
 0x145   :  { %399 = vsyncpa [#allocation7], 1 }
 0x146   :  { %400 = vsyncpa [#allocation5], 1 }

// kernel: wrn_forward.21
= control target key start
LH: loop header
LB: loop body
LE: loop exit
PB: predicated region body
PF: predicated region fallthrough
CT: control target
= control target key end

     0   :  { %8 = vsyncpa [#allocation4], 0  ;;  %s1808_s0 = inlined_call_operand.hbm [shape: bf16[2,1568], index: 0, kind: input, shape index: {}]   ;;  %s1809_s1 = inlined_call_operand.hbm [shape: bf16[1568,10], index: 1, kind: input, shape index: {}]   ;;  %s1810_s2 = inlined_call_operand.hbm [shape: f32[1,10], index: 2, kind: input, shape index: {}]   ;;  %s1811_s3 = inlined_call_operand.hbm [shape: f32[2,10], index: 3, kind: output, shape index: {}]  }
   0x1   :  { %9 = vsyncpa [#allocation7], 0 }
   0x2   :  { %10 = vsyncpa [#allocation5], 0  ;;  %s1710_s12 = smov [#allocation6]   ;;  %s1616_s16 = scalar_lea.hbm %s1809_s1, 12544 }
   0x3   :  { %s26_s13 = sshll.u32 %s1710_s12, 4  ;;  %p1617_p0 = scmp.ne.s32.totalorder %s1809_s1, %s1616_s16  ;;  %s27_s13 = int_to_ptr.vmem [resolvable:$true] %s26_s13 }
   0x4   :  { %p1620_p1 = scmp.lt.u32.totalorder %s1616_s16, %s1809_s1 }
   0x6   :  { %p1622_p2 = pnand %p1620_p1, %p1617_p0 }
   0x8   :  { %1625 = shalt.err (!%p1622_p2)
}
   0x9   :  { %s1626_s21 = scalar_lea.vmem %s27_s13, 12544  ;;  %p1631_p4 = scmp.lt.s32.totalorder %s27_s13, %s27_s13 }
   0xa   :  { %p1627_p3 = scmp.ne.s32.totalorder %s27_s13, %s1626_s21  ;;  %p1632_p5 = scmp.lt.s32.totalorder %s1626_s21, %s1626_s21 }
   0xc   :  { %p1633_p6 = por %p1632_p5, %p1631_p4 }
   0xe   :  { %p1634_p7 = pnand %p1633_p6, %p1627_p3 }
  0x10   :  { %1637 = shalt.err (!%p1634_p7)
}
  0x11   :  { %s1711_s22 = smov 64   ;;  %s1712_s23 = smov 4  }
  0x12   :  { %32 = dma.hbm_to_vmem [thread:$0]  %s1809_s1, 12544, %s27_s13, [#allocation7], %s1711_s22, %s1711_s22, %s1712_s23  }
  0x13   :  { %s1713_s26 = smov [#allocation3]   ;;  %s1714_s28 = smov [#allocation8]  }
  0x14   :  { %s17_s27 = sshll.u32 %s1713_s26, 4  ;;  %s39_s29 = sshll.u32 %s1714_s28, 4  ;;  %s18_s27 = int_to_ptr.vmem [resolvable:$true] %s17_s27  ;;  %s40_s29 = int_to_ptr.vmem [resolvable:$true] %s39_s29 }
  0x15   :  { %s1638_s5 = scalar_lea.hbm %s1808_s0, 208 }
  0x16   :  { %p1639_p8 = scmp.ne.s32.totalorder %s1808_s0, %s1638_s5  ;;  %p1642_p9 = scmp.lt.u32.totalorder %s1638_s5, %s1808_s0 }
  0x18   :  { %p1644_p10 = pnand %p1642_p9, %p1639_p8 }
  0x1a   :  { %1647 = shalt.err (!%p1644_p10)
}
  0x1b   :  { %s1648_s1 = scalar_lea.vmem %s18_s27, 208  ;;  %s1652_s10 = scalar_lea.vmem %s18_s27, 224 }
  0x1c   :  { %p1649_p11 = scmp.ne.s32.totalorder %s18_s27, %s1648_s1  ;;  %p1653_p12 = scmp.lt.s32.totalorder %s18_s27, %s18_s27 }
  0x1d   :  { %p1654_p13 = scmp.lt.s32.totalorder %s1652_s10, %s1648_s1 }
  0x1f   :  { %p1655_p0 = por %p1654_p13, %p1653_p12 }
  0x21   :  { %p1656_p1 = pnand %p1655_p0, %p1649_p11 }
  0x23   :  { %1659 = shalt.err (!%p1656_p1)
}
  0x24   :  { %20 = dma.hbm_to_vmem [thread:$0]  %s1808_s0, 208, %s18_s27, [#allocation4]  }
  0x25   :  { %s1660_s15 = scalar_lea.hbm %s1810_s2, 16 }
  0x26   :  { %p1661_p2 = scmp.ne.s32.totalorder %s1810_s2, %s1660_s15  ;;  %p1664_p3 = scmp.lt.u32.totalorder %s1660_s15, %s1810_s2 }
  0x28   :  { %p1666_p4 = pnand %p1664_p3, %p1661_p2 }
  0x2a   :  { %1669 = shalt.err (!%p1666_p4)
}
  0x2b   :  { %s1670_s20 = scalar_lea.vmem %s40_s29, 16  ;;  %s1674_s21 = scalar_lea.vmem %s40_s29, 32 }
  0x2c   :  { %p1671_p5 = scmp.ne.s32.totalorder %s40_s29, %s1670_s20  ;;  %p1675_p6 = scmp.lt.s32.totalorder %s40_s29, %s40_s29 }
  0x2d   :  { %p1676_p7 = scmp.lt.s32.totalorder %s1674_s21, %s1670_s20 }
  0x2f   :  { %p1677_p8 = por %p1676_p7, %p1675_p6 }
  0x31   :  { %p1678_p9 = pnand %p1677_p8, %p1671_p5 }
  0x33   :  { %1681 = shalt.err (!%p1678_p9)
}
  0x34   :  { %42 = dma.hbm_to_vmem [thread:$0]  %s1810_s2, 16, %s40_s29, [#allocation7]  }
  0x35   :  { %1704 = dma.done.wait [#allocation4], 208  }
  0x36   :  { %1705 = vsyncadd [#allocation4], 4294967088 }
  0x37   :  { %1706 = dma.done.wait [#allocation7], 12560  }
  0x38   :  { %1707 = vsyncadd [#allocation7], 4294954736  ;;  %v1516_v0 = vld [vmem:[#allocation6 + $0x40] sm:$0xff]   ;;  %v1520_v4 = vld [vmem:[#allocation6 + $0x48] sm:$0xff]   ;;  %v1715_v22 = vmov 1966171168   ;;  %v264_v24 = vlaneseq }
  0x39   :  { %v1517_v1 = vld [vmem:[#allocation6 + $0xc0] sm:$0xff]   ;;  %1364 = vmatprep.subr.bf16.mxu0 %v1516_v0  ;;  %v1521_v5 = vld [vmem:[#allocation6 + $0xc8] sm:$0xff]   ;;  %v1524_v8 = vld [vmem:[#allocation6 + $0x50] sm:$0xff]   ;;  %v262_v23 = vunpack.c.l.s4 %v1715_v22  ;;  %vm1717_vm0 = vmmov 0   ;;  %vm948_vm1 = vcmask 261120   ;;  %vm57_vm2 = vcmask 74752  }
  0x3a   :  { %v1518_v2 = vld [vmem:[#allocation6] sm:$0xff]   ;;  %1386 = vmatprep.subr.bf16.mxu1 %v1517_v1  ;;  %v1522_v6 = vld [vmem:[#allocation6 + $0x8] sm:$0xff]   ;;  %v1525_v9 = vld [vmem:[#allocation6 + $0xd0] sm:$0xff]   ;;  %v265_v30 = vshrl.u32 %v264_v24, 7  ;;  %s1718_s2 = smov [#allocation9]  }
  0x3b   :  { %v1519_v3 = vld [vmem:[#allocation6 + $0x80] sm:$0xff]   ;;  %1365 = vmatpush3.bf16.msra.mxu0 %v1518_v2  ;;  %v1523_v7 = vld [vmem:[#allocation6 + $0x88] sm:$0xff]   ;;  %v1526_v10 = vld [vmem:[#allocation6 + $0x10] sm:$0xff]   ;;  %v263_v29 = vunpack.c.0.s8 %v262_v23  ;;  %s1254_s23 = sshll.u32 %s1718_s2, 4  ;;  %s1255_s23 = int_to_ptr.vmem [resolvable:$true] %s1254_s23 }
  0x3c   :  { %1387 = vmatpush3.bf16.msra.mxu1 %v1519_v3  ;;  %1366 = vmatprep.subr.bf16.mxu0 %v1520_v4  ;;  %v1527_v11 = vld [vmem:[#allocation6 + $0x90] sm:$0xff]   ;;  %v1528_v12 = vld [vmem:[#allocation6 + $0x58] sm:$0xff]   ;;  %v1532_v16 = vld [vmem:[#allocation6 + $0x60] sm:$0xff]   ;;  %s1682_s24 = scalar_lea.vmem %s1255_s23, 32  ;;  %p1687_p11 = scmp.lt.s32.totalorder %s1255_s23, %s1255_s23 }
  0x3d   :  { %1388 = vmatprep.subr.bf16.mxu1 %v1521_v5  ;;  %v1529_v13 = vld [vmem:[#allocation6 + $0xd8] sm:$0xff]   ;;  %v1533_v17 = vld [vmem:[#allocation6 + $0xe0] sm:$0xff]   ;;  %v1536_v20 = vld [vmem:[#allocation6 + $0x68] sm:$0xff]   ;;  %v1775_v35 = vsub.s32 %v263_v29, %v265_v30  ;;  %p1683_p10 = scmp.ne.s32.totalorder %s1255_s23, %s1682_s24  ;;  %p1688_p12 = scmp.lt.s32.totalorder %s1682_s24, %s1682_s24 }
  0x3e   :  { %v1530_v14 = vld [vmem:[#allocation6 + $0x18] sm:$0xff]   ;;  %v1534_v18 = vld [vmem:[#allocation6 + $0x20] sm:$0xff]   ;;  %v1537_v21 = vld [vmem:[#allocation6 + $0xe8] sm:$0xff]  }
  0x3f   :  { %1367 = vmatpush3.bf16.msra.mxu0 %v1522_v6  ;;  %v1531_v15 = vld [vmem:[#allocation6 + $0x98] sm:$0xff]   ;;  %v1535_v19 = vld [vmem:[#allocation6 + $0xa0] sm:$0xff]   ;;  %v1538_v25 = vld [vmem:[#allocation6 + $0x28] sm:$0xff]   ;;  %p1689_p13 = por %p1688_p12, %p1687_p11 }
  0x40   :  { %1389 = vmatpush3.bf16.msra.mxu1 %v1523_v7  ;;  %1368 = vmatprep.subr.bf16.mxu0 %v1524_v8  ;;  %v1539_v26 = vld [vmem:[#allocation6 + $0xa8] sm:$0xff]   ;;  %v1540_v27 = vld [vmem:[#allocation6 + $0x70] sm:$0xff]   ;;  %v1544_v33 = vld [vmem:[#allocation6 + $0x78] sm:$0xff]  }
  0x41   :  { %1390 = vmatprep.subr.bf16.mxu1 %v1525_v9  ;;  %v1541_v28 = vld [vmem:[#allocation6 + $0xf0] sm:$0xff]   ;;  %v1545_v34 = vld [vmem:[#allocation6 + $0xf8] sm:$0xff]   ;;  %v1549_v41 = vld [vmem:[#allocation6 + $0x140] sm:$0xff]   ;;  %p1690_p0 = pnand %p1689_p13, %p1683_p10 }
  0x42   :  { %v1542_v31 = vld [vmem:[#allocation6 + $0x30] sm:$0xff]   ;;  %v1546_v36 = vld [vmem:[#allocation6 + $0x38] sm:$0xff]   ;;  %v1551_v44 = vld [vmem:[#allocation6 + $0x1c0] sm:$0xff]  }
  0x43   :  { %1369 = vmatpush3.bf16.msra.mxu0 %v1526_v10  ;;  %v1543_v32 = vld [vmem:[#allocation6 + $0xb0] sm:$0xff]   ;;  %v1547_v37 = vld [vmem:[#allocation6 + $0xb8] sm:$0xff]   ;;  %v1550_v47 = vld [vmem:[#allocation6 + $0x100] sm:$0xff]  }
  0x44   :  { %1391 = vmatpush3.bf16.msra.mxu1 %v1527_v11  ;;  %1370 = vmatprep.subr.bf16.mxu0 %v1528_v12  ;;  %v60_v38 = vld [vmem:[#allocation3] sm:$0xff]  ;;  %v1553_v50 = vld [vmem:[#allocation6 + $0x148] sm:$0xff]   ;;  %v1552_v52 = vld [vmem:[#allocation6 + $0x180] sm:$0xff]  }
  0x45   :  { %1392 = vmatprep.subr.bf16.mxu1 %v1529_v13  ;;  %v260_v39 = vcombine.high %v60_v38, %v60_v38  ;;  %v267_v40 = vrot.slane %v60_v38, %v1775_v35  ;;  %v1555_v54 = vld [vmem:[#allocation6 + $0x1c8] sm:$0xff]   ;;  %v1557_v57 = vld [vmem:[#allocation6 + $0x150] sm:$0xff]   ;;  %v1561_v61 = vld [vmem:[#allocation6 + $0x158] sm:$0xff]  }
  0x46   :  { %v1554_v55 = vld [vmem:[#allocation6 + $0x108] sm:$0xff]   ;;  %v1559_v59 = vld [vmem:[#allocation6 + $0x1d0] sm:$0xff]   ;;  %v1563_v63 = vld [vmem:[#allocation6 + $0x1d8] sm:$0xff]  }
  0x47   :  { %1371 = vmatpush3.bf16.msra.mxu0 %v1530_v14  ;;  %v275_v42 = vcombine.high %v267_v40, %v267_v40  ;;  %v283_v43 = vrot.slane %v267_v40, %v1775_v35  ;;  %v1780_v45 = vrot.slane %v260_v39, %v1775_v35  ;;  %v1556_v58 = vld [vmem:[#allocation6 + $0x188] sm:$0xff]   ;;  %v1558_v60 = vld [vmem:[#allocation6 + $0x110] sm:$0xff]   ;;  %v1562_v0 = vld [vmem:[#allocation6 + $0x118] sm:$0xff]  }
  0x48   :  { %1393 = vmatpush3.bf16.msra.mxu1 %v1531_v15  ;;  %1372 = vmatprep.subr.bf16.mxu0 %v1532_v16  ;;  %v1560_v62 = vld [vmem:[#allocation6 + $0x190] sm:$0xff]   ;;  %v1565_v1 = vld [vmem:[#allocation6 + $0x160] sm:$0xff]   ;;  %v1564_v2 = vld [vmem:[#allocation6 + $0x198] sm:$0xff]  }
  0x49   :  { %1394 = vmatprep.subr.bf16.mxu1 %v1533_v17  ;;  %v297_v46 = vrot.slane %v275_v42, %v1775_v35  ;;  %v276_v48 = vcombine.high %v1780_v45, %v1780_v45  ;;  %v305_v49 = vcombine.high %v283_v43, %v283_v43  ;;  %v1567_v3 = vld [vmem:[#allocation6 + $0x1e0] sm:$0xff]   ;;  %v1569_v5 = vld [vmem:[#allocation6 + $0x168] sm:$0xff]   ;;  %v1573_v9 = vld [vmem:[#allocation6 + $0x170] sm:$0xff]   ;;  %v290_v17 = vrot.slane %v1780_v45, %v1775_v35 }
  0x4a   :  { %v1566_v4 = vld [vmem:[#allocation6 + $0x120] sm:$0xff]   ;;  %v1571_v7 = vld [vmem:[#allocation6 + $0x1e8] sm:$0xff]   ;;  %v1575_v11 = vld [vmem:[#allocation6 + $0x1f0] sm:$0xff]  }
  0x4b   :  { %1373 = vmatpush3.bf16.msra.mxu0 %v1534_v18  ;;  %984 = vmatprep.mubr.bf16.mxu0 %v297_v46  ;;  %v307_v51 = vcombine.high %v297_v46, %v297_v46  ;;  %v304_v53 = vrot.slane %v276_v48, %v1775_v35  ;;  %v1568_v6 = vld [vmem:[#allocation6 + $0x1a0] sm:$0xff]   ;;  %v1570_v8 = vld [vmem:[#allocation6 + $0x128] sm:$0xff]   ;;  %v1574_v12 = vld [vmem:[#allocation6 + $0x130] sm:$0xff]   ;;  %v306_v22 = vcombine.high %v290_v17, %v290_v17 }
  0x4c   :  { %1395 = vmatpush3.bf16.msra.mxu1 %v1535_v19  ;;  %1374 = vmatprep.subr.bf16.mxu0 %v1536_v20  ;;  %v1572_v10 = vld [vmem:[#allocation6 + $0x1a8] sm:$0xff]   ;;  %v1577_v13 = vld [vmem:[#allocation6 + $0x178] sm:$0xff]   ;;  %v1576_v14 = vld [vmem:[#allocation6 + $0x1b0] sm:$0xff]  }
  0x4d   :  { %1396 = vmatprep.subr.bf16.mxu1 %v1537_v21  ;;  %1024 = vmatprep.mubr.bf16.mxu1 %v307_v51  ;;  %v308_v56 = vcombine.high %v304_v53, %v304_v53  ;;  %v1579_v15 = vld [vmem:[#allocation6 + $0x1f8] sm:$0xff]   ;;  %v1581_v18 = vld [vmem:[#allocation6 + $0x240] sm:$0xff]   ;;  %v1585_v23 = vld [vmem:[#allocation6 + $0x248] sm:$0xff]  }
  0x4e   :  { %v1578_v16 = vld [vmem:[#allocation6 + $0x138] sm:$0xff]   ;;  %v1583_v20 = vld [vmem:[#allocation6 + $0x2c0] sm:$0xff]   ;;  %v1591_v29 = vld [vmem:[#allocation6 + $0x2d0] sm:$0xff]  }
  0x4f   :  { %1375 = vmatpush3.bf16.msra.mxu0 %v1538_v25  ;;  %v1580_v19 = vld [vmem:[#allocation6 + $0x1b8] sm:$0xff]   ;;  %v1582_v21 = vld [vmem:[#allocation6 + $0x200] sm:$0xff]   ;;  %v1587_v25 = vld [vmem:[#allocation6 + $0x2c8] sm:$0xff]  }
  0x50   :  { %1397 = vmatpush3.bf16.msra.mxu1 %v1539_v26  ;;  %1376 = vmatprep.subr.bf16.mxu0 %v1540_v27  ;;  %v1584_v24 = vld [vmem:[#allocation6 + $0x280] sm:$0xff]   ;;  %v1586_v26 = vld [vmem:[#allocation6 + $0x208] sm:$0xff]   ;;  %v1589_v27 = vld [vmem:[#allocation6 + $0x250] sm:$0xff]  }
  0x51   :  { %1398 = vmatprep.subr.bf16.mxu1 %v1541_v28  ;;  %v1588_v28 = vld [vmem:[#allocation6 + $0x288] sm:$0xff]   ;;  %v1590_v30 = vld [vmem:[#allocation6 + $0x210] sm:$0xff]   ;;  %v1599_v38 = vld [vmem:[#allocation6 + $0x2e0] sm:$0xff]  }
  0x52   :  { %v1598_v39 = vld [vmem:[#allocation6 + $0x220] sm:$0xff]   ;;  %v1601_v40 = vld [vmem:[#allocation6 + $0x268] sm:$0xff]   ;;  %v1607_v46 = vld [vmem:[#allocation6 + $0x2f0] sm:$0xff]  }
  0x53   :  { %1377 = vmatpush3.bf16.msra.mxu0 %v1542_v31  ;;  %v1593_v31 = vld [vmem:[#allocation6 + $0x258] sm:$0xff]   ;;  %v1603_v42 = vld [vmem:[#allocation6 + $0x2e8] sm:$0xff]  }
  0x54   :  { %1399 = vmatpush3.bf16.msra.mxu1 %v1543_v32  ;;  %1378 = vmatprep.subr.bf16.mxu0 %v1544_v33  ;;  %v1592_v32 = vld [vmem:[#allocation6 + $0x290] sm:$0xff]   ;;  %v1595_v33 = vld [vmem:[#allocation6 + $0x2d8] sm:$0xff]   ;;  %v1604_v45 = vld [vmem:[#allocation6 + $0x2a8] sm:$0xff]  }
  0x55   :  { %1400 = vmatprep.subr.bf16.mxu1 %v1545_v34  ;;  %v1594_v34 = vld [vmem:[#allocation6 + $0x218] sm:$0xff]  }
  0x56   :  { %v1609_v48 = vld [vmem:[#allocation6 + $0x278] sm:$0xff]  }
  0x57   :  { %1379 = vmatpush3.bf16.msra.mxu0 %v1546_v36  ;;  %v1597_v36 = vld [vmem:[#allocation6 + $0x260] sm:$0xff]   ;;  %v61_v51 = vld [vmem:[#allocation3 + $0x8] sm:$0x1f] }
  0x58   :  { %1401 = vmatpush3.bf16.msra.mxu1 %v1547_v37  ;;  %1408 = vmatprep.subr.bf16.mxu0 %v1549_v41  ;;  %v1596_v37 = vld [vmem:[#allocation6 + $0x298] sm:$0xff]   ;;  %v1600_v41 = vld [vmem:[#allocation6 + $0x2a0] sm:$0xff]  }
  0x59   :  { %1430 = vmatprep.subr.bf16.mxu1 %v1551_v44  ;;  %v1605_v44 = vld [vmem:[#allocation6 + $0x270] sm:$0xff]  }
  0x5a   :  { %985 = vmatmul.mubr.bf16.vlgmr.msra.gmra.mrb[0].mxu0 %v283_v43  ;;  %v1602_v43 = vld [vmem:[#allocation6 + $0x228] sm:$0xff]  }
  0x5b   :  { %1409 = vmatpush3.bf16.msra.mxu0 %v1550_v47  ;;  %1025 = vmatmul.mubr.bf16.vlgmr.msra.gmra.mrb[0].mxu1 %v305_v49  ;;  %v1606_v47 = vld [vmem:[#allocation6 + $0x230] sm:$0xff]  }
  0x5c   :  { %1410 = vmatprep.subr.bf16.mxu0 %v1553_v50  ;;  %1431 = vmatpush3.bf16.msra.mxu1 %v1552_v52  ;;  %v1608_v49 = vld [vmem:[#allocation6 + $0x2b0] sm:$0xff]   ;;  %v1611_v50 = vld [vmem:[#allocation6 + $0x2f8] sm:$0xff]  }
  0x5d   :  { %1064 = vmatprep.mubr.bf16.mxu0 %v304_v53  ;;  %1432 = vmatprep.subr.bf16.mxu1 %v1555_v54  ;;  %v1610_v52 = vld [vmem:[#allocation6 + $0x238] sm:$0xff]   ;;  %v316_v53 = vrot.slane %v61_v51, %v1775_v35 }
  0x5e   :  { %1104 = vmatprep.mubr.bf16.mxu1 %v308_v56  ;;  %v1612_v54 = vld [vmem:[#allocation6 + $0x2b8] sm:$0xff]  }
  0x5f   :  { %1411 = vmatpush3.bf16.msra.mxu0 %v1554_v55  ;;  %v324_v55 = vcombine.high %v316_v53, %v316_v53  ;;  %v331_v56 = vrot.slane %v316_v53, %v1775_v35 }
  0x60   :  { %1412 = vmatprep.subr.bf16.mxu0 %v1557_v57  ;;  %1433 = vmatpush3.bf16.msra.mxu1 %v1556_v58  ;;  %v309_v57 = vcombine.high %v61_v51, %v61_v51 }
  0x61   :  { %1434 = vmatprep.subr.bf16.mxu1 %v1559_v59  ;;  %v345_v58 = vrot.slane %v324_v55, %v1775_v35  ;;  %v1614_v59 = vld [vmem:[#allocation6 + $0x300] sm:$0xff]  }
  0x63   :  { %1413 = vmatpush3.bf16.msra.mxu0 %v1558_v60  ;;  %v1716_v60 = vmov 0.0  }
  0x64   :  { %1414 = vmatprep.subr.bf16.mxu0 %v1561_v61  ;;  %1435 = vmatpush3.bf16.msra.mxu1 %v1560_v62  ;;  %v346_v61 = vcombine.high %v331_v56, %v331_v56  ;;  %v347_v62 = vcombine.high %v345_v58, %v345_v58  ;;  %58 = vst.msk [vmem:[#allocation2] sm:$0x3] %vm57_vm2, %v1716_v60 }
  0x65   :  { %1436 = vmatprep.subr.bf16.mxu1 %v1563_v63  ;;  %v323_v63 = vrot.slane %v309_v57, %v1775_v35 }
  0x67   :  { %1415 = vmatpush3.bf16.msra.mxu0 %v1562_v0  ;;  %v1615_v0 = vld [vmem:[#allocation6 + $0x308] sm:$0xff]  }
  0x68   :  { %1416 = vmatprep.subr.bf16.mxu0 %v1565_v1  ;;  %1437 = vmatpush3.bf16.msra.mxu1 %v1564_v2  ;;  %v338_v1 = vrot.slane %v323_v63, %v1775_v35 }
  0x69   :  { %1438 = vmatprep.subr.bf16.mxu1 %v1567_v3 }
  0x6b   :  { %1417 = vmatpush3.bf16.msra.mxu0 %v1566_v4 }
  0x6c   :  { %1418 = vmatprep.subr.bf16.mxu0 %v1569_v5  ;;  %1439 = vmatpush3.bf16.msra.mxu1 %v1568_v6 }
  0x6d   :  { %1440 = vmatprep.subr.bf16.mxu1 %v1571_v7 }
  0x6f   :  { %1419 = vmatpush3.bf16.msra.mxu0 %v1570_v8 }
  0x70   :  { %1420 = vmatprep.subr.bf16.mxu0 %v1573_v9  ;;  %1441 = vmatpush3.bf16.msra.mxu1 %v1572_v10 }
  0x71   :  { %1442 = vmatprep.subr.bf16.mxu1 %v1575_v11 }
  0x73   :  { %1421 = vmatpush3.bf16.msra.mxu0 %v1574_v12 }
  0x74   :  { %1422 = vmatprep.subr.bf16.mxu0 %v1577_v13  ;;  %1443 = vmatpush3.bf16.msra.mxu1 %v1576_v14 }
  0x75   :  { %1444 = vmatprep.subr.bf16.mxu1 %v1579_v15 }
  0x77   :  { %1423 = vmatpush3.bf16.msra.mxu0 %v1578_v16 }
  0x78   :  { %1452 = vmatprep.subr.bf16.mxu0 %v1581_v18  ;;  %1445 = vmatpush3.bf16.msra.mxu1 %v1580_v19 }
  0x79   :  { %1474 = vmatprep.subr.bf16.mxu1 %v1583_v20 }
  0x7a   :  { %1065 = vmatmul.mubr.bf16.vlgmr.msra.gmra.mrb[4].mxu0 %v290_v17 }
  0x7b   :  { %1453 = vmatpush3.bf16.msra.mxu0 %v1582_v21  ;;  %1105 = vmatmul.mubr.bf16.vlgmr.msra.gmra.mrb[4].mxu1 %v306_v22 }
  0x7c   :  { %1454 = vmatprep.subr.bf16.mxu0 %v1585_v23  ;;  %1475 = vmatpush3.bf16.msra.mxu1 %v1584_v24 }
  0x7d   :  { %1476 = vmatprep.subr.bf16.mxu1 %v1587_v25  ;;  %1144 = vmatprep.mubr.bf16.mxu0 %v345_v58 }
  0x7e   :  { %1184 = vmatprep.mubr.bf16.mxu1 %v347_v62 }
  0x7f   :  { %1455 = vmatpush3.bf16.msra.mxu0 %v1586_v26 }
  0x80   :  { %1456 = vmatprep.subr.bf16.mxu0 %v1589_v27  ;;  %1477 = vmatpush3.bf16.msra.mxu1 %v1588_v28 }
  0x81   :  { %1478 = vmatprep.subr.bf16.mxu1 %v1591_v29 }
  0x83   :  { %1457 = vmatpush3.bf16.msra.mxu0 %v1590_v30 }
  0x84   :  { %1458 = vmatprep.subr.bf16.mxu0 %v1593_v31  ;;  %1479 = vmatpush3.bf16.msra.mxu1 %v1592_v32 }
  0x85   :  { %1480 = vmatprep.subr.bf16.mxu1 %v1595_v33 }
  0x87   :  { %1459 = vmatpush3.bf16.msra.mxu0 %v1594_v34 }
  0x88   :  { %1460 = vmatprep.subr.bf16.mxu0 %v1597_v36  ;;  %1481 = vmatpush3.bf16.msra.mxu1 %v1596_v37  ;;  %v59_v37 = vld [vmem:[#allocation2] sm:$0x3] }
  0x89   :  { %1482 = vmatprep.subr.bf16.mxu1 %v1599_v38 }
  0x8b   :  { %1461 = vmatpush3.bf16.msra.mxu0 %v1598_v39 }
  0x8c   :  { %1462 = vmatprep.subr.bf16.mxu0 %v1601_v40  ;;  %1483 = vmatpush3.bf16.msra.mxu1 %v1600_v41 }
  0x8d   :  { %1484 = vmatprep.subr.bf16.mxu1 %v1603_v42 }
  0x8f   :  { %1463 = vmatpush3.bf16.msra.mxu0 %v1602_v43 }
  0x90   :  { %1464 = vmatprep.subr.bf16.mxu0 %v1605_v44  ;;  %1485 = vmatpush3.bf16.msra.mxu1 %v1604_v45  ;;  %v1363_v44 = vld [vmem:[#allocation8] ss:$0 sm:$0xff] }
  0x91   :  { %1486 = vmatprep.subr.bf16.mxu1 %v1607_v46 }
  0x93   :  { %1465 = vmatpush3.bf16.msra.mxu0 %v1606_v47 }
  0x94   :  { %1466 = vmatprep.subr.bf16.mxu0 %v1609_v48  ;;  %1487 = vmatpush3.bf16.msra.mxu1 %v1608_v49 }
  0x95   :  { %1488 = vmatprep.subr.bf16.mxu1 %v1611_v50 }
  0x97   :  { %1467 = vmatpush3.bf16.msra.mxu0 %v1610_v52 }
  0x98   :  { %1499 = vmatprep.subr.bf16.mxu0 %v1716_v60  ;;  %1489 = vmatpush3.bf16.msra.mxu1 %v1612_v54 }
  0x9a   :  { %1145 = vmatmul.mubr.bf16.vlgmr.msra.gmra.mrb[8].mxu0 %v331_v56 }
  0x9b   :  { %1500 = vmatpush3.bf16.msra.mxu0 %v1614_v59  ;;  %1185 = vmatmul.mubr.bf16.vlgmr.msra.gmra.mrb[8].mxu1 %v346_v61 }
  0x9c   :  { %1501 = vmatprep.subr.bf16.mxu0 %v1716_v60  ;;  %1503 = vmatprep.mubr.msk.bf16.mxu0 %vm1717_vm0, %v1716_v60 }
  0x9f   :  { %1502 = vmatpush3.bf16.msra.mxu0 %v1615_v0 }
  0xa2   :  { %1504 = vmatmul.mubr.msk.bf16.vlgmr.msra.gmra.mrb[12].mxu0 %vm948_vm1, %v338_v1 }
 0x12d   :  { %v1380_v2 = vpop.f32.mrb[0].mxu0 }
 0x12e   :  { %v1381_v3 = vpop.f32.mrb[1].mxu0  ;;  %v1402_v4 = vpop.f32.mrb[0].mxu1 }
 0x12f   :  { %v1382_v5 = vadd.f32 %v1381_v3, %v1380_v2  ;;  %v1383_v6 = vpop.f32.mrb[2].mxu0  ;;  %v1403_v7 = vpop.f32.mrb[1].mxu1 }
 0x130   :  { %v1384_v8 = vpop.f32.mrb[3].mxu0  ;;  %v1404_v9 = vadd.f32 %v1403_v7, %v1402_v4  ;;  %v1405_v10 = vpop.f32.mrb[2].mxu1 }
 0x131   :  { %v1406_v11 = vpop.f32.mrb[3].mxu1 }
 0x132   :  { %v1027_v12 = vadd.f32 %v1404_v9, %v1382_v5 }
 0x14d   :  { %v1424_v13 = vpop.f32.mrb[4].mxu0 }
 0x14e   :  { %v1425_v14 = vpop.f32.mrb[5].mxu0  ;;  %v1446_v16 = vpop.f32.mrb[4].mxu1 }
 0x14f   :  { %v1426_v35 = vadd.f32 %v1425_v14, %v1424_v13  ;;  %v1427_v15 = vpop.f32.mrb[6].mxu0  ;;  %v1447_v18 = vpop.f32.mrb[5].mxu1 }
 0x150   :  { %v1428_v17 = vpop.f32.mrb[7].mxu0  ;;  %v1448_v20 = vadd.f32 %v1447_v18, %v1446_v16  ;;  %v1449_v21 = vpop.f32.mrb[6].mxu1 }
 0x151   :  { %v1067_v19 = vadd.f32 %v1426_v35, %v1027_v12  ;;  %v1450_v22 = vpop.f32.mrb[7].mxu1 }
 0x153   :  { %v1107_v23 = vadd.f32 %v1448_v20, %v1067_v19 }
 0x16d   :  { %v1468_v24 = vpop.f32.mrb[8].mxu0 }
 0x16e   :  { %v1469_v25 = vpop.f32.mrb[9].mxu0  ;;  %v1490_v27 = vpop.f32.mrb[8].mxu1 }
 0x16f   :  { %v1470_v26 = vadd.f32 %v1469_v25, %v1468_v24  ;;  %v1471_v28 = vpop.f32.mrb[10].mxu0  ;;  %v1491_v29 = vpop.f32.mrb[9].mxu1 }
 0x170   :  { %v1472_v30 = vpop.f32.mrb[11].mxu0  ;;  %v1492_v32 = vadd.f32 %v1491_v29, %v1490_v27  ;;  %v1493_v33 = vpop.f32.mrb[10].mxu1 }
 0x171   :  { %v1147_v31 = vadd.f32 %v1470_v26, %v1107_v23  ;;  %v1494_v34 = vpop.f32.mrb[11].mxu1 }
 0x173   :  { %v1187_v36 = vadd.f32 %v1492_v32, %v1147_v31 }
 0x175   :  { %v1226_v38 = vpop.f32.mrb[12].mxu0 }
 0x176   :  { %v1227_v39 = vadd.f32 %v1226_v38, %v1187_v36  ;;  %v1505_v40 = vpop.f32.mrb[13].mxu0 }
 0x177   :  { %v1229_v41 = vpop.f32.mrb[14].mxu0 }
 0x178   :  { %v1232_v42 = vadd.f32 %v1227_v39, %v59_v37  ;;  %v1506_v43 = vpop.f32.mrb[15].mxu0 }
 0x17a   :  { %1234 = vst.msk [vmem:[#allocation2] sm:$0x3] %vm57_vm2, %v1232_v42 }
 0x181   :  { %v1238_v45 = vld [vmem:[#allocation2] sm:$0x3] }
 0x182   :  { %v1246_v46 = vadd.f32 %v1363_v44, %v1238_v45 }
 0x184   :  { %1247 = vst.msk [vmem:[#allocation9] sm:$0x3] %vm57_vm2, %v1246_v46 }
 0x185   :  { %1693 = shalt.err (!%p1690_p0)
}
 0x186   :  { %s1694_s27 = scalar_lea.hbm %s1811_s3, 32 }
 0x187   :  { %p1695_p1 = scmp.ne.s32.totalorder %s1811_s3, %s1694_s27  ;;  %p1698_p2 = scmp.lt.u32.totalorder %s1694_s27, %s1811_s3 }
 0x189   :  { %p1700_p3 = pnand %p1698_p2, %p1695_p1 }
 0x18b   :  { %1703 = shalt.err (!%p1700_p3)
}
 0x18c   :  { %1257 = dma.vmem_to_hbm [thread:$0]  %s1255_s23, 32, %s1811_s3, [#allocation5]  }
 0x18d   :  { %1708 = dma.done.wait [#allocation5], 32  }
 0x18e   :  { %1709 = vsyncadd [#allocation5], 4294967264 }
 0x18f   :  { %1261 = vsyncpa [#allocation4], 1 }
 0x190   :  { %1262 = vsyncpa [#allocation7], 1 }
 0x191   :  { %1263 = vsyncpa [#allocation5], 1 }

</bundles_post_ra>
